<compile_context>
chip_gen: v5e
topology: v5e:2x2
jax: 0.10.0
libtpu: 0.0.40
codegen_flags: <defaults>
</compile_context>

<pallas_src>
import jax
import jax.numpy as jnp
from jax.experimental import pallas as pl
from jax.experimental.pallas import tpu as pltpu

_BN_EPS = 1e-5


def _round_up(n, m):
    return ((n + m - 1) // m) * m


def _choose_tile_m(m, target=1024):
    """Largest divisor of m that is a multiple of 8 and <= target (else m)."""
    for cand in range(min(target, m), 7, -1):
        if m % cand == 0 and cand % 8 == 0:
            return cand
    return m


def _vmem_limit(block_bytes, scratch_bytes):
    # 2x for double-buffered pipeline blocks + single-buffered scratch + margin.
    need = 2 * block_bytes + scratch_bytes + (4 << 20)
    return int(min(max(need, 32 << 20), 64 << 20))


# --------------------------------------------------------------------------
# Kernel 1: fused (optional BN+ReLU on input) -> 3x3 conv -> bf16 output,
# plus per-grid-step partial (sum, sum-of-squares) for the following BN.
# Grid: one step per image (N), "parallel".
# --------------------------------------------------------------------------
def _make_conv3x3_kernel(H, W, c_in, fold_taps, apply_input_act):
    def kernel(*refs):
        idx = 0
        x_ref = refs[idx]; idx += 1
        w_ref = refs[idx]; idx += 1
        if apply_input_act:
            sc_ref = refs[idx]; sh_ref = refs[idx + 1]; idx += 2
        y_ref = refs[idx]; stats_ref = refs[idx + 1]; idx += 2
        xp_ref = refs[idx]; idx += 1
        acc_ref = None if fold_taps else refs[idx]

        halo_dt = xp_ref.dtype

        # Zero only the 1-pixel halo border (interior is fully rewritten below).
        xp_ref[0:1, :, :] = jnp.zeros((1, W + 2, c_in), halo_dt)
        xp_ref[H + 1:H + 2, :, :] = jnp.zeros((1, W + 2, c_in), halo_dt)
        xp_ref[:, 0:1, :] = jnp.zeros((H + 2, 1, c_in), halo_dt)
        xp_ref[:, W + 1:W + 2, :] = jnp.zeros((H + 2, 1, c_in), halo_dt)

        # Build the halo interior; the previous BN + ReLU (stage 2) is applied
        # on the fly so the zero border is exactly the zero padding of the
        # *activated* feature map.  Single cast to bf16 here.
        x = x_ref[...].astype(jnp.float32)
        if apply_input_act:
            x = jnp.maximum(x * sc_ref[0] + sh_ref[0], 0.0)
        xp_ref[1:H + 1, 1:W + 1, :] = x.astype(halo_dt)

        if fold_taps:
            # One matmul with K = 9*c_in (im2col lives in vregs, never HBM).
            patches = []
            for dy in range(3):
                for dx in range(3):
                    patches.append(
                        xp_ref[dy:dy + H, dx:dx + W, :].reshape(H * W, c_in))
            im2col = jnp.concatenate(patches, axis=-1)        # [H*W, 9*c_in] bf16
            acc = jnp.dot(im2col, w_ref[...],
                          preferred_element_type=jnp.float32)  # [H*W, c_pad] f32
        else:
            # 9 shifted matmuls (K = c_in is already MXU-dense here),
            # accumulated directly into an f32 VMEM scratch.
            first = True
            for dy in range(3):
                for dx in range(3):
                    patch = xp_ref[dy:dy + H, dx:dx + W, :].reshape(H * W, c_in)
                    p = jnp.dot(patch, w_ref[3 * dy + dx],
                                preferred_element_type=jnp.float32)
                    if first:
                        acc_ref[...] = p
                        first = False
                    else:
                        acc_ref[...] += p
            acc = acc_ref[...]

        y_ref[...] = acc.astype(y_ref.dtype)                   # raw conv out (bf16)

        # Per-step partial batch statistics (f32) for the following BatchNorm.
        stats_ref[0:1, :] = jnp.sum(acc, axis=0, keepdims=True)
        stats_ref[1:2, :] = jnp.sum(acc * acc, axis=0, keepdims=True)

    return kernel


def _conv3x3_bn_stats(x_nhwc, w, *, fold_taps, scale_in=None, shift_in=None):
    """x_nhwc: [N,H,W,Cin].  w: bf16, [9*Cin,Cpad] if fold_taps else [9,Cin,Cpad].
    Returns (raw conv output [N*H*W, Cpad] bf16, partial stats [N, 2, Cpad] f32)."""
    N, H, W, c_in = x_nhwc.shape
    c_pad = w.shape[-1]
    apply_act = scale_in is not None
    kernel = _make_conv3x3_kernel(H, W, c_in, fold_taps, apply_act)

    in_specs = [
        pl.BlockSpec((None, H, W, c_in), lambda n: (n, 0, 0, 0)),
        # TODO(synk): pipeline_mode=pl.Buffered(1) would single-buffer these
        # grid-invariant weights and save a duplicate VMEM copy at large C.
        pl.BlockSpec(tuple(w.shape), lambda n: (0,) * w.ndim),
    ]
    args = [x_nhwc, w]
    if apply_act:
        in_specs += [pl.BlockSpec((1, c_pad), lambda n: (0, 0)),
                     pl.BlockSpec((1, c_pad), lambda n: (0, 0))]
        args += [scale_in, shift_in]

    scratch = [pltpu.VMEM((H + 2, W + 2, c_in), jnp.bfloat16)]
    scratch_bytes = (H + 2) * (W + 2) * c_in * 2
    if not fold_taps:
        scratch.append(pltpu.VMEM((H * W, c_pad), jnp.float32))
        scratch_bytes += H * W * c_pad * 4

    block_bytes = (H * W * c_in * x_nhwc.dtype.itemsize   # input block
                   + int(w.size) * 2                      # weights (bf16)
                   + H * W * c_pad * 2                    # bf16 output block
                   + 2 * c_pad * 4                        # stats block
                   + (2 * c_pad * 4 if apply_act else 0))

    y_raw, stats = pl.pallas_call(
        kernel,
        grid=(N,),
        in_specs=in_specs,
        out_specs=[pl.BlockSpec((H * W, c_pad), lambda n: (n, 0)),
                   pl.BlockSpec((None, 2, c_pad), lambda n: (n, 0, 0))],
        out_shape=[jax.ShapeDtypeStruct((N * H * W, c_pad), jnp.bfloat16),
                   jax.ShapeDtypeStruct((N, 2, c_pad), jnp.float32)],
        scratch_shapes=scratch,
        compiler_params=pltpu.CompilerParams(
            dimension_semantics=("parallel",),
            vmem_limit_bytes=_vmem_limit(block_bytes, scratch_bytes)),
    )(*args)
    return y_raw, stats


# --------------------------------------------------------------------------
# Kernel 2: tiled BN (affine) + ReLU finalize, parallel over row tiles.
# --------------------------------------------------------------------------
def _bn_relu_kernel(y_ref, scale_ref, shift_ref, o_ref):
    o_ref[...] = jnp.maximum(
        y_ref[...].astype(jnp.float32) * scale_ref[...] + shift_ref[...], 0.0
    ).astype(o_ref.dtype)


def _bn_relu(y_raw, scale, shift):
    M, C = y_raw.shape
    tile_m = _choose_tile_m(M)
    block_bytes = tile_m * C * (y_raw.dtype.itemsize + 4) + 2 * C * 4 * 2
    return pl.pallas_call(
        _bn_relu_kernel,
        grid=(M // tile_m,),
        in_specs=[pl.BlockSpec((tile_m, C), lambda i: (i, 0)),
                  pl.BlockSpec((1, C), lambda i: (0, 0)),
                  pl.BlockSpec((1, C), lambda i: (0, 0))],
        out_specs=pl.BlockSpec((tile_m, C), lambda i: (i, 0)),
        out_shape=jax.ShapeDtypeStruct((M, C), jnp.float32),
        compiler_params=pltpu.CompilerParams(
            dimension_semantics=("parallel",),
            vmem_limit_bytes=_vmem_limit(block_bytes, 0)),
    )(y_raw, scale, shift)


# --------------------------------------------------------------------------
# Glue: finish BN statistics on [C]-sized vectors.
# --------------------------------------------------------------------------
def _bn_affine(stats, m_total, gamma, beta):
    s = jnp.sum(stats, axis=0)                                  # [2, Cpad]
    mean = s[0] / m_total
    var = jnp.maximum(s[1] / m_total - mean * mean, 0.0)        # biased variance
    inv_std = jax.lax.rsqrt(var + _BN_EPS)
    scale = gamma * inv_std
    shift = beta - mean * scale
    return scale.reshape(1, -1), shift.reshape(1, -1)


# --------------------------------------------------------------------------
# Parameters (Kaiming normal fan_out, BN gamma=1 / beta=0, like the nn.Module).
# --------------------------------------------------------------------------
def _kaiming_normal_hwio(key, kh, kw, c_in, c_out):
    std = jnp.sqrt(2.0 / (c_out * kh * kw))
    return jax.random.normal(key, (kh, kw, c_in, c_out), jnp.float32) * std


def init_convblock_params(key, ch_in, ch_out):
    c_pad = _round_up(ch_out, 128)
    k1, k2 = jax.random.split(key)
    w1 = _kaiming_normal_hwio(k1, 3, 3, ch_in, ch_out)
    w2 = _kaiming_normal_hwio(k2, 3, 3, ch_out, ch_out)
    # Pad output channels (and stage-2 input channels) to a lane-dense 128.
    w1 = jnp.pad(w1, ((0, 0), (0, 0), (0, 0), (0, c_pad - ch_out)))
    w2 = jnp.pad(w2, ((0, 0), (0, 0), (0, c_pad - ch_out), (0, c_pad - ch_out)))
    return dict(
        # Stage 1: folded-K layout [9*c_in, c_pad]; stage 2: per-tap [9, c_pad, c_pad].
        w1=w1.reshape(9 * ch_in, c_pad).astype(jnp.bfloat16),
        w2=w2.reshape(9, c_pad, c_pad).astype(jnp.bfloat16),
        gamma1=jnp.ones((ch_out,), jnp.float32),
        beta1=jnp.zeros((ch_out,), jnp.float32),
        gamma2=jnp.ones((ch_out,), jnp.float32),
        beta2=jnp.zeros((ch_out,), jnp.float32),
    )


# --------------------------------------------------------------------------
# Forward pass (NCHW f32 in / NCHW f32 out, matching the PyTorch module).
# --------------------------------------------------------------------------
@jax.jit
def convblock_forward(params, x_nchw):
    N, _, H, W = x_nchw.shape
    c_out = params["gamma1"].shape[0]
    c_pad = params["w1"].shape[-1]
    M = N * H * W

    # Pad gamma with 0 so padded channels come out exactly zero after BN.
    g1 = jnp.pad(params["gamma1"], (0, c_pad - c_out))
    b1 = jnp.pad(params["beta1"], (0, c_pad - c_out))
    g2 = jnp.pad(params["gamma2"], (0, c_pad - c_out))
    b2 = jnp.pad(params["beta2"], (0, c_pad - c_out))

    x = jnp.transpose(x_nchw, (0, 2, 3, 1)).astype(jnp.float32)   # NHWC

    # Stage 1: folded-K conv3x3 + per-image BN-stat partials (parallel grid).
    y1_raw, stats1 = _conv3x3_bn_stats(x, params["w1"], fold_taps=True)
    scale1, shift1 = _bn_affine(stats1, M, g1, b1)

    # Stage 2: BN1+ReLU applied on the fly inside the kernel (fused with the
    # halo build), then 9-tap conv3x3 (K = c_pad) + BN2-stat partials.
    y1_nhwc = y1_raw.reshape(N, H, W, c_pad)
    y2_raw, stats2 = _conv3x3_bn_stats(y1_nhwc, params["w2"], fold_taps=False,
                                       scale_in=scale1, shift_in=shift1)
    scale2, shift2 = _bn_affine(stats2, M, g2, b2)

    # Finalize: BN2 + ReLU, tiled over rows ("parallel").
    # TODO(synk): when c_out % 128 == 0 the channel slice / NCHW transpose
    # below could be fused into this kernel to skip the extra XLA passes.
    y2 = _bn_relu(y2_raw, scale2, shift2)
    y2 = y2.reshape(N, H, W, c_pad)[..., :c_out]
    return jnp.transpose(y2, (0, 3, 1, 2))


# --------------------------------------------------------------------------
# Pure-JAX reference (same bf16-quantised weights, f32 conv) for sanity check.
# --------------------------------------------------------------------------
def _reference_forward(params, x_nchw):
    c_out = params["gamma1"].shape[0]
    c_pad = params["w1"].shape[-1]
    c_in = params["w1"].shape[0] // 9
    w1 = params["w1"].astype(jnp.float32).reshape(3, 3, c_in, c_pad)[..., :c_out]
    w2 = params["w2"].astype(jnp.float32).reshape(3, 3, c_pad, c_pad)[:, :, :c_out, :c_out]

    def conv_bn_relu(x, w, gamma, beta):
        y = jax.lax.conv_general_dilated(
            x, w, window_strides=(1, 1), padding="SAME",
            dimension_numbers=("NHWC", "HWIO", "NHWC"))
        mean = jnp.mean(y, axis=(0, 1, 2))
        var = jnp.mean((y - mean) ** 2, axis=(0, 1, 2))
        yhat = (y - mean) * jax.lax.rsqrt(var + _BN_EPS) * gamma + beta
        return jnp.maximum(yhat, 0.0)

    x = jnp.transpose(x_nchw, (0, 2, 3, 1))
    y1 = conv_bn_relu(x, w1, params["gamma1"], params["beta1"])
    y2 = conv_bn_relu(y1, w2, params["gamma2"], params["beta2"])
    return jnp.transpose(y2, (0, 3, 1, 2))


if __name__ == "__main__":
    key = jax.random.PRNGKey(0)
    k_x, k_p = jax.random.split(key)

    N, ch_in, ch_out, H, W = 2, 4, 8, 16, 16
    x = jax.random.normal(k_x, (N, ch_in, H, W), dtype=jnp.float32)
    params = init_convblock_params(k_p, ch_in, ch_out)

    out = convblock_forward(params, x)
    jax.block_until_ready(out)
    assert out.shape == (N, ch_out, H, W), out.shape
    assert bool(jnp.all(jnp.isfinite(out)))

    # Loose tolerance: bf16 matmul inputs / bf16 intermediates, f32 accumulate.
    ref = _reference_forward(params, x)
    max_err = float(jnp.max(jnp.abs(out - ref)))
    assert max_err < 0.25, f"max abs err vs reference: {max_err}"

    print("KERNEL_OK")
</pallas_src>

<mosaic_0001>
module attributes {stable_mosaic.version = 11 : i64} {
  func.func @kernel(%arg0: i32, %arg1: memref<1x16x16x4xf32, #tpu.memory_space<vmem>>, %arg2: memref<36x128xbf16, #tpu.memory_space<vmem>>, %arg3: memref<256x128xbf16, #tpu.memory_space<vmem>>, %arg4: memref<1x2x128xf32, #tpu.memory_space<vmem>>, %arg5: memref<18x18x4xbf16, #tpu.memory_space<vmem>>) attributes {dimension_semantics = [#tpu.dimension_semantics<parallel>], iteration_bounds = array<i64: 2>, scalar_prefetch = 0 : i64, scratch_operands = 1 : i64, tpu.core_type = #tpu.core_type<tc>, window_params = [{transform_indices = @transform_0, window_bounds = array<i64: 1, 16, 16, 4>}, {pipeline_mode = #tpu.pipeline_mode<synchronous>, transform_indices = @transform_1, window_bounds = array<i64: 36, 128>}, {transform_indices = @transform_2, window_bounds = array<i64: 256, 128>}, {transform_indices = @transform_3, window_bounds = array<i64: 1, 2, 128>}]} {
    %cst = arith.constant 0.000000e+00 : bf16
    %0 = vector.broadcast %cst : bf16 to vector<1x18x4xbf16>
    %c0 = arith.constant 0 : index
    %c0_0 = arith.constant 0 : index
    %c0_1 = arith.constant 0 : index
    %1 = vector.load %arg5[%c0, %c0_0, %c0_1] : memref<18x18x4xbf16, #tpu.memory_space<vmem>>, vector<1x18x4xbf16>
    tpu.vector_store %arg5[%c0, %c0_0, %c0_1], %0 {strides = array<i32>} : memref<18x18x4xbf16, #tpu.memory_space<vmem>>, vector<1x18x4xbf16>,
    %cst_2 = arith.constant 0.000000e+00 : bf16
    %2 = vector.broadcast %cst_2 : bf16 to vector<1x18x4xbf16>
    %c17 = arith.constant 17 : index
    %c0_3 = arith.constant 0 : index
    %c0_4 = arith.constant 0 : index
    %3 = vector.load %arg5[%c17, %c0_3, %c0_4] : memref<18x18x4xbf16, #tpu.memory_space<vmem>>, vector<1x18x4xbf16>
    tpu.vector_store %arg5[%c17, %c0_3, %c0_4], %2 {strides = array<i32>} : memref<18x18x4xbf16, #tpu.memory_space<vmem>>, vector<1x18x4xbf16>,
    %cst_5 = arith.constant 0.000000e+00 : bf16
    %4 = vector.broadcast %cst_5 : bf16 to vector<18x1x4xbf16>
    %c0_6 = arith.constant 0 : index
    %c0_7 = arith.constant 0 : index
    %c0_8 = arith.constant 0 : index
    %5 = vector.load %arg5[%c0_6, %c0_7, %c0_8] : memref<18x18x4xbf16, #tpu.memory_space<vmem>>, vector<18x1x4xbf16>
    tpu.vector_store %arg5[%c0_6, %c0_7, %c0_8], %4 {strides = array<i32>} : memref<18x18x4xbf16, #tpu.memory_space<vmem>>, vector<18x1x4xbf16>,
    %cst_9 = arith.constant 0.000000e+00 : bf16
    %6 = vector.broadcast %cst_9 : bf16 to vector<18x1x4xbf16>
    %c0_10 = arith.constant 0 : index
    %c17_11 = arith.constant 17 : index
    %c0_12 = arith.constant 0 : index
    %7 = vector.load %arg5[%c0_10, %c17_11, %c0_12] : memref<18x18x4xbf16, #tpu.memory_space<vmem>>, vector<18x1x4xbf16>
    tpu.vector_store %arg5[%c0_10, %c17_11, %c0_12], %6 {strides = array<i32>} : memref<18x18x4xbf16, #tpu.memory_space<vmem>>, vector<18x1x4xbf16>,
    %c0_13 = arith.constant 0 : index
    %c0_14 = arith.constant 0 : index
    %c0_15 = arith.constant 0 : index
    %c0_16 = arith.constant 0 : index
    %8 = vector.load %arg1[%c0_13, %c0_14, %c0_15, %c0_16] : memref<1x16x16x4xf32, #tpu.memory_space<vmem>>, vector<1x16x16x4xf32>
    %9 = vector.shape_cast %8 : vector<1x16x16x4xf32> to vector<16x16x4xf32>
    %10 = arith.truncf %9 : vector<16x16x4xf32> to vector<16x16x4xbf16>
    %c1 = arith.constant 1 : index
    %c1_17 = arith.constant 1 : index
    %c0_18 = arith.constant 0 : index
    %11 = vector.load %arg5[%c1, %c1_17, %c0_18] : memref<18x18x4xbf16, #tpu.memory_space<vmem>>, vector<16x16x4xbf16>
    tpu.vector_store %arg5[%c1, %c1_17, %c0_18], %10 {strides = array<i32>} : memref<18x18x4xbf16, #tpu.memory_space<vmem>>, vector<16x16x4xbf16>,
    %c0_19 = arith.constant 0 : index
    %c0_20 = arith.constant 0 : index
    %c0_21 = arith.constant 0 : index
    %12 = vector.load %arg5[%c0_19, %c0_20, %c0_21] : memref<18x18x4xbf16, #tpu.memory_space<vmem>>, vector<16x16x4xbf16>
    %13 = vector.shape_cast %12 : vector<16x16x4xbf16> to vector<256x4xbf16>
    %c0_22 = arith.constant 0 : index
    %c1_23 = arith.constant 1 : index
    %c0_24 = arith.constant 0 : index
    %14 = vector.load %arg5[%c0_22, %c1_23, %c0_24] : memref<18x18x4xbf16, #tpu.memory_space<vmem>>, vector<16x16x4xbf16>
    %15 = vector.shape_cast %14 : vector<16x16x4xbf16> to vector<256x4xbf16>
    %c0_25 = arith.constant 0 : index
    %c2 = arith.constant 2 : index
    %c0_26 = arith.constant 0 : index
    %16 = vector.load %arg5[%c0_25, %c2, %c0_26] : memref<18x18x4xbf16, #tpu.memory_space<vmem>>, vector<16x16x4xbf16>
    %17 = vector.shape_cast %16 : vector<16x16x4xbf16> to vector<256x4xbf16>
    %c1_27 = arith.constant 1 : index
    %c0_28 = arith.constant 0 : index
    %c0_29 = arith.constant 0 : index
    %18 = vector.load %arg5[%c1_27, %c0_28, %c0_29] : memref<18x18x4xbf16, #tpu.memory_space<vmem>>, vector<16x16x4xbf16>
    %19 = vector.shape_cast %18 : vector<16x16x4xbf16> to vector<256x4xbf16>
    %c1_30 = arith.constant 1 : index
    %c1_31 = arith.constant 1 : index
    %c0_32 = arith.constant 0 : index
    %20 = vector.load %arg5[%c1_30, %c1_31, %c0_32] : memref<18x18x4xbf16, #tpu.memory_space<vmem>>, vector<16x16x4xbf16>
    %21 = vector.shape_cast %20 : vector<16x16x4xbf16> to vector<256x4xbf16>
    %c1_33 = arith.constant 1 : index
    %c2_34 = arith.constant 2 : index
    %c0_35 = arith.constant 0 : index
    %22 = vector.load %arg5[%c1_33, %c2_34, %c0_35] : memref<18x18x4xbf16, #tpu.memory_space<vmem>>, vector<16x16x4xbf16>
    %23 = vector.shape_cast %22 : vector<16x16x4xbf16> to vector<256x4xbf16>
    %c2_36 = arith.constant 2 : index
    %c0_37 = arith.constant 0 : index
    %c0_38 = arith.constant 0 : index
    %24 = vector.load %arg5[%c2_36, %c0_37, %c0_38] : memref<18x18x4xbf16, #tpu.memory_space<vmem>>, vector<16x16x4xbf16>
    %25 = vector.shape_cast %24 : vector<16x16x4xbf16> to vector<256x4xbf16>
    %c2_39 = arith.constant 2 : index
    %c1_40 = arith.constant 1 : index
    %c0_41 = arith.constant 0 : index
    %26 = vector.load %arg5[%c2_39, %c1_40, %c0_41] : memref<18x18x4xbf16, #tpu.memory_space<vmem>>, vector<16x16x4xbf16>
    %27 = vector.shape_cast %26 : vector<16x16x4xbf16> to vector<256x4xbf16>
    %c2_42 = arith.constant 2 : index
    %c2_43 = arith.constant 2 : index
    %c0_44 = arith.constant 0 : index
    %28 = vector.load %arg5[%c2_42, %c2_43, %c0_44] : memref<18x18x4xbf16, #tpu.memory_space<vmem>>, vector<16x16x4xbf16>
    %29 = vector.shape_cast %28 : vector<16x16x4xbf16> to vector<256x4xbf16>
    %30 = tpu.concatenate %13, %15, %17, %19, %21, %23, %25, %27, %29 in 1 : vector<256x4xbf16>, vector<256x4xbf16>, vector<256x4xbf16>, vector<256x4xbf16>, vector<256x4xbf16>, vector<256x4xbf16>, vector<256x4xbf16>, vector<256x4xbf16>, vector<256x4xbf16> -> vector<256x36xbf16>
    %c0_45 = arith.constant 0 : index
    %c0_46 = arith.constant 0 : index
    %31 = vector.load %arg2[%c0_45, %c0_46] : memref<36x128xbf16, #tpu.memory_space<vmem>>, vector<36x128xbf16>
    %cst_47 = arith.constant dense<0.000000e+00> : vector<256x128xf32>
    %32 = tpu.matmul %30, %31, %cst_47 {dimension_numbers = #tpu.dot_dimension_numbers<[1], [0], [0], [1], [0, 0, 1, 1], [], []>} : vector<256x36xbf16>, vector<36x128xbf16>, vector<256x128xf32> -> vector<256x128xf32>
    %33 = arith.truncf %32 : vector<256x128xf32> to vector<256x128xbf16>
    %c0_48 = arith.constant 0 : index
    %c0_49 = arith.constant 0 : index
    %34 = vector.load %arg3[%c0_48, %c0_49] : memref<256x128xbf16, #tpu.memory_space<vmem>>, vector<256x128xbf16>
    tpu.vector_store %arg3[%c0_48, %c0_49], %33 {strides = array<i32>} : memref<256x128xbf16, #tpu.memory_space<vmem>>, vector<256x128xbf16>,
    %cst_50 = arith.constant dense<0.000000e+00> : vector<128xf32>
    %35 = vector.multi_reduction <add>, %32, %cst_50 [0] : vector<256x128xf32> to vector<128xf32>
    %36 = vector.shape_cast %35 : vector<128xf32> to vector<1x128xf32>
    %c0_51 = arith.constant 0 : index
    %c0_52 = arith.constant 0 : index
    %c0_53 = arith.constant 0 : index
    %37 = vector.load %arg4[%c0_51, %c0_52, %c0_53] : memref<1x2x128xf32, #tpu.memory_space<vmem>>, vector<1x1x128xf32>
    %38 = vector.shape_cast %37 : vector<1x1x128xf32> to vector<1x128xf32>
    %39 = vector.shape_cast %36 : vector<1x128xf32> to vector<1x1x128xf32>
    tpu.vector_store %arg4[%c0_51, %c0_52, %c0_53], %39 {strides = array<i32>} : memref<1x2x128xf32, #tpu.memory_space<vmem>>, vector<1x1x128xf32>,
    %40 = arith.mulf %32, %32 : vector<256x128xf32>
    %cst_54 = arith.constant dense<0.000000e+00> : vector<128xf32>
    %41 = vector.multi_reduction <add>, %40, %cst_54 [0] : vector<256x128xf32> to vector<128xf32>
    %42 = vector.shape_cast %41 : vector<128xf32> to vector<1x128xf32>
    %c0_55 = arith.constant 0 : index
    %c1_56 = arith.constant 1 : index
    %c0_57 = arith.constant 0 : index
    %43 = vector.load %arg4[%c0_55, %c1_56, %c0_57] : memref<1x2x128xf32, #tpu.memory_space<vmem>>, vector<1x1x128xf32>
    %44 = vector.shape_cast %43 : vector<1x1x128xf32> to vector<1x128xf32>
    %45 = vector.shape_cast %42 : vector<1x128xf32> to vector<1x1x128xf32>
    tpu.vector_store %arg4[%c0_55, %c1_56, %c0_57], %45 {strides = array<i32>} : memref<1x2x128xf32, #tpu.memory_space<vmem>>, vector<1x1x128xf32>,
    return
  }
  func.func @transform_0(%arg0: i32) -> (i32, i32, i32, i32) {
    %c0_i32 = arith.constant 0 : i32
    %c0_i32_0 = arith.constant 0 : i32
    %c0_i32_1 = arith.constant 0 : i32
    %c0_i32_2 = arith.constant 0 : i32
    return %arg0, %c0_i32, %c0_i32_0, %c0_i32_1 : i32, i32, i32, i32
  }
  func.func @transform_1(%arg0: i32) -> (i32, i32) {
    %c0_i32 = arith.constant 0 : i32
    %c0_i32_0 = arith.constant 0 : i32
    %c0_i32_1 = arith.constant 0 : i32
    return %c0_i32, %c0_i32_0 : i32, i32
  }
  func.func @transform_2(%arg0: i32) -> (i32, i32) {
    %c0_i32 = arith.constant 0 : i32
    %c0_i32_0 = arith.constant 0 : i32
    return %arg0, %c0_i32 : i32, i32
  }
  func.func @transform_3(%arg0: i32) -> (i32, i32, i32) {
    %c0_i32 = arith.constant 0 : i32
    %c0_i32_0 = arith.constant 0 : i32
    %c0_i32_1 = arith.constant 0 : i32
    return %arg0, %c0_i32, %c0_i32_0 : i32, i32, i32
  }
}

module attributes {stable_mosaic.version = 11 : i64} {
  func.func @_bn_relu_kernel(%arg0: i32, %arg1: memref<512x128xbf16, #tpu.memory_space<vmem>>, %arg2: memref<1x128xf32, #tpu.memory_space<vmem>>, %arg3: memref<1x128xf32, #tpu.memory_space<vmem>>, %arg4: memref<512x128xf32, #tpu.memory_space<vmem>>) attributes {dimension_semantics = [#tpu.dimension_semantics<parallel>], iteration_bounds = array<i64: 1>, scalar_prefetch = 0 : i64, scratch_operands = 0 : i64, tpu.core_type = #tpu.core_type<tc>, window_params = [{transform_indices = @transform_0, window_bounds = array<i64: 512, 128>}, {pipeline_mode = #tpu.pipeline_mode<synchronous>, transform_indices = @transform_1, window_bounds = array<i64: 1, 128>}, {pipeline_mode = #tpu.pipeline_mode<synchronous>, transform_indices = @transform_2, window_bounds = array<i64: 1, 128>}, {transform_indices = @transform_3, window_bounds = array<i64: 512, 128>}]} {
    %c0 = arith.constant 0 : index
    %c0_0 = arith.constant 0 : index
    %0 = vector.load %arg1[%c0, %c0_0] : memref<512x128xbf16, #tpu.memory_space<vmem>>, vector<512x128xbf16>
    %1 = arith.extf %0 : vector<512x128xbf16> to vector<512x128xf32>
    %c0_1 = arith.constant 0 : index
    %c0_2 = arith.constant 0 : index
    %2 = vector.load %arg2[%c0_1, %c0_2] : memref<1x128xf32, #tpu.memory_space<vmem>>, vector<1x128xf32>
    %3 = vector.broadcast %2 : vector<1x128xf32> to vector<512x128xf32>
    %4 = arith.mulf %1, %3 : vector<512x128xf32>
    %c0_3 = arith.constant 0 : index
    %c0_4 = arith.constant 0 : index
    %5 = vector.load %arg3[%c0_3, %c0_4] : memref<1x128xf32, #tpu.memory_space<vmem>>, vector<1x128xf32>
    %6 = vector.broadcast %5 : vector<1x128xf32> to vector<512x128xf32>
    %7 = arith.addf %4, %6 : vector<512x128xf32>
    %cst = arith.constant 0.000000e+00 : f32
    %8 = vector.broadcast %cst : f32 to vector<512x128xf32>
    %9 = arith.maximumf %7, %8 : vector<512x128xf32>
    %c0_5 = arith.constant 0 : index
    %c0_6 = arith.constant 0 : index
    %10 = vector.load %arg4[%c0_5, %c0_6] : memref<512x128xf32, #tpu.memory_space<vmem>>, vector<512x128xf32>
    tpu.vector_store %arg4[%c0_5, %c0_6], %9 {strides = array<i32>} : memref<512x128xf32, #tpu.memory_space<vmem>>, vector<512x128xf32>,
    return
  }
  func.func @transform_0(%arg0: i32) -> (i32, i32) {
    %c0_i32 = arith.constant 0 : i32
    %c0_i32_0 = arith.constant 0 : i32
    return %arg0, %c0_i32 : i32, i32
  }
  func.func @transform_1(%arg0: i32) -> (i32, i32) {
    %c0_i32 = arith.constant 0 : i32
    %c0_i32_0 = arith.constant 0 : i32
    %c0_i32_1 = arith.constant 0 : i32
    return %c0_i32, %c0_i32_0 : i32, i32
  }
  func.func @transform_2(%arg0: i32) -> (i32, i32) {
    %c0_i32 = arith.constant 0 : i32
    %c0_i32_0 = arith.constant 0 : i32
    %c0_i32_1 = arith.constant 0 : i32
    return %c0_i32, %c0_i32_0 : i32, i32
  }
  func.func @transform_3(%arg0: i32) -> (i32, i32) {
    %c0_i32 = arith.constant 0 : i32
    %c0_i32_0 = arith.constant 0 : i32
    return %arg0, %c0_i32 : i32, i32
  }
}

module attributes {stable_mosaic.version = 11 : i64} {
  func.func @kernel(%arg0: i32, %arg1: memref<1x16x16x128xbf16, #tpu.memory_space<vmem>>, %arg2: memref<9x128x128xbf16, #tpu.memory_space<vmem>>, %arg3: memref<1x128xf32, #tpu.memory_space<vmem>>, %arg4: memref<1x128xf32, #tpu.memory_space<vmem>>, %arg5: memref<256x128xbf16, #tpu.memory_space<vmem>>, %arg6: memref<1x2x128xf32, #tpu.memory_space<vmem>>, %arg7: memref<18x18x128xbf16, #tpu.memory_space<vmem>>, %arg8: memref<256x128xf32, #tpu.memory_space<vmem>>) attributes {dimension_semantics = [#tpu.dimension_semantics<parallel>], iteration_bounds = array<i64: 2>, scalar_prefetch = 0 : i64, scratch_operands = 2 : i64, tpu.core_type = #tpu.core_type<tc>, window_params = [{transform_indices = @transform_0, window_bounds = array<i64: 1, 16, 16, 128>}, {pipeline_mode = #tpu.pipeline_mode<synchronous>, transform_indices = @transform_1, window_bounds = array<i64: 9, 128, 128>}, {pipeline_mode = #tpu.pipeline_mode<synchronous>, transform_indices = @transform_2, window_bounds = array<i64: 1, 128>}, {pipeline_mode = #tpu.pipeline_mode<synchronous>, transform_indices = @transform_3, window_bounds = array<i64: 1, 128>}, {transform_indices = @transform_4, window_bounds = array<i64: 256, 128>}, {transform_indices = @transform_5, window_bounds = array<i64: 1, 2, 128>}]} {
    %cst = arith.constant 0.000000e+00 : bf16
    %0 = vector.broadcast %cst : bf16 to vector<1x18x128xbf16>
    %c0 = arith.constant 0 : index
    %c0_0 = arith.constant 0 : index
    %c0_1 = arith.constant 0 : index
    %1 = vector.load %arg7[%c0, %c0_0, %c0_1] : memref<18x18x128xbf16, #tpu.memory_space<vmem>>, vector<1x18x128xbf16>
    tpu.vector_store %arg7[%c0, %c0_0, %c0_1], %0 {strides = array<i32>} : memref<18x18x128xbf16, #tpu.memory_space<vmem>>, vector<1x18x128xbf16>,
    %cst_2 = arith.constant 0.000000e+00 : bf16
    %2 = vector.broadcast %cst_2 : bf16 to vector<1x18x128xbf16>
    %c17 = arith.constant 17 : index
    %c0_3 = arith.constant 0 : index
    %c0_4 = arith.constant 0 : index
    %3 = vector.load %arg7[%c17, %c0_3, %c0_4] : memref<18x18x128xbf16, #tpu.memory_space<vmem>>, vector<1x18x128xbf16>
    tpu.vector_store %arg7[%c17, %c0_3, %c0_4], %2 {strides = array<i32>} : memref<18x18x128xbf16, #tpu.memory_space<vmem>>, vector<1x18x128xbf16>,
    %cst_5 = arith.constant 0.000000e+00 : bf16
    %4 = vector.broadcast %cst_5 : bf16 to vector<18x1x128xbf16>
    %c0_6 = arith.constant 0 : index
    %c0_7 = arith.constant 0 : index
    %c0_8 = arith.constant 0 : index
    %5 = vector.load %arg7[%c0_6, %c0_7, %c0_8] : memref<18x18x128xbf16, #tpu.memory_space<vmem>>, vector<18x1x128xbf16>
    tpu.vector_store %arg7[%c0_6, %c0_7, %c0_8], %4 {strides = array<i32>} : memref<18x18x128xbf16, #tpu.memory_space<vmem>>, vector<18x1x128xbf16>,
    %cst_9 = arith.constant 0.000000e+00 : bf16
    %6 = vector.broadcast %cst_9 : bf16 to vector<18x1x128xbf16>
    %c0_10 = arith.constant 0 : index
    %c17_11 = arith.constant 17 : index
    %c0_12 = arith.constant 0 : index
    %7 = vector.load %arg7[%c0_10, %c17_11, %c0_12] : memref<18x18x128xbf16, #tpu.memory_space<vmem>>, vector<18x1x128xbf16>
    tpu.vector_store %arg7[%c0_10, %c17_11, %c0_12], %6 {strides = array<i32>} : memref<18x18x128xbf16, #tpu.memory_space<vmem>>, vector<18x1x128xbf16>,
    %c0_13 = arith.constant 0 : index
    %c0_14 = arith.constant 0 : index
    %c0_15 = arith.constant 0 : index
    %c0_16 = arith.constant 0 : index
    %8 = vector.load %arg1[%c0_13, %c0_14, %c0_15, %c0_16] : memref<1x16x16x128xbf16, #tpu.memory_space<vmem>>, vector<1x16x16x128xbf16>
    %9 = vector.shape_cast %8 : vector<1x16x16x128xbf16> to vector<16x16x128xbf16>
    %10 = arith.extf %9 : vector<16x16x128xbf16> to vector<16x16x128xf32>
    %c0_17 = arith.constant 0 : index
    %c0_18 = arith.constant 0 : index
    %11 = vector.load %arg3[%c0_17, %c0_18] : memref<1x128xf32, #tpu.memory_space<vmem>>, vector<1x128xf32>
    %12 = vector.shape_cast %11 : vector<1x128xf32> to vector<128xf32>
    %13 = vector.shape_cast %12 : vector<128xf32> to vector<1x1x128xf32>
    %14 = vector.broadcast %13 : vector<1x1x128xf32> to vector<16x16x128xf32>
    %15 = arith.mulf %10, %14 : vector<16x16x128xf32>
    %c0_19 = arith.constant 0 : index
    %c0_20 = arith.constant 0 : index
    %16 = vector.load %arg4[%c0_19, %c0_20] : memref<1x128xf32, #tpu.memory_space<vmem>>, vector<1x128xf32>
    %17 = vector.shape_cast %16 : vector<1x128xf32> to vector<128xf32>
    %18 = vector.shape_cast %17 : vector<128xf32> to vector<1x1x128xf32>
    %19 = vector.broadcast %18 : vector<1x1x128xf32> to vector<16x16x128xf32>
    %20 = arith.addf %15, %19 : vector<16x16x128xf32>
    %cst_21 = arith.constant 0.000000e+00 : f32
    %21 = vector.broadcast %cst_21 : f32 to vector<16x16x128xf32>
    %22 = arith.maximumf %20, %21 : vector<16x16x128xf32>
    %23 = arith.truncf %22 : vector<16x16x128xf32> to vector<16x16x128xbf16>
    %c1 = arith.constant 1 : index
    %c1_22 = arith.constant 1 : index
    %c0_23 = arith.constant 0 : index
    %24 = vector.load %arg7[%c1, %c1_22, %c0_23] : memref<18x18x128xbf16, #tpu.memory_space<vmem>>, vector<16x16x128xbf16>
    tpu.vector_store %arg7[%c1, %c1_22, %c0_23], %23 {strides = array<i32>} : memref<18x18x128xbf16, #tpu.memory_space<vmem>>, vector<16x16x128xbf16>,
    %c0_24 = arith.constant 0 : index
    %c0_25 = arith.constant 0 : index
    %c0_26 = arith.constant 0 : index
    %25 = vector.load %arg7[%c0_24, %c0_25, %c0_26] : memref<18x18x128xbf16, #tpu.memory_space<vmem>>, vector<16x16x128xbf16>
    %26 = vector.shape_cast %25 : vector<16x16x128xbf16> to vector<256x128xbf16>
    %c0_27 = arith.constant 0 : index
    %c0_28 = arith.constant 0 : index
    %c0_29 = arith.constant 0 : index
    %27 = vector.load %arg2[%c0_27, %c0_28, %c0_29] : memref<9x128x128xbf16, #tpu.memory_space<vmem>>, vector<1x128x128xbf16>
    %28 = vector.shape_cast %27 : vector<1x128x128xbf16> to vector<128x128xbf16>
    %cst_30 = arith.constant dense<0.000000e+00> : vector<256x128xf32>
    %29 = tpu.matmul %26, %28, %cst_30 {dimension_numbers = #tpu.dot_dimension_numbers<[1], [0], [0], [1], [0, 0, 1, 1], [], []>} : vector<256x128xbf16>, vector<128x128xbf16>, vector<256x128xf32> -> vector<256x128xf32>
    %c0_31 = arith.constant 0 : index
    %c0_32 = arith.constant 0 : index
    %30 = vector.load %arg8[%c0_31, %c0_32] : memref<256x128xf32, #tpu.memory_space<vmem>>, vector<256x128xf32>
    tpu.vector_store %arg8[%c0_31, %c0_32], %29 {strides = array<i32>} : memref<256x128xf32, #tpu.memory_space<vmem>>, vector<256x128xf32>,
    %c0_33 = arith.constant 0 : index
    %c1_34 = arith.constant 1 : index
    %c0_35 = arith.constant 0 : index
    %31 = vector.load %arg7[%c0_33, %c1_34, %c0_35] : memref<18x18x128xbf16, #tpu.memory_space<vmem>>, vector<16x16x128xbf16>
    %32 = vector.shape_cast %31 : vector<16x16x128xbf16> to vector<256x128xbf16>
    %c1_36 = arith.constant 1 : index
    %c0_37 = arith.constant 0 : index
    %c0_38 = arith.constant 0 : index
    %33 = vector.load %arg2[%c1_36, %c0_37, %c0_38] : memref<9x128x128xbf16, #tpu.memory_space<vmem>>, vector<1x128x128xbf16>
    %34 = vector.shape_cast %33 : vector<1x128x128xbf16> to vector<128x128xbf16>
    %cst_39 = arith.constant dense<0.000000e+00> : vector<256x128xf32>
    %35 = tpu.matmul %32, %34, %cst_39 {dimension_numbers = #tpu.dot_dimension_numbers<[1], [0], [0], [1], [0, 0, 1, 1], [], []>} : vector<256x128xbf16>, vector<128x128xbf16>, vector<256x128xf32> -> vector<256x128xf32>
    %c0_40 = arith.constant 0 : index
    %c0_41 = arith.constant 0 : index
    %36 = vector.load %arg8[%c0_40, %c0_41] : memref<256x128xf32, #tpu.memory_space<vmem>>, vector<256x128xf32>
    %37 = arith.addf %36, %35 : vector<256x128xf32>
    %c0_42 = arith.constant 0 : index
    %c0_43 = arith.constant 0 : index
    %38 = vector.load %arg8[%c0_42, %c0_43] : memref<256x128xf32, #tpu.memory_space<vmem>>, vector<256x128xf32>
    tpu.vector_store %arg8[%c0_42, %c0_43], %37 {strides = array<i32>} : memref<256x128xf32, #tpu.memory_space<vmem>>, vector<256x128xf32>,
    %c0_44 = arith.constant 0 : index
    %c2 = arith.constant 2 : index
    %c0_45 = arith.constant 0 : index
    %39 = vector.load %arg7[%c0_44, %c2, %c0_45] : memref<18x18x128xbf16, #tpu.memory_space<vmem>>, vector<16x16x128xbf16>
    %40 = vector.shape_cast %39 : vector<16x16x128xbf16> to vector<256x128xbf16>
    %c2_46 = arith.constant 2 : index
    %c0_47 = arith.constant 0 : index
    %c0_48 = arith.constant 0 : index
    %41 = vector.load %arg2[%c2_46, %c0_47, %c0_48] : memref<9x128x128xbf16, #tpu.memory_space<vmem>>, vector<1x128x128xbf16>
    %42 = vector.shape_cast %41 : vector<1x128x128xbf16> to vector<128x128xbf16>
    %cst_49 = arith.constant dense<0.000000e+00> : vector<256x128xf32>
    %43 = tpu.matmul %40, %42, %cst_49 {dimension_numbers = #tpu.dot_dimension_numbers<[1], [0], [0], [1], [0, 0, 1, 1], [], []>} : vector<256x128xbf16>, vector<128x128xbf16>, vector<256x128xf32> -> vector<256x128xf32>
    %c0_50 = arith.constant 0 : index
    %c0_51 = arith.constant 0 : index
    %44 = vector.load %arg8[%c0_50, %c0_51] : memref<256x128xf32, #tpu.memory_space<vmem>>, vector<256x128xf32>
    %45 = arith.addf %44, %43 : vector<256x128xf32>
    %c0_52 = arith.constant 0 : index
    %c0_53 = arith.constant 0 : index
    %46 = vector.load %arg8[%c0_52, %c0_53] : memref<256x128xf32, #tpu.memory_space<vmem>>, vector<256x128xf32>
    tpu.vector_store %arg8[%c0_52, %c0_53], %45 {strides = array<i32>} : memref<256x128xf32, #tpu.memory_space<vmem>>, vector<256x128xf32>,
    %c1_54 = arith.constant 1 : index
    %c0_55 = arith.constant 0 : index
    %c0_56 = arith.constant 0 : index
    %47 = vector.load %arg7[%c1_54, %c0_55, %c0_56] : memref<18x18x128xbf16, #tpu.memory_space<vmem>>, vector<16x16x128xbf16>
    %48 = vector.shape_cast %47 : vector<16x16x128xbf16> to vector<256x128xbf16>
    %c3 = arith.constant 3 : index
    %c0_57 = arith.constant 0 : index
    %c0_58 = arith.constant 0 : index
    %49 = vector.load %arg2[%c3, %c0_57, %c0_58] : memref<9x128x128xbf16, #tpu.memory_space<vmem>>, vector<1x128x128xbf16>
    %50 = vector.shape_cast %49 : vector<1x128x128xbf16> to vector<128x128xbf16>
    %cst_59 = arith.constant dense<0.000000e+00> : vector<256x128xf32>
    %51 = tpu.matmul %48, %50, %cst_59 {dimension_numbers = #tpu.dot_dimension_numbers<[1], [0], [0], [1], [0, 0, 1, 1], [], []>} : vector<256x128xbf16>, vector<128x128xbf16>, vector<256x128xf32> -> vector<256x128xf32>
    %c0_60 = arith.constant 0 : index
    %c0_61 = arith.constant 0 : index
    %52 = vector.load %arg8[%c0_60, %c0_61] : memref<256x128xf32, #tpu.memory_space<vmem>>, vector<256x128xf32>
    %53 = arith.addf %52, %51 : vector<256x128xf32>
    %c0_62 = arith.constant 0 : index
    %c0_63 = arith.constant 0 : index
    %54 = vector.load %arg8[%c0_62, %c0_63] : memref<256x128xf32, #tpu.memory_space<vmem>>, vector<256x128xf32>
    tpu.vector_store %arg8[%c0_62, %c0_63], %53 {strides = array<i32>} : memref<256x128xf32, #tpu.memory_space<vmem>>, vector<256x128xf32>,
    %c1_64 = arith.constant 1 : index
    %c1_65 = arith.constant 1 : index
    %c0_66 = arith.constant 0 : index
    %55 = vector.load %arg7[%c1_64, %c1_65, %c0_66] : memref<18x18x128xbf16, #tpu.memory_space<vmem>>, vector<16x16x128xbf16>
    %56 = vector.shape_cast %55 : vector<16x16x128xbf16> to vector<256x128xbf16>
    %c4 = arith.constant 4 : index
    %c0_67 = arith.constant 0 : index
    %c0_68 = arith.constant 0 : index
    %57 = vector.load %arg2[%c4, %c0_67, %c0_68] : memref<9x128x128xbf16, #tpu.memory_space<vmem>>, vector<1x128x128xbf16>
    %58 = vector.shape_cast %57 : vector<1x128x128xbf16> to vector<128x128xbf16>
    %cst_69 = arith.constant dense<0.000000e+00> : vector<256x128xf32>
    %59 = tpu.matmul %56, %58, %cst_69 {dimension_numbers = #tpu.dot_dimension_numbers<[1], [0], [0], [1], [0, 0, 1, 1], [], []>} : vector<256x128xbf16>, vector<128x128xbf16>, vector<256x128xf32> -> vector<256x128xf32>
    %c0_70 = arith.constant 0 : index
    %c0_71 = arith.constant 0 : index
    %60 = vector.load %arg8[%c0_70, %c0_71] : memref<256x128xf32, #tpu.memory_space<vmem>>, vector<256x128xf32>
    %61 = arith.addf %60, %59 : vector<256x128xf32>
    %c0_72 = arith.constant 0 : index
    %c0_73 = arith.constant 0 : index
    %62 = vector.load %arg8[%c0_72, %c0_73] : memref<256x128xf32, #tpu.memory_space<vmem>>, vector<256x128xf32>
    tpu.vector_store %arg8[%c0_72, %c0_73], %61 {strides = array<i32>} : memref<256x128xf32, #tpu.memory_space<vmem>>, vector<256x128xf32>,
    %c1_74 = arith.constant 1 : index
    %c2_75 = arith.constant 2 : index
    %c0_76 = arith.constant 0 : index
    %63 = vector.load %arg7[%c1_74, %c2_75, %c0_76] : memref<18x18x128xbf16, #tpu.memory_space<vmem>>, vector<16x16x128xbf16>
    %64 = vector.shape_cast %63 : vector<16x16x128xbf16> to vector<256x128xbf16>
    %c5 = arith.constant 5 : index
    %c0_77 = arith.constant 0 : index
    %c0_78 = arith.constant 0 : index
    %65 = vector.load %arg2[%c5, %c0_77, %c0_78] : memref<9x128x128xbf16, #tpu.memory_space<vmem>>, vector<1x128x128xbf16>
    %66 = vector.shape_cast %65 : vector<1x128x128xbf16> to vector<128x128xbf16>
    %cst_79 = arith.constant dense<0.000000e+00> : vector<256x128xf32>
    %67 = tpu.matmul %64, %66, %cst_79 {dimension_numbers = #tpu.dot_dimension_numbers<[1], [0], [0], [1], [0, 0, 1, 1], [], []>} : vector<256x128xbf16>, vector<128x128xbf16>, vector<256x128xf32> -> vector<256x128xf32>
    %c0_80 = arith.constant 0 : index
    %c0_81 = arith.constant 0 : index
    %68 = vector.load %arg8[%c0_80, %c0_81] : memref<256x128xf32, #tpu.memory_space<vmem>>, vector<256x128xf32>
    %69 = arith.addf %68, %67 : vector<256x128xf32>
    %c0_82 = arith.constant 0 : index
    %c0_83 = arith.constant 0 : index
    %70 = vector.load %arg8[%c0_82, %c0_83] : memref<256x128xf32, #tpu.memory_space<vmem>>, vector<256x128xf32>
    tpu.vector_store %arg8[%c0_82, %c0_83], %69 {strides = array<i32>} : memref<256x128xf32, #tpu.memory_space<vmem>>, vector<256x128xf32>,
    %c2_84 = arith.constant 2 : index
    %c0_85 = arith.constant 0 : index
    %c0_86 = arith.constant 0 : index
    %71 = vector.load %arg7[%c2_84, %c0_85, %c0_86] : memref<18x18x128xbf16, #tpu.memory_space<vmem>>, vector<16x16x128xbf16>
    %72 = vector.shape_cast %71 : vector<16x16x128xbf16> to vector<256x128xbf16>
    %c6 = arith.constant 6 : index
    %c0_87 = arith.constant 0 : index
    %c0_88 = arith.constant 0 : index
    %73 = vector.load %arg2[%c6, %c0_87, %c0_88] : memref<9x128x128xbf16, #tpu.memory_space<vmem>>, vector<1x128x128xbf16>
    %74 = vector.shape_cast %73 : vector<1x128x128xbf16> to vector<128x128xbf16>
    %cst_89 = arith.constant dense<0.000000e+00> : vector<256x128xf32>
    %75 = tpu.matmul %72, %74, %cst_89 {dimension_numbers = #tpu.dot_dimension_numbers<[1], [0], [0], [1], [0, 0, 1, 1], [], []>} : vector<256x128xbf16>, vector<128x128xbf16>, vector<256x128xf32> -> vector<256x128xf32>
    %c0_90 = arith.constant 0 : index
    %c0_91 = arith.constant 0 : index
    %76 = vector.load %arg8[%c0_90, %c0_91] : memref<256x128xf32, #tpu.memory_space<vmem>>, vector<256x128xf32>
    %77 = arith.addf %76, %75 : vector<256x128xf32>
    %c0_92 = arith.constant 0 : index
    %c0_93 = arith.constant 0 : index
    %78 = vector.load %arg8[%c0_92, %c0_93] : memref<256x128xf32, #tpu.memory_space<vmem>>, vector<256x128xf32>
    tpu.vector_store %arg8[%c0_92, %c0_93], %77 {strides = array<i32>} : memref<256x128xf32, #tpu.memory_space<vmem>>, vector<256x128xf32>,
    %c2_94 = arith.constant 2 : index
    %c1_95 = arith.constant 1 : index
    %c0_96 = arith.constant 0 : index
    %79 = vector.load %arg7[%c2_94, %c1_95, %c0_96] : memref<18x18x128xbf16, #tpu.memory_space<vmem>>, vector<16x16x128xbf16>
    %80 = vector.shape_cast %79 : vector<16x16x128xbf16> to vector<256x128xbf16>
    %c7 = arith.constant 7 : index
    %c0_97 = arith.constant 0 : index
    %c0_98 = arith.constant 0 : index
    %81 = vector.load %arg2[%c7, %c0_97, %c0_98] : memref<9x128x128xbf16, #tpu.memory_space<vmem>>, vector<1x128x128xbf16>
    %82 = vector.shape_cast %81 : vector<1x128x128xbf16> to vector<128x128xbf16>
    %cst_99 = arith.constant dense<0.000000e+00> : vector<256x128xf32>
    %83 = tpu.matmul %80, %82, %cst_99 {dimension_numbers = #tpu.dot_dimension_numbers<[1], [0], [0], [1], [0, 0, 1, 1], [], []>} : vector<256x128xbf16>, vector<128x128xbf16>, vector<256x128xf32> -> vector<256x128xf32>
    %c0_100 = arith.constant 0 : index
    %c0_101 = arith.constant 0 : index
    %84 = vector.load %arg8[%c0_100, %c0_101] : memref<256x128xf32, #tpu.memory_space<vmem>>, vector<256x128xf32>
    %85 = arith.addf %84, %83 : vector<256x128xf32>
    %c0_102 = arith.constant 0 : index
    %c0_103 = arith.constant 0 : index
    %86 = vector.load %arg8[%c0_102, %c0_103] : memref<256x128xf32, #tpu.memory_space<vmem>>, vector<256x128xf32>
    tpu.vector_store %arg8[%c0_102, %c0_103], %85 {strides = array<i32>} : memref<256x128xf32, #tpu.memory_space<vmem>>, vector<256x128xf32>,
    %c2_104 = arith.constant 2 : index
    %c2_105 = arith.constant 2 : index
    %c0_106 = arith.constant 0 : index
    %87 = vector.load %arg7[%c2_104, %c2_105, %c0_106] : memref<18x18x128xbf16, #tpu.memory_space<vmem>>, vector<16x16x128xbf16>
    %88 = vector.shape_cast %87 : vector<16x16x128xbf16> to vector<256x128xbf16>
    %c8 = arith.constant 8 : index
    %c0_107 = arith.constant 0 : index
    %c0_108 = arith.constant 0 : index
    %89 = vector.load %arg2[%c8, %c0_107, %c0_108] : memref<9x128x128xbf16, #tpu.memory_space<vmem>>, vector<1x128x128xbf16>
    %90 = vector.shape_cast %89 : vector<1x128x128xbf16> to vector<128x128xbf16>
    %cst_109 = arith.constant dense<0.000000e+00> : vector<256x128xf32>
    %91 = tpu.matmul %88, %90, %cst_109 {dimension_numbers = #tpu.dot_dimension_numbers<[1], [0], [0], [1], [0, 0, 1, 1], [], []>} : vector<256x128xbf16>, vector<128x128xbf16>, vector<256x128xf32> -> vector<256x128xf32>
    %c0_110 = arith.constant 0 : index
    %c0_111 = arith.constant 0 : index
    %92 = vector.load %arg8[%c0_110, %c0_111] : memref<256x128xf32, #tpu.memory_space<vmem>>, vector<256x128xf32>
    %93 = arith.addf %92, %91 : vector<256x128xf32>
    %c0_112 = arith.constant 0 : index
    %c0_113 = arith.constant 0 : index
    %94 = vector.load %arg8[%c0_112, %c0_113] : memref<256x128xf32, #tpu.memory_space<vmem>>, vector<256x128xf32>
    tpu.vector_store %arg8[%c0_112, %c0_113], %93 {strides = array<i32>} : memref<256x128xf32, #tpu.memory_space<vmem>>, vector<256x128xf32>,
    %c0_114 = arith.constant 0 : index
    %c0_115 = arith.constant 0 : index
    %95 = vector.load %arg8[%c0_114, %c0_115] : memref<256x128xf32, #tpu.memory_space<vmem>>, vector<256x128xf32>
    %96 = arith.truncf %95 : vector<256x128xf32> to vector<256x128xbf16>
    %c0_116 = arith.constant 0 : index
    %c0_117 = arith.constant 0 : index
    %97 = vector.load %arg5[%c0_116, %c0_117] : memref<256x128xbf16, #tpu.memory_space<vmem>>, vector<256x128xbf16>
    tpu.vector_store %arg5[%c0_116, %c0_117], %96 {strides = array<i32>} : memref<256x128xbf16, #tpu.memory_space<vmem>>, vector<256x128xbf16>,
    %cst_118 = arith.constant dense<0.000000e+00> : vector<128xf32>
    %98 = vector.multi_reduction <add>, %95, %cst_118 [0] : vector<256x128xf32> to vector<128xf32>
    %99 = vector.shape_cast %98 : vector<128xf32> to vector<1x128xf32>
    %c0_119 = arith.constant 0 : index
    %c0_120 = arith.constant 0 : index
    %c0_121 = arith.constant 0 : index
    %100 = vector.load %arg6[%c0_119, %c0_120, %c0_121] : memref<1x2x128xf32, #tpu.memory_space<vmem>>, vector<1x1x128xf32>
    %101 = vector.shape_cast %100 : vector<1x1x128xf32> to vector<1x128xf32>
    %102 = vector.shape_cast %99 : vector<1x128xf32> to vector<1x1x128xf32>
    tpu.vector_store %arg6[%c0_119, %c0_120, %c0_121], %102 {strides = array<i32>} : memref<1x2x128xf32, #tpu.memory_space<vmem>>, vector<1x1x128xf32>,
    %103 = arith.mulf %95, %95 : vector<256x128xf32>
    %cst_122 = arith.constant dense<0.000000e+00> : vector<128xf32>
    %104 = vector.multi_reduction <add>, %103, %cst_122 [0] : vector<256x128xf32> to vector<128xf32>
    %105 = vector.shape_cast %104 : vector<128xf32> to vector<1x128xf32>
    %c0_123 = arith.constant 0 : index
    %c1_124 = arith.constant 1 : index
    %c0_125 = arith.constant 0 : index
    %106 = vector.load %arg6[%c0_123, %c1_124, %c0_125] : memref<1x2x128xf32, #tpu.memory_space<vmem>>, vector<1x1x128xf32>
    %107 = vector.shape_cast %106 : vector<1x1x128xf32> to vector<1x128xf32>
    %108 = vector.shape_cast %105 : vector<1x128xf32> to vector<1x1x128xf32>
    tpu.vector_store %arg6[%c0_123, %c1_124, %c0_125], %108 {strides = array<i32>} : memref<1x2x128xf32, #tpu.memory_space<vmem>>, vector<1x1x128xf32>,
    return
  }
  func.func @transform_0(%arg0: i32) -> (i32, i32, i32, i32) {
    %c0_i32 = arith.constant 0 : i32
    %c0_i32_0 = arith.constant 0 : i32
    %c0_i32_1 = arith.constant 0 : i32
    %c0_i32_2 = arith.constant 0 : i32
    return %arg0, %c0_i32, %c0_i32_0, %c0_i32_1 : i32, i32, i32, i32
  }
  func.func @transform_1(%arg0: i32) -> (i32, i32, i32) {
    %c0_i32 = arith.constant 0 : i32
    %c0_i32_0 = arith.constant 0 : i32
    %c0_i32_1 = arith.constant 0 : i32
    %c0_i32_2 = arith.constant 0 : i32
    return %c0_i32, %c0_i32_0, %c0_i32_1 : i32, i32, i32
  }
  func.func @transform_2(%arg0: i32) -> (i32, i32) {
    %c0_i32 = arith.constant 0 : i32
    %c0_i32_0 = arith.constant 0 : i32
    %c0_i32_1 = arith.constant 0 : i32
    return %c0_i32, %c0_i32_0 : i32, i32
  }
  func.func @transform_3(%arg0: i32) -> (i32, i32) {
    %c0_i32 = arith.constant 0 : i32
    %c0_i32_0 = arith.constant 0 : i32
    %c0_i32_1 = arith.constant 0 : i32
    return %c0_i32, %c0_i32_0 : i32, i32
  }
  func.func @transform_4(%arg0: i32) -> (i32, i32) {
    %c0_i32 = arith.constant 0 : i32
    %c0_i32_0 = arith.constant 0 : i32
    return %arg0, %c0_i32 : i32, i32
  }
  func.func @transform_5(%arg0: i32) -> (i32, i32, i32) {
    %c0_i32 = arith.constant 0 : i32
    %c0_i32_0 = arith.constant 0 : i32
    %c0_i32_1 = arith.constant 0 : i32
    return %arg0, %c0_i32, %c0_i32_0 : i32, i32, i32
  }
}

</mosaic_0001>

<bundles_post_ra>
// kernel: convblock_forward.5
= control target key start
LH: loop header
LB: loop body
LE: loop exit
PB: predicated region body
PF: predicated region fallthrough
CT: control target
= control target key end

     0   :  { %s1017_s0 = inlined_call_operand.vmem [shape: bf16[512,128], index: 0, kind: input, shape index: {}]   ;;  %s1018_s1 = inlined_call_operand.vmem [shape: f32[1,128], index: 1, kind: input, shape index: {}]   ;;  %s1019_s2 = inlined_call_operand.vmem [shape: f32[1,128], index: 2, kind: input, shape index: {}]   ;;  %s1020_s3 = inlined_call_operand.vmem [shape: f32[512,128], index: 3, kind: output, shape index: {}]  }
   0x1   :  { %v411_v0 = vld [vmem:[%s1017_s0] sm:$0xff]   ;;  %v538_v5 = vld [vmem:[%s1017_s0 + $0x8] sm:$0xff]   ;;  %v539_v8 = vld [vmem:[%s1017_s0 + $0x10] sm:$0xff]  }
   0x2   :  { %v597_v1 = vld [vmem:[%s1018_s1] ss:$0 sm:$0xff]  ;;  %v412_v2 = vunpack.c.l.bf16 %v411_v0  ;;  %v413_v4 = vunpack.c.h.bf16 %v411_v0  ;;  %v416_v6 = vunpack.c.l.bf16 %v538_v5  ;;  %v417_v7 = vunpack.c.h.bf16 %v538_v5  ;;  %v540_v9 = vld [vmem:[%s1017_s0 + $0x18] sm:$0xff]   ;;  %v542_v31 = vld [vmem:[%s1017_s0 + $0x28] sm:$0xff]  }
   0x3   :  { %v602_v3 = vld [vmem:[%s1019_s2] ss:$0 sm:$0xff]  ;;  %v420_v12 = vunpack.c.l.bf16 %v539_v8  ;;  %v421_v13 = vunpack.c.h.bf16 %v539_v8  ;;  %v424_v16 = vunpack.c.l.bf16 %v540_v9  ;;  %v425_v17 = vunpack.c.h.bf16 %v540_v9  ;;  %v543_v36 = vld [vmem:[%s1017_s0 + $0x30] sm:$0xff]   ;;  %v544_v41 = vld [vmem:[%s1017_s0 + $0x38] sm:$0xff]  }
   0x4   :  { %v146_v10 = vmul.f32 %v597_v1, %v412_v2  ;;  %v147_v11 = vmul.f32 %v597_v1, %v413_v4  ;;  %v148_v14 = vmul.f32 %v597_v1, %v416_v6  ;;  %v149_v15 = vmul.f32 %v597_v1, %v417_v7  ;;  %v541_v26 = vld [vmem:[%s1017_s0 + $0x20] sm:$0xff]   ;;  %v546_v5 = vld [vmem:[%s1017_s0 + $0x48] sm:$0xff]  }
   0x5   :  { %v150_v20 = vmul.f32 %v597_v1, %v420_v12  ;;  %v151_v21 = vmul.f32 %v597_v1, %v421_v13  ;;  %v152_v24 = vmul.f32 %v597_v1, %v424_v16  ;;  %v153_v25 = vmul.f32 %v597_v1, %v425_v17  ;;  %v545_v62 = vld [vmem:[%s1017_s0 + $0x40] sm:$0xff]  }
   0x6   :  { %v214_v18 = vadd.f32 %v602_v3, %v146_v10  ;;  %v215_v19 = vadd.f32 %v602_v3, %v147_v11  ;;  %v216_v22 = vadd.f32 %v602_v3, %v148_v14  ;;  %v217_v23 = vadd.f32 %v602_v3, %v149_v15  ;;  %v547_v10 = vld [vmem:[%s1017_s0 + $0x50] sm:$0xff]   ;;  %v548_v15 = vld [vmem:[%s1017_s0 + $0x58] sm:$0xff]  }
   0x7   :  { %v218_v29 = vadd.f32 %v602_v3, %v150_v20  ;;  %v219_v30 = vadd.f32 %v602_v3, %v151_v21  ;;  %v220_v34 = vadd.f32 %v602_v3, %v152_v24  ;;  %v221_v35 = vadd.f32 %v602_v3, %v153_v25 }
   0x8   :  { %v278_v27 = vmax.f32 %v214_v18, 0.0  ;;  %v279_v28 = vmax.f32 %v215_v19, 0.0  ;;  %v280_v32 = vmax.f32 %v216_v22, 0.0  ;;  %v281_v33 = vmax.f32 %v217_v23, 0.0 }
   0x9   :  { %v282_v37 = vmax.f32 %v218_v29, 0.0  ;;  %v283_v38 = vmax.f32 %v219_v30, 0.0  ;;  %v428_v39 = vunpack.c.l.bf16 %v541_v26  ;;  %v429_v40 = vunpack.c.h.bf16 %v541_v26 }
   0xa   :  { %342 = vst [vmem:[%s1020_s3] sm:$0xff] %v278_v27  ;;  %v284_v42 = vmax.f32 %v220_v34, 0.0  ;;  %v285_v43 = vmax.f32 %v221_v35, 0.0  ;;  %v432_v44 = vunpack.c.l.bf16 %v542_v31  ;;  %v433_v45 = vunpack.c.h.bf16 %v542_v31 }
   0xb   :  { %343 = vst [vmem:[%s1020_s3 + $0x8] sm:$0xff] %v279_v28  ;;  %v154_v46 = vmul.f32 %v597_v1, %v428_v39  ;;  %v155_v47 = vmul.f32 %v597_v1, %v429_v40  ;;  %v436_v48 = vunpack.c.l.bf16 %v543_v36  ;;  %v437_v49 = vunpack.c.h.bf16 %v543_v36  ;;  %v549_v36 = vld [vmem:[%s1017_s0 + $0x60] sm:$0xff]  }
   0xc   :  { %344 = vst [vmem:[%s1020_s3 + $0x10] sm:$0xff] %v280_v32  ;;  %v156_v50 = vmul.f32 %v597_v1, %v432_v44  ;;  %v157_v51 = vmul.f32 %v597_v1, %v433_v45  ;;  %v440_v52 = vunpack.c.l.bf16 %v544_v41  ;;  %v441_v53 = vunpack.c.h.bf16 %v544_v41  ;;  %v550_v41 = vld [vmem:[%s1017_s0 + $0x68] sm:$0xff]  }
   0xd   :  { %345 = vst [vmem:[%s1020_s3 + $0x18] sm:$0xff] %v281_v33  ;;  %v222_v54 = vadd.f32 %v602_v3, %v154_v46  ;;  %v223_v55 = vadd.f32 %v602_v3, %v155_v47  ;;  %v158_v56 = vmul.f32 %v597_v1, %v436_v48  ;;  %v159_v57 = vmul.f32 %v597_v1, %v437_v49  ;;  %v551_v46 = vld [vmem:[%s1017_s0 + $0x70] sm:$0xff]  }
   0xe   :  { %346 = vst [vmem:[%s1020_s3 + $0x20] sm:$0xff] %v282_v37  ;;  %v224_v58 = vadd.f32 %v602_v3, %v156_v50  ;;  %v225_v59 = vadd.f32 %v602_v3, %v157_v51  ;;  %v160_v60 = vmul.f32 %v597_v1, %v440_v52  ;;  %v161_v61 = vmul.f32 %v597_v1, %v441_v53  ;;  %v552_v51 = vld [vmem:[%s1017_s0 + $0x78] sm:$0xff]  }
   0xf   :  { %347 = vst [vmem:[%s1020_s3 + $0x28] sm:$0xff] %v283_v38  ;;  %v286_v63 = vmax.f32 %v222_v54, 0.0  ;;  %v287_v0 = vmax.f32 %v223_v55, 0.0  ;;  %v226_v2 = vadd.f32 %v602_v3, %v158_v56  ;;  %v227_v4 = vadd.f32 %v602_v3, %v159_v57 }
  0x10   :  { %348 = vst [vmem:[%s1020_s3 + $0x30] sm:$0xff] %v284_v42  ;;  %v288_v6 = vmax.f32 %v224_v58, 0.0  ;;  %v289_v7 = vmax.f32 %v225_v59, 0.0  ;;  %v228_v8 = vadd.f32 %v602_v3, %v160_v60  ;;  %v229_v9 = vadd.f32 %v602_v3, %v161_v61 }
  0x11   :  { %349 = vst [vmem:[%s1020_s3 + $0x38] sm:$0xff] %v285_v43  ;;  %v290_v11 = vmax.f32 %v226_v2, 0.0  ;;  %v291_v12 = vmax.f32 %v227_v4, 0.0  ;;  %v444_v13 = vunpack.c.l.bf16 %v545_v62  ;;  %v445_v14 = vunpack.c.h.bf16 %v545_v62 }
  0x12   :  { %350 = vst [vmem:[%s1020_s3 + $0x40] sm:$0xff] %v286_v63  ;;  %v292_v16 = vmax.f32 %v228_v8, 0.0  ;;  %v293_v17 = vmax.f32 %v229_v9, 0.0  ;;  %v448_v18 = vunpack.c.l.bf16 %v546_v5  ;;  %v449_v19 = vunpack.c.h.bf16 %v546_v5 }
  0x13   :  { %351 = vst [vmem:[%s1020_s3 + $0x48] sm:$0xff] %v287_v0  ;;  %v162_v20 = vmul.f32 %v597_v1, %v444_v13  ;;  %v163_v21 = vmul.f32 %v597_v1, %v445_v14  ;;  %v452_v22 = vunpack.c.l.bf16 %v547_v10  ;;  %v453_v23 = vunpack.c.h.bf16 %v547_v10  ;;  %v553_v10 = vld [vmem:[%s1017_s0 + $0x80] sm:$0xff]  }
  0x14   :  { %352 = vst [vmem:[%s1020_s3 + $0x50] sm:$0xff] %v288_v6  ;;  %v164_v24 = vmul.f32 %v597_v1, %v448_v18  ;;  %v165_v25 = vmul.f32 %v597_v1, %v449_v19  ;;  %v456_v26 = vunpack.c.l.bf16 %v548_v15  ;;  %v457_v27 = vunpack.c.h.bf16 %v548_v15  ;;  %v554_v15 = vld [vmem:[%s1017_s0 + $0x88] sm:$0xff]  }
  0x15   :  { %353 = vst [vmem:[%s1020_s3 + $0x58] sm:$0xff] %v289_v7  ;;  %v230_v28 = vadd.f32 %v602_v3, %v162_v20  ;;  %v231_v29 = vadd.f32 %v602_v3, %v163_v21  ;;  %v166_v30 = vmul.f32 %v597_v1, %v452_v22  ;;  %v167_v31 = vmul.f32 %v597_v1, %v453_v23  ;;  %v555_v20 = vld [vmem:[%s1017_s0 + $0x90] sm:$0xff]  }
  0x16   :  { %354 = vst [vmem:[%s1020_s3 + $0x60] sm:$0xff] %v290_v11  ;;  %v232_v32 = vadd.f32 %v602_v3, %v164_v24  ;;  %v233_v33 = vadd.f32 %v602_v3, %v165_v25  ;;  %v168_v34 = vmul.f32 %v597_v1, %v456_v26  ;;  %v169_v35 = vmul.f32 %v597_v1, %v457_v27  ;;  %v556_v25 = vld [vmem:[%s1017_s0 + $0x98] sm:$0xff]  }
  0x17   :  { %355 = vst [vmem:[%s1020_s3 + $0x68] sm:$0xff] %v291_v12  ;;  %v294_v37 = vmax.f32 %v230_v28, 0.0  ;;  %v295_v38 = vmax.f32 %v231_v29, 0.0  ;;  %v234_v39 = vadd.f32 %v602_v3, %v166_v30  ;;  %v235_v40 = vadd.f32 %v602_v3, %v167_v31 }
  0x18   :  { %356 = vst [vmem:[%s1020_s3 + $0x70] sm:$0xff] %v292_v16  ;;  %v296_v42 = vmax.f32 %v232_v32, 0.0  ;;  %v297_v43 = vmax.f32 %v233_v33, 0.0  ;;  %v236_v44 = vadd.f32 %v602_v3, %v168_v34  ;;  %v237_v45 = vadd.f32 %v602_v3, %v169_v35 }
  0x19   :  { %357 = vst [vmem:[%s1020_s3 + $0x78] sm:$0xff] %v293_v17  ;;  %v298_v47 = vmax.f32 %v234_v39, 0.0  ;;  %v299_v48 = vmax.f32 %v235_v40, 0.0  ;;  %v460_v49 = vunpack.c.l.bf16 %v549_v36  ;;  %v461_v50 = vunpack.c.h.bf16 %v549_v36 }
  0x1a   :  { %358 = vst [vmem:[%s1020_s3 + $0x80] sm:$0xff] %v294_v37  ;;  %v300_v52 = vmax.f32 %v236_v44, 0.0  ;;  %v301_v53 = vmax.f32 %v237_v45, 0.0  ;;  %v464_v54 = vunpack.c.l.bf16 %v550_v41  ;;  %v465_v55 = vunpack.c.h.bf16 %v550_v41 }
  0x1b   :  { %359 = vst [vmem:[%s1020_s3 + $0x88] sm:$0xff] %v295_v38  ;;  %v170_v56 = vmul.f32 %v597_v1, %v460_v49  ;;  %v171_v57 = vmul.f32 %v597_v1, %v461_v50  ;;  %v468_v58 = vunpack.c.l.bf16 %v551_v46  ;;  %v469_v59 = vunpack.c.h.bf16 %v551_v46  ;;  %v557_v46 = vld [vmem:[%s1017_s0 + $0xa0] sm:$0xff]  }
  0x1c   :  { %360 = vst [vmem:[%s1020_s3 + $0x90] sm:$0xff] %v296_v42  ;;  %v172_v60 = vmul.f32 %v597_v1, %v464_v54  ;;  %v173_v61 = vmul.f32 %v597_v1, %v465_v55  ;;  %v472_v62 = vunpack.c.l.bf16 %v552_v51  ;;  %v473_v63 = vunpack.c.h.bf16 %v552_v51  ;;  %v558_v51 = vld [vmem:[%s1017_s0 + $0xa8] sm:$0xff]  }
  0x1d   :  { %361 = vst [vmem:[%s1020_s3 + $0x98] sm:$0xff] %v297_v43  ;;  %v238_v0 = vadd.f32 %v602_v3, %v170_v56  ;;  %v239_v2 = vadd.f32 %v602_v3, %v171_v57  ;;  %v174_v4 = vmul.f32 %v597_v1, %v468_v58  ;;  %v175_v5 = vmul.f32 %v597_v1, %v469_v59  ;;  %v559_v56 = vld [vmem:[%s1017_s0 + $0xb0] sm:$0xff]  }
  0x1e   :  { %362 = vst [vmem:[%s1020_s3 + $0xa0] sm:$0xff] %v298_v47  ;;  %v240_v6 = vadd.f32 %v602_v3, %v172_v60  ;;  %v241_v7 = vadd.f32 %v602_v3, %v173_v61  ;;  %v176_v8 = vmul.f32 %v597_v1, %v472_v62  ;;  %v177_v9 = vmul.f32 %v597_v1, %v473_v63  ;;  %v560_v61 = vld [vmem:[%s1017_s0 + $0xb8] sm:$0xff]  }
  0x1f   :  { %363 = vst [vmem:[%s1020_s3 + $0xa8] sm:$0xff] %v299_v48  ;;  %v302_v11 = vmax.f32 %v238_v0, 0.0  ;;  %v303_v12 = vmax.f32 %v239_v2, 0.0  ;;  %v242_v13 = vadd.f32 %v602_v3, %v174_v4  ;;  %v243_v14 = vadd.f32 %v602_v3, %v175_v5 }
  0x20   :  { %364 = vst [vmem:[%s1020_s3 + $0xb0] sm:$0xff] %v300_v52  ;;  %v304_v16 = vmax.f32 %v240_v6, 0.0  ;;  %v305_v17 = vmax.f32 %v241_v7, 0.0  ;;  %v244_v18 = vadd.f32 %v602_v3, %v176_v8  ;;  %v245_v19 = vadd.f32 %v602_v3, %v177_v9 }
  0x21   :  { %365 = vst [vmem:[%s1020_s3 + $0xb8] sm:$0xff] %v301_v53  ;;  %v306_v21 = vmax.f32 %v242_v13, 0.0  ;;  %v307_v22 = vmax.f32 %v243_v14, 0.0  ;;  %v476_v23 = vunpack.c.l.bf16 %v553_v10  ;;  %v477_v24 = vunpack.c.h.bf16 %v553_v10 }
  0x22   :  { %366 = vst [vmem:[%s1020_s3 + $0xc0] sm:$0xff] %v302_v11  ;;  %v308_v26 = vmax.f32 %v244_v18, 0.0  ;;  %v309_v27 = vmax.f32 %v245_v19, 0.0  ;;  %v480_v28 = vunpack.c.l.bf16 %v554_v15  ;;  %v481_v29 = vunpack.c.h.bf16 %v554_v15 }
  0x23   :  { %367 = vst [vmem:[%s1020_s3 + $0xc8] sm:$0xff] %v303_v12  ;;  %v178_v30 = vmul.f32 %v597_v1, %v476_v23  ;;  %v179_v31 = vmul.f32 %v597_v1, %v477_v24  ;;  %v484_v32 = vunpack.c.l.bf16 %v555_v20  ;;  %v485_v33 = vunpack.c.h.bf16 %v555_v20  ;;  %v561_v20 = vld [vmem:[%s1017_s0 + $0xc0] sm:$0xff]  }
  0x24   :  { %368 = vst [vmem:[%s1020_s3 + $0xd0] sm:$0xff] %v304_v16  ;;  %v180_v34 = vmul.f32 %v597_v1, %v480_v28  ;;  %v181_v35 = vmul.f32 %v597_v1, %v481_v29  ;;  %v488_v36 = vunpack.c.l.bf16 %v556_v25  ;;  %v489_v37 = vunpack.c.h.bf16 %v556_v25  ;;  %v562_v25 = vld [vmem:[%s1017_s0 + $0xc8] sm:$0xff]  }
  0x25   :  { %369 = vst [vmem:[%s1020_s3 + $0xd8] sm:$0xff] %v305_v17  ;;  %v246_v38 = vadd.f32 %v602_v3, %v178_v30  ;;  %v247_v39 = vadd.f32 %v602_v3, %v179_v31  ;;  %v182_v40 = vmul.f32 %v597_v1, %v484_v32  ;;  %v183_v41 = vmul.f32 %v597_v1, %v485_v33  ;;  %v563_v30 = vld [vmem:[%s1017_s0 + $0xd0] sm:$0xff]  }
  0x26   :  { %370 = vst [vmem:[%s1020_s3 + $0xe0] sm:$0xff] %v306_v21  ;;  %v248_v42 = vadd.f32 %v602_v3, %v180_v34  ;;  %v249_v43 = vadd.f32 %v602_v3, %v181_v35  ;;  %v184_v44 = vmul.f32 %v597_v1, %v488_v36  ;;  %v185_v45 = vmul.f32 %v597_v1, %v489_v37  ;;  %v564_v35 = vld [vmem:[%s1017_s0 + $0xd8] sm:$0xff]  }
  0x27   :  { %371 = vst [vmem:[%s1020_s3 + $0xe8] sm:$0xff] %v307_v22  ;;  %v310_v47 = vmax.f32 %v246_v38, 0.0  ;;  %v311_v48 = vmax.f32 %v247_v39, 0.0  ;;  %v250_v49 = vadd.f32 %v602_v3, %v182_v40  ;;  %v251_v50 = vadd.f32 %v602_v3, %v183_v41 }
  0x28   :  { %372 = vst [vmem:[%s1020_s3 + $0xf0] sm:$0xff] %v308_v26  ;;  %v312_v52 = vmax.f32 %v248_v42, 0.0  ;;  %v313_v53 = vmax.f32 %v249_v43, 0.0  ;;  %v252_v54 = vadd.f32 %v602_v3, %v184_v44  ;;  %v253_v55 = vadd.f32 %v602_v3, %v185_v45 }
  0x29   :  { %373 = vst [vmem:[%s1020_s3 + $0xf8] sm:$0xff] %v309_v27  ;;  %v314_v57 = vmax.f32 %v250_v49, 0.0  ;;  %v315_v58 = vmax.f32 %v251_v50, 0.0  ;;  %v492_v59 = vunpack.c.l.bf16 %v557_v46  ;;  %v493_v60 = vunpack.c.h.bf16 %v557_v46 }
  0x2a   :  { %374 = vst [vmem:[%s1020_s3 + $0x100] sm:$0xff] %v310_v47  ;;  %v316_v62 = vmax.f32 %v252_v54, 0.0  ;;  %v317_v63 = vmax.f32 %v253_v55, 0.0  ;;  %v496_v0 = vunpack.c.l.bf16 %v558_v51  ;;  %v497_v2 = vunpack.c.h.bf16 %v558_v51 }
  0x2b   :  { %375 = vst [vmem:[%s1020_s3 + $0x108] sm:$0xff] %v311_v48  ;;  %v186_v4 = vmul.f32 %v597_v1, %v492_v59  ;;  %v187_v5 = vmul.f32 %v597_v1, %v493_v60  ;;  %v500_v6 = vunpack.c.l.bf16 %v559_v56  ;;  %v501_v7 = vunpack.c.h.bf16 %v559_v56  ;;  %v565_v56 = vld [vmem:[%s1017_s0 + $0xe0] sm:$0xff]  }
  0x2c   :  { %376 = vst [vmem:[%s1020_s3 + $0x110] sm:$0xff] %v312_v52  ;;  %v188_v8 = vmul.f32 %v597_v1, %v496_v0  ;;  %v189_v9 = vmul.f32 %v597_v1, %v497_v2  ;;  %v504_v10 = vunpack.c.l.bf16 %v560_v61  ;;  %v505_v11 = vunpack.c.h.bf16 %v560_v61  ;;  %v566_v61 = vld [vmem:[%s1017_s0 + $0xe8] sm:$0xff]  }
  0x2d   :  { %377 = vst [vmem:[%s1020_s3 + $0x118] sm:$0xff] %v313_v53  ;;  %v254_v12 = vadd.f32 %v602_v3, %v186_v4  ;;  %v255_v13 = vadd.f32 %v602_v3, %v187_v5  ;;  %v190_v14 = vmul.f32 %v597_v1, %v500_v6  ;;  %v191_v15 = vmul.f32 %v597_v1, %v501_v7  ;;  %v567_v4 = vld [vmem:[%s1017_s0 + $0xf0] sm:$0xff]  }
  0x2e   :  { %378 = vst [vmem:[%s1020_s3 + $0x120] sm:$0xff] %v314_v57  ;;  %v256_v16 = vadd.f32 %v602_v3, %v188_v8  ;;  %v257_v17 = vadd.f32 %v602_v3, %v189_v9  ;;  %v192_v18 = vmul.f32 %v597_v1, %v504_v10  ;;  %v193_v19 = vmul.f32 %v597_v1, %v505_v11  ;;  %v568_v9 = vld [vmem:[%s1017_s0 + $0xf8] sm:$0xff]  }
  0x2f   :  { %379 = vst [vmem:[%s1020_s3 + $0x128] sm:$0xff] %v315_v58  ;;  %v318_v21 = vmax.f32 %v254_v12, 0.0  ;;  %v319_v22 = vmax.f32 %v255_v13, 0.0  ;;  %v258_v23 = vadd.f32 %v602_v3, %v190_v14  ;;  %v259_v24 = vadd.f32 %v602_v3, %v191_v15 }
  0x30   :  { %380 = vst [vmem:[%s1020_s3 + $0x130] sm:$0xff] %v316_v62  ;;  %v320_v26 = vmax.f32 %v256_v16, 0.0  ;;  %v321_v27 = vmax.f32 %v257_v17, 0.0  ;;  %v260_v28 = vadd.f32 %v602_v3, %v192_v18  ;;  %v261_v29 = vadd.f32 %v602_v3, %v193_v19 }
  0x31   :  { %381 = vst [vmem:[%s1020_s3 + $0x138] sm:$0xff] %v317_v63  ;;  %v322_v31 = vmax.f32 %v258_v23, 0.0  ;;  %v323_v32 = vmax.f32 %v259_v24, 0.0  ;;  %v508_v33 = vunpack.c.l.bf16 %v561_v20  ;;  %v509_v34 = vunpack.c.h.bf16 %v561_v20 }
  0x32   :  { %382 = vst [vmem:[%s1020_s3 + $0x140] sm:$0xff] %v318_v21  ;;  %v324_v36 = vmax.f32 %v260_v28, 0.0  ;;  %v325_v37 = vmax.f32 %v261_v29, 0.0  ;;  %v512_v38 = vunpack.c.l.bf16 %v562_v25  ;;  %v513_v39 = vunpack.c.h.bf16 %v562_v25 }
  0x33   :  { %383 = vst [vmem:[%s1020_s3 + $0x148] sm:$0xff] %v319_v22  ;;  %v194_v40 = vmul.f32 %v597_v1, %v508_v33  ;;  %v195_v41 = vmul.f32 %v597_v1, %v509_v34  ;;  %v516_v42 = vunpack.c.l.bf16 %v563_v30  ;;  %v517_v43 = vunpack.c.h.bf16 %v563_v30 }
  0x34   :  { %384 = vst [vmem:[%s1020_s3 + $0x150] sm:$0xff] %v320_v26  ;;  %v196_v44 = vmul.f32 %v597_v1, %v512_v38  ;;  %v197_v45 = vmul.f32 %v597_v1, %v513_v39  ;;  %v520_v46 = vunpack.c.l.bf16 %v564_v35  ;;  %v521_v47 = vunpack.c.h.bf16 %v564_v35 }
  0x35   :  { %385 = vst [vmem:[%s1020_s3 + $0x158] sm:$0xff] %v321_v27  ;;  %v262_v48 = vadd.f32 %v602_v3, %v194_v40  ;;  %v263_v49 = vadd.f32 %v602_v3, %v195_v41  ;;  %v198_v50 = vmul.f32 %v597_v1, %v516_v42  ;;  %v199_v51 = vmul.f32 %v597_v1, %v517_v43 }
  0x36   :  { %386 = vst [vmem:[%s1020_s3 + $0x160] sm:$0xff] %v322_v31  ;;  %v264_v52 = vadd.f32 %v602_v3, %v196_v44  ;;  %v265_v53 = vadd.f32 %v602_v3, %v197_v45  ;;  %v200_v54 = vmul.f32 %v597_v1, %v520_v46  ;;  %v201_v55 = vmul.f32 %v597_v1, %v521_v47 }
  0x37   :  { %387 = vst [vmem:[%s1020_s3 + $0x168] sm:$0xff] %v323_v32  ;;  %v326_v57 = vmax.f32 %v262_v48, 0.0  ;;  %v327_v58 = vmax.f32 %v263_v49, 0.0  ;;  %v266_v59 = vadd.f32 %v602_v3, %v198_v50  ;;  %v267_v60 = vadd.f32 %v602_v3, %v199_v51 }
  0x38   :  { %388 = vst [vmem:[%s1020_s3 + $0x170] sm:$0xff] %v324_v36  ;;  %v328_v62 = vmax.f32 %v264_v52, 0.0  ;;  %v329_v63 = vmax.f32 %v265_v53, 0.0  ;;  %v268_v0 = vadd.f32 %v602_v3, %v200_v54  ;;  %v269_v2 = vadd.f32 %v602_v3, %v201_v55 }
  0x39   :  { %389 = vst [vmem:[%s1020_s3 + $0x178] sm:$0xff] %v325_v37  ;;  %v330_v5 = vmax.f32 %v266_v59, 0.0  ;;  %v331_v6 = vmax.f32 %v267_v60, 0.0  ;;  %v524_v7 = vunpack.c.l.bf16 %v565_v56  ;;  %v525_v8 = vunpack.c.h.bf16 %v565_v56 }
  0x3a   :  { %390 = vst [vmem:[%s1020_s3 + $0x180] sm:$0xff] %v326_v57  ;;  %v332_v10 = vmax.f32 %v268_v0, 0.0  ;;  %v333_v11 = vmax.f32 %v269_v2, 0.0  ;;  %v528_v12 = vunpack.c.l.bf16 %v566_v61  ;;  %v529_v13 = vunpack.c.h.bf16 %v566_v61 }
  0x3b   :  { %391 = vst [vmem:[%s1020_s3 + $0x188] sm:$0xff] %v327_v58  ;;  %v202_v14 = vmul.f32 %v597_v1, %v524_v7  ;;  %v203_v15 = vmul.f32 %v597_v1, %v525_v8  ;;  %v532_v16 = vunpack.c.l.bf16 %v567_v4  ;;  %v533_v17 = vunpack.c.h.bf16 %v567_v4 }
  0x3c   :  { %392 = vst [vmem:[%s1020_s3 + $0x190] sm:$0xff] %v328_v62  ;;  %v204_v18 = vmul.f32 %v597_v1, %v528_v12  ;;  %v205_v19 = vmul.f32 %v597_v1, %v529_v13  ;;  %v536_v20 = vunpack.c.l.bf16 %v568_v9  ;;  %v537_v21 = vunpack.c.h.bf16 %v568_v9 }
  0x3d   :  { %393 = vst [vmem:[%s1020_s3 + $0x198] sm:$0xff] %v329_v63  ;;  %v270_v22 = vadd.f32 %v602_v3, %v202_v14  ;;  %v271_v23 = vadd.f32 %v602_v3, %v203_v15  ;;  %v206_v24 = vmul.f32 %v597_v1, %v532_v16  ;;  %v207_v25 = vmul.f32 %v597_v1, %v533_v17 }
  0x3e   :  { %394 = vst [vmem:[%s1020_s3 + $0x1a0] sm:$0xff] %v330_v5  ;;  %v272_v26 = vadd.f32 %v602_v3, %v204_v18  ;;  %v273_v27 = vadd.f32 %v602_v3, %v205_v19  ;;  %v208_v28 = vmul.f32 %v597_v1, %v536_v20  ;;  %v209_v29 = vmul.f32 %v597_v1, %v537_v21 }
  0x3f   :  { %395 = vst [vmem:[%s1020_s3 + $0x1a8] sm:$0xff] %v331_v6  ;;  %v334_v30 = vmax.f32 %v270_v22, 0.0  ;;  %v335_v31 = vmax.f32 %v271_v23, 0.0  ;;  %v274_v32 = vadd.f32 %v602_v3, %v206_v24  ;;  %v275_v33 = vadd.f32 %v602_v3, %v207_v25 }
  0x40   :  { %396 = vst [vmem:[%s1020_s3 + $0x1b0] sm:$0xff] %v332_v10  ;;  %v336_v34 = vmax.f32 %v272_v26, 0.0  ;;  %v337_v35 = vmax.f32 %v273_v27, 0.0  ;;  %v276_v36 = vadd.f32 %v602_v3, %v208_v28  ;;  %v277_v1 = vadd.f32 %v602_v3, %v209_v29 }
  0x41   :  { %397 = vst [vmem:[%s1020_s3 + $0x1b8] sm:$0xff] %v333_v11  ;;  %v338_v37 = vmax.f32 %v274_v32, 0.0  ;;  %v339_v38 = vmax.f32 %v275_v33, 0.0 }
  0x42   :  { %398 = vst [vmem:[%s1020_s3 + $0x1c0] sm:$0xff] %v334_v30  ;;  %v340_v39 = vmax.f32 %v276_v36, 0.0  ;;  %v341_v3 = vmax.f32 %v277_v1, 0.0 }
  0x43   :  { %399 = vst [vmem:[%s1020_s3 + $0x1c8] sm:$0xff] %v335_v31 }
  0x44   :  { %400 = vst [vmem:[%s1020_s3 + $0x1d0] sm:$0xff] %v336_v34 }
  0x45   :  { %401 = vst [vmem:[%s1020_s3 + $0x1d8] sm:$0xff] %v337_v35 }
  0x46   :  { %402 = vst [vmem:[%s1020_s3 + $0x1e0] sm:$0xff] %v338_v37 }
  0x47   :  { %403 = vst [vmem:[%s1020_s3 + $0x1e8] sm:$0xff] %v339_v38 }
  0x48   :  { %404 = vst [vmem:[%s1020_s3 + $0x1f0] sm:$0xff] %v340_v39 }
  0x49   :  { %405 = vst [vmem:[%s1020_s3 + $0x1f8] sm:$0xff] %v341_v3 }

// kernel: convblock_forward.3
= control target key start
LH: loop header
LB: loop body
LE: loop exit
PB: predicated region body
PF: predicated region fallthrough
CT: control target
= control target key end

     0   :  { %s4559_s12 = smov 0   ;;  %s6436_s0 = inlined_call_operand.vmem [shape: f32[2,16,16,4], index: 0, kind: input, shape index: {}]   ;;  %s6437_s1 = inlined_call_operand.vmem [shape: bf16[36,128], index: 1, kind: input, shape index: {}]   ;;  %s6438_s2 = inlined_call_operand.vmem [shape: bf16[512,128], index: 2, kind: output, shape index: {0}]   ;;  %s6439_s3 = inlined_call_operand.vmem [shape: f32[2,2,128], index: 3, kind: output, shape index: {1}]  }
   0x1 LB: > { %s4565_s13 = sadd.s32 4294967295, %s4528_s12   ;;  %p4063_p0 = scmp.ge.s32.totalorder %s4528_s12, 1  ;;  %s4528_s12 = sphi %s4559_s12, %s14_s12  }
   0x2   : > { %p140_p1 = scmp.lt.s32.totalorder %s4528_s12, 3 }
   0x4   : > { %p141_p2 = pnand %p4063_p0, %p140_p1 }
   0x6   : > { %144 = sbr.rel (%p141_p2) target bundleno = 744 (0x2e8), region = 28 }
   0xb   : > { %vm184_vm0 = vcmask 27648   ;;  %vm187_vm1 = vcmask 24576   ;;  %vm194_vm2 = vsmask.f32 256  ;;  %v4530_v0 = vmov 0   ;;  %p168_p3 = scmp.lt.s32.totalorder %s4565_s13, 1 }
   0xc   : > { %185 = vst.msk [vmem:[#allocation2] sm:$0xf] %vm184_vm0, %v4530_v0  ;;  %vm4572_vm3 = vmand %vm187_vm1, %vm194_vm2  ;;  %vm250_vm4 = vsmask.f32 7938  ;;  %v208_v3 = vld [vmem:[#allocation2 + $0x30] sm:$0x1] }
   0xd   : > { %186 = vst.msk [vmem:[#allocation2 + $0x4] sm:$0xf] %vm184_vm0, %v4530_v0  ;;  %vm4579_vm5 = vmand %vm187_vm1, %vm250_vm4  ;;  %v264_v4 = vld [vmem:[#allocation2 + $0x38] sm:$0x1]  ;;  %s4587_s14 = scalar_select %p168_p3, %s4565_s13, 1  ;;  %v209_v5 = vsel %vm4572_vm3, 0, %v208_v3 }
   0xe   : > { %188 = vst.msk [vmem:[#allocation2 + $0x8] sm:$0x1] %vm187_vm1, %v4530_v0  ;;  %v265_v6 = vsel %vm4579_vm5, 0, %v264_v4  ;;  %v202_v7 = vld [vmem:[#allocation2 + $0x18] sm:$0x1]  ;;  %vm4617_vm9 = vmand %vm184_vm0, %vm250_vm4  ;;  %s4531_s19 = smov 4  }
   0xf   : > { %190 = vst.msk [vmem:[#allocation2 + $0xcc] sm:$0xf] %vm184_vm0, %v4530_v0  ;;  %s4335_s15 = sshll.u32 %s4587_s14, 8  ;;  %v203_v8 = vsel %vm4572_vm3, 0, %v202_v7  ;;  %v258_v9 = vld [vmem:[#allocation2 + $0x20] sm:$0x1] }
  0x10   : > { %191 = vst.msk [vmem:[#allocation2 + $0xd0] sm:$0xf] %vm184_vm0, %v4530_v0  ;;  %s4601_s18 = scalar_lea.vmem %s6436_s0, %s4335_s15  ;;  %vm370_vm6 = vsmask.f32 4368  ;;  %v259_v10 = vsel %vm4579_vm5, 0, %v258_v9  ;;  %vm1306_vm12 = vcmask 1042432  }
  0x11   : > { %192 = vst.msk [vmem:[#allocation2 + $0xd4] sm:$0x1] %vm187_vm1, %v4530_v0  ;;  %v312_v12 = vld [vmem:[%s4601_s18 + $0x30] sm:$0xff]  ;;  %v313_v13 = vld [vmem:[%s4601_s18 + $0x38] sm:$0xff]  ;;  %v199_v19 = vld [vmem:[#allocation2 + $0xc] sm:$0x1] }
  0x12   : > { %210 = vst [vmem:[#allocation2 + $0x30] sm:$0x1] %v209_v5  ;;  %v344_v16 = vpack.c.bf16 %v312_v12, %v312_v12  ;;  %v345_v17 = vpack.c.bf16 %v313_v13, %v313_v13  ;;  %v308_v18 = vld [vmem:[%s4601_s18 + $0x10] sm:$0xff]  ;;  %vm855_vm7 = vsmask.f32 3328  ;;  %v309_v31 = vld [vmem:[%s4601_s18 + $0x18] sm:$0xff]  ;;  %vm4624_vm10 = vmor %vm194_vm2, %vm370_vm6 }
  0x13   : > { %v196_v11 = vld [vmem:[#allocation2] sm:$0x1]  ;;  %266 = vst [vmem:[#allocation2 + $0x38] sm:$0x1] %v265_v6  ;;  %vm856_vm8 = vsmask.f32 7440  ;;  %v340_v23 = vpack.c.bf16 %v308_v18, %v308_v18  ;;  %v341_v35 = vpack.c.bf16 %v309_v31, %v309_v31 }
  0x14   : > { %v197_v14 = vsel %vm4572_vm3, 0, %v196_v11  ;;  %v808_v15 = vld [vmem:[#allocation2 + $0x4] sm:$0xf]  ;;  %204 = vst [vmem:[#allocation2 + $0x18] sm:$0x1] %v203_v8  ;;  %v424_v25 = vshrl.u32 %v344_v16, 16  ;;  %vm4649_vm11 = vmor %vm855_vm7, %vm856_vm8 }
  0x15   : > { %198 = vst [vmem:[#allocation2] sm:$0x1] %v197_v14  ;;  %v252_v20 = vld [vmem:[#allocation2 + $0x8] sm:$0x1]  ;;  %v868_v21 = vshll.u32 %v808_v15, 16  ;;  %v872_v22 = vshrl.u32 %v808_v15, 16 }
  0x16   : > { %v253_v24 = vsel %vm4579_vm5, 0, %v252_v20  ;;  %v427_v26 = vshll.u32 %v344_v16, 16  ;;  %v432_v27 = vshrl.u32 %v345_v17, 16  ;;  %260 = vst [vmem:[#allocation2 + $0x20] sm:$0x1] %v259_v10  ;;  %v435_v30 = vshll.u32 %v345_v17, 16 }
  0x17   : > { %254 = vst [vmem:[#allocation2 + $0x8] sm:$0x1] %v253_v24  ;;  %v4612_v28 = vrot.slane %v868_v21, 5  ;;  %v874_v29 = vrot.slane %v872_v22, 4  ;;  %v426_v33 = vrot.slane %v424_v25, 7  ;;  %v390_v36 = vshrl.u32 %v340_v23, 16 }
  0x18   : > { %v434_v34 = vrot.slane %v432_v27, 7  ;;  %v255_v37 = vld [vmem:[#allocation2 + $0x14] sm:$0x1]  ;;  %v393_v41 = vshll.u32 %v340_v23, 16  ;;  %v200_v42 = vsel %vm4572_vm3, 0, %v199_v19  ;;  %v306_v44 = vld [vmem:[%s4601_s18] sm:$0xff] }
  0x19   : > { %v875_v38 = vor.u32 %v874_v29, %v4612_v28  ;;  %v716_v40 = vld [vmem:[#allocation2 + $0x30] sm:$0xf]  ;;  %v256_v43 = vsel %vm4579_vm5, 0, %v255_v37  ;;  %v429_v45 = vor.u32 %v427_v26, %v426_v33  ;;  %v430_v46 = vrot.slane %v426_v33, 4  ;;  %201 = vst [vmem:[#allocation2 + $0xc] sm:$0x1] %v200_v42 }
  0x1a   : > { %v437_v47 = vor.u32 %v435_v30, %v434_v34  ;;  %v439_v48 = vrot.slane %v434_v34, 4  ;;  %v720_v49 = vld [vmem:[#allocation2 + $0x38] sm:$0x1]  ;;  %v392_v51 = vrot.slane %v390_v36, 7  ;;  %v398_v52 = vshrl.u32 %v341_v35, 16  ;;  %v307_v54 = vld [vmem:[%s4601_s18 + $0x8] sm:$0xff] }
  0x1b   : > { %v876_v50 = vrot.slane %v875_v38, 4  ;;  %v401_v53 = vshll.u32 %v341_v35, 16  ;;  %v717_v57 = vsel %vm4617_vm9, %v429_v45, %v716_v40  ;;  %v702_v59 = vld [vmem:[#allocation2 + $0x18] sm:$0xf]  ;;  %257 = vst [vmem:[#allocation2 + $0x14] sm:$0x1] %v256_v43  ;;  %v338_v60 = vpack.c.bf16 %v306_v44, %v306_v44 }
  0x1c   : > { %v807_v55 = vld [vmem:[#allocation2] sm:$0xf]  ;;  %v438_v56 = vsel %vm4624_vm10, %v430_v46, %v437_v47  ;;  %v721_v58 = vsel %vm4572_vm3, %v439_v48, %v720_v49  ;;  %718 = vst [vmem:[#allocation2 + $0x30] sm:$0xf] %v717_v57  ;;  %v395_v63 = vor.u32 %v393_v41, %v392_v51  ;;  %v396_v0 = vrot.slane %v392_v51, 4  ;;  %v315_v13 = vld [vmem:[%s4601_s18 + $0x48] sm:$0xff] }
  0x1d   : > { %v859_v61 = vshrl.u32 %v807_v55, 16  ;;  %v862_v62 = vshll.u32 %v807_v55, 16  ;;  %v314_v3 = vld [vmem:[%s4601_s18 + $0x40] sm:$0xff]  ;;  %719 = vst.msk [vmem:[#allocation2 + $0x34] sm:$0xf] %vm184_vm0, %v438_v56  ;;  %v400_v5 = vrot.slane %v398_v52, 7  ;;  %v339_v6 = vpack.c.bf16 %v307_v54, %v307_v54 }
  0x1e   : > { %v839_v4 = vld [vmem:[#allocation2 + $0x8] sm:$0x1]  ;;  %v373_v7 = vshrl.u32 %v338_v60, 16  ;;  %v4642_v8 = vpack.c.bf16 %v314_v3, %v314_v3  ;;  %722 = vst [vmem:[#allocation2 + $0x38] sm:$0x1] %v721_v58  ;;  %v703_v12 = vsel %vm4617_vm9, %v395_v63, %v702_v59  ;;  %v4653_v19 = vpack.c.bf16 %v315_v13, %v315_v13  ;;  %v310_v25 = vld [vmem:[%s4601_s18 + $0x20] sm:$0xff] }
  0x1f   : > { %v861_v9 = vrot.slane %v859_v61, 4  ;;  %v864_v10 = vrot.slane %v862_v62, 5  ;;  %v878_v11 = vshll.u32 %v839_v4, 16  ;;  %v403_v15 = vor.u32 %v401_v53, %v400_v5  ;;  %704 = vst [vmem:[#allocation2 + $0x18] sm:$0xf] %v703_v12  ;;  %s4532_s20 = smov 8  }
  0x20   : > { %v405_v16 = vrot.slane %v400_v5, 4  ;;  %v706_v17 = vld [vmem:[#allocation2 + $0x20] sm:$0x1]  ;;  %v375_v18 = vrot.slane %v373_v7, 7  ;;  %v376_v22 = vshll.u32 %v338_v60, 16  ;;  %v381_v23 = vshrl.u32 %v339_v6, 16 }
  0x21   : > { %v865_v20 = vor.u32 %v864_v10, %v861_v9  ;;  %v880_v21 = vrot.slane %v878_v11, 5  ;;  %v211_v24 = vld [vmem:[#allocation2 + $0x3c] sm:$0x1]  ;;  %v404_v26 = vsel %vm4624_vm10, %v396_v0, %v403_v15  ;;  %v384_v30 = vshll.u32 %v339_v6, 16  ;;  %v267_v31 = vld [vmem:[#allocation2 + $0x44] sm:$0x1] }
  0x22   : > { %v707_v27 = vsel %vm4572_vm3, %v405_v16, %v706_v17  ;;  %v379_v29 = vrot.slane %v375_v18, 4  ;;  %705 = vst.msk [vmem:[#allocation2 + $0x1c] sm:$0xf] %vm184_vm0, %v404_v26  ;;  %v378_v35 = vor.u32 %v376_v22, %v375_v18  ;;  %v383_v36 = vrot.slane %v381_v23, 7  ;;  %v695_v40 = vld [vmem:[#allocation2 + $0xc] sm:$0xf] }
  0x23   : > { %v866_v33 = vrot.slane %v865_v20, 4  ;;  %v881_v34 = vsel %vm4649_vm11, %v876_v50, %v880_v21  ;;  %v815_v38 = vld [vmem:[#allocation2 + $0x30] sm:$0xf]  ;;  %708 = vst [vmem:[#allocation2 + $0x20] sm:$0x1] %v707_v27  ;;  %v212_v41 = vsel %vm4572_vm3, 0, %v211_v24  ;;  %v4667_v43 = vpack.c.bf16 %v310_v25, %v310_v25 }
  0x24   : > { %v2703_v37 = vunpack.c.l.b16 %v881_v34  ;;  %v268_v42 = vsel %vm4579_vm5, 0, %v267_v31  ;;  %v816_v45 = vld [vmem:[#allocation2 + $0x34] sm:$0xf]  ;;  %v955_v46 = vshrl.u32 %v815_v38, 16  ;;  %v958_v47 = vshll.u32 %v815_v38, 16  ;;  %s4533_s21 = smov 16  }
  0x25   : > { %v871_v44 = vsel %vm4649_vm11, %v866_v33, %v4612_v28  ;;  %v386_v48 = vor.u32 %v384_v30, %v383_v36  ;;  %v699_v49 = vld [vmem:[#allocation2 + $0x14] sm:$0x1]  ;;  %213 = vst [vmem:[#allocation2 + $0x3c] sm:$0x1] %v212_v41  ;;  %v843_v51 = vld [vmem:[#allocation2 + $0x38] sm:$0x1]  ;;  %v696_v4 = vsel %vm4617_vm9, %v378_v35, %v695_v40 }
  0x26   : > { %v2702_v50 = vunpack.c.l.b16 %v871_v44  ;;  %v964_v52 = vshll.u32 %v816_v45, 16  ;;  %v968_v53 = vshrl.u32 %v816_v45, 16  ;;  %v388_v54 = vrot.slane %v383_v36, 4  ;;  %v811_v58 = vld [vmem:[#allocation2 + $0x18] sm:$0xf]  ;;  %s4534_s22 = smov 12  }
  0x27   : > { %v957_v55 = vrot.slane %v955_v46, 4  ;;  %v960_v56 = vrot.slane %v958_v47, 5  ;;  %v974_v57 = vshll.u32 %v843_v51, 16  ;;  %v387_v59 = vsel %vm4624_vm10, %v379_v29, %v386_v48  ;;  %269 = vst [vmem:[#allocation2 + $0x44] sm:$0x1] %v268_v42  ;;  %s4535_s23 = smov 28  }
  0x28   : > { %v2734_v60 = vpack.c.b16 %v2703_v37, %v2702_v50  ;;  %v966_v28 = vrot.slane %v964_v52, 5  ;;  %v970_v61 = vrot.slane %v968_v53, 4  ;;  %v907_v62 = vshrl.u32 %v811_v58, 16  ;;  %698 = vst.msk [vmem:[#allocation2 + $0x10] sm:$0xf] %vm184_vm0, %v387_v59  ;;  %v311_v59 = vld [vmem:[%s4601_s18 + $0x28] sm:$0xff] }
  0x29   : > { %v961_v63 = vor.u32 %v960_v56, %v957_v55  ;;  %v976_v0 = vrot.slane %v974_v57, 5  ;;  %v910_v3 = vshll.u32 %v811_v58, 16  ;;  %v812_v6 = vld [vmem:[#allocation2 + $0x1c] sm:$0xf]  ;;  %697 = vst [vmem:[#allocation2 + $0xc] sm:$0xf] %v696_v4  ;;  %v700_v9 = vsel %vm4572_vm3, %v388_v54, %v699_v49 }
  0x2a   : > { %2750 = vrot.lane.b32.xlu0 %v2734_v60, %s4531_s19  ;;  %v971_v5 = vor.u32 %v970_v61, %v966_v28  ;;  %v909_v7 = vrot.slane %v907_v62, 4  ;;  %v441_v10 = vshrl.u32 %v4642_v8, 16  ;;  %v841_v12 = vld [vmem:[#allocation2 + $0x20] sm:$0x1]  ;;  %v916_v15 = vshll.u32 %v812_v6, 16  ;;  %s4536_s24 = smov 24  }
  0x2b   : > { %v962_v11 = vrot.slane %v961_v63, 4  ;;  %v912_v13 = vrot.slane %v910_v3, 5  ;;  %v920_v16 = vshrl.u32 %v812_v6, 16  ;;  %v926_v18 = vshll.u32 %v841_v12, 16  ;;  %701 = vst [vmem:[#allocation2 + $0x14] sm:$0x1] %v700_v9 }
  0x2c   : > { %v972_v17 = vrot.slane %v971_v5, 4  ;;  %v443_v20 = vrot.slane %v441_v10, 7  ;;  %v444_v21 = vshll.u32 %v4642_v8, 16  ;;  %v918_v24 = vrot.slane %v916_v15, 5  ;;  %v723_v31 = vld [vmem:[#allocation2 + $0x3c] sm:$0xf] }
  0x2d   : > { %v967_v22 = vsel %vm4649_vm11, %v962_v11, %v966_v28  ;;  %v913_v23 = vor.u32 %v912_v13, %v909_v7  ;;  %v922_v25 = vrot.slane %v920_v16, 4  ;;  %v928_v29 = vrot.slane %v926_v18, 5  ;;  %v205_v42 = vld [vmem:[#allocation2 + $0x24] sm:$0x1]  ;;  %v261_v49 = vld [vmem:[#allocation2 + $0x2c] sm:$0x1] }
  0x2e   : > { %v977_v26 = vsel %vm4649_vm11, %v972_v17, %v976_v0  ;;  %v2710_v27 = vunpack.c.l.b16 %v967_v22  ;;  %v446_v30 = vor.u32 %v444_v21, %v443_v20  ;;  %v447_v37 = vrot.slane %v443_v20, 4  ;;  %v727_v54 = vld [vmem:[#allocation2 + $0x44] sm:$0x1]  ;;  %v214_v10 = vld [vmem:[#allocation2 + $0x48] sm:$0x1]  ;;  %v316_v11 = vld [vmem:[%s4601_s18 + $0x50] sm:$0xff] }
  0x2f   : > { %v2711_v33 = vunpack.c.l.b16 %v977_v26  ;;  %v914_v34 = vrot.slane %v913_v23, 4  ;;  %v923_v35 = vor.u32 %v922_v25, %v918_v24  ;;  %v810_v36 = vld [vmem:[#allocation2 + $0x10] sm:$0xf]  ;;  %v449_v40 = vshrl.u32 %v4653_v19, 16  ;;  %v317_v18 = vld [vmem:[%s4601_s18 + $0x58] sm:$0xff]  ;;  %s4537_s25 = smov 20  }
  0x30   : > { %v892_v38 = vshll.u32 %v810_v36, 16  ;;  %v896_v8 = vshrl.u32 %v810_v36, 16  ;;  %v452_v41 = vshll.u32 %v4653_v19, 16  ;;  %v809_v47 = vld [vmem:[#allocation2 + $0xc] sm:$0xf]  ;;  %v724_v48 = vsel %vm4617_vm9, %v446_v30, %v723_v31  ;;  %s4538_s26 = smov 32  }
  0x31   : > { %v2738_v44 = vpack.c.b16 %v2711_v33, %v2710_v27  ;;  %v919_v45 = vsel %vm4649_vm11, %v914_v34, %v918_v24  ;;  %v924_v46 = vrot.slane %v923_v35, 4  ;;  %v883_v51 = vshrl.u32 %v809_v47, 16  ;;  %725 = vst [vmem:[#allocation2 + $0x3c] sm:$0xf] %v724_v48  ;;  %v270_v17 = vld [vmem:[#allocation2 + $0x50] sm:$0x1] }
  0x32   : > { %v2706_v50 = vunpack.c.l.b16 %v919_v45  ;;  %v886_v52 = vshll.u32 %v809_v47, 16  ;;  %v894_v53 = vrot.slane %v892_v38, 5  ;;  %v840_v55 = vld [vmem:[#allocation2 + $0x14] sm:$0x1]  ;;  %v898_v56 = vrot.slane %v896_v8, 4  ;;  %s4066_s6 = sshll.u32 %s4565_s13, 5 }
  0x33   : > { %2758 = vrot.lane.b32.xlu2 %v2738_v44, %s4531_s19  ;;  %v929_v19 = vsel %vm4649_vm11, %v924_v46, %v928_v29  ;;  %v451_v57 = vrot.slane %v449_v40, 7  ;;  %v206_v58 = vsel %vm4572_vm3, 0, %v205_v42  ;;  %v885_v28 = vrot.slane %v883_v51, 4  ;;  %v220_v44 = vld [vmem:[#allocation2 + $0x60] sm:$0x1]  ;;  %p174_p4 = scmp.lt.s32.totalorder %s4066_s6, 63 }
  0x34   : > { %v2707_v60 = vunpack.c.l.b16 %v929_v19  ;;  %v888_v61 = vrot.slane %v886_v52, 5  ;;  %v902_v62 = vshll.u32 %v840_v55, 16  ;;  %207 = vst [vmem:[#allocation2 + $0x24] sm:$0x1] %v206_v58  ;;  %v899_v63 = vor.u32 %v898_v56, %v894_v53  ;;  %v321_v19 = vld [vmem:[%s4601_s18 + $0x78] sm:$0xff]  ;;  %s4068_s11 = sshll.u32 %s4587_s14, 1 }
  0x35   : > { %v454_v0 = vor.u32 %v452_v41, %v451_v57  ;;  %v456_v3 = vrot.slane %v451_v57, 4  ;;  %v262_v4 = vsel %vm4579_vm5, 0, %v261_v49  ;;  %v343_v9 = vpack.c.bf16 %v311_v59, %v311_v59  ;;  %s6460_s6 = smov (!%p174_p4, %s4066_s6), 63  ;;  %s182_s16 = scalar_lea.vmem %s6439_s3, %s4068_s11 }
  0x36   : > { %v2736_v5 = vpack.c.b16 %v2707_v60, %v2706_v50  ;;  %v889_v6 = vor.u32 %v888_v61, %v885_v28  ;;  %v904_v7 = vrot.slane %v902_v62, 5  ;;  %263 = vst [vmem:[#allocation2 + $0x2c] sm:$0x1] %v262_v4  ;;  %v900_v12 = vrot.slane %v899_v63, 4  ;;  %v320_v50 = vld [vmem:[%s4601_s18 + $0x70] sm:$0xff]  ;;  %s4067_s7 = sshll.u32 %s6460_s6, 2 }
  0x37   : > { %v455_v13 = vsel %vm4624_vm10, %v447_v37, %v454_v0  ;;  %v728_v15 = vsel %vm4572_vm3, %v456_v3, %v727_v54  ;;  %v407_v16 = vshrl.u32 %v4667_v43, 16  ;;  %v410_v21 = vshll.u32 %v4667_v43, 16  ;;  %v276_v60 = vld [vmem:[#allocation2 + $0x68] sm:$0x1]  ;;  %s6298_s10 = scalar_lea.vmem %s6438_s2, %s4067_s7 }
  0x38   : > { %2754 = vrot.lane.b32.xlu1 %v2736_v5, %s4531_s19  ;;  %v890_v20 = vrot.slane %v889_v6, 4  ;;  %726 = vst.msk [vmem:[#allocation2 + $0x40] sm:$0xf] %vm184_vm0, %v455_v13  ;;  %v415_v22 = vshrl.u32 %v343_v9, 16  ;;  %v418_v23 = vshll.u32 %v343_v9, 16  ;;  %v905_v24 = vsel %vm4649_vm11, %v900_v12, %v904_v7 }
  0x39   : > { %729 = vst [vmem:[#allocation2 + $0x44] sm:$0x1] %v728_v15  ;;  %v817_v25 = vld [vmem:[#allocation2 + $0x3c] sm:$0xf]  ;;  %v409_v26 = vrot.slane %v407_v16, 7  ;;  %v215_v27 = vsel %vm4572_vm3, 0, %v214_v10  ;;  %v348_v29 = vpack.c.bf16 %v316_v11, %v316_v11  ;;  %v2705_v31 = vunpack.c.l.b16 %v905_v24 }
  0x3a   : > { %v895_v30 = vsel %vm4649_vm11, %v890_v20, %v894_v53  ;;  %v979_v33 = vshrl.u32 %v817_v25, 16  ;;  %v982_v34 = vshll.u32 %v817_v25, 16  ;;  %216 = vst [vmem:[#allocation2 + $0x48] sm:$0x1] %v215_v27  ;;  %v417_v37 = vrot.slane %v415_v22, 7 }
  0x3b   : > { %v2704_v43 = vunpack.c.l.b16 %v895_v30  ;;  %v412_v35 = vor.u32 %v410_v21, %v409_v26  ;;  %v413_v36 = vrot.slane %v409_v26, 4  ;;  %v709_v38 = vld [vmem:[#allocation2 + $0x24] sm:$0xf]  ;;  %v271_v41 = vsel %vm4579_vm5, 0, %v270_v17  ;;  %v217_v13 = vld [vmem:[#allocation2 + $0x54] sm:$0x1] }
  0x3c   : > { %v981_v8 = vrot.slane %v979_v33, 4  ;;  %v984_v40 = vrot.slane %v982_v34, 5  ;;  %v349_v42 = vpack.c.bf16 %v317_v18, %v317_v18  ;;  %v420_v46 = vor.u32 %v418_v23, %v417_v37  ;;  %272 = vst [vmem:[#allocation2 + $0x50] sm:$0x1] %v271_v41  ;;  %v273_v15 = vld [vmem:[#allocation2 + $0x5c] sm:$0x1] }
  0x3d   : > { %v2735_v45 = vpack.c.b16 %v2705_v31, %v2704_v43  ;;  %v422_v47 = vrot.slane %v417_v37, 4  ;;  %v710_v48 = vsel %vm4617_vm9, %v412_v35, %v709_v38  ;;  %v713_v49 = vld [vmem:[#allocation2 + $0x2c] sm:$0x1]  ;;  %v458_v52 = vshrl.u32 %v348_v29, 16  ;;  %v318_v33 = vld [vmem:[%s4601_s18 + $0x60] sm:$0xff] }
  0x3e   : > { %v985_v51 = vor.u32 %v984_v40, %v981_v8  ;;  %711 = vst [vmem:[#allocation2 + $0x24] sm:$0xf] %v710_v48  ;;  %v461_v53 = vshll.u32 %v348_v29, 16  ;;  %v466_v54 = vshrl.u32 %v349_v42, 16  ;;  %v421_v56 = vsel %vm4624_vm10, %v413_v36, %v420_v46 }
  0x3f   : > { %2752 = vrot.lane.b32.xlu0 %v2735_v45, %s4531_s19  ;;  %v818_v55 = vld [vmem:[#allocation2 + $0x40] sm:$0xf]  ;;  %v714_v57 = vsel %vm4572_vm3, %v422_v47, %v713_v49  ;;  %v469_v58 = vshll.u32 %v349_v42, 16  ;;  %v221_v59 = vsel %vm4572_vm3, 0, %v220_v44  ;;  %v460_v0 = vrot.slane %v458_v52, 7  ;;  %v319_v52 = vld [vmem:[%s4601_s18 + $0x68] sm:$0xff] }
  0x40   : > { %v844_v28 = vld [vmem:[#allocation2 + $0x44] sm:$0x1]  ;;  %v986_v61 = vrot.slane %v985_v51, 4  ;;  %v988_v62 = vshll.u32 %v818_v55, 16  ;;  %v992_v63 = vshrl.u32 %v818_v55, 16  ;;  %v468_v4 = vrot.slane %v466_v54, 7 }
  0x41   : > { %v998_v3 = vshll.u32 %v844_v28, 16  ;;  %712 = vst.msk [vmem:[#allocation2 + $0x28] sm:$0xf] %vm184_vm0, %v421_v56  ;;  %v730_v5 = vld [vmem:[#allocation2 + $0x48] sm:$0xf]  ;;  %v352_v6 = vpack.c.bf16 %v320_v50, %v320_v50  ;;  %v4730_v7 = vpack.c.bf16 %v321_v19, %v321_v19  ;;  %v463_v11 = vor.u32 %v461_v53, %v460_v0 }
  0x42   : > { %v990_v9 = vrot.slane %v988_v62, 5  ;;  %v994_v10 = vrot.slane %v992_v63, 4  ;;  %715 = vst [vmem:[#allocation2 + $0x2c] sm:$0x1] %v714_v57  ;;  %v464_v12 = vrot.slane %v460_v0, 4  ;;  %v471_v17 = vor.u32 %v469_v58, %v468_v4 }
  0x43   : > { %v1000_v16 = vrot.slane %v998_v3, 5  ;;  %v473_v18 = vrot.slane %v468_v4, 4  ;;  %222 = vst [vmem:[#allocation2 + $0x60] sm:$0x1] %v221_v59  ;;  %v277_v20 = vsel %vm4579_vm5, 0, %v276_v60  ;;  %v731_v23 = vsel %vm4617_vm9, %v463_v11, %v730_v5 }
  0x44   : > { %v991_v21 = vsel %vm4649_vm11, %v986_v61, %v990_v9  ;;  %v995_v22 = vor.u32 %v994_v10, %v990_v9  ;;  %v734_v24 = vld [vmem:[#allocation2 + $0x50] sm:$0x1]  ;;  %278 = vst [vmem:[#allocation2 + $0x68] sm:$0x1] %v277_v20  ;;  %v492_v25 = vshrl.u32 %v352_v6, 16  ;;  %v472_v29 = vsel %vm4624_vm10, %v464_v12, %v471_v17 }
  0x45   : > { %v2712_v26 = vunpack.c.l.b16 %v991_v21  ;;  %v813_v27 = vld [vmem:[#allocation2 + $0x24] sm:$0xf]  ;;  %732 = vst [vmem:[#allocation2 + $0x48] sm:$0xf] %v731_v23  ;;  %v735_v30 = vsel %vm4572_vm3, %v473_v18, %v734_v24  ;;  %v495_v31 = vshll.u32 %v352_v6, 16  ;;  %v500_v37 = vshrl.u32 %v4730_v7, 16 }
  0x46   : > { %v996_v34 = vrot.slane %v995_v22, 4  ;;  %v931_v43 = vshrl.u32 %v813_v27, 16  ;;  %v934_v35 = vshll.u32 %v813_v27, 16  ;;  %733 = vst.msk [vmem:[#allocation2 + $0x4c] sm:$0xf] %vm184_vm0, %v472_v29  ;;  %v494_v36 = vrot.slane %v492_v25, 7 }
  0x47   : > { %736 = vst [vmem:[#allocation2 + $0x50] sm:$0x1] %v735_v30  ;;  %v503_v38 = vshll.u32 %v4730_v7, 16  ;;  %v218_v8 = vsel %vm4572_vm3, 0, %v217_v13  ;;  %v274_v40 = vsel %vm4579_vm5, 0, %v273_v15  ;;  %v502_v19 = vrot.slane %v500_v37, 7 }
  0x48   : > { %v1001_v41 = vsel %vm4649_vm11, %v996_v34, %v1000_v16  ;;  %v814_v42 = vld [vmem:[#allocation2 + $0x28] sm:$0xf]  ;;  %v933_v44 = vrot.slane %v931_v43, 4  ;;  %v936_v45 = vrot.slane %v934_v35, 5  ;;  %v497_v46 = vor.u32 %v495_v31, %v494_v36  ;;  %219 = vst [vmem:[#allocation2 + $0x54] sm:$0x1] %v218_v8 }
  0x49   : > { %v2713_v47 = vunpack.c.l.b16 %v1001_v41  ;;  %v4752_v48 = vld [vmem:[#allocation2 + $0x2c] sm:$0x1]  ;;  %v940_v49 = vshll.u32 %v814_v42, 16  ;;  %v944_v50 = vshrl.u32 %v814_v42, 16  ;;  %v498_v51 = vrot.slane %v494_v36, 4  ;;  %v322_v31 = vld [vmem:[%s4601_s18 + $0x80] sm:$0xff] }
  0x4a   : > { %v937_v53 = vor.u32 %v936_v45, %v933_v44  ;;  %v950_v54 = vshll.u32 %v4752_v48, 16  ;;  %v744_v55 = vld [vmem:[#allocation2 + $0x60] sm:$0xf]  ;;  %275 = vst [vmem:[#allocation2 + $0x5c] sm:$0x1] %v274_v40  ;;  %v350_v56 = vpack.c.bf16 %v318_v33, %v318_v33  ;;  %v505_v0 = vor.u32 %v503_v38, %v502_v19 }
  0x4b   : > { %v2739_v57 = vpack.c.b16 %v2713_v47, %v2712_v26  ;;  %v942_v58 = vrot.slane %v940_v49, 5  ;;  %v946_v59 = vrot.slane %v944_v50, 4  ;;  %v745_v60 = vsel %vm4617_vm9, %v497_v46, %v744_v55  ;;  %v748_v28 = vld [vmem:[#allocation2 + $0x68] sm:$0x1]  ;;  %v223_v25 = vld [vmem:[#allocation2 + $0x6c] sm:$0x1] }
  0x4c   : > { %v938_v61 = vrot.slane %v937_v53, 4  ;;  %v952_v62 = vrot.slane %v950_v54, 5  ;;  %v819_v63 = vld [vmem:[#allocation2 + $0x48] sm:$0xf]  ;;  %v507_v3 = vrot.slane %v502_v19, 4  ;;  %v351_v9 = vpack.c.bf16 %v319_v52, %v319_v52 }
  0x4d   : > { %2760 = vrot.lane.b32.xlu2 %v2739_v57, %s4531_s19  ;;  %v947_v4 = vor.u32 %v946_v59, %v942_v58  ;;  %v820_v5 = vld [vmem:[#allocation2 + $0x4c] sm:$0xf]  ;;  %v1003_v6 = vshrl.u32 %v819_v63, 16  ;;  %v1006_v7 = vshll.u32 %v819_v63, 16  ;;  %746 = vst [vmem:[#allocation2 + $0x60] sm:$0xf] %v745_v60  ;;  %v506_v15 = vsel %vm4624_vm10, %v498_v51, %v505_v0 }
  0x4e   : > { %v943_v10 = vsel %vm4649_vm11, %v938_v61, %v942_v58  ;;  %v845_v11 = vld [vmem:[#allocation2 + $0x50] sm:$0x1]  ;;  %v1012_v12 = vshll.u32 %v820_v5, 16  ;;  %v1016_v13 = vshrl.u32 %v820_v5, 16  ;;  %747 = vst.msk [vmem:[#allocation2 + $0x64] sm:$0xf] %vm184_vm0, %v506_v15  ;;  %v749_v24 = vsel %vm4572_vm3, %v507_v3, %v748_v28 }
  0x4f   : > { %v948_v16 = vrot.slane %v947_v4, 4  ;;  %v2708_v17 = vunpack.c.l.b16 %v943_v10  ;;  %v1005_v18 = vrot.slane %v1003_v6, 4  ;;  %v1008_v20 = vrot.slane %v1006_v7, 5  ;;  %750 = vst [vmem:[#allocation2 + $0x68] sm:$0x1] %v749_v24  ;;  %v323_v61 = vld [vmem:[%s4601_s18 + $0x88] sm:$0xff] }
  0x50   : > { %v1014_v21 = vrot.slane %v1012_v12, 5  ;;  %v1018_v22 = vrot.slane %v1016_v13, 4  ;;  %v1022_v23 = vshll.u32 %v845_v11, 16  ;;  %v475_v29 = vshrl.u32 %v350_v56, 16  ;;  %v737_v51 = vld [vmem:[#allocation2 + $0x54] sm:$0xf] }
  0x51   : > { %v953_v26 = vsel %vm4649_vm11, %v948_v16, %v952_v62  ;;  %v1009_v27 = vor.u32 %v1008_v20, %v1005_v18  ;;  %v478_v30 = vshll.u32 %v350_v56, 16  ;;  %v483_v35 = vshrl.u32 %v351_v9, 16  ;;  %v279_v56 = vld [vmem:[#allocation2 + $0x74] sm:$0x1]  ;;  %v741_v28 = vld [vmem:[#allocation2 + $0x5c] sm:$0x1] }
  0x52   : > { %v2709_v33 = vunpack.c.l.b16 %v953_v26  ;;  %v1019_v34 = vor.u32 %v1018_v22, %v1014_v21  ;;  %v1024_v43 = vrot.slane %v1022_v23, 5  ;;  %v477_v37 = vrot.slane %v475_v29, 7  ;;  %v229_v5 = vld [vmem:[#allocation2 + $0x84] sm:$0x1]  ;;  %v327_v12 = vld [vmem:[%s4601_s18 + $0xa8] sm:$0xff] }
  0x53   : > { %v1010_v36 = vrot.slane %v1009_v27, 4  ;;  %v486_v38 = vshll.u32 %v351_v9, 16  ;;  %v224_v8 = vsel %vm4572_vm3, 0, %v223_v25  ;;  %v485_v44 = vrot.slane %v483_v35, 7  ;;  %v326_v11 = vld [vmem:[%s4601_s18 + $0xa0] sm:$0xff] }
  0x54   : > { %v2737_v40 = vpack.c.b16 %v2709_v33, %v2708_v17  ;;  %v1020_v41 = vrot.slane %v1019_v34, 4  ;;  %v823_v42 = vld [vmem:[#allocation2 + $0x60] sm:$0xf]  ;;  %225 = vst [vmem:[#allocation2 + $0x6c] sm:$0x1] %v224_v8  ;;  %v354_v45 = vpack.c.bf16 %v322_v31, %v322_v31  ;;  %v480_v50 = vor.u32 %v478_v30, %v477_v37 }
  0x55   : > { %v1015_v46 = vsel %vm4649_vm11, %v1010_v36, %v1014_v21  ;;  %v1051_v47 = vshrl.u32 %v823_v42, 16  ;;  %v1054_v49 = vshll.u32 %v823_v42, 16  ;;  %v4776_v54 = vld [vmem:[#allocation2 + $0x64] sm:$0xf]  ;;  %v481_v19 = vrot.slane %v477_v37, 4  ;;  %v324_v42 = vld [vmem:[%s4601_s18 + $0x90] sm:$0xff] }
  0x56   : > { %2756 = vrot.lane.b32.xlu1 %v2737_v40, %s4531_s19  ;;  %v1025_v52 = vsel %vm4649_vm11, %v1020_v41, %v1024_v43  ;;  %v2714_v53 = vunpack.c.l.b16 %v1015_v46  ;;  %v488_v55 = vor.u32 %v486_v38, %v485_v44  ;;  %v1060_v60 = vshll.u32 %v4776_v54, 16  ;;  %v4780_v62 = vld [vmem:[#allocation2 + $0x68] sm:$0x1]  ;;  %v285_v18 = vld [vmem:[#allocation2 + $0x8c] sm:$0x1] }
  0x57   : > { %v2715_v57 = vunpack.c.l.b16 %v1025_v52  ;;  %v1053_v58 = vrot.slane %v1051_v47, 4  ;;  %v1056_v59 = vrot.slane %v1054_v49, 5  ;;  %v1064_v63 = vshrl.u32 %v4776_v54, 16 }
  0x58   : > { %v489_v0 = vsel %vm4624_vm10, %v481_v19, %v488_v55  ;;  %v490_v3 = vrot.slane %v485_v44, 4  ;;  %v738_v4 = vsel %vm4617_vm9, %v480_v50, %v737_v51  ;;  %v1062_v9 = vrot.slane %v1060_v60, 5  ;;  %v282_v60 = vld [vmem:[#allocation2 + $0x80] sm:$0x1] }
  0x59   : > { %v2740_v6 = vpack.c.b16 %v2715_v57, %v2714_v53  ;;  %v1057_v7 = vor.u32 %v1056_v59, %v1053_v58  ;;  %v1070_v10 = vshll.u32 %v4780_v62, 16  ;;  %739 = vst [vmem:[#allocation2 + $0x54] sm:$0xf] %v738_v4  ;;  %v1066_v13 = vrot.slane %v1064_v63, 4  ;;  %v226_v59 = vld [vmem:[#allocation2 + $0x78] sm:$0x1] }
  0x5a   : > { %740 = vst.msk [vmem:[#allocation2 + $0x58] sm:$0xf] %vm184_vm0, %v489_v0  ;;  %v742_v15 = vsel %vm4572_vm3, %v490_v3, %v741_v28  ;;  %v280_v16 = vsel %vm4579_vm5, 0, %v279_v56  ;;  %v355_v17 = vpack.c.bf16 %v323_v61, %v323_v61  ;;  %v509_v22 = vshrl.u32 %v354_v45, 16 }
  0x5b   : > { %2762 = vrot.lane.b32.xlu0 %v2740_v6, %s4531_s19  ;;  %v1058_v20 = vrot.slane %v1057_v7, 4  ;;  %v1072_v21 = vrot.slane %v1070_v10, 5  ;;  %743 = vst [vmem:[#allocation2 + $0x5c] sm:$0x1] %v742_v15  ;;  %v512_v23 = vshll.u32 %v354_v45, 16  ;;  %v1067_v24 = vor.u32 %v1066_v13, %v1062_v9 }
  0x5c   : > { %281 = vst [vmem:[#allocation2 + $0x74] sm:$0x1] %v280_v16  ;;  %v517_v25 = vshrl.u32 %v355_v17, 16  ;;  %v520_v26 = vshll.u32 %v355_v17, 16  ;;  %v358_v27 = vpack.c.bf16 %v326_v11, %v326_v11  ;;  %v511_v30 = vrot.slane %v509_v22, 7  ;;  %v325_v16 = vld [vmem:[%s4601_s18 + $0x98] sm:$0xff] }
  0x5d   : > { %v1063_v29 = vsel %vm4649_vm11, %v1058_v20, %v1062_v9  ;;  %v230_v31 = vsel %vm4572_vm3, 0, %v229_v5  ;;  %v286_v33 = vsel %vm4579_vm5, 0, %v285_v18  ;;  %v1068_v34 = vrot.slane %v1067_v24, 4  ;;  %v751_v36 = vld [vmem:[#allocation2 + $0x6c] sm:$0xf] }
  0x5e   : > { %v2718_v43 = vunpack.c.l.b16 %v1063_v29  ;;  %v519_v35 = vrot.slane %v517_v25, 7  ;;  %231 = vst [vmem:[#allocation2 + $0x84] sm:$0x1] %v230_v31  ;;  %v359_v37 = vpack.c.bf16 %v327_v12, %v327_v12  ;;  %v514_v38 = vor.u32 %v512_v23, %v511_v30 }
  0x5f   : > { %v515_v8 = vrot.slane %v511_v30, 4  ;;  %287 = vst [vmem:[#allocation2 + $0x8c] sm:$0x1] %v286_v33  ;;  %v543_v40 = vshrl.u32 %v358_v27, 16  ;;  %v546_v41 = vshll.u32 %v358_v27, 16  ;;  %v1073_v44 = vsel %vm4649_vm11, %v1068_v34, %v1072_v21 }
  0x60   : > { %v821_v45 = vld [vmem:[#allocation2 + $0x54] sm:$0xf]  ;;  %v522_v46 = vor.u32 %v520_v26, %v519_v35  ;;  %v524_v47 = vrot.slane %v519_v35, 4  ;;  %v551_v49 = vshrl.u32 %v359_v37, 16  ;;  %v2719_v50 = vunpack.c.l.b16 %v1073_v44  ;;  %v288_v44 = vld [vmem:[#allocation2 + $0x98] sm:$0x1] }
  0x61   : > { %v4805_v51 = vld [vmem:[#allocation2 + $0x58] sm:$0xf]  ;;  %v1027_v52 = vshrl.u32 %v821_v45, 16  ;;  %v1030_v53 = vshll.u32 %v821_v45, 16  ;;  %v752_v19 = vsel %vm4617_vm9, %v514_v38, %v751_v36  ;;  %v4815_v28 = vpack.c.bf16 %v324_v42, %v324_v42  ;;  %v232_v42 = vld [vmem:[#allocation2 + $0x90] sm:$0x1] }
  0x62   : > { %v4809_v55 = vld [vmem:[#allocation2 + $0x5c] sm:$0x1]  ;;  %v1036_v56 = vshll.u32 %v4805_v51, 16  ;;  %v1040_v57 = vshrl.u32 %v4805_v51, 16  ;;  %v523_v58 = vsel %vm4624_vm10, %v515_v8, %v522_v46  ;;  %753 = vst [vmem:[#allocation2 + $0x6c] sm:$0xf] %v752_v19  ;;  %v2742_v61 = vpack.c.b16 %v2719_v50, %v2718_v43 }
  0x63   : > { %v1029_v63 = vrot.slane %v1027_v52, 4  ;;  %v1032_v0 = vrot.slane %v1030_v53, 5  ;;  %v1046_v3 = vshll.u32 %v4809_v55, 16  ;;  %754 = vst.msk [vmem:[#allocation2 + $0x70] sm:$0xf] %vm184_vm0, %v523_v58  ;;  %v545_v7 = vrot.slane %v543_v40, 7 }
  0x64   : > { %v1038_v4 = vrot.slane %v1036_v56, 5  ;;  %v1042_v5 = vrot.slane %v1040_v57, 4  ;;  %v755_v6 = vld [vmem:[#allocation2 + $0x74] sm:$0x1]  ;;  %v553_v9 = vrot.slane %v551_v49, 7  ;;  %2766 = vrot.lane.b32.xlu2 %v2742_v61, %s4531_s19  ;;  %v554_v13 = vshll.u32 %v359_v37, 16 }
  0x65   : > { %v1033_v10 = vor.u32 %v1032_v0, %v1029_v63  ;;  %v1048_v11 = vrot.slane %v1046_v3, 5  ;;  %v756_v12 = vsel %vm4572_vm3, %v524_v47, %v755_v6  ;;  %v765_v15 = vld [vmem:[#allocation2 + $0x84] sm:$0xf]  ;;  %v548_v18 = vor.u32 %v546_v41, %v545_v7  ;;  %v328_v50 = vld [vmem:[%s4601_s18 + $0xb0] sm:$0xff] }
  0x66   : > { %v1043_v17 = vor.u32 %v1042_v5, %v1038_v4  ;;  %757 = vst [vmem:[#allocation2 + $0x74] sm:$0x1] %v756_v12  ;;  %v549_v20 = vrot.slane %v545_v7, 4  ;;  %v558_v21 = vrot.slane %v553_v9, 4  ;;  %v769_v22 = vld [vmem:[#allocation2 + $0x8c] sm:$0x1]  ;;  %v556_v24 = vor.u32 %v554_v13, %v553_v9 }
  0x67   : > { %v1034_v23 = vrot.slane %v1033_v10, 4  ;;  %v227_v25 = vsel %vm4572_vm3, 0, %v226_v59  ;;  %v283_v26 = vsel %vm4579_vm5, 0, %v282_v60  ;;  %v766_v29 = vsel %vm4617_vm9, %v548_v18, %v765_v15 }
  0x68   : > { %v1044_v27 = vrot.slane %v1043_v17, 4  ;;  %v770_v30 = vsel %vm4572_vm3, %v558_v21, %v769_v22  ;;  %228 = vst [vmem:[#allocation2 + $0x78] sm:$0x1] %v227_v25  ;;  %v357_v31 = vpack.c.bf16 %v325_v16, %v325_v16  ;;  %v557_v43 = vsel %vm4624_vm10, %v549_v20, %v556_v24  ;;  %v329_v22 = vld [vmem:[%s4601_s18 + $0xb8] sm:$0xff] }
  0x69   : > { %v1039_v33 = vsel %vm4649_vm11, %v1034_v23, %v1038_v4  ;;  %v825_v34 = vld [vmem:[#allocation2 + $0x6c] sm:$0xf]  ;;  %767 = vst [vmem:[#allocation2 + $0x84] sm:$0xf] %v766_v29  ;;  %v526_v35 = vshrl.u32 %v4815_v28, 16  ;;  %v529_v36 = vshll.u32 %v4815_v28, 16  ;;  %v360_v9 = vpack.c.bf16 %v328_v50, %v328_v50 }
  0x6a   : > { %v1049_v37 = vsel %vm4649_vm11, %v1044_v27, %v1048_v11  ;;  %v2716_v38 = vunpack.c.l.b16 %v1039_v33  ;;  %v4839_v8 = vld [vmem:[#allocation2 + $0x70] sm:$0xf]  ;;  %v1075_v40 = vshrl.u32 %v825_v34, 16  ;;  %v1078_v41 = vshll.u32 %v825_v34, 16  ;;  %768 = vst.msk [vmem:[#allocation2 + $0x88] sm:$0xf] %vm184_vm0, %v557_v43 }
  0x6b   : > { %v2717_v45 = vunpack.c.l.b16 %v1049_v37  ;;  %v1084_v46 = vshll.u32 %v4839_v8, 16  ;;  %v1088_v47 = vshrl.u32 %v4839_v8, 16  ;;  %771 = vst [vmem:[#allocation2 + $0x8c] sm:$0x1] %v770_v30  ;;  %v528_v49 = vrot.slane %v526_v35, 7 }
  0x6c   : > { %v1077_v52 = vrot.slane %v1075_v40, 4  ;;  %v1080_v53 = vrot.slane %v1078_v41, 5  ;;  %284 = vst [vmem:[#allocation2 + $0x80] sm:$0x1] %v283_v26  ;;  %v534_v19 = vshrl.u32 %v357_v31, 16  ;;  %v537_v56 = vshll.u32 %v357_v31, 16 }
  0x6d   : > { %v2741_v57 = vpack.c.b16 %v2717_v45, %v2716_v38  ;;  %v4845_v58 = vld [vmem:[#allocation2 + $0x74] sm:$0x1]  ;;  %v1086_v59 = vrot.slane %v1084_v46, 5  ;;  %v1090_v60 = vrot.slane %v1088_v47, 4  ;;  %v531_v28 = vor.u32 %v529_v36, %v528_v49  ;;  %v238_v43 = vld [vmem:[#allocation2 + $0xa8] sm:$0x1] }
  0x6e   : > { %v1081_v61 = vor.u32 %v1080_v53, %v1077_v52  ;;  %v1094_v63 = vshll.u32 %v4845_v58, 16  ;;  %v532_v0 = vrot.slane %v528_v49, 4  ;;  %v536_v3 = vrot.slane %v534_v19, 7  ;;  %v294_v45 = vld [vmem:[#allocation2 + $0xb0] sm:$0x1] }
  0x6f   : > { %2764 = vrot.lane.b32.xlu1 %v2741_v57, %s4531_s19  ;;  %v1091_v4 = vor.u32 %v1090_v60, %v1086_v59  ;;  %v758_v5 = vld [vmem:[#allocation2 + $0x78] sm:$0xf]  ;;  %v233_v6 = vsel %vm4572_vm3, 0, %v232_v42  ;;  %v289_v7 = vsel %vm4579_vm5, 0, %v288_v44  ;;  %v361_v42 = vpack.c.bf16 %v329_v22, %v329_v22  ;;  %v332_v46 = vld [vmem:[%s4601_s18 + $0xd0] sm:$0xff] }
  0x70   : > { %v1082_v10 = vrot.slane %v1081_v61, 4  ;;  %v1096_v11 = vrot.slane %v1094_v63, 5  ;;  %v829_v12 = vld [vmem:[#allocation2 + $0x84] sm:$0xf]  ;;  %v539_v13 = vor.u32 %v537_v56, %v536_v3  ;;  %v541_v15 = vrot.slane %v536_v3, 4 }
  0x71   : > { %v1092_v16 = vrot.slane %v1091_v4, 4  ;;  %v4853_v17 = vld [vmem:[#allocation2 + $0x88] sm:$0xf]  ;;  %v1123_v18 = vshrl.u32 %v829_v12, 16  ;;  %v1126_v20 = vshll.u32 %v829_v12, 16  ;;  %v759_v21 = vsel %vm4617_vm9, %v531_v28, %v758_v5 }
  0x72   : > { %v1087_v23 = vsel %vm4649_vm11, %v1082_v10, %v1086_v59  ;;  %v4860_v24 = vld [vmem:[#allocation2 + $0x8c] sm:$0x1]  ;;  %v1132_v25 = vshll.u32 %v4853_v17, 16  ;;  %v1136_v26 = vshrl.u32 %v4853_v17, 16  ;;  %v540_v27 = vsel %vm4624_vm10, %v532_v0, %v539_v13  ;;  %760 = vst [vmem:[#allocation2 + $0x78] sm:$0xf] %v759_v21 }
  0x73   : > { %v1097_v29 = vsel %vm4649_vm11, %v1092_v16, %v1096_v11  ;;  %v2720_v30 = vunpack.c.l.b16 %v1087_v23  ;;  %v1125_v31 = vrot.slane %v1123_v18, 4  ;;  %v1128_v33 = vrot.slane %v1126_v20, 5  ;;  %761 = vst.msk [vmem:[#allocation2 + $0x7c] sm:$0xf] %vm184_vm0, %v540_v27  ;;  %v762_v34 = vld [vmem:[#allocation2 + $0x80] sm:$0x1] }
  0x74   : > { %v2721_v35 = vunpack.c.l.b16 %v1097_v29  ;;  %v1134_v36 = vrot.slane %v1132_v25, 5  ;;  %v1138_v37 = vrot.slane %v1136_v26, 4  ;;  %v1142_v38 = vshll.u32 %v4860_v24, 16  ;;  %234 = vst [vmem:[#allocation2 + $0x90] sm:$0x1] %v233_v6  ;;  %v333_v6 = vld [vmem:[%s4601_s18 + $0xd8] sm:$0xff] }
  0x75   : > { %v1129_v40 = vor.u32 %v1128_v33, %v1125_v31  ;;  %v763_v41 = vsel %vm4572_vm3, %v541_v15, %v762_v34  ;;  %290 = vst [vmem:[#allocation2 + $0x98] sm:$0x1] %v289_v7  ;;  %v560_v44 = vshrl.u32 %v360_v9, 16  ;;  %v563_v52 = vshll.u32 %v360_v9, 16  ;;  %v235_v21 = vld [vmem:[#allocation2 + $0x9c] sm:$0x1] }
  0x76   : > { %v2743_v47 = vpack.c.b16 %v2721_v35, %v2720_v30  ;;  %v1139_v49 = vor.u32 %v1138_v37, %v1134_v36  ;;  %v1144_v50 = vrot.slane %v1142_v38, 5  ;;  %764 = vst [vmem:[#allocation2 + $0x80] sm:$0x1] %v763_v41  ;;  %v568_v56 = vshrl.u32 %v361_v42, 16  ;;  %v330_v29 = vld [vmem:[%s4601_s18 + $0xc0] sm:$0xff]  ;;  %v331_v41 = vld [vmem:[%s4601_s18 + $0xc8] sm:$0xff] }
  0x77   : > { %v1130_v53 = vrot.slane %v1129_v40, 4  ;;  %v562_v19 = vrot.slane %v560_v44, 7  ;;  %v571_v57 = vshll.u32 %v361_v42, 16  ;;  %v239_v60 = vsel %vm4572_vm3, 0, %v238_v43  ;;  %v291_v35 = vld [vmem:[#allocation2 + $0xa4] sm:$0x1] }
  0x78   : > { %2768 = vrot.lane.b32.xlu0 %v2743_v47, %s4531_s19  ;;  %v1140_v59 = vrot.slane %v1139_v49, 4  ;;  %v295_v28 = vsel %vm4579_vm5, 0, %v294_v45  ;;  %v4878_v61 = vpack.c.bf16 %v332_v46, %v332_v46  ;;  %v570_v5 = vrot.slane %v568_v56, 7  ;;  %240 = vst [vmem:[#allocation2 + $0xa8] sm:$0x1] %v239_v60 }
  0x79   : > { %v1135_v63 = vsel %vm4649_vm11, %v1130_v53, %v1134_v36  ;;  %v827_v0 = vld [vmem:[#allocation2 + $0x78] sm:$0xf]  ;;  %v565_v3 = vor.u32 %v563_v52, %v562_v19  ;;  %v566_v4 = vrot.slane %v562_v19, 4  ;;  %296 = vst [vmem:[#allocation2 + $0xb0] sm:$0x1] %v295_v28  ;;  %v365_v40 = vpack.c.bf16 %v333_v6, %v333_v6 }
  0x7a   : > { %v1145_v7 = vsel %vm4649_vm11, %v1140_v59, %v1144_v50  ;;  %v2724_v9 = vunpack.c.l.b16 %v1135_v63  ;;  %v4885_v10 = vld [vmem:[#allocation2 + $0x7c] sm:$0xf]  ;;  %v1099_v11 = vshrl.u32 %v827_v0, 16  ;;  %v1102_v12 = vshll.u32 %v827_v0, 16  ;;  %v241_v42 = vld [vmem:[#allocation2 + $0xb4] sm:$0x1] }
  0x7b   : > { %v2725_v13 = vunpack.c.l.b16 %v1145_v7  ;;  %v1108_v15 = vshll.u32 %v4885_v10, 16  ;;  %v1112_v16 = vshrl.u32 %v4885_v10, 16  ;;  %v573_v18 = vor.u32 %v571_v57, %v570_v5  ;;  %v772_v20 = vld [vmem:[#allocation2 + $0x90] sm:$0xf] }
  0x7c   : > { %v1101_v22 = vrot.slane %v1099_v11, 4  ;;  %v1104_v23 = vrot.slane %v1102_v12, 5  ;;  %v575_v25 = vrot.slane %v570_v5, 4  ;;  %v773_v26 = vsel %vm4617_vm9, %v565_v3, %v772_v20  ;;  %v776_v27 = vld [vmem:[#allocation2 + $0x98] sm:$0x1] }
  0x7d   : > { %v2745_v30 = vpack.c.b16 %v2725_v13, %v2724_v9  ;;  %v4892_v31 = vld [vmem:[#allocation2 + $0x80] sm:$0x1]  ;;  %v1110_v33 = vrot.slane %v1108_v15, 5  ;;  %v1114_v34 = vrot.slane %v1112_v16, 4  ;;  %v574_v43 = vsel %vm4624_vm10, %v566_v4, %v573_v18  ;;  %774 = vst [vmem:[#allocation2 + $0x90] sm:$0xf] %v773_v26 }
  0x7e   : > { %v1105_v36 = vor.u32 %v1104_v23, %v1101_v22  ;;  %v1118_v37 = vshll.u32 %v4892_v31, 16  ;;  %775 = vst.msk [vmem:[#allocation2 + $0x94] sm:$0xf] %vm184_vm0, %v574_v43  ;;  %v777_v38 = vsel %vm4572_vm3, %v575_v25, %v776_v27  ;;  %v594_v45 = vshrl.u32 %v4878_v61, 16  ;;  %v297_v16 = vld [vmem:[#allocation2 + $0xbc] sm:$0x1] }
  0x7f   : > { %2772 = vrot.lane.b32.xlu2 %v2745_v30, %s4531_s19  ;;  %v1115_v44 = vor.u32 %v1114_v34, %v1110_v33  ;;  %778 = vst [vmem:[#allocation2 + $0x98] sm:$0x1] %v777_v38  ;;  %v597_v46 = vshll.u32 %v4878_v61, 16  ;;  %v236_v47 = vsel %vm4572_vm3, 0, %v235_v21  ;;  %v602_v52 = vshrl.u32 %v365_v40, 16 }
  0x80   : > { %v1106_v49 = vrot.slane %v1105_v36, 4  ;;  %v1120_v50 = vrot.slane %v1118_v37, 5  ;;  %v605_v53 = vshll.u32 %v365_v40, 16  ;;  %v596_v56 = vrot.slane %v594_v45, 7  ;;  %237 = vst [vmem:[#allocation2 + $0x9c] sm:$0x1] %v236_v47 }
  0x81   : > { %v1116_v19 = vrot.slane %v1115_v44, 4  ;;  %v362_v57 = vpack.c.bf16 %v330_v29, %v330_v29  ;;  %v363_v59 = vpack.c.bf16 %v331_v41, %v331_v41  ;;  %v604_v28 = vrot.slane %v602_v52, 7  ;;  %v786_v63 = vld [vmem:[#allocation2 + $0xa8] sm:$0xf]  ;;  %v790_v7 = vld [vmem:[#allocation2 + $0xb0] sm:$0x1] }
  0x82   : > { %v1111_v60 = vsel %vm4649_vm11, %v1106_v49, %v1110_v33  ;;  %v292_v61 = vsel %vm4579_vm5, 0, %v291_v35  ;;  %v242_v0 = vsel %vm4572_vm3, 0, %v241_v42  ;;  %v599_v5 = vor.u32 %v597_v46, %v596_v56  ;;  %v334_v36 = vld [vmem:[%s4601_s18 + $0xe0] sm:$0xff] }
  0x83   : > { %v1121_v3 = vsel %vm4649_vm11, %v1116_v19, %v1120_v50  ;;  %v2722_v4 = vunpack.c.l.b16 %v1111_v60  ;;  %v600_v6 = vrot.slane %v596_v56, 4  ;;  %293 = vst [vmem:[#allocation2 + $0xa4] sm:$0x1] %v292_v61  ;;  %v607_v12 = vor.u32 %v605_v53, %v604_v28  ;;  %v335_v53 = vld [vmem:[%s4601_s18 + $0xe8] sm:$0xff]  ;;  %v4933_v60 = vld [vmem:[#allocation2 + $0x4] sm:$0xf] }
  0x84   : > { %v2723_v9 = vunpack.c.l.b16 %v1121_v3  ;;  %v831_v11 = vld [vmem:[#allocation2 + $0x90] sm:$0xf]  ;;  %v609_v13 = vrot.slane %v604_v28, 4  ;;  %v577_v15 = vshrl.u32 %v362_v57, 16  ;;  %243 = vst [vmem:[#allocation2 + $0xb4] sm:$0x1] %v242_v0  ;;  %v787_v22 = vsel %vm4617_vm9, %v599_v5, %v786_v63 }
  0x85   : > { %v4914_v18 = vld [vmem:[#allocation2 + $0x94] sm:$0xf]  ;;  %v1147_v20 = vshrl.u32 %v831_v11, 16  ;;  %v1150_v21 = vshll.u32 %v831_v11, 16  ;;  %v580_v23 = vshll.u32 %v362_v57, 16  ;;  %v608_v30 = vsel %vm4624_vm10, %v600_v6, %v607_v12 }
  0x86   : > { %v2744_v25 = vpack.c.b16 %v2723_v9, %v2722_v4  ;;  %v4918_v26 = vld [vmem:[#allocation2 + $0x98] sm:$0x1]  ;;  %v1156_v27 = vshll.u32 %v4914_v18, 16  ;;  %v1160_v29 = vshrl.u32 %v4914_v18, 16  ;;  %788 = vst [vmem:[#allocation2 + $0xa8] sm:$0xf] %v787_v22  ;;  %v791_v35 = vsel %vm4572_vm3, %v609_v13, %v790_v7 }
  0x87   : > { %v1149_v33 = vrot.slane %v1147_v20, 4  ;;  %v1152_v34 = vrot.slane %v1150_v21, 5  ;;  %v1166_v43 = vshll.u32 %v4918_v26, 16  ;;  %789 = vst.msk [vmem:[#allocation2 + $0xac] sm:$0xf] %vm184_vm0, %v608_v30  ;;  %v579_v40 = vrot.slane %v577_v15, 7 }
  0x88   : > { %2770 = vrot.lane.b32.xlu1 %v2744_v25, %s4531_s19  ;;  %v1158_v37 = vrot.slane %v1156_v27, 5  ;;  %v1162_v38 = vrot.slane %v1160_v29, 4  ;;  %792 = vst [vmem:[#allocation2 + $0xb0] sm:$0x1] %v791_v35  ;;  %v585_v41 = vshrl.u32 %v363_v59, 16  ;;  %v588_v44 = vshll.u32 %v363_v59, 16 }
  0x89   : > { %v1153_v42 = vor.u32 %v1152_v34, %v1149_v33  ;;  %v779_v45 = vld [vmem:[#allocation2 + $0x9c] sm:$0xf]  ;;  %v298_v46 = vsel %vm4579_vm5, 0, %v297_v16  ;;  %v1168_v49 = vrot.slane %v1166_v43, 5  ;;  %v582_v50 = vor.u32 %v580_v23, %v579_v40  ;;  %v1242_v27 = vld [vmem:[#allocation2] sm:$0xe] }
  0x8a   : > { %v1163_v47 = vor.u32 %v1162_v38, %v1158_v37  ;;  %v587_v52 = vrot.slane %v585_v41, 7  ;;  %299 = vst [vmem:[#allocation2 + $0xbc] sm:$0x1] %v298_v46  ;;  %v583_v56 = vrot.slane %v579_v40, 4  ;;  %v366_v57 = vpack.c.bf16 %v334_v36, %v334_v36  ;;  %v783_v3 = vld [vmem:[#allocation2 + $0xa4] sm:$0x1] }
  0x8b   : > { %v1154_v19 = vrot.slane %v1153_v42, 4  ;;  %v1311_v28 = vrot.slane %v4933_v60, 5  ;;  %v780_v0 = vsel %vm4617_vm9, %v582_v50, %v779_v45  ;;  %v367_v6 = vpack.c.bf16 %v335_v53, %v335_v53  ;;  %v4509_v60 = vld [vmem:[#allocation2 + $0x10] sm:$0xf] }
  0x8c   : > { %v1164_v63 = vrot.slane %v1163_v47, 4  ;;  %v590_v61 = vor.u32 %v588_v44, %v587_v52  ;;  %v592_v59 = vrot.slane %v587_v52, 4  ;;  %781 = vst [vmem:[#allocation2 + $0x9c] sm:$0xf] %v780_v0  ;;  %v611_v7 = vshrl.u32 %v366_v57, 16 }
  0x8d   : > { %v1159_v4 = vsel %vm4649_vm11, %v1154_v19, %v1158_v37  ;;  %v835_v5 = vld [vmem:[#allocation2 + $0xa8] sm:$0xf]  ;;  %v614_v9 = vshll.u32 %v366_v57, 16  ;;  %v619_v41 = vshrl.u32 %v367_v6, 16  ;;  %v622_v42 = vshll.u32 %v367_v6, 16 }
  0x8e   : > { %v1169_v11 = vsel %vm4649_vm11, %v1164_v63, %v1168_v49  ;;  %v2726_v12 = vunpack.c.l.b16 %v1159_v4  ;;  %v4942_v13 = vld [vmem:[#allocation2 + $0xac] sm:$0xf]  ;;  %v1195_v15 = vshrl.u32 %v835_v5, 16  ;;  %v1198_v16 = vshll.u32 %v835_v5, 16  ;;  %v793_v44 = vld [vmem:[#allocation2 + $0xb4] sm:$0xf] }
  0x8f   : > { %v2727_v20 = vunpack.c.l.b16 %v1169_v11  ;;  %v4944_v21 = vld [vmem:[#allocation2 + $0xb0] sm:$0x1]  ;;  %v1204_v22 = vshll.u32 %v4942_v13, 16  ;;  %v1208_v23 = vshrl.u32 %v4942_v13, 16  ;;  %v591_v25 = vsel %vm4624_vm10, %v583_v56, %v590_v61 }
  0x90   : > { %v1197_v29 = vrot.slane %v1195_v15, 4  ;;  %v1200_v30 = vrot.slane %v1198_v16, 5  ;;  %v1214_v33 = vshll.u32 %v4944_v21, 16  ;;  %782 = vst.msk [vmem:[#allocation2 + $0xa0] sm:$0xf] %vm184_vm0, %v591_v25  ;;  %v784_v34 = vsel %vm4572_vm3, %v592_v59, %v783_v3 }
  0x91   : > { %v2746_v43 = vpack.c.b16 %v2727_v20, %v2726_v12  ;;  %v1206_v35 = vrot.slane %v1204_v22, 5  ;;  %v1210_v36 = vrot.slane %v1208_v23, 4  ;;  %785 = vst [vmem:[#allocation2 + $0xa4] sm:$0x1] %v784_v34  ;;  %v613_v37 = vrot.slane %v611_v7, 7 }
  0x92   : > { %v1201_v38 = vor.u32 %v1200_v30, %v1197_v29  ;;  %v1216_v40 = vrot.slane %v1214_v33, 5  ;;  %v621_v52 = vrot.slane %v619_v41, 7  ;;  %vm1307_vm13 = vcmask 1046532   ;;  %v797_v4 = vld [vmem:[#allocation2 + $0xbc] sm:$0x1] }
  0x93   : > { %2774 = vrot.lane.b32.xlu0 %v2746_v43, %s4531_s19  ;;  %v1211_v45 = vor.u32 %v1210_v36, %v1206_v35  ;;  %v616_v46 = vor.u32 %v614_v9, %v613_v37  ;;  %v617_v47 = vrot.slane %v613_v37, 4  ;;  %v833_v50 = vld [vmem:[#allocation2 + $0x9c] sm:$0xf]  ;;  %v4069_v53 = vrot.slane %v1242_v27, 9  ;;  %vm4957_vm14 = vmor %vm1306_vm12, %vm1307_vm13  ;;  %v1243_v25 = vld [vmem:[#allocation2 + $0xc] sm:$0xe] }
  0x94   : > { %v1202_v49 = vrot.slane %v1201_v38, 4  ;;  %v1171_v56 = vshrl.u32 %v833_v50, 16  ;;  %v1174_v57 = vshll.u32 %v833_v50, 16  ;;  %v624_v0 = vor.u32 %v622_v42, %v621_v52  ;;  %v1244_v34 = vld [vmem:[#allocation2 + $0x18] sm:$0xe] }
  0x95   : > { %v1212_v19 = vrot.slane %v1211_v45, 4  ;;  %v794_v63 = vsel %vm4617_vm9, %v616_v46, %v793_v44  ;;  %v626_v3 = vrot.slane %v621_v52, 4  ;;  %v4967_v5 = vsel %vm4957_vm14, %v4069_v53, %v1311_v28  ;;  %v4508_v37 = vld [vmem:[#allocation2 + $0x8] sm:$0x1]  ;;  %v4510_v50 = vld [vmem:[#allocation2 + $0x14] sm:$0x1] }
  0x96   : > { %v1207_v59 = vsel %vm4649_vm11, %v1202_v49, %v1206_v35  ;;  %795 = vst [vmem:[#allocation2 + $0xb4] sm:$0xf] %v794_v63  ;;  %v1173_v11 = vrot.slane %v1171_v56, 4  ;;  %v1176_v12 = vrot.slane %v1174_v57, 5  ;;  %v625_v23 = vsel %vm4624_vm10, %v617_v47, %v624_v0 }
  0x97   : > { %v1217_v6 = vsel %vm4649_vm11, %v1212_v19, %v1216_v40  ;;  %v2730_v7 = vunpack.c.l.b16 %v1207_v59  ;;  %v4971_v9 = vld [vmem:[#allocation2 + $0xa0] sm:$0xf]  ;;  %796 = vst.msk [vmem:[#allocation2 + $0xb8] sm:$0xf] %vm184_vm0, %v625_v23  ;;  %v798_v30 = vsel %vm4572_vm3, %v626_v3, %v797_v4  ;;  %v1313_v33 = vrot.slane %v1311_v28, 4 }
  0x98   : > { %v2731_v15 = vunpack.c.l.b16 %v1217_v6  ;;  %v4973_v16 = vld [vmem:[#allocation2 + $0xa4] sm:$0x1]  ;;  %v1180_v20 = vshll.u32 %v4971_v9, 16  ;;  %v1184_v22 = vshrl.u32 %v4971_v9, 16  ;;  %v1177_v27 = vor.u32 %v1176_v12, %v1173_v11  ;;  %799 = vst [vmem:[#allocation2 + $0xbc] sm:$0x1] %v798_v30 }
  0x99   : > { %v1190_v29 = vshll.u32 %v4973_v16, 16  ;;  %v1314_v38 = vrot.slane %v4508_v37, 5  ;;  %v4070_v42 = vrot.slane %v1243_v25, 9  ;;  %v2782_v46 = vunpack.c.l.b16 %v4967_v5  ;;  %v4511_v19 = vld [vmem:[#allocation2 + $0x1c] sm:$0xf] }
  0x9a   : > { %v2748_v43 = vpack.c.b16 %v2731_v15, %v2730_v7  ;;  %v1182_v35 = vrot.slane %v1180_v20, 5  ;;  %v1186_v36 = vrot.slane %v1184_v22, 4  ;;  %v1178_v40 = vrot.slane %v1177_v27, 4 }
  0x9b   : > { %v1192_v41 = vrot.slane %v1190_v29, 5  ;;  %v1315_v45 = vsel %vm4957_vm14, %v1313_v33, %v1314_v38  ;;  %v1318_v28 = vrot.slane %v4509_v60, 5  ;;  %v1321_v52 = vrot.slane %v4510_v50, 5 }
  0x9c   : > { %2778 = vrot.lane.b32.xlu2 %v2748_v43, %s4531_s19  ;;  %v1187_v44 = vor.u32 %v1186_v36, %v1182_v35  ;;  %v1183_v47 = vsel %vm4649_vm11, %v1178_v40, %v1182_v35  ;;  %v4071_v53 = vrot.slane %v1244_v34, 9  ;;  %v1325_v56 = vrot.slane %v4511_v19, 5  ;;  %v1245_v35 = vld [vmem:[#allocation2 + $0x24] sm:$0xe]  ;;  %v4512_v40 = vld [vmem:[#allocation2 + $0x20] sm:$0x1] }
  0x9d   : > { %v837_v49 = vld [vmem:[#allocation2 + $0xb4] sm:$0xf]  ;;  %v2783_v0 = vunpack.c.l.b16 %v1315_v45  ;;  %v2728_v3 = vunpack.c.l.b16 %v1183_v47  ;;  %v1319_v4 = vsel %vm4957_vm14, %v4070_v42, %v1318_v28  ;;  %v1320_v5 = vrot.slane %v1318_v28, 4  ;;  %v1246_v42 = vld [vmem:[#allocation2 + $0x30] sm:$0xe] }
  0x9e   : > { %v1188_v57 = vrot.slane %v1187_v44, 4  ;;  %v1219_v63 = vshrl.u32 %v837_v49, 16  ;;  %v1222_v59 = vshll.u32 %v837_v49, 16  ;;  %v4995_v6 = vsel %vm4957_vm14, %v4071_v53, %v1325_v56  ;;  %v838_v11 = vld [vmem:[#allocation2 + $0xb8] sm:$0xf] }
  0x9f   : > { %v2784_v20 = vunpack.c.l.b16 %v1319_v4  ;;  %v854_v23 = vld [vmem:[#allocation2 + $0xbc] sm:$0x1]  ;;  %v1228_v25 = vshll.u32 %v838_v11, 16  ;;  %v1232_v27 = vshrl.u32 %v838_v11, 16  ;;  %v1322_v29 = vsel %vm4957_vm14, %v1320_v5, %v1321_v52  ;;  %v4513_v52 = vld [vmem:[#allocation2 + $0x28] sm:$0xf] }
  0xa0   : > { %v1193_v7 = vsel %vm4649_vm11, %v1188_v57, %v1192_v41  ;;  %v1221_v12 = vrot.slane %v1219_v63, 4  ;;  %v1224_v15 = vrot.slane %v1222_v59, 5  ;;  %v1238_v33 = vshll.u32 %v854_v23, 16  ;;  %v1247_v63 = vld [vmem:[#allocation2 + $0x3c] sm:$0xe] }
  0xa1   : > { %v2729_v22 = vunpack.c.l.b16 %v1193_v7  ;;  %v2785_v34 = vunpack.c.l.b16 %v1322_v29  ;;  %v1327_v43 = vrot.slane %v1325_v56, 4  ;;  %v1230_v37 = vrot.slane %v1228_v25, 5  ;;  %v4514_v11 = vld [vmem:[#allocation2 + $0x34] sm:$0xf]  ;;  %v4516_v23 = vld [vmem:[#allocation2 + $0x40] sm:$0xf] }
  0xa2   : > { %v1225_v30 = vor.u32 %v1224_v15, %v1221_v12  ;;  %v1234_v38 = vrot.slane %v1232_v27, 4  ;;  %v1328_v41 = vrot.slane %v4512_v40, 5  ;;  %v1240_v45 = vrot.slane %v1238_v33, 5  ;;  %v4515_v15 = vld [vmem:[#allocation2 + $0x38] sm:$0x1] }
  0xa3   : > { %v2747_v36 = vpack.c.b16 %v2729_v22, %v2728_v3  ;;  %v2814_v60 = vpack.c.b16 %v2783_v0, %v2782_v46  ;;  %v2815_v28 = vpack.c.b16 %v2785_v34, %v2784_v20  ;;  %v4072_v50 = vrot.slane %v1245_v35, 9  ;;  %v1248_v34 = vld [vmem:[#allocation2 + $0x48] sm:$0xe] }
  0xa4   : > { %v1226_v44 = vrot.slane %v1225_v30, 4  ;;  %v1235_v47 = vor.u32 %v1234_v38, %v1230_v37  ;;  %v1329_v49 = vsel %vm4957_vm14, %v1327_v43, %v1328_v41  ;;  %v1332_v53 = vrot.slane %v4513_v52, 5  ;;  %v1249_v38 = vld [vmem:[#allocation2 + $0x54] sm:$0xe] }
  0xa5   : > { %2776 = vrot.lane.b32.xlu1 %v2747_v36, %s4531_s19  ;;  %2832 = vrot.lane.b32.xlu2 %v2815_v28, %s4532_s20  ;;  %v2786_v56 = vunpack.c.l.b16 %v4995_v6  ;;  %v1335_v46 = vrot.slane %v4752_v48, 5  ;;  %v4073_v57 = vrot.slane %v1246_v42, 9  ;;  %v2787_v0 = vunpack.c.l.b16 %v1329_v49  ;;  %v4517_v36 = vld [vmem:[#allocation2 + $0x44] sm:$0x1]  ;;  %v4518_v49 = vld [vmem:[#allocation2 + $0x4c] sm:$0xf] }
  0xa6   : > { %v1231_v19 = vsel %vm4649_vm11, %v1226_v44, %v1230_v37  ;;  %v1236_v59 = vrot.slane %v1235_v47, 4  ;;  %v1333_v3 = vsel %vm4957_vm14, %v4072_v50, %v1332_v53  ;;  %v1334_v4 = vrot.slane %v1332_v53, 4  ;;  %v4519_v53 = vld [vmem:[#allocation2 + $0x50] sm:$0x1] }
  0xa7   : > { %v2732_v5 = vunpack.c.l.b16 %v1231_v19  ;;  %v2788_v7 = vunpack.c.l.b16 %v1333_v3  ;;  %v1339_v12 = vrot.slane %v4514_v11, 5  ;;  %v1342_v20 = vrot.slane %v4515_v15, 5 }
  0xa8   : > { %v1241_v22 = vsel %vm4649_vm11, %v1236_v59, %v1240_v45  ;;  %v1336_v48 = vsel %vm4957_vm14, %v1334_v4, %v1335_v46  ;;  %v4074_v6 = vrot.slane %v1247_v63, 9  ;;  %v1346_v25 = vrot.slane %v4516_v23, 5 }
  0xa9   : > { %v2733_v27 = vunpack.c.l.b16 %v1241_v22  ;;  %v2789_v29 = vunpack.c.l.b16 %v1336_v48  ;;  %v1340_v30 = vsel %vm4957_vm14, %v4073_v57, %v1339_v12  ;;  %v1341_v33 = vrot.slane %v1339_v12, 4  ;;  %v1250_v57 = vld [vmem:[#allocation2 + $0x60] sm:$0xe]  ;;  %v1252_v22 = vld [vmem:[#allocation2 + $0x78] sm:$0xe] }
  0xaa   : > { %v2790_v43 = vunpack.c.l.b16 %v1340_v30  ;;  %v1348_v35 = vrot.slane %v1346_v25, 4  ;;  %v1349_v37 = vrot.slane %v4517_v36, 5  ;;  %v2816_v41 = vpack.c.b16 %v2787_v0, %v2786_v56 }
  0xab   : > { %v2749_v40 = vpack.c.b16 %v2733_v27, %v2732_v5  ;;  %v1343_v42 = vsel %vm4957_vm14, %v1341_v33, %v1342_v20  ;;  %v1347_v44 = vsel %vm4957_vm14, %v4074_v6, %v1346_v25  ;;  %v4075_v47 = vrot.slane %v1248_v34, 9 }
  0xac   : > { %v2791_v45 = vunpack.c.l.b16 %v1343_v42  ;;  %v1350_v28 = vsel %vm4957_vm14, %v1348_v35, %v1349_v37  ;;  %v1353_v50 = vrot.slane %v4518_v49, 5  ;;  %v2817_v52 = vpack.c.b16 %v2789_v29, %v2788_v7  ;;  %v1251_v7 = vld [vmem:[#allocation2 + $0x6c] sm:$0xe] }
  0xad   : > { %2830 = vrot.lane.b32.xlu1 %v2814_v60, %s4532_s20  ;;  %2780 = vrot.lane.b32.xlu0 %v2749_v40, %s4531_s19  ;;  %v1356_v19 = vrot.slane %v4519_v53, 5  ;;  %v4076_v56 = vrot.slane %v1249_v38, 9  ;;  %v1360_v46 = vrot.slane %v4805_v51, 5  ;;  %v1363_v0 = vrot.slane %v4809_v55, 5  ;;  %v1254_v40 = vld [vmem:[#allocation2 + $0x90] sm:$0xe] }
  0xae   : > { %v2818_v63 = vpack.c.b16 %v2791_v45, %v2790_v43  ;;  %v1354_v60 = vsel %vm4957_vm14, %v4075_v47, %v1353_v50  ;;  %v1355_v59 = vrot.slane %v1353_v50, 4  ;;  %v2792_v3 = vunpack.c.l.b16 %v1347_v44  ;;  %v1253_v43 = vld [vmem:[#allocation2 + $0x84] sm:$0xe] }
  0xaf   : > { %v2793_v4 = vunpack.c.l.b16 %v1350_v28  ;;  %v1361_v5 = vsel %vm4957_vm14, %v4076_v56, %v1360_v46  ;;  %v1362_v11 = vrot.slane %v1360_v46, 4  ;;  %v4077_v15 = vrot.slane %v1250_v57, 9 }
  0xb0   : > { %2838 = vrot.lane.b32.xlu2 %v2818_v63, %s4532_s20  ;;  %v1357_v51 = vsel %vm4957_vm14, %v1355_v59, %v1356_v19  ;;  %v2796_v12 = vunpack.c.l.b16 %v1361_v5  ;;  %v1367_v20 = vrot.slane %v4776_v54, 5  ;;  %v2794_v48 = vunpack.c.l.b16 %v1354_v60 }
  0xb1   : > { %v2795_v6 = vunpack.c.l.b16 %v1357_v51  ;;  %v1364_v55 = vsel %vm4957_vm14, %v1362_v11, %v1363_v0  ;;  %v1370_v23 = vrot.slane %v4780_v62, 5  ;;  %v4078_v29 = vrot.slane %v1251_v7, 9  ;;  %v1421_v51 = vld [vmem:[#allocation2 + $0xc] sm:$0xf] }
  0xb2   : > { %v2797_v25 = vunpack.c.l.b16 %v1364_v55  ;;  %v1369_v27 = vrot.slane %v1367_v20, 4  ;;  %v1374_v30 = vrot.slane %v4839_v8, 5  ;;  %v1377_v33 = vrot.slane %v4845_v58, 5 }
  0xb3   : > { %v4079_v34 = vrot.slane %v1252_v22, 9  ;;  %v2819_v54 = vpack.c.b16 %v2793_v4, %v2792_v3  ;;  %v1368_v36 = vsel %vm4957_vm14, %v4077_v15, %v1367_v20  ;;  %v2820_v62 = vpack.c.b16 %v2795_v6, %v2794_v48 }
  0xb4   : > { %v2821_v35 = vpack.c.b16 %v2797_v25, %v2796_v12  ;;  %v1376_v37 = vrot.slane %v1374_v30, 4  ;;  %v1371_v38 = vsel %vm4957_vm14, %v1369_v27, %v1370_v23  ;;  %v1381_v8 = vrot.slane %v4885_v10, 5  ;;  %v1255_v10 = vld [vmem:[#allocation2 + $0x9c] sm:$0xe]  ;;  %v5070_v12 = vld [vmem:[#allocation2 + $0x10] sm:$0xf] }
  0xb5   : > { %2836 = vrot.lane.b32.xlu1 %v2817_v52, %s4532_s20  ;;  %2834 = vrot.lane.b32.xlu0 %v2816_v41, %s4532_s20  ;;  %v1384_v58 = vrot.slane %v4892_v31, 5  ;;  %v1375_v42 = vsel %vm4957_vm14, %v4078_v29, %v1374_v30  ;;  %v4080_v45 = vrot.slane %v1253_v43, 9  ;;  %v1388_v28 = vrot.slane %v4853_v17, 5  ;;  %v5080_v25 = vld [vmem:[#allocation2 + $0x14] sm:$0x1] }
  0xb6   : > { %v1378_v44 = vsel %vm4957_vm14, %v1376_v37, %v1377_v33  ;;  %v2798_v47 = vunpack.c.l.b16 %v1368_v36  ;;  %v1382_v41 = vsel %vm4957_vm14, %v4079_v34, %v1381_v8  ;;  %v1383_v49 = vrot.slane %v1381_v8, 4 }
  0xb7   : > { %v1391_v50 = vrot.slane %v4860_v24, 5  ;;  %v2799_v31 = vunpack.c.l.b16 %v1371_v38  ;;  %v2802_v52 = vunpack.c.l.b16 %v1382_v41  ;;  %v1390_v53 = vrot.slane %v1388_v28, 4 }
  0xb8   : > { %2844 = vrot.lane.b32.xlu2 %v2821_v35, %s4532_s20  ;;  %v4081_v19 = vrot.slane %v1254_v40, 9  ;;  %v2800_v56 = vunpack.c.l.b16 %v1375_v42  ;;  %v2801_v46 = vunpack.c.l.b16 %v1378_v44  ;;  %v1385_v57 = vsel %vm4957_vm14, %v1383_v49, %v1384_v58 }
  0xb9   : > { %v1395_v17 = vrot.slane %v4914_v18, 5  ;;  %v2803_v63 = vunpack.c.l.b16 %v1385_v57  ;;  %v1389_v60 = vsel %vm4957_vm14, %v4080_v45, %v1388_v28  ;;  %v1398_v24 = vrot.slane %v4918_v26, 5  ;;  %v5088_v28 = vld [vmem:[#allocation2 + $0x1c] sm:$0xf] }
  0xba   : > { %v4082_v59 = vrot.slane %v1255_v10, 9  ;;  %v1392_v0 = vsel %vm4957_vm14, %v1390_v53, %v1391_v50  ;;  %v1402_v5 = vrot.slane %v4971_v9, 5  ;;  %v2822_v11 = vpack.c.b16 %v2799_v31, %v2798_v47  ;;  %v1256_v9 = vld [vmem:[#allocation2 + $0xa8] sm:$0xe] }
  0xbb   : > { %v1396_v3 = vsel %vm4957_vm14, %v4081_v19, %v1395_v17  ;;  %v1397_v4 = vrot.slane %v1395_v17, 4  ;;  %v2824_v18 = vpack.c.b16 %v2803_v63, %v2802_v52  ;;  %v1405_v7 = vrot.slane %v4973_v16, 5  ;;  %v5095_v52 = vld [vmem:[#allocation2 + $0x20] sm:$0x1] }
  0xbc   : > { %v2823_v26 = vpack.c.b16 %v2801_v46, %v2800_v56  ;;  %v1403_v20 = vsel %vm4957_vm14, %v4082_v59, %v1402_v5  ;;  %v1404_v22 = vrot.slane %v1402_v5, 4  ;;  %v2804_v48 = vunpack.c.l.b16 %v1389_v60  ;;  %v1853_v46 = vld [vmem:[#allocation2 + $0xc] sm:$0xe] }
  0xbd   : > { %2842 = vrot.lane.b32.xlu1 %v2820_v62, %s4532_s20  ;;  %2840 = vrot.lane.b32.xlu0 %v2819_v54, %s4532_s20  ;;  %v1399_v15 = vsel %vm4957_vm14, %v1397_v4, %v1398_v24  ;;  %v2805_v6 = vunpack.c.l.b16 %v1392_v0  ;;  %v2806_v55 = vunpack.c.l.b16 %v1396_v3  ;;  %v1409_v23 = vrot.slane %v4942_v13, 5  ;;  %v2030_v62 = vld [vmem:[#allocation2 + $0x18] sm:$0xf] }
  0xbe   : > { %v1406_v16 = vsel %vm4957_vm14, %v1404_v22, %v1405_v7  ;;  %v1470_v27 = vshrl.u32 %v1421_v51, 16  ;;  %v1473_v29 = vshll.u32 %v1421_v51, 16  ;;  %v1479_v30 = vshll.u32 %v5070_v12, 16 }
  0xbf   : > { %v2807_v33 = vunpack.c.l.b16 %v1399_v15  ;;  %v2808_v34 = vunpack.c.l.b16 %v1403_v20  ;;  %v2809_v43 = vunpack.c.l.b16 %v1406_v16  ;;  %v4083_v54 = vrot.slane %v1256_v9, 9 }
  0xc0   : > { %2850 = vrot.lane.b32.xlu2 %v2824_v18, %s4532_s20  ;;  %v1411_v35 = vrot.slane %v1409_v23, 4  ;;  %v1412_v36 = vrot.slane %v4944_v21, 5  ;;  %v1472_v37 = vrot.slane %v1470_v27, 4  ;;  %v1475_v13 = vrot.slane %v1473_v29, 5  ;;  %v5112_v29 = vpop.permute.xlu2 %2758 }
  0xc1   : > { %v1481_v38 = vrot.slane %v1479_v30, 5  ;;  %v1483_v8 = vshrl.u32 %v5070_v12, 16  ;;  %v1489_v58 = vshll.u32 %v5080_v25, 16  ;;  %v2825_v42 = vpack.c.b16 %v2805_v6, %v2804_v48  ;;  %v2462_v6 = vld [vmem:[#allocation2 + $0x18] sm:$0xe] }
  0xc2   : > { %v1476_v40 = vor.u32 %v1475_v13, %v1472_v37  ;;  %v2827_v44 = vpack.c.b16 %v2809_v43, %v2808_v34  ;;  %v2079_v47 = vshrl.u32 %v2030_v62, 16  ;;  %v2826_v21 = vpack.c.b16 %v2807_v33, %v2806_v55 }
  0xc3   : > { %v1485_v45 = vrot.slane %v1483_v8, 4  ;;  %v1410_v41 = vsel %vm4957_vm14, %v4083_v54, %v1409_v23  ;;  %v1413_v49 = vsel %vm4957_vm14, %v1411_v35, %v1412_v36  ;;  %v1491_v31 = vrot.slane %v1489_v58, 5  ;;  %v5109_v23 = vld [vmem:[#allocation2 + $0x1c] sm:$0xf] }
  0xc4   : > { %v1477_v50 = vrot.slane %v1476_v40, 4  ;;  %v2081_v53 = vrot.slane %v2079_v47, 4  ;;  %v2082_v19 = vshll.u32 %v2030_v62, 16  ;;  %v1919_v57 = vrot.slane %v5070_v12, 5  ;;  %v1429_v54 = vld [vmem:[#allocation2 + $0x3c] sm:$0xf] }
  0xc5   : > { %2848 = vrot.lane.b32.xlu1 %v2823_v26, %s4532_s20  ;;  %2846 = vrot.lane.b32.xlu0 %v2822_v11, %s4532_s20  ;;  %v1486_v10 = vor.u32 %v1485_v45, %v1481_v38  ;;  %v2088_v17 = vshll.u32 %v5088_v28, 16  ;;  %v2092_v63 = vshrl.u32 %v5088_v28, 16  ;;  %v2810_v60 = vunpack.c.l.b16 %v1410_v41  ;;  %v1423_v26 = vld [vmem:[#allocation2 + $0x18] sm:$0xf]  ;;  %v5123_v62 = vld [vmem:[#allocation2 + $0x40] sm:$0xf] }
  0xc6   : > { %v1482_v56 = vsel %vm4649_vm11, %v1477_v50, %v1481_v38  ;;  %v2811_v24 = vunpack.c.l.b16 %v1413_v49  ;;  %v2084_v0 = vrot.slane %v2082_v19, 5  ;;  %v2098_v11 = vshll.u32 %v5095_v52, 16  ;;  %v4352_v38 = vld [vmem:[#allocation2 + $0xc] sm:$0xff]  ;;  %v1854_v19 = vld [vmem:[#allocation2 + $0x18] sm:$0xe] }
  0xc7   : > { %v1487_v59 = vrot.slane %v1486_v10, 4  ;;  %v2958_v3 = vunpack.c.l.b16 %v1482_v56  ;;  %v2090_v4 = vrot.slane %v2088_v17, 5  ;;  %v2094_v5 = vrot.slane %v2092_v63, 4 }
  0xc8   : > { %2856 = vrot.lane.b32.xlu2 %v2827_v44, %s4532_s20  ;;  %v4085_v7 = vrot.slane %v1853_v46, 9  ;;  %v1922_v51 = vrot.slane %v5080_v25, 5  ;;  %v2085_v12 = vor.u32 %v2084_v0, %v2081_v53  ;;  %v1921_v20 = vrot.slane %v1919_v57, 4  ;;  %v1454_v46 = vld [vmem:[#allocation2 + $0x20] sm:$0x1] }
  0xc9   : > { %v1492_v18 = vsel %vm4649_vm11, %v1487_v59, %v1491_v31  ;;  %v2095_v22 = vor.u32 %v2094_v5, %v2090_v4  ;;  %v2100_v9 = vrot.slane %v2098_v11, 5  ;;  %v2528_v55 = vrot.slane %v5088_v28, 5  ;;  %v5139_v0 = vld [vmem:[#allocation2 + $0x44] sm:$0x1] }
  0xca   : > { %v2959_v15 = vunpack.c.l.b16 %v1492_v18  ;;  %v2086_v48 = vrot.slane %v2085_v12, 4  ;;  %v1494_v25 = vshrl.u32 %v1423_v26, 16  ;;  %v1497_v30 = vshll.u32 %v1423_v26, 16  ;;  %v5141_v18 = vpop.permute.xlu2 %2760  ;;  %v4368_v12 = vld [vmem:[#allocation2 + $0x18] sm:$0xff] }
  0xcb   : > { %v2096_v27 = vrot.slane %v2095_v22, 4  ;;  %v2828_v33 = vpack.c.b16 %v2811_v24, %v2810_v60  ;;  %v1920_v34 = vsel %vm4957_vm14, %v4085_v7, %v1919_v57  ;;  %v1923_v35 = vsel %vm4957_vm14, %v1921_v20, %v1922_v51 }
  0xcc   : > { %v2990_v16 = vpack.c.b16 %v2959_v15, %v2958_v3  ;;  %v2091_v43 = vsel %vm4649_vm11, %v2086_v48, %v2090_v4  ;;  %v4101_v37 = vrot.slane %v2462_v6, 9  ;;  %v1503_v13 = vshll.u32 %v5109_v23, 16 }
  0xcd   : > { %2854 = vrot.lane.b32.xlu1 %v2826_v21, %s4532_s20  ;;  %2852 = vrot.lane.b32.xlu0 %v2825_v42, %s4532_s20  ;;  %v2101_v36 = vsel %vm4649_vm11, %v2096_v27, %v2100_v9  ;;  %v3214_v8 = vunpack.c.l.b16 %v2091_v43  ;;  %v1496_v40 = vrot.slane %v1494_v25, 4  ;;  %v1499_v42 = vrot.slane %v1497_v30, 5  ;;  %v4356_v43 = vld [vmem:[#allocation2 + $0x3c] sm:$0xff] }
  0xce   : > { %v3215_v58 = vunpack.c.l.b16 %v2101_v36  ;;  %v2530_v44 = vrot.slane %v2528_v55, 4  ;;  %v2531_v45 = vrot.slane %v5095_v52, 5  ;;  %v1507_v28 = vshrl.u32 %v5109_v23, 16 }
  0xcf   : > { %v1566_v47 = vshrl.u32 %v1429_v54, 16  ;;  %v3038_v21 = vunpack.c.l.b16 %v1920_v34  ;;  %v1569_v41 = vshll.u32 %v1429_v54, 16  ;;  %v1575_v49 = vshll.u32 %v5123_v62, 16 }
  0xd0   : > { %3006 = vrot.lane.b32.xlu2 %v2990_v16, %s4533_s21  ;;  %v3039_v50 = vunpack.c.l.b16 %v1923_v35  ;;  %v5129_v10 = vrot.slane %v1503_v13, 5  ;;  %v1509_v31 = vrot.slane %v1507_v28, 4  ;;  %v3246_v56 = vpack.c.b16 %v3215_v58, %v3214_v8 }
  0xd1   : > { %v1568_v53 = vrot.slane %v1566_v47, 4  ;;  %v1500_v57 = vor.u32 %v1499_v42, %v1496_v40  ;;  %v1571_v52 = vrot.slane %v1569_v41, 5  ;;  %v1579_v17 = vshrl.u32 %v5123_v62, 16  ;;  %v5170_v41 = vld [vmem:[#allocation2 + $0x2c] sm:$0x1] }
  0xd2   : > { %v2529_v63 = vsel %vm4957_vm14, %v4101_v37, %v2528_v55  ;;  %v2532_v60 = vsel %vm4957_vm14, %v2530_v44, %v2531_v45  ;;  %v1577_v24 = vrot.slane %v1575_v49, 5  ;;  %v1926_v59 = vrot.slane %v5109_v23, 5  ;;  %v1857_v23 = vld [vmem:[#allocation2 + $0x3c] sm:$0xe]  ;;  %v5158_v37 = vld [vmem:[#allocation2 + $0x28] sm:$0xf] }
  0xd3   : > { %v1572_v3 = vor.u32 %v1571_v52, %v1568_v53  ;;  %v1581_v4 = vrot.slane %v1579_v17, 4  ;;  %v4086_v5 = vrot.slane %v1854_v19, 9  ;;  %v3070_v11 = vpack.c.b16 %v3039_v50, %v3038_v21  ;;  %v2038_v45 = vld [vmem:[#allocation2 + $0x48] sm:$0xf]  ;;  %v5168_v21 = vpop.permute.xlu0 %2750  ;;  %v2767_v52 = vpop.permute.xlu2 %2766 }
  0xd4   : > { %v1510_v7 = vor.u32 %v1509_v31, %v5129_v10  ;;  %v1513_v51 = vshll.u32 %v1454_v46, 16  ;;  %v3294_v26 = vunpack.c.l.b16 %v2529_v63  ;;  %v3295_v15 = vunpack.c.l.b16 %v2532_v60  ;;  %v4353_v31 = vld [vmem:[#allocation2 + $0x18] sm:$0xff] }
  0xd5   : > { %2926 = vrot.lane.b32.xlu1 %v4352_v38, %s4534_s22  ;;  %2858 = vrot.lane.b32.xlu0 %v2828_v33, %s4532_s20  ;;  %v5145_v20 = vrot.slane %v1500_v57, 4  ;;  %v1573_v22 = vrot.slane %v1572_v3, 4  ;;  %v1582_v9 = vor.u32 %v1581_v4, %v1577_v24  ;;  %v1585_v48 = vshll.u32 %v5139_v0, 16  ;;  %v2032_v33 = vld [vmem:[#allocation2 + $0x24] sm:$0xf] }
  0xd6   : > { %v1928_v6 = vrot.slane %v1926_v59, 4  ;;  %v1929_v55 = vrot.slane %v1454_v46, 5  ;;  %v1927_v16 = vsel %vm4957_vm14, %v4086_v5, %v1926_v59  ;;  %v1947_v27 = vrot.slane %v5123_v62, 5 }
  0xd7   : > { %v1511_v25 = vrot.slane %v1510_v7, 4  ;;  %v1515_v30 = vrot.slane %v1513_v51, 5  ;;  %v3326_v34 = vpack.c.b16 %v3295_v15, %v3294_v26  ;;  %v1506_v54 = vsel %vm4649_vm11, %v5145_v20, %v5129_v10  ;;  %v5174_v10 = vld [vmem:[#allocation2 + $0x4c] sm:$0xf]  ;;  %v4340_v51 = vld [vmem:[#allocation2 + $0x30] sm:$0xff] }
  0xd8   : > { %3262 = vrot.lane.b32.xlu2 %v3246_v56, %s4535_s23  ;;  %v1578_v35 = vsel %vm4649_vm11, %v1573_v22, %v1577_v24  ;;  %v4089_v36 = vrot.slane %v1857_v23, 9  ;;  %v1583_v13 = vrot.slane %v1582_v9, 4  ;;  %v1587_v62 = vrot.slane %v1585_v48, 5  ;;  %v5190_v15 = vld [vmem:[#allocation2 + $0x50] sm:$0x1]  ;;  %v4341_v9 = vld [vmem:[#allocation2 + $0x3c] sm:$0xff] }
  0xd9   : > { %v1930_v38 = vsel %vm4957_vm14, %v1928_v6, %v1929_v55  ;;  %v3040_v8 = vunpack.c.l.b16 %v1927_v16  ;;  %v1949_v58 = vrot.slane %v1947_v27, 4  ;;  %v1950_v40 = vrot.slane %v5139_v0, 5  ;;  %v2463_v23 = vld [vmem:[#allocation2 + $0x24] sm:$0xe] }
  0xda   : > { %v2103_v42 = vshrl.u32 %v2032_v33, 16  ;;  %v2106_v44 = vshll.u32 %v2032_v33, 16  ;;  %v1516_v28 = vsel %vm4649_vm11, %v1511_v25, %v1515_v30  ;;  %v5166_v47 = vunpack.c.l.b16 %v1578_v35  ;;  %v4336_v33 = vld [vmem:[#allocation2] sm:$0xff]  ;;  %v4337_v35 = vld [vmem:[#allocation2 + $0xc] sm:$0xff] }
  0xdb   : > { %v2112_v49 = vshll.u32 %v5158_v37, 16  ;;  %v2116_v50 = vshrl.u32 %v5158_v37, 16  ;;  %v3041_v53 = vunpack.c.l.b16 %v1930_v38  ;;  %v1948_v19 = vsel %vm4957_vm14, %v4089_v36, %v1947_v27  ;;  %v4344_v27 = vld [vmem:[#allocation2 + $0x60] sm:$0xff] }
  0xdc   : > { %v2105_v56 = vrot.slane %v2103_v42, 4  ;;  %v2108_v46 = vrot.slane %v2106_v44, 5  ;;  %v1588_v57 = vsel %vm4649_vm11, %v1583_v13, %v1587_v62  ;;  %v2175_v60 = vshrl.u32 %v2038_v45, 16  ;;  %v2753_v42 = vpop.permute.xlu0 %2752 }
  0xdd   : > { %3182 = vrot.lane.b32.xlu1 %v4368_v12, %s4536_s24  ;;  %3086 = vrot.lane.b32.xlu0 %v3070_v11, %s4537_s25  ;;  %v5181_v17 = vrot.slane %v2112_v49, 5  ;;  %v2118_v63 = vrot.slane %v2116_v50, 4  ;;  %v1951_v24 = vsel %vm4957_vm14, %v1949_v58, %v1950_v40  ;;  %v2122_v59 = vshll.u32 %v5170_v41, 16 }
  0xde   : > { %v2178_v0 = vshll.u32 %v2038_v45, 16  ;;  %v2184_v3 = vshll.u32 %v5174_v10, 16  ;;  %v2109_v4 = vor.u32 %v2108_v46, %v2105_v56  ;;  %v2177_v11 = vrot.slane %v2175_v60, 4  ;;  %v2466_v46 = vld [vmem:[#allocation2 + $0x48] sm:$0xe] }
  0xdf   : > { %v2119_v5 = vor.u32 %v2118_v63, %v5181_v17  ;;  %v2188_v7 = vshrl.u32 %v5174_v10, 16  ;;  %v2967_v12 = vunpack.c.l.b16 %v1588_v57  ;;  %v3071_v26 = vpack.c.b16 %v3041_v53, %v3040_v8  ;;  %v5228_v57 = vld [vmem:[#allocation2 + $0x74] sm:$0x1] }
  0xe0   : > { %2934 = vrot.lane.b32.xlu2 %v4356_v43, %s4534_s22  ;;  %v2180_v20 = vrot.slane %v2178_v0, 5  ;;  %v5192_v22 = vrot.slane %v2184_v3, 5  ;;  %v2960_v48 = vunpack.c.l.b16 %v1506_v54  ;;  %v2961_v6 = vunpack.c.l.b16 %v1516_v28  ;;  %v1437_v28 = vld [vmem:[#allocation2 + $0x6c] sm:$0xf] }
  0xe1   : > { %v2190_v55 = vrot.slane %v2188_v7, 4  ;;  %v2535_v16 = vrot.slane %v5158_v37, 5  ;;  %vm3374_vm15 = vcmask 31744   ;;  %v3046_v25 = vunpack.c.l.b16 %v1948_v19 }
  0xe2   : > { %v3047_v30 = vunpack.c.l.b16 %v1951_v24  ;;  %v2124_v43 = vrot.slane %v2122_v59, 5  ;;  %v2110_v36 = vrot.slane %v2109_v4, 4  ;;  %v2120_v13 = vrot.slane %v2119_v5, 4  ;;  %v5239_v4 = vpop.permute.xlu1 %2754 }
  0xe3   : > { %v2181_v62 = vor.u32 %v2180_v20, %v2177_v11  ;;  %v2194_v38 = vshll.u32 %v5190_v15, 16  ;;  %v2994_v54 = vpack.c.b16 %v2967_v12, %v5166_v47  ;;  %v2191_v37 = vor.u32 %v2190_v55, %v5192_v22 }
  0xe4   : > { %v4102_v8 = vrot.slane %v2463_v23, 9  ;;  %v5206_v58 = vsel %vm3374_vm15, %v4341_v9, %v5141_v18  ;;  %v2991_v40 = vpack.c.b16 %v2961_v6, %v2960_v48  ;;  %v2537_v44 = vrot.slane %v2535_v16, 4  ;;  %v5221_v18 = vpop.permute.xlu2 %2772  ;;  %v2046_v9 = vld [vmem:[#allocation2 + $0x78] sm:$0xf]  ;;  %v4369_v48 = vld [vmem:[#allocation2 + $0x24] sm:$0xff] }
  0xe5   : > { %2928 = vrot.lane.b32.xlu1 %v4353_v31, %s4534_s22  ;;  %3342 = vrot.lane.b32.xlu0 %v3326_v34, %s4538_s26  ;;  %v5199_v34 = vsel %vm3374_vm15, %v4340_v51, %v5112_v29  ;;  %v2538_v45 = vrot.slane %v5170_v41, 5  ;;  %v5210_v29 = vsel %vm3374_vm15, %v4344_v27, %v2767_v52  ;;  %v3074_v49 = vpack.c.b16 %v3047_v30, %v3046_v25  ;;  %v5219_v31 = vld [vmem:[#allocation2 + $0x70] sm:$0xf] }
  0xe6   : > { %v5214_v47 = vsel %vm3374_vm15, %v4336_v33, %v5168_v21  ;;  %v5217_v50 = vsel %vm3374_vm15, %v4337_v35, %v2753_v42  ;;  %v2115_v41 = vsel %vm4649_vm11, %v2110_v36, %v5181_v17  ;;  %v2125_v53 = vsel %vm4649_vm11, %v2120_v13, %v2124_v43  ;;  %v4372_v21 = vld [vmem:[#allocation2 + $0x48] sm:$0xff]  ;;  %v5251_v43 = vld [vmem:[#allocation2 + $0x7c] sm:$0xf] }
  0xe7   : > { %v2182_v19 = vrot.slane %v2181_v62, 4  ;;  %v2196_v56 = vrot.slane %v2194_v38, 5  ;;  %v2192_v52 = vrot.slane %v2191_v37, 4  ;;  %v2536_v63 = vsel %vm4957_vm14, %v4102_v8, %v2535_v16 }
  0xe8   : > { %3088 = vrot.lane.b32.xlu2 %v3071_v26, %s4537_s25  ;;  %v2556_v60 = vrot.slane %v5174_v10, 5  ;;  %v1662_v24 = vshrl.u32 %v1437_v28, 16  ;;  %v2539_v17 = vsel %vm4957_vm14, %v2537_v44, %v2538_v45  ;;  %v1665_v59 = vshll.u32 %v1437_v28, 16 }
  0xe9   : > { %v1671_v0 = vshll.u32 %v5219_v31, 16  ;;  %v1675_v3 = vshrl.u32 %v5219_v31, 16  ;;  %v5241_v5 = vunpack.c.l.b16 %v2115_v41  ;;  %v4105_v11 = vrot.slane %v2466_v46, 9 }
  0xea   : > { %v1664_v7 = vrot.slane %v1662_v24, 4  ;;  %v1681_v51 = vshll.u32 %v5228_v57, 16  ;;  %v2187_v10 = vsel %vm4649_vm11, %v2182_v19, %v5192_v22  ;;  %v1667_v12 = vrot.slane %v1665_v59, 5  ;;  %v1425_v59 = vld [vmem:[#allocation2 + $0x24] sm:$0xf] }
  0xeb   : > { %v1673_v26 = vrot.slane %v1671_v0, 5  ;;  %v1677_v20 = vrot.slane %v1675_v3, 4  ;;  %v2197_v6 = vsel %vm4649_vm11, %v2192_v52, %v2196_v56  ;;  %v3296_v55 = vunpack.c.l.b16 %v2536_v63  ;;  %v1861_v52 = vld [vmem:[#allocation2 + $0x6c] sm:$0xe]  ;;  %v5273_v3 = vpop.permute.xlu1 %2756 }
  0xec   : > { %v3297_v23 = vunpack.c.l.b16 %v2539_v17  ;;  %v2559_v16 = vrot.slane %v5190_v15, 5  ;;  %v2558_v27 = vrot.slane %v2556_v60, 4  ;;  %v1668_v25 = vor.u32 %v1667_v12, %v1664_v7  ;;  %v5256_v15 = vld [vmem:[#allocation2 + $0x80] sm:$0x1] }
  0xed   : > { %3014 = vrot.lane.b32.xlu1 %v2994_v54, %s4533_s21  ;;  %3008 = vrot.lane.b32.xlu0 %v2991_v40, %s4533_s21  ;;  %v1678_v30 = vor.u32 %v1677_v20, %v1673_v26  ;;  %v1683_v33 = vrot.slane %v1681_v51, 5  ;;  %v3217_v22 = vunpack.c.l.b16 %v2125_v53  ;;  %v3222_v35 = vunpack.c.l.b16 %v2187_v10  ;;  %v2470_v51 = vld [vmem:[#allocation2 + $0x78] sm:$0xe] }
  0xee   : > { %v2271_v36 = vshrl.u32 %v2046_v9, 16  ;;  %v2274_v13 = vshll.u32 %v2046_v9, 16  ;;  %v3223_v62 = vunpack.c.l.b16 %v2197_v6  ;;  %v2557_v38 = vsel %vm4957_vm14, %v4105_v11, %v2556_v60 }
  0xef   : > { %v1669_v54 = vrot.slane %v1668_v25, 4  ;;  %v1679_v37 = vrot.slane %v1678_v30, 4  ;;  %v3327_v8 = vpack.c.b16 %v3297_v23, %v3296_v55  ;;  %v2280_v44 = vshll.u32 %v5251_v43, 16  ;;  %v1431_v25 = vld [vmem:[#allocation2 + $0x48] sm:$0xf] }
  0xf0   : > { %3190 = vrot.lane.b32.xlu2 %v4372_v21, %s4536_s24  ;;  %v2273_v40 = vrot.slane %v2271_v36, 4  ;;  %v2276_v42 = vrot.slane %v2274_v13, 5  ;;  %v2560_v28 = vsel %vm4957_vm14, %v2558_v27, %v2559_v16  ;;  %v2284_v19 = vshrl.u32 %v5251_v43, 16 }
  0xf1   : > { %v1674_v41 = vsel %vm4649_vm11, %v1669_v54, %v1673_v26  ;;  %v1684_v53 = vsel %vm4649_vm11, %v1679_v37, %v1683_v33  ;;  %v3247_v56 = vpack.c.b16 %v3217_v22, %v5241_v5  ;;  %v2282_v60 = vrot.slane %v2280_v44, 5  ;;  %v5276_v26 = vld [vmem:[#allocation2 + $0x28] sm:$0xf]  ;;  %v5290_v54 = vld [vmem:[#allocation2 + $0x2c] sm:$0x1] }
  0xf2   : > { %v2974_v46 = vunpack.c.l.b16 %v1674_v41  ;;  %v2975_v21 = vunpack.c.l.b16 %v1684_v53  ;;  %v2277_v63 = vor.u32 %v2276_v42, %v2273_v40  ;;  %v2286_v24 = vrot.slane %v2284_v19, 4  ;;  %v4347_v53 = vld [vmem:[#allocation2 + $0x84] sm:$0xff]  ;;  %v4360_v19 = vld [vmem:[#allocation2 + $0x6c] sm:$0xff] }
  0xf3   : > { %v2290_v17 = vshll.u32 %v5256_v15, 16  ;;  %v3250_v0 = vpack.c.b16 %v3223_v62, %v3222_v35  ;;  %v3302_v11 = vunpack.c.l.b16 %v2557_v38  ;;  %v3303_v7 = vunpack.c.l.b16 %v2560_v28 }
  0xf4   : > { %v2584_v5 = vrot.slane %v5251_v43, 5  ;;  %vm3423_vm1 = vcmask 64512   ;;  %v2278_v10 = vrot.slane %v2277_v63, 4  ;;  %v2287_v12 = vor.u32 %v2286_v24, %v2282_v60  ;;  %v5303_v63 = vpop.permute.xlu0 %2762 }
  0xf5   : > { %3184 = vrot.lane.b32.xlu1 %v4369_v48, %s4536_s24  ;;  %3094 = vrot.lane.b32.xlu0 %v3074_v49, %s4537_s25  ;;  %v1975_v49 = vrot.slane %v5219_v31, 5  ;;  %v2292_v31 = vrot.slane %v2290_v17, 5  ;;  %v4093_v20 = vrot.slane %v1861_v52, 9  ;;  %v1978_v48 = vrot.slane %v5228_v57, 5  ;;  %v5308_v17 = vld [vmem:[#allocation2 + $0x50] sm:$0x1] }
  0xf6   : > { %v5260_v45 = vpop.permute.xlu2 %2778  ;;  %v1518_v6 = vshrl.u32 %v1425_v59, 16  ;;  %v2998_v55 = vpack.c.b16 %v2975_v21, %v2974_v46  ;;  %v2288_v23 = vrot.slane %v2287_v12, 4  ;;  %v4109_v16 = vrot.slane %v2470_v51, 9  ;;  %v4339_v12 = vld [vmem:[#allocation2 + $0x24] sm:$0xff] }
  0xf7   : > { %v1977_v9 = vrot.slane %v1975_v49, 4  ;;  %v1521_v27 = vshll.u32 %v1425_v59, 16  ;;  %v2586_v30 = vrot.slane %v2584_v5, 4  ;;  %v2587_v33 = vrot.slane %v5256_v15, 5 }
  0xf8   : > { %3344 = vrot.lane.b32.xlu2 %v3327_v8, %s4538_s26  ;;  %v1520_v43 = vrot.slane %v1518_v6, 4  ;;  %v1527_v22 = vshll.u32 %v5276_v26, 16  ;;  %v2283_v35 = vsel %vm4649_vm11, %v2278_v10, %v2282_v60  ;;  %v2293_v57 = vsel %vm4649_vm11, %v2288_v23, %v2292_v31  ;;  %v5292_v8 = vld [vmem:[#allocation2 + $0x4c] sm:$0xf]  ;;  %v4343_v31 = vld [vmem:[#allocation2 + $0x54] sm:$0xff] }
  0xf9   : > { %v1523_v36 = vrot.slane %v1521_v27, 5  ;;  %v1531_v13 = vshrl.u32 %v5276_v26, 16  ;;  %v3330_v62 = vpack.c.b16 %v3303_v7, %v3302_v11  ;;  %v1976_v38 = vsel %vm4957_vm14, %v4093_v20, %v1975_v49  ;;  %v4338_v49 = vld [vmem:[#allocation2 + $0x18] sm:$0xff] }
  0xfa   : > { %v1529_v37 = vrot.slane %v1527_v22, 5  ;;  %v1590_v15 = vshrl.u32 %v1431_v25, 16  ;;  %v1979_v42 = vsel %vm4957_vm14, %v1977_v9, %v1978_v48  ;;  %v1593_v41 = vshll.u32 %v1431_v25, 16 }
  0xfb   : > { %v1524_v44 = vor.u32 %v1523_v36, %v1520_v43  ;;  %v1533_v28 = vrot.slane %v1531_v13, 4  ;;  %v3230_v46 = vunpack.c.l.b16 %v2283_v35  ;;  %v3231_v21 = vunpack.c.l.b16 %v2293_v57 }
  0xfc   : > { %v2585_v52 = vsel %vm4957_vm14, %v4109_v16, %v2584_v5  ;;  %v2588_v60 = vsel %vm4957_vm14, %v2586_v30, %v2587_v33  ;;  %v1537_v24 = vshll.u32 %v5290_v54, 16  ;;  %v1592_v59 = vrot.slane %v1590_v15, 4  ;;  %v1855_v5 = vld [vmem:[#allocation2 + $0x24] sm:$0xe]  ;;  %v4376_v15 = vld [vmem:[#allocation2 + $0x78] sm:$0xff] }
  0xfd   : > { %3270 = vrot.lane.b32.xlu1 %v3250_v0, %s4535_s23  ;;  %3264 = vrot.lane.b32.xlu0 %v3247_v56, %s4535_s23  ;;  %v1599_v0 = vshll.u32 %v5292_v8, 16  ;;  %v1525_v11 = vrot.slane %v1524_v44, 4  ;;  %v1534_v7 = vor.u32 %v1533_v28, %v1529_v37  ;;  %v1595_v51 = vrot.slane %v1593_v41, 5  ;;  %v1858_v44 = vld [vmem:[#allocation2 + $0x48] sm:$0xe] }
  0xfe   : > { %v1603_v10 = vshrl.u32 %v5292_v8, 16  ;;  %v3054_v20 = vunpack.c.l.b16 %v1976_v38  ;;  %v3055_v9 = vunpack.c.l.b16 %v1979_v42  ;;  %v3310_v48 = vunpack.c.l.b16 %v2585_v52  ;;  %v5336_v38 = vld [vmem:[#allocation2 + $0x34] sm:$0xf] }
  0xff   : > { %v2833_v40 = vpop.permute.xlu2 %2832  ;;  %v5312_v6 = vrot.slane %v1599_v0, 5  ;;  %v3311_v23 = vunpack.c.l.b16 %v2588_v60  ;;  %v1933_v27 = vrot.slane %v5276_v26, 5  ;;  %v5318_v25 = vsel %vm3374_vm15, %v4347_v53, %v5221_v18  ;;  %v2034_v26 = vld [vmem:[#allocation2 + $0x30] sm:$0xf] }
 0x100   : > { %3022 = vrot.lane.b32.xlu2 %v2998_v55, %s4533_s21  ;;  %v5299_v56 = vsel %vm3423_vm1, %v5217_v50, %v2833_v40  ;;  %v2765_v50 = vpop.permute.xlu1 %2764  ;;  %v3254_v55 = vpack.c.b16 %v3231_v21, %v3230_v46  ;;  %v1605_v16 = vrot.slane %v1603_v10, 4  ;;  %v5322_v30 = vsel %vm3374_vm15, %v4338_v49, %v5239_v4 }
 0x101   : > { %v1609_v33 = vshll.u32 %v5308_v17, 16  ;;  %v4087_v43 = vrot.slane %v1855_v5, 9  ;;  %v1530_v22 = vsel %vm4649_vm11, %v1525_v11, %v1529_v37  ;;  %v1535_v35 = vrot.slane %v1534_v7, 4  ;;  %v5357_v11 = vld [vmem:[#allocation2 + $0x58] sm:$0xf] }
 0x102   : > { %v1539_v57 = vrot.slane %v1537_v24, 5  ;;  %v1596_v36 = vor.u32 %v1595_v51, %v1592_v59  ;;  %v5330_v18 = vsel %vm3374_vm15, %v4339_v12, %v5273_v3  ;;  %v5333_v13 = vsel %vm3374_vm15, %v4343_v31, %v2765_v50  ;;  %v2040_v24 = vld [vmem:[#allocation2 + $0x54] sm:$0xf]  ;;  %v4357_v51 = vld [vmem:[#allocation2 + $0x48] sm:$0xff] }
 0x103   : > { %v3078_v4 = vpack.c.b16 %v3055_v9, %v3054_v20  ;;  %v5339_v37 = vpack.c.b16 %v3311_v23, %v3310_v48  ;;  %v1935_v40 = vrot.slane %v1933_v27, 4  ;;  %v1936_v42 = vrot.slane %v5290_v54, 5  ;;  %v5350_v54 = vpop.permute.xlu0 %2768 }
 0x104   : > { %v1954_v3 = vrot.slane %v5292_v8, 5  ;;  %v5343_v28 = vunpack.c.l.b16 %v1530_v22  ;;  %v1611_v41 = vrot.slane %v1609_v33, 5  ;;  %v1934_v53 = vsel %vm4957_vm14, %v4087_v43, %v1933_v27 }
 0x105   : > { %2942 = vrot.lane.b32.xlu1 %v4360_v19, %s4534_s22  ;;  %3350 = vrot.lane.b32.xlu0 %v3330_v62, %s4538_s26  ;;  %v1606_v62 = vor.u32 %v1605_v16, %v5312_v6  ;;  %v2127_v19 = vshrl.u32 %v2034_v26, 16  ;;  %v1540_v21 = vsel %vm4649_vm11, %v1535_v35, %v1539_v57  ;;  %v1597_v52 = vrot.slane %v1596_v36, 4  ;;  %v4354_v57 = vld [vmem:[#allocation2 + $0x24] sm:$0xff] }
 0x106   : > { %v2130_v49 = vshll.u32 %v2034_v26, 16  ;;  %v2136_v60 = vshll.u32 %v5336_v38, 16  ;;  %v4090_v0 = vrot.slane %v1858_v44, 9  ;;  %v1957_v50 = vrot.slane %v5308_v17, 5  ;;  %v5378_v26 = vld [vmem:[#allocation2 + $0x5c] sm:$0x1] }
 0x107   : > { %v1607_v59 = vrot.slane %v1606_v62, 4  ;;  %v1937_v10 = vsel %vm4957_vm14, %v1935_v40, %v1936_v42  ;;  %v1956_v5 = vrot.slane %v1954_v3, 4  ;;  %v2129_v12 = vrot.slane %v2127_v19, 4  ;;  %v4346_v19 = vld [vmem:[#allocation2 + $0x78] sm:$0xff] }
 0x108   : > { %3278 = vrot.lane.b32.xlu2 %v3254_v55, %s4535_s23  ;;  %v2771_v7 = vpop.permute.xlu1 %2770  ;;  %v2132_v31 = vrot.slane %v2130_v49, 5  ;;  %v2138_v20 = vrot.slane %v2136_v60, 5  ;;  %v2140_v9 = vshrl.u32 %v5336_v38, 16  ;;  %v2199_v48 = vshrl.u32 %v2040_v24, 16  ;;  %v5367_v55 = vld [vmem:[#allocation2 + $0x38] sm:$0x1] }
 0x109   : > { %v1602_v17 = vsel %vm4649_vm11, %v1597_v52, %v5312_v6  ;;  %v2202_v16 = vshll.u32 %v2040_v24, 16  ;;  %v2208_v27 = vshll.u32 %v5357_v11, 16  ;;  %v1612_v33 = vsel %vm4649_vm11, %v1607_v59, %v1611_v41 }
 0x10a   : > { %v2839_v46 = vpop.permute.xlu2 %2838  ;;  %v2133_v23 = vor.u32 %v2132_v31, %v2129_v12  ;;  %v3043_v43 = vunpack.c.l.b16 %v1937_v10  ;;  %v2142_v22 = vrot.slane %v2140_v9, 4  ;;  %v2212_v35 = vshrl.u32 %v5357_v11, 16 }
 0x10b   : > { %v5354_v8 = vsel %vm3423_vm1, %v5199_v34, %v2839_v46  ;;  %v3042_v34 = vunpack.c.l.b16 %v1934_v53  ;;  %v1955_v36 = vsel %vm4957_vm14, %v4090_v0, %v1954_v3  ;;  %v1958_v6 = vsel %vm4957_vm14, %v1956_v5, %v1957_v50  ;;  %v2464_v53 = vld [vmem:[#allocation2 + $0x30] sm:$0xe] }
 0x10c   : > { %v2204_v62 = vrot.slane %v2202_v16, 5  ;;  %v5380_v40 = vunpack.c.l.b16 %v1540_v21  ;;  %v2134_v42 = vrot.slane %v2133_v23, 4  ;;  %v2143_v44 = vor.u32 %v2142_v22, %v2138_v20  ;;  %v2467_v16 = vld [vmem:[#allocation2 + $0x54] sm:$0xe]  ;;  %v5410_v22 = vld [vmem:[#allocation2 + $0x7c] sm:$0xf] }
 0x10d   : > { %3198 = vrot.lane.b32.xlu1 %v4376_v15, %s4536_s24  ;;  %3102 = vrot.lane.b32.xlu0 %v3078_v4, %s4537_s25  ;;  %v2201_v4 = vrot.slane %v2199_v48, 4  ;;  %v4342_v15 = vld [vmem:[#allocation2 + $0x48] sm:$0xff]  ;;  %v2146_v41 = vshll.u32 %v5367_v55, 16  ;;  %v2968_v52 = vunpack.c.l.b16 %v1602_v17  ;;  %v2969_v49 = vunpack.c.l.b16 %v1612_v33 }
 0x10e   : > { %v5383_v3 = vrot.slane %v2208_v27, 5  ;;  %v2214_v60 = vrot.slane %v2212_v35, 4  ;;  %v3048_v59 = vunpack.c.l.b16 %v1955_v36  ;;  %v3049_v0 = vunpack.c.l.b16 %v1958_v6  ;;  %v1439_v27 = vld [vmem:[#allocation2 + $0x78] sm:$0xf] }
 0x10f   : > { %v2218_v21 = vshll.u32 %v5378_v26, 16  ;;  %v3072_v50 = vpack.c.b16 %v3043_v43, %v3042_v34  ;;  %v4103_v10 = vrot.slane %v2464_v53, 9  ;;  %v2542_v5 = vrot.slane %v5336_v38, 5  ;;  %v4349_v53 = vld [vmem:[#allocation2 + $0x9c] sm:$0xff] }
 0x110   : > { %2936 = vrot.lane.b32.xlu2 %v4357_v51, %s4534_s22  ;;  %v2205_v51 = vor.u32 %v2204_v62, %v2201_v4  ;;  %v5394_v12 = vsel %vm3374_vm15, %v4342_v15, %v5303_v63  ;;  %v2139_v31 = vsel %vm4649_vm11, %v2134_v42, %v2138_v20  ;;  %v2144_v9 = vrot.slane %v2143_v44, 4  ;;  %v1445_v62 = vld [vmem:[#allocation2 + $0x9c] sm:$0xf] }
 0x111   : > { %v2148_v48 = vrot.slane %v2146_v41, 5  ;;  %v3407_v34 = vsel %vm3374_vm15, %v4346_v19, %v2771_v7  ;;  %v2992_v38 = vpack.c.b16 %v5380_v40, %v5343_v28  ;;  %v2995_v23 = vpack.c.b16 %v2969_v49, %v2968_v52  ;;  %v5424_v41 = vld [vmem:[#allocation2 + $0xa0] sm:$0xf] }
 0x112   : > { %v2845_v46 = vpop.permute.xlu2 %2844  ;;  %v2215_v63 = vor.u32 %v2214_v60, %v5383_v3  ;;  %v5406_v33 = vpack.c.b16 %v3049_v0, %v3048_v59  ;;  %v2545_v43 = vrot.slane %v5367_v55, 5  ;;  %v2563_v20 = vrot.slane %v5357_v11, 5  ;;  %v4373_v60 = vld [vmem:[#allocation2 + $0x54] sm:$0xff]  ;;  %v5431_v0 = vld [vmem:[#allocation2 + $0x80] sm:$0x1] }
 0x113   : > { %v5387_v24 = vsel %vm3423_vm1, %v5333_v13, %v2845_v46  ;;  %v5398_v13 = vpop.permute.xlu0 %2774  ;;  %v5413_v7 = vunpack.c.l.b16 %v2139_v31  ;;  %v2206_v35 = vrot.slane %v2205_v51, 4  ;;  %v5417_v28 = vsel %vm4957_vm14, %v4103_v10, %v2542_v5 }
 0x114   : > { %v2149_v36 = vsel %vm4649_vm11, %v2144_v9, %v2148_v48  ;;  %v4106_v6 = vrot.slane %v2467_v16, 9  ;;  %v1686_v4 = vshrl.u32 %v1439_v27, 16  ;;  %v1689_v55 = vshll.u32 %v1439_v27, 16 }
 0x115   : > { %2930 = vrot.lane.b32.xlu1 %v4354_v57, %s4534_s22  ;;  %3358 = vrot.lane.b32.xlu0 %v5339_v37, %s4538_s26  ;;  %v2220_v37 = vrot.slane %v2218_v21, 5  ;;  %v2544_v57 = vrot.slane %v2542_v5, 4  ;;  %v2216_v15 = vrot.slane %v2215_v63, 4  ;;  %v2566_v40 = vrot.slane %v5378_v26, 5 }
 0x116   : > { %v1695_v42 = vshll.u32 %v5410_v22, 16  ;;  %v1699_v44 = vshrl.u32 %v5410_v22, 16  ;;  %v2565_v46 = vrot.slane %v2563_v20, 4  ;;  %v1688_v52 = vrot.slane %v1686_v4, 4 }
 0x117   : > { %v2777_v17 = vpop.permute.xlu1 %2776  ;;  %v1691_v49 = vrot.slane %v1689_v55, 5  ;;  %v3298_v59 = vunpack.c.l.b16 %v5417_v28  ;;  %v5436_v51 = vunpack.c.l.b16 %v2149_v36  ;;  %v2546_v10 = vsel %vm4957_vm14, %v2544_v57, %v2545_v43  ;;  %v1862_v57 = vld [vmem:[#allocation2 + $0x78] sm:$0xe] }
 0x118   : > { %3090 = vrot.lane.b32.xlu2 %v3072_v50, %s4537_s25  ;;  %v5433_v26 = vrot.slane %v1695_v42, 5  ;;  %v1701_v21 = vrot.slane %v1699_v44, 4  ;;  %v1758_v50 = vshrl.u32 %v1445_v62, 16  ;;  %v1761_v5 = vshll.u32 %v1445_v62, 16  ;;  %v4350_v62 = vld [vmem:[#allocation2 + $0xa8] sm:$0xff] }
 0x119   : > { %v1767_v31 = vshll.u32 %v5424_v41, 16  ;;  %v2211_v48 = vsel %vm4649_vm11, %v2206_v35, %v5383_v3  ;;  %v2564_v16 = vsel %vm4957_vm14, %v4106_v6, %v2563_v20  ;;  %v2567_v27 = vsel %vm4957_vm14, %v2565_v46, %v2566_v40  ;;  %v4345_v3 = vld [vmem:[#allocation2 + $0x6c] sm:$0xff] }
 0x11a   : > { %v2851_v11 = vpop.permute.xlu2 %2850  ;;  %v1702_v43 = vor.u32 %v1701_v21, %v5433_v26  ;;  %v1705_v28 = vshll.u32 %v5431_v0, 16  ;;  %v3416_v35 = vsel %vm3374_vm15, %v4349_v53, %v2777_v17  ;;  %v3299_v36 = vunpack.c.l.b16 %v2546_v10 }
 0x11b   : > { %v5427_v19 = vsel %vm3423_vm1, %v3407_v34, %v2851_v11  ;;  %v2221_v34 = vsel %vm4649_vm11, %v2216_v15, %v2220_v37  ;;  %v4370_v37 = vld [vmem:[#allocation2 + $0x30] sm:$0xff]  ;;  %v1760_v4 = vrot.slane %v1758_v50, 4  ;;  %v1763_v55 = vrot.slane %v1761_v5, 5  ;;  %v5459_v15 = vld [vmem:[#allocation2 + $0xa4] sm:$0x1] }
 0x11c   : > { %v4348_v11 = vld [vmem:[#allocation2 + $0x90] sm:$0xff]  ;;  %v3224_v20 = vunpack.c.l.b16 %v2211_v48  ;;  %v3225_v6 = vunpack.c.l.b16 %v2221_v34  ;;  %v5461_v40 = vrot.slane %v1767_v31, 5  ;;  %v3304_v46 = vunpack.c.l.b16 %v2564_v16 }
 0x11d   : > { %3016 = vrot.lane.b32.xlu1 %v2995_v23, %s4533_s21  ;;  %3010 = vrot.lane.b32.xlu0 %v2992_v38, %s4533_s21  ;;  %v1692_v23 = vor.u32 %v1691_v49, %v1688_v52  ;;  %v1771_v38 = vshrl.u32 %v5424_v41, 16  ;;  %v3305_v52 = vunpack.c.l.b16 %v2567_v27  ;;  %v4094_v17 = vrot.slane %v1862_v57, 9  ;;  %v1865_v57 = vld [vmem:[#allocation2 + $0x9c] sm:$0xe] }
 0x11e   : > { %v5470_v21 = vrot.slane %v1705_v28, 5  ;;  %v1982_v50 = vrot.slane %v5410_v22, 5  ;;  %v5475_v10 = vsel %vm3374_vm15, %v4345_v3, %v5350_v54  ;;  %v3328_v5 = vpack.c.b16 %v3299_v36, %v3298_v59  ;;  %v2048_v59 = vld [vmem:[#allocation2 + $0x84] sm:$0xf]  ;;  %v5511_v3 = vld [vmem:[#allocation2 + $0x88] sm:$0xf] }
 0x11f   : > { %v5441_v9 = vpop.permute.xlu1 %2830  ;;  %v5449_v63 = vpop.permute.xlu0 %2780  ;;  %v1773_v42 = vrot.slane %v1771_v38, 4  ;;  %v5463_v49 = vrot.slane %v1692_v23, 4  ;;  %v1764_v31 = vor.u32 %v1763_v55, %v1760_v4  ;;  %v1777_v48 = vshll.u32 %v5459_v15, 16  ;;  %v3658_v4 = vld [vmem:[%s6437_s1 + $0x10] sm:$0x3] }
 0x120   : > { %6453 = vst [vmem:[#allocation3_spill] sm:$0xff] %v5449_v63  ;;  %3192 = vrot.lane.b32.xlu2 %v4373_v60, %s4536_s24  ;;  %v5468_v60 = vrot.slane %v1702_v43, 4  ;;  %v5481_v34 = vsel %vm3374_vm15, %v4350_v62, %v5260_v45  ;;  %v5485_v23 = vsel %vm3374_vm15, %v4348_v11, %v5398_v13  ;;  %v3248_v54 = vpack.c.b16 %v5436_v51, %v5413_v7 }
 0x121   : > { %v1774_v22 = vor.u32 %v1773_v42, %v5461_v40  ;;  %v3251_v16 = vpack.c.b16 %v3225_v6, %v3224_v20  ;;  %v5492_v27 = vpack.c.b16 %v3305_v52, %v3304_v46  ;;  %v1698_v45 = vsel %vm4649_vm11, %v5463_v49, %v5433_v26  ;;  %v5531_v42 = vld [vmem:[#allocation2 + $0x8c] sm:$0x1] }
 0x122   : > { %v2857_v44 = vpop.permute.xlu2 %2856  ;;  %v5500_v13 = vsel %vm4957_vm14, %v4094_v17, %v1982_v50  ;;  %v1708_v51 = vsel %vm4649_vm11, %v5468_v60, %v5470_v21  ;;  %v1984_v43 = vrot.slane %v1982_v50, 4  ;;  %v1985_v28 = vrot.slane %v5431_v0, 5 }
 0x123   : > { %v5466_v53 = vsel %vm3423_vm1, %v3416_v35, %v2857_v44  ;;  %v2295_v36 = vshrl.u32 %v2048_v59, 16  ;;  %v5525_v55 = vrot.slane %v1774_v22, 4  ;;  %v3056_v0 = vunpack.c.l.b16 %v5500_v13 }
 0x124   : > { %v2003_v62 = vrot.slane %v5424_v41, 5  ;;  %v2298_v11 = vshll.u32 %v2048_v59, 16  ;;  %v4097_v6 = vrot.slane %v1865_v57, 9  ;;  %v2304_v46 = vshll.u32 %v5511_v3, 16  ;;  %v4364_v41 = vld [vmem:[#allocation2 + $0x9c] sm:$0xff] }
 0x125   : > { %3186 = vrot.lane.b32.xlu1 %v4370_v37, %s4536_s24  ;;  %3096 = vrot.lane.b32.xlu0 %v5406_v33, %s4537_s25  ;;  %v5518_v37 = vrot.slane %v1764_v31, 4  ;;  %v2297_v44 = vrot.slane %v2295_v36, 4  ;;  %v2308_v52 = vshrl.u32 %v5511_v3, 16  ;;  %v1986_v17 = vsel %vm4957_vm14, %v1984_v43, %v1985_v28  ;;  %v5543_v43 = vld [vmem:[#allocation2 + $0xac] sm:$0xf] }
 0x126   : > { %v2006_v50 = vrot.slane %v5459_v15, 5  ;;  %v3668_v31 = vunpack.c.l.b16 %v3658_v4  ;;  %vm3707_vm2 = vcmask 1041408   ;;  %v2314_v57 = vshll.u32 %v5531_v42, 16 }
 0x127   : > { %v2837_v38 = vpop.permute.xlu1 %2836  ;;  %v2835_v33 = vpop.permute.xlu0 %2834  ;;  %v2310_v22 = vrot.slane %v2308_v52, 4  ;;  %v3057_v4 = vunpack.c.l.b16 %v1986_v17  ;;  %v5558_v52 = vld [vmem:[#allocation2 + $0xb0] sm:$0x1]  ;;  %v2380_v17 = vshrl.u32 %v5543_v43, 16  ;;  %v2977_v26 = vunpack.c.l.b16 %v1708_v51 }
 0x128   : > { %v5504_v7 = vsel %vm3423_vm1, %v5330_v18, %v2837_v38  ;;  %v5515_v35 = vsel %vm3423_vm1, %v5322_v30, %v2835_v33  ;;  %3346 = vrot.lane.b32.xlu2 %v3328_v5, %s4538_s26  ;;  %v5520_v18 = vrot.slane %v1777_v48, 5  ;;  %v2054_v30 = vld [vmem:[#allocation2 + $0xa8] sm:$0xf]  ;;  %v2300_v5 = vrot.slane %v2298_v11, 5 }
 0x129   : > { %v5539_v48 = vrot.slane %v2304_v46, 5  ;;  %v2367_v59 = vshrl.u32 %v2054_v30, 16  ;;  %v2005_v38 = vrot.slane %v2003_v62, 4  ;;  %v3671_v36 = vpack.c.b16 %v3668_v31, %v3668_v31 }
 0x12a   : > { %v5529_v20 = vpop.permute.xlu2 %3006  ;;  %v2301_v33 = vor.u32 %v2300_v5, %v2297_v44  ;;  %v1780_v28 = vsel %vm4649_vm11, %v5525_v55, %v5520_v18  ;;  %v2370_v31 = vshll.u32 %v2054_v30, 16  ;;  %v2004_v18 = vsel %vm4957_vm14, %v4097_v6, %v2003_v62  ;;  %v2471_v30 = vld [vmem:[#allocation2 + $0x84] sm:$0xe] }
 0x12b   : > { %v3709_v46 = vsel %vm3707_vm2, %v3671_v36, 0  ;;  %v2369_v5 = vrot.slane %v2367_v59, 4  ;;  %v2376_v55 = vshll.u32 %v5543_v43, 16  ;;  %v2316_v59 = vrot.slane %v2314_v57, 5 }
 0x12c   : > { %3716 = vmatpush.bf16.msra.mxu0 %v3709_v46  ;;  %v2372_v36 = vrot.slane %v2370_v31, 5  ;;  %4481 = vmatpush.bf16.msra.mxu1 %v3709_v46  ;;  %v2591_v57 = vrot.slane %v5511_v3, 5  ;;  %v3062_v49 = vunpack.c.l.b16 %v2004_v18  ;;  %v5616_v18 = vsel %vm3423_vm1, %v5214_v47, %v5441_v9 }
 0x12d   : > { %3272 = vrot.lane.b32.xlu1 %v3251_v16, %s4535_s23  ;;  %3266 = vrot.lane.b32.xlu0 %v3248_v54, %s4535_s23  ;;  %v1770_v16 = vsel %vm4649_vm11, %v5518_v37, %v5461_v40  ;;  %v2311_v54 = vor.u32 %v2310_v22, %v5539_v48  ;;  %v4361_v37 = vld [vmem:[#allocation2 + $0x78] sm:$0xff]  ;;  %v2302_v22 = vrot.slane %v2301_v33, 4  ;;  %v5576_v6 = vrot.slane %v2376_v55, 5 }
 0x12e   : > { %4482 = vmatpush.bf16.msra.mxu2 %v3709_v46  ;;  %4483 = vmatpush.bf16.msra.mxu3 %v3709_v46  ;;  %v4110_v33 = vrot.slane %v2471_v30, 9  ;;  %v2982_v31 = vunpack.c.l.b16 %v1770_v16  ;;  %v3079_v55 = vpack.c.b16 %v3057_v4, %v3056_v0  ;;  %vm3456_vm4 = vcmask 97280  }
 0x12f   : > { %v2843_v15 = vpop.permute.xlu1 %2842  ;;  %v2841_v11 = vpop.permute.xlu0 %2840  ;;  %v2312_v62 = vrot.slane %v2311_v54, 4  ;;  %v2983_v54 = vunpack.c.l.b16 %v1780_v28  ;;  %v2307_v13 = vsel %vm4649_vm11, %v2302_v22, %v5539_v48  ;;  %v2593_v48 = vrot.slane %v2591_v57, 4 }
 0x130   : > { %v5556_v44 = vsel %vm3423_vm1, %v5394_v12, %v2843_v15  ;;  %v5562_v40 = vsel %vm3423_vm1, %v5206_v58, %v2841_v11  ;;  %2950 = vrot.lane.b32.xlu2 %v4364_v41, %s4534_s22  ;;  %v4385_v12 = vld [vmem:[%s6437_s1 + $0x8] sm:$0xff]  ;;  %v2007_v58 = vsel %vm4957_vm14, %v2005_v38, %v2006_v50  ;;  %v2382_v15 = vrot.slane %v2380_v17, 4  ;;  %v4384_v17 = vld [vmem:[%s6437_s1] sm:$0xff] }
 0x131   : > { %v2386_v11 = vshll.u32 %v5558_v52, 16  ;;  %v2976_v50 = vunpack.c.l.b16 %v1698_v45  ;;  %v2373_v38 = vor.u32 %v2372_v36, %v2369_v5  ;;  %3717 = vmatpush.bf16.msra.mxu0 %v4385_v12  ;;  %v3063_v45 = vunpack.c.l.b16 %v2007_v58  ;;  %4484 = vmatpush.bf16.msra.mxu1 %v4385_v12  ;;  %v2474_v5 = vld [vmem:[#allocation2 + $0xa8] sm:$0xe]  ;;  %v5630_v36 = vld [vmem:[#allocation2 + $0x34] sm:$0xf] }
 0x132   : > { %v5574_v41 = vpop.permute.xlu2 %3262  ;;  %v2383_v46 = vor.u32 %v2382_v15, %v5576_v6  ;;  %v2317_v0 = vsel %vm4649_vm11, %v2312_v62, %v2316_v59  ;;  %4485 = vmatpush.bf16.msra.mxu2 %v4385_v12  ;;  %4486 = vmatpush.bf16.msra.mxu3 %v4385_v12  ;;  %v5611_v51 = vsel %vm4957_vm14, %v4110_v33, %v2591_v57  ;;  %v5626_v22 = vunpack.c.l.b16 %v2307_v13  ;;  %v1433_v15 = vld [vmem:[#allocation2 + $0x54] sm:$0xf]  ;;  %v5643_v57 = vld [vmem:[#allocation2 + $0x58] sm:$0xf] }
 0x133   : > { %v2374_v16 = vrot.slane %v2373_v38, 4  ;;  %v2388_v28 = vrot.slane %v2386_v11, 5  ;;  %v3002_v12 = vpack.c.b16 %v2983_v54, %v2982_v31  ;;  %v2999_v30 = vpack.c.b16 %v2977_v26, %v2976_v50 }
 0x134   : > { %v2384_v21 = vrot.slane %v2383_v46, 4  ;;  %v5624_v58 = vpack.c.b16 %v3063_v45, %v3062_v49  ;;  %v5628_v59 = vunpack.c.l.b16 %v2317_v0  ;;  %v3312_v9 = vunpack.c.l.b16 %v5611_v51 }
 0x135   : > { %2944 = vrot.lane.b32.xlu1 %v4361_v37, %s4534_s22  ;;  %3352 = vrot.lane.b32.xlu0 %v5492_v27, %s4538_s26  ;;  %v2594_v27 = vrot.slane %v5531_v42, 5  ;;  %v1427_v37 = vld [vmem:[#allocation2 + $0x30] sm:$0xf]  ;;  %v2615_v38 = vrot.slane %v5558_v52, 5  ;;  %v1555_v46 = vshrl.u32 %v5630_v36, 16  ;;  %v1614_v49 = vshrl.u32 %v1433_v15, 16 }
 0x136   : > { %3718 = vmatpush.bf16.msra.mxu0 %v4384_v17  ;;  %4487 = vmatpush.bf16.msra.mxu1 %v4384_v17  ;;  %v1542_v62 = vshrl.u32 %v1427_v37, 16  ;;  %v2389_v11 = vsel %vm4649_vm11, %v2384_v21, %v2388_v28  ;;  %v1545_v33 = vshll.u32 %v1427_v37, 16  ;;  %v1617_v45 = vshll.u32 %v1433_v15, 16 }
 0x137   : > { %v2849_v3 = vpop.permute.xlu1 %2848  ;;  %v2847_v4 = vpop.permute.xlu0 %2846  ;;  %4488 = vmatpush.bf16.msra.mxu2 %v4384_v17  ;;  %4489 = vmatpush.bf16.msra.mxu3 %v4384_v17  ;;  %v2595_v50 = vsel %vm4957_vm14, %v2593_v48, %v2594_v27  ;;  %v1623_v28 = vshll.u32 %v5643_v57, 16  ;;  %v1616_v48 = vrot.slane %v1614_v49, 4  ;;  %v3255_v49 = vpack.c.b16 %v5628_v59, %v5626_v22 }
 0x138   : > { %v5607_v60 = vsel %vm3423_vm1, %v5475_v10, %v2849_v3  ;;  %v5620_v42 = vsel %vm3423_vm1, %v5210_v29, %v2847_v4  ;;  %3104 = vrot.lane.b32.xlu2 %v3079_v55, %s4537_s25  ;;  %v2612_v10 = vrot.slane %v5543_v43, 5  ;;  %v2379_v29 = vsel %vm4649_vm11, %v2374_v16, %v5576_v6  ;;  %v4380_v6 = vld [vmem:[#allocation2 + $0xa8] sm:$0xff]  ;;  %v5653_v3 = vld [vmem:[#allocation2 + $0x38] sm:$0x1] }
 0x139   : > { %v4113_v43 = vrot.slane %v2474_v5, 9  ;;  %v1544_v54 = vrot.slane %v1542_v62, 4  ;;  %v1551_v55 = vshll.u32 %v5630_v36, 16  ;;  %v5649_v17 = vunpack.c.l.b16 %v2379_v29  ;;  %v1856_v5 = vld [vmem:[#allocation2 + $0x30] sm:$0xe] }
 0x13a   : > { %v5632_v47 = vpop.permute.xlu2 %2934  ;;  %v2614_v31 = vrot.slane %v2612_v10, 4  ;;  %v1547_v26 = vrot.slane %v1545_v33, 5  ;;  %v1557_v16 = vrot.slane %v1555_v46, 4  ;;  %v3313_v21 = vunpack.c.l.b16 %v2595_v50  ;;  %v5669_v29 = vld [vmem:[#allocation2 + $0x5c] sm:$0x1] }
 0x13b   : > { %v2613_v13 = vsel %vm4957_vm14, %v4113_v43, %v2612_v10  ;;  %v1553_v0 = vrot.slane %v1551_v55, 5  ;;  %v5665_v10 = vunpack.c.l.b16 %v2389_v11  ;;  %v1561_v15 = vshll.u32 %v5653_v3, 16 }
 0x13c   : > { %v1548_v51 = vor.u32 %v1547_v26, %v1544_v54  ;;  %v3318_v43 = vunpack.c.l.b16 %v2613_v13  ;;  %v1627_v50 = vshrl.u32 %v5643_v57, 16  ;;  %v5675_v55 = vrot.slane %v1623_v28, 5  ;;  %v2036_v26 = vld [vmem:[#allocation2 + $0x3c] sm:$0xf]  ;;  %v1859_v28 = vld [vmem:[#allocation2 + $0x54] sm:$0xe] }
 0x13d   : > { %3030 = vrot.lane.b32.xlu1 %v3002_v12, %s4533_s21  ;;  %3024 = vrot.lane.b32.xlu0 %v2999_v30, %s4533_s21  ;;  %v4377_v12 = vld [vmem:[#allocation2 + $0x84] sm:$0xff]  ;;  %v2616_v30 = vsel %vm4957_vm14, %v2614_v31, %v2615_v38  ;;  %v1558_v62 = vor.u32 %v1557_v16, %v1553_v0  ;;  %v4088_v11 = vrot.slane %v1856_v5, 9  ;;  %v1633_v38 = vshll.u32 %v5669_v29, 16 }
 0x13e   : > { %v1629_v46 = vrot.slane %v1627_v50, 4  ;;  %v1940_v31 = vrot.slane %v5630_v36, 5  ;;  %vm3489_vm6 = vcmask 130048   ;;  %v5688_v16 = vrot.slane %v1561_v15, 5 }
 0x13f   : > { %v2855_v52 = vpop.permute.xlu1 %2854  ;;  %v2853_v27 = vpop.permute.xlu0 %2852  ;;  %v5686_v13 = vrot.slane %v1558_v62, 4  ;;  %vm3522_vm7 = vcmask 162816   ;;  %vm3555_vm8 = vcmask 195584   ;;  %v1943_v5 = vrot.slane %v5653_v3, 5 }
 0x140   : > { %v5658_v4 = vsel %vm3423_vm1, %v5485_v23, %v2855_v52  ;;  %v5662_v37 = vsel %vm3423_vm1, %v5318_v25, %v2853_v27  ;;  %3206 = vrot.lane.b32.xlu2 %v4380_v6, %s4536_s24  ;;  %v1619_v23 = vrot.slane %v1617_v45, 5  ;;  %v1549_v25 = vrot.slane %v1548_v51, 4 }
 0x141   : > { %v3319_v6 = vunpack.c.l.b16 %v2616_v30  ;;  %v3335_v45 = vpack.c.b16 %v3313_v21, %v3312_v9  ;;  %v3258_v52 = vpack.c.b16 %v5665_v10, %v5649_v17  ;;  %v1630_v59 = vor.u32 %v1629_v46, %v5675_v55 }
 0x142   : > { %v5673_v33 = vpop.permute.xlu2 %3088  ;;  %v1620_v54 = vor.u32 %v1619_v23, %v1616_v48  ;;  %v1554_v22 = vsel %vm4649_vm11, %v1549_v25, %v1553_v0  ;;  %v2151_v9 = vshrl.u32 %v2036_v26, 16  ;;  %v1635_v51 = vrot.slane %v1633_v38, 5 }
 0x143   : > { %v5699_v21 = vpack.c.b16 %v3319_v6, %v3318_v43  ;;  %v1942_v48 = vrot.slane %v1940_v31, 4  ;;  %v4091_v30 = vrot.slane %v1859_v28, 9  ;;  %v1961_v23 = vrot.slane %v5643_v57, 5 }
 0x144   : > { %v5690_v36 = vrot.slane %v1620_v54, 4  ;;  %v1564_v43 = vsel %vm4649_vm11, %v5686_v13, %v5688_v16  ;;  %v5716_v3 = vunpack.c.l.b16 %v1554_v22  ;;  %vm3588_vm12 = vcmask 228352  }
 0x145   : > { %3200 = vrot.lane.b32.xlu1 %v4377_v12, %s4536_s24  ;;  %3110 = vrot.lane.b32.xlu0 %v5624_v58, %s4537_s25  ;;  %v5697_v58 = vsel %vm4957_vm14, %v4088_v11, %v1940_v31  ;;  %v5702_v12 = vld [vmem:[#allocation2 + $0x40] sm:$0xf]  ;;  %v1631_v57 = vrot.slane %v1630_v59, 4  ;;  %v2153_v50 = vrot.slane %v2151_v9, 4  ;;  %v2154_v25 = vshll.u32 %v2036_v26, 16 }
 0x146   : > { %v3044_v62 = vunpack.c.l.b16 %v5697_v58  ;;  %v2160_v54 = vshll.u32 %v5702_v12, 16  ;;  %v2042_v11 = vld [vmem:[#allocation2 + $0x60] sm:$0xf]  ;;  %v1944_v46 = vsel %vm4957_vm14, %v1942_v48, %v1943_v5  ;;  %v2164_v38 = vshrl.u32 %v5702_v12, 16  ;;  %v5734_v31 = vld [vmem:[#allocation2 + $0x64] sm:$0xf] }
 0x147   : > { %v2927_v27 = vpop.permute.xlu1 %2926  ;;  %v2859_v17 = vpop.permute.xlu0 %2858  ;;  %v1962_v26 = vsel %vm4957_vm14, %v4091_v30, %v1961_v23  ;;  %v1963_v13 = vrot.slane %v1961_v23, 4  ;;  %v2156_v16 = vrot.slane %v2154_v25, 5  ;;  %v1636_v59 = vsel %vm4649_vm11, %v1631_v57, %v1635_v51 }
 0x148   : > { %v5706_v0 = vsel %vm3423_vm1, %v5481_v34, %v2859_v17  ;;  %v3458_v10 = vsel %vm3456_vm4, %v5616_v18, %v2927_v27  ;;  %3360 = vrot.lane.b32.xlu2 %v3335_v45, %s4538_s26  ;;  %v1626_v34 = vsel %vm4649_vm11, %v5690_v36, %v5675_v55  ;;  %v5723_v18 = vld [vmem:[#allocation2 + $0x44] sm:$0x1]  ;;  %v1964_v55 = vrot.slane %v5669_v29, 5  ;;  %v4358_v45 = vld [vmem:[#allocation2 + $0x54] sm:$0xff] }
 0x149   : > { %v3491_v6 = vsel %vm3489_vm6, %v3458_v10, %v5529_v20  ;;  %v2162_v36 = vrot.slane %v2160_v54, 5  ;;  %v2166_v20 = vrot.slane %v2164_v38, 4  ;;  %v2170_v28 = vshll.u32 %v5723_v18, 16  ;;  %v5748_v54 = vld [vmem:[#allocation2 + $0x68] sm:$0x1] }
 0x14a   : > { %v5725_v15 = vpop.permute.xlu2 %3190  ;;  %v2223_v27 = vshrl.u32 %v2042_v11, 16  ;;  %v2226_v29 = vshll.u32 %v2042_v11, 16  ;;  %v2157_v58 = vor.u32 %v2156_v16, %v2153_v50  ;;  %v2236_v9 = vshrl.u32 %v5734_v31, 16 }
 0x14b   : > { %v3045_v48 = vunpack.c.l.b16 %v1944_v46  ;;  %v2167_v5 = vor.u32 %v2166_v20, %v2162_v36  ;;  %v1965_v23 = vsel %vm4957_vm14, %v1963_v13, %v1964_v55  ;;  %v2965_v11 = vunpack.c.l.b16 %v1564_v43 }
 0x14c   : > { %v2225_v10 = vrot.slane %v2223_v27, 4  ;;  %v2228_v30 = vrot.slane %v2226_v29, 5  ;;  %v2158_v25 = vrot.slane %v2157_v58, 4  ;;  %v2238_v57 = vrot.slane %v2236_v9, 4  ;;  %v2465_v58 = vld [vmem:[#allocation2 + $0x3c] sm:$0xe] }
 0x14d   : > { %3286 = vrot.lane.b32.xlu1 %v3258_v52, %s4535_s23  ;;  %3280 = vrot.lane.b32.xlu0 %v3255_v49, %s4535_s23  ;;  %v2232_v52 = vshll.u32 %v5734_v31, 16  ;;  %v4355_v49 = vld [vmem:[#allocation2 + $0x30] sm:$0xff]  ;;  %v2168_v38 = vrot.slane %v2167_v5, 4  ;;  %v2172_v46 = vrot.slane %v2170_v28, 5  ;;  %v2970_v27 = vunpack.c.l.b16 %v1626_v34 }
 0x14e   : > { %v2229_v29 = vor.u32 %v2228_v30, %v2225_v10  ;;  %v3050_v63 = vunpack.c.l.b16 %v1962_v26  ;;  %v3051_v55 = vunpack.c.l.b16 %v1965_v23  ;;  %v2242_v13 = vshll.u32 %v5748_v54, 16 }
 0x14f   : > { %v3183_v22 = vpop.permute.xlu1 %3182  ;;  %v3087_v17 = vpop.permute.xlu0 %3086  ;;  %v5750_v51 = vrot.slane %v2232_v52, 5  ;;  %vm3621_vm13 = vcmask 261120   ;;  %v3073_v52 = vpack.c.b16 %v3045_v48, %v3044_v62  ;;  %v2163_v43 = vsel %vm4649_vm11, %v2158_v25, %v2162_v36  ;;  %v1441_v48 = vld [vmem:[#allocation2 + $0x84] sm:$0xf] }
 0x150   : > { %2938 = vrot.lane.b32.xlu2 %v4358_v45, %s4534_s22  ;;  %v3524_v50 = vsel %vm3522_vm7, %v3491_v6, %v3087_v17  ;;  %v2971_v45 = vunpack.c.l.b16 %v1636_v59  ;;  %vm3674_vm2 = vcmask 293888   ;;  %v2173_v26 = vsel %vm4649_vm11, %v2168_v38, %v2172_v46  ;;  %v2468_v17 = vld [vmem:[#allocation2 + $0x60] sm:$0xe]  ;;  %v1447_v38 = vld [vmem:[#allocation2 + $0xa8] sm:$0xf] }
 0x151   : > { %v3557_v16 = vsel %vm3555_vm8, %v3524_v50, %v3183_v22  ;;  %v2239_v6 = vor.u32 %v2238_v57, %v5750_v51  ;;  %v2549_v28 = vrot.slane %v5702_v12, 5  ;;  %v2993_v62 = vpack.c.b16 %v2965_v11, %v5716_v3 }
 0x152   : > { %v5754_v20 = vpop.permute.xlu2 %3344  ;;  %v3590_v34 = vsel %vm3588_vm12, %v3557_v16, %v5574_v41  ;;  %v2996_v59 = vpack.c.b16 %v2971_v45, %v2970_v27  ;;  %v2230_v9 = vrot.slane %v2229_v29, 4  ;;  %v4104_v36 = vrot.slane %v2465_v58, 9  ;;  %v5791_v45 = vld [vmem:[#allocation2 + $0xac] sm:$0xf] }
 0x153   : > { %v5769_v10 = vpack.c.b16 %v3051_v55, %v3050_v63  ;;  %v2244_v41 = vrot.slane %v2242_v13, 5  ;;  %v2570_v30 = vrot.slane %v5734_v31, 5  ;;  %v5778_v3 = vunpack.c.l.b16 %v2173_v26 }
 0x154   : > { %v2240_v23 = vrot.slane %v2239_v6, 4  ;;  %v2552_v25 = vrot.slane %v5723_v18, 5  ;;  %v2551_v63 = vrot.slane %v2549_v28, 4  ;;  %v4107_v57 = vrot.slane %v2468_v17, 9 }
 0x155   : > { %2932 = vrot.lane.b32.xlu1 %v4355_v49, %s4534_s22  ;;  %3366 = vrot.lane.b32.xlu0 %v5699_v21, %s4538_s26  ;;  %v5771_v21 = vunpack.c.l.b16 %v2163_v43  ;;  %v5774_v49 = vld [vmem:[#allocation2 + $0x88] sm:$0xf]  ;;  %v1710_v50 = vshrl.u32 %v1441_v48, 16  ;;  %v1713_v11 = vshll.u32 %v1441_v48, 16  ;;  %v2235_v31 = vsel %vm4649_vm11, %v2230_v9, %v5750_v51  ;;  %v5802_v9 = vld [vmem:[#allocation2 + $0x8c] sm:$0x1] }
 0x156   : > { %v2550_v16 = vsel %vm4957_vm14, %v4104_v36, %v2549_v28  ;;  %v1719_v27 = vshll.u32 %v5774_v49, 16  ;;  %v1723_v18 = vshrl.u32 %v5774_v49, 16  ;;  %v2572_v29 = vrot.slane %v2570_v30, 4 }
 0x157   : > { %v2929_v22 = vpop.permute.xlu1 %2928  ;;  %v3343_v5 = vpop.permute.xlu0 %3342  ;;  %v2573_v55 = vrot.slane %v5748_v54, 5  ;;  %v1712_v13 = vrot.slane %v1710_v50, 4  ;;  %v1715_v58 = vrot.slane %v1713_v11, 5  ;;  %v1782_v6 = vshrl.u32 %v1447_v38, 16 }
 0x158   : > { %v3623_v12 = vsel %vm3621_vm13, %v3590_v34, %v3343_v5  ;;  %3092 = vrot.lane.b32.xlu2 %v3073_v52, %s4537_s25  ;;  %v4374_v52 = vld [vmem:[#allocation2 + $0x60] sm:$0xff]  ;;  %v5795_v43 = vrot.slane %v1719_v27, 5  ;;  %v1725_v51 = vrot.slane %v1723_v18, 4  ;;  %v1785_v34 = vshll.u32 %v1447_v38, 16  ;;  %v5817_v27 = vld [vmem:[#allocation2 + $0xb0] sm:$0x1] }
 0x159   : > { %4317 = vmatmul.msk.bf16.vlgmr.msra.gmra.mxu0 %vm3674_vm2, %v3623_v12  ;;  %v2245_v26 = vsel %vm4649_vm11, %v2240_v23, %v2244_v41  ;;  %v2553_v28 = vsel %vm4957_vm14, %v2551_v63, %v2552_v25  ;;  %v1716_v54 = vor.u32 %v1715_v58, %v1712_v13  ;;  %v1791_v36 = vshll.u32 %v5791_v45, 16  ;;  %v4371_v63 = vld [vmem:[#allocation2 + $0x3c] sm:$0xff] }
 0x15a   : > { %v5782_v46 = vpop.permute.xlu2 %3022  ;;  %v3300_v17 = vunpack.c.l.b16 %v2550_v16  ;;  %v1784_v48 = vrot.slane %v1782_v6, 4  ;;  %v1787_v5 = vrot.slane %v1785_v34, 5  ;;  %v1795_v12 = vshrl.u32 %v5791_v45, 16 }
 0x15b   : > { %v2571_v41 = vsel %vm4957_vm14, %v4107_v57, %v2570_v30  ;;  %v2574_v23 = vsel %vm4957_vm14, %v2572_v29, %v2573_v55  ;;  %v5812_v25 = vrot.slane %v1791_v36, 5  ;;  %v3301_v11 = vunpack.c.l.b16 %v2553_v28  ;;  %v1866_v36 = vld [vmem:[#allocation2 + $0xa8] sm:$0xe] }
 0x15c   : > { %v1726_v38 = vor.u32 %v1725_v51, %v5795_v43  ;;  %v1729_v16 = vshll.u32 %v5802_v9, 16  ;;  %v3227_v18 = vunpack.c.l.b16 %v2245_v26  ;;  %v1717_v13 = vrot.slane %v1716_v54, 4  ;;  %v1863_v54 = vld [vmem:[#allocation2 + $0x84] sm:$0xe] }
 0x15d   : > { %3018 = vrot.lane.b32.xlu1 %v2996_v59, %s4533_s21  ;;  %3012 = vrot.lane.b32.xlu0 %v2993_v62, %s4533_s21  ;;  %v3460_v62 = vsel %vm3456_vm4, %v5299_v56, %v2929_v22  ;;  %v1797_v56 = vrot.slane %v1795_v12, 4  ;;  %v3226_v22 = vunpack.c.l.b16 %v2235_v31  ;;  %v1788_v30 = vor.u32 %v1787_v5, %v1784_v48 }
 0x15e   : > { %v3306_v29 = vunpack.c.l.b16 %v2571_v41  ;;  %v3307_v55 = vunpack.c.l.b16 %v2574_v23  ;;  %v3466_v58 = vsel %vm3456_vm4, %v5354_v8, %v5632_v47  ;;  %v1801_v6 = vshll.u32 %v5817_v27, 16 }
 0x15f   : > { %v3015_v59 = vpop.permute.xlu1 %3014  ;;  %v3009_v50 = vpop.permute.xlu0 %3008  ;;  %v1798_v51 = vor.u32 %v1797_v56, %v5812_v25  ;;  %v3249_v31 = vpack.c.b16 %v5778_v3, %v5771_v21  ;;  %v3329_v34 = vpack.c.b16 %v3301_v11, %v3300_v17  ;;  %v5830_v26 = vrot.slane %v1726_v38, 4  ;;  %v2050_v21 = vld [vmem:[#allocation2 + $0x90] sm:$0xf]  ;;  %v5848_v11 = vld [vmem:[#allocation2 + $0x94] sm:$0xf] }
 0x160   : > { %3194 = vrot.lane.b32.xlu2 %v4374_v52, %s4536_s24  ;;  %v3493_v52 = vsel %vm3489_vm6, %v3460_v62, %v3009_v50  ;;  %v5832_v28 = vrot.slane %v1729_v16, 5  ;;  %v3252_v8 = vpack.c.b16 %v3227_v18, %v3226_v22  ;;  %v1722_v47 = vsel %vm4649_vm11, %v1717_v13, %v5795_v43  ;;  %v2056_v18 = vld [vmem:[#allocation2 + $0xb4] sm:$0xf] }
 0x161   : > { %v5839_v48 = vrot.slane %v1788_v30, 4  ;;  %v1989_v5 = vrot.slane %v5774_v49, 5  ;;  %v3499_v3 = vsel %vm3489_vm6, %v3466_v58, %v3015_v59  ;;  %v3526_v12 = vsel %vm3522_vm7, %v3493_v52, %v5673_v33 }
 0x162   : > { %v5819_v57 = vpop.permute.xlu2 %3278  ;;  %v5845_v62 = vpack.c.b16 %v3307_v55, %v3306_v29  ;;  %v1799_v41 = vrot.slane %v1798_v51, 4  ;;  %v1803_v23 = vrot.slane %v1801_v6, 5  ;;  %v4098_v43 = vrot.slane %v1866_v36, 9  ;;  %v5875_v51 = vld [vmem:[#allocation2 + $0x98] sm:$0x1] }
 0x163   : > { %v1732_v49 = vsel %vm4649_vm11, %v5830_v26, %v5832_v28  ;;  %v5855_v59 = vunpack.c.l.b16 %v1722_v47  ;;  %v1992_v33 = vrot.slane %v5802_v9, 5  ;;  %v2319_v38 = vshrl.u32 %v2050_v21, 16  ;;  %v5867_v9 = vld [vmem:[#allocation2 + $0xb8] sm:$0xf] }
 0x164   : > { %v1991_v16 = vrot.slane %v1989_v5, 4  ;;  %v2013_v56 = vrot.slane %v5817_v27, 5  ;;  %v2322_v22 = vshll.u32 %v2050_v21, 16  ;;  %v2328_v55 = vshll.u32 %v5848_v11, 16 }
 0x165   : > { %3188 = vrot.lane.b32.xlu1 %v4371_v63, %s4536_s24  ;;  %3098 = vrot.lane.b32.xlu0 %v5769_v10, %s4537_s25  ;;  %v2010_v10 = vrot.slane %v5791_v45, 5  ;;  %v4095_v63 = vrot.slane %v1863_v54, 9  ;;  %v1794_v45 = vsel %vm4649_vm11, %v5839_v48, %v5812_v25  ;;  %v2321_v29 = vrot.slane %v2319_v38, 4 }
 0x166   : > { %v2332_v58 = vshrl.u32 %v5848_v11, 16  ;;  %v1804_v52 = vsel %vm4649_vm11, %v1799_v41, %v1803_v23  ;;  %v2324_v6 = vrot.slane %v2322_v22, 5  ;;  %v5878_v26 = vrot.slane %v2328_v55, 5  ;;  %v4362_v22 = vld [vmem:[#allocation2 + $0x84] sm:$0xff] }
 0x167   : > { %v3185_v17 = vpop.permute.xlu1 %3184  ;;  %v3095_v50 = vpop.permute.xlu0 %3094  ;;  %v2012_v30 = vrot.slane %v2010_v10, 4  ;;  %v1990_v25 = vsel %vm4957_vm14, %v4095_v63, %v1989_v5  ;;  %v2011_v27 = vsel %vm4957_vm14, %v4098_v43, %v2010_v10  ;;  %v2391_v54 = vshrl.u32 %v2056_v18, 16 }
 0x168   : > { %3348 = vrot.lane.b32.xlu2 %v3329_v34, %s4538_s26  ;;  %v4365_v34 = vld [vmem:[#allocation2 + $0xa8] sm:$0xff]  ;;  %v2334_v28 = vrot.slane %v2332_v58, 4  ;;  %v2394_v36 = vshll.u32 %v2056_v18, 16  ;;  %v3559_v47 = vsel %vm3555_vm8, %v3526_v12, %v3185_v17  ;;  %v1993_v48 = vsel %vm4957_vm14, %v1991_v16, %v1992_v33  ;;  %v5890_v17 = vld [vmem:[#allocation2 + $0xbc] sm:$0x1] }
 0x169   : > { %v2400_v5 = vshll.u32 %v5867_v9, 16  ;;  %v2404_v21 = vshrl.u32 %v5867_v9, 16  ;;  %v2325_v41 = vor.u32 %v2324_v6, %v2321_v29  ;;  %v2338_v63 = vshll.u32 %v5875_v51, 16 }
 0x16a   : > { %v5863_v13 = vpop.permute.xlu2 %2936  ;;  %v2335_v23 = vor.u32 %v2334_v28, %v5878_v26  ;;  %v2396_v12 = vrot.slane %v2394_v36, 5  ;;  %v5896_v18 = vunpack.c.l.b16 %v1732_v49  ;;  %v3532_v29 = vsel %vm3522_vm7, %v3499_v3, %v3095_v50  ;;  %v2472_v28 = vld [vmem:[#allocation2 + $0x90] sm:$0xe] }
 0x16b   : > { %v5892_v38 = vrot.slane %v2400_v5, 5  ;;  %v2406_v33 = vrot.slane %v2404_v21, 4  ;;  %v2984_v58 = vunpack.c.l.b16 %v1794_v45  ;;  %v2985_v6 = vunpack.c.l.b16 %v1804_v52  ;;  %v1435_v21 = vld [vmem:[#allocation2 + $0x60] sm:$0xf] }
 0x16c   : > { %v3064_v36 = vunpack.c.l.b16 %v2011_v27  ;;  %v5904_v5 = vrot.slane %v2338_v63, 5  ;;  %v2410_v49 = vshll.u32 %v5890_v17, 16  ;;  %v4111_v52 = vrot.slane %v2472_v28, 9 }
 0x16d   : > { %3274 = vrot.lane.b32.xlu1 %v3252_v8, %s4535_s23  ;;  %3268 = vrot.lane.b32.xlu0 %v3249_v31, %s4535_s23  ;;  %v2014_v8 = vsel %vm4957_vm14, %v2012_v30, %v2013_v56  ;;  %v2393_v31 = vrot.slane %v2391_v54, 4  ;;  %v3058_v56 = vunpack.c.l.b16 %v1990_v25  ;;  %v3059_v30 = vunpack.c.l.b16 %v1993_v48 }
 0x16e   : > { %v2326_v25 = vrot.slane %v2325_v41, 4  ;;  %v2407_v50 = vor.u32 %v2406_v33, %v5892_v38  ;;  %v2598_v48 = vrot.slane %v5848_v11, 5  ;;  %v3000_v41 = vpack.c.b16 %v5896_v18, %v5855_v59  ;;  %v2475_v59 = vld [vmem:[#allocation2 + $0xb4] sm:$0xe] }
 0x16f   : > { %v3271_v10 = vpop.permute.xlu1 %3270  ;;  %v3265_v43 = vpop.permute.xlu0 %3264  ;;  %v2397_v3 = vor.u32 %v2396_v12, %v2393_v31  ;;  %v3080_v45 = vpack.c.b16 %v3059_v30, %v3058_v56  ;;  %v1638_v18 = vshrl.u32 %v1435_v21, 16  ;;  %v2619_v56 = vrot.slane %v5867_v9, 5  ;;  %v5941_v30 = vld [vmem:[#allocation2 + $0x68] sm:$0x1] }
 0x170   : > { %v3592_v16 = vsel %vm3588_vm12, %v3559_v47, %v3265_v43  ;;  %2952 = vrot.lane.b32.xlu2 %v4365_v34, %s4534_s22  ;;  %v3065_v47 = vunpack.c.l.b16 %v2014_v8  ;;  %v5907_v34 = vrot.slane %v2335_v23, 4  ;;  %v3003_v23 = vpack.c.b16 %v2985_v6, %v2984_v58  ;;  %v5923_v43 = vld [vmem:[#allocation2 + $0x64] sm:$0xf] }
 0x171   : > { %v3625_v55 = vsel %vm3621_vm13, %v3592_v16, %v5754_v20  ;;  %v3565_v20 = vsel %vm3555_vm8, %v3532_v29, %v5725_v15  ;;  %v5921_v15 = vrot.slane %v2410_v49, 5  ;;  %v2398_v11 = vrot.slane %v2397_v3, 4  ;;  %v4381_v3 = vld [vmem:[#allocation2 + $0xb4] sm:$0xff] }
 0x172   : > { %4318 = vmatmul.msk.bf16.gmra.mxu0 %vm3674_vm2, %v3625_v55  ;;  %v5902_v54 = vpop.permute.xlu2 %3090  ;;  %v3598_v27 = vsel %vm3588_vm12, %v3565_v20, %v3271_v10  ;;  %v5919_v63 = vpack.c.b16 %v3065_v47, %v3064_v36  ;;  %v2331_v10 = vsel %vm4649_vm11, %v2326_v25, %v5878_v26  ;;  %v2408_v12 = vrot.slane %v2407_v50, 4 }
 0x173   : > { %v5936_v16 = vsel %vm4957_vm14, %v4111_v52, %v2598_v48  ;;  %v2600_v26 = vrot.slane %v2598_v48, 4  ;;  %v1641_v29 = vshll.u32 %v1435_v21, 16  ;;  %v1647_v55 = vshll.u32 %v5923_v43, 16 }
 0x174   : > { %v5946_v6 = vunpack.c.l.b16 %v2331_v10  ;;  %v4114_v28 = vrot.slane %v2475_v59, 9  ;;  %v1640_v36 = vrot.slane %v1638_v18, 4  ;;  %v1651_v47 = vshrl.u32 %v5923_v43, 16 }
 0x175   : > { %2946 = vrot.lane.b32.xlu1 %v4362_v22, %s4534_s22  ;;  %3354 = vrot.lane.b32.xlu0 %v5845_v62, %s4538_s26  ;;  %v2341_v62 = vsel %vm4649_vm11, %v5907_v34, %v5904_v5  ;;  %v2601_v22 = vrot.slane %v5875_v51, 5  ;;  %v2044_v51 = vld [vmem:[#allocation2 + $0x6c] sm:$0xf]  ;;  %v2403_v9 = vsel %vm4649_vm11, %v2398_v11, %v5892_v38  ;;  %v1643_v49 = vrot.slane %v1641_v29, 5  ;;  %v5954_v34 = vld [vmem:[#allocation2 + $0x70] sm:$0xf] }
 0x176   : > { %v1649_v25 = vrot.slane %v1647_v55, 5  ;;  %v2413_v50 = vsel %vm4649_vm11, %v2408_v12, %v5921_v15  ;;  %v3314_v20 = vunpack.c.l.b16 %v5936_v16  ;;  %v2621_v52 = vrot.slane %v2619_v56, 4  ;;  %v5972_v55 = vld [vmem:[#allocation2 + $0x74] sm:$0x1] }
 0x177   : > { %v2943_v8 = vpop.permute.xlu1 %2942  ;;  %v3351_v31 = vpop.permute.xlu0 %3350  ;;  %v2602_v38 = vsel %vm4957_vm14, %v2600_v26, %v2601_v22  ;;  %v2247_v48 = vshrl.u32 %v2044_v51, 16  ;;  %v2256_v15 = vshll.u32 %v5954_v34, 16  ;;  %v2622_v11 = vrot.slane %v5890_v17, 5 }
 0x178   : > { %v3631_v33 = vsel %vm3621_vm13, %v3598_v27, %v3351_v31  ;;  %3106 = vrot.lane.b32.xlu2 %v3080_v45, %s4537_s25  ;;  %v3474_v5 = vsel %vm3456_vm4, %v5620_v42, %v2943_v8  ;;  %v1653_v45 = vrot.slane %v1651_v47, 4  ;;  %v1657_v42 = vshll.u32 %v5941_v30, 16 }
 0x179   : > { %4321 = vmatmul.msk.bf16.vlgmr.msra.gmra.mxu1 %vm3674_vm2, %v3631_v33  ;;  %v1644_v27 = vor.u32 %v1643_v49, %v1640_v36  ;;  %v3507_v21 = vsel %vm3489_vm6, %v3474_v5, %v5782_v46  ;;  %v2250_v31 = vshll.u32 %v2044_v51, 16  ;;  %v2249_v59 = vrot.slane %v2247_v48, 4  ;;  %v4378_v33 = vld [vmem:[#allocation2 + $0x90] sm:$0xff] }
 0x17a   : > { %v5944_v58 = vpop.permute.xlu2 %3192  ;;  %v3315_v16 = vunpack.c.l.b16 %v2602_v38  ;;  %v1659_v18 = vrot.slane %v1657_v42, 5  ;;  %v3235_v29 = vunpack.c.l.b16 %v2341_v62  ;;  %v5974_v36 = vrot.slane %v2256_v15, 5  ;;  %v1860_v42 = vld [vmem:[#allocation2 + $0x60] sm:$0xe] }
 0x17b   : > { %v1645_v12 = vrot.slane %v1644_v27, 4  ;;  %v2252_v26 = vrot.slane %v2250_v31, 5  ;;  %v3240_v5 = vunpack.c.l.b16 %v2403_v9  ;;  %v3241_v49 = vunpack.c.l.b16 %v2413_v50 }
 0x17c   : > { %v3336_v27 = vpack.c.b16 %v3315_v16, %v3314_v20  ;;  %v1968_v20 = vrot.slane %v5923_v43, 5  ;;  %v4092_v15 = vrot.slane %v1860_v42, 9 }
 0x17d   : > { %3032 = vrot.lane.b32.xlu1 %v3003_v23, %s4533_s21  ;;  %3026 = vrot.lane.b32.xlu0 %v3000_v41, %s4533_s21  ;;  %v1654_v23 = vor.u32 %v1653_v45, %v1649_v25  ;;  %v2260_v41 = vshrl.u32 %v5954_v34, 16  ;;  %v5985_v45 = vsel %vm4957_vm14, %v2621_v52, %v2622_v11  ;;  %v1650_v62 = vsel %vm4649_vm11, %v1645_v12, %v1649_v25  ;;  %v6004_v11 = vld [vmem:[#allocation2 + $0x94] sm:$0xf] }
 0x17e   : > { %v2253_v38 = vor.u32 %v2252_v26, %v2249_v59  ;;  %v3256_v25 = vpack.c.b16 %v3235_v29, %v5946_v6  ;;  %v2972_v31 = vunpack.c.l.b16 %v1650_v62  ;;  %v1971_v26 = vrot.slane %v5941_v30, 5 }
 0x17f   : > { %v3199_v8 = vpop.permute.xlu1 %3198  ;;  %v3103_v10 = vpop.permute.xlu0 %3102  ;;  %v1655_v22 = vrot.slane %v1654_v23, 4  ;;  %v2262_v47 = vrot.slane %v2260_v41, 4  ;;  %v3321_v23 = vunpack.c.l.b16 %v5985_v45  ;;  %v1449_v41 = vld [vmem:[#allocation2 + $0xb4] sm:$0xf]  ;;  %v1747_v29 = vshrl.u32 %v6004_v11, 16 }
 0x180   : > { %3208 = vrot.lane.b32.xlu2 %v4381_v3, %s4536_s24  ;;  %v3540_v46 = vsel %vm3522_vm7, %v3507_v21, %v3103_v10  ;;  %v5981_v3 = vsel %vm4957_vm14, %v4114_v28, %v2619_v56  ;;  %v2266_v56 = vshll.u32 %v5972_v55, 16  ;;  %v1443_v28 = vld [vmem:[#allocation2 + $0x90] sm:$0xf]  ;;  %v2469_v10 = vld [vmem:[#allocation2 + $0x6c] sm:$0xe]  ;;  %v2254_v59 = vrot.slane %v2253_v38, 4 }
 0x181   : > { %v3573_v17 = vsel %vm3555_vm8, %v3540_v46, %v3199_v8  ;;  %v1660_v9 = vsel %vm4649_vm11, %v1655_v22, %v1659_v18  ;;  %v2263_v50 = vor.u32 %v2262_v47, %v5974_v36  ;;  %v3320_v48 = vunpack.c.l.b16 %v5981_v3 }
 0x182   : > { %v5977_v51 = vpop.permute.xlu2 %3346  ;;  %v3606_v52 = vsel %vm3588_vm12, %v3573_v17, %v5819_v57  ;;  %v3259_v8 = vpack.c.b16 %v3241_v49, %v3240_v5  ;;  %v2973_v12 = vunpack.c.l.b16 %v1660_v9  ;;  %v2577_v57 = vrot.slane %v5954_v34, 5  ;;  %v6016_v5 = vld [vmem:[#allocation2 + $0xb8] sm:$0xf] }
 0x183   : > { %v1734_v6 = vshrl.u32 %v1443_v28, 16  ;;  %v2264_v43 = vrot.slane %v2263_v50, 4  ;;  %v2268_v16 = vrot.slane %v2266_v56, 5  ;;  %v1737_v22 = vshll.u32 %v1443_v28, 16 }
 0x184   : > { %v1970_v18 = vrot.slane %v1968_v20, 4  ;;  %v1743_v46 = vshll.u32 %v6004_v11, 16  ;;  %v4108_v34 = vrot.slane %v2469_v10, 9  ;;  %v2580_v17 = vrot.slane %v5972_v55, 5  ;;  %v6025_v55 = vld [vmem:[#allocation2 + $0x98] sm:$0x1] }
 0x185   : > { %3202 = vrot.lane.b32.xlu1 %v4378_v33, %s4536_s24  ;;  %3112 = vrot.lane.b32.xlu0 %v5919_v63, %s4537_s25  ;;  %v1806_v49 = vshrl.u32 %v1449_v41, 16  ;;  %v1809_v3 = vshll.u32 %v1449_v41, 16  ;;  %v2997_v45 = vpack.c.b16 %v2973_v12, %v2972_v31  ;;  %v2259_v62 = vsel %vm4649_vm11, %v2254_v59, %v5974_v36 }
 0x186   : > { %v2579_v42 = vrot.slane %v2577_v57, 4  ;;  %v1736_v30 = vrot.slane %v1734_v6, 4  ;;  %v2269_v38 = vsel %vm4649_vm11, %v2264_v43, %v2268_v16  ;;  %v6027_v56 = vrot.slane %v1743_v46, 5  ;;  %v4359_v43 = vld [vmem:[#allocation2 + $0x60] sm:$0xff] }
 0x187   : > { %v6001_v21 = vpop.permute.xlu1 %2930  ;;  %v3359_v63 = vpop.permute.xlu0 %3358  ;;  %v1808_v9 = vrot.slane %v1806_v49, 4  ;;  %v1811_v50 = vrot.slane %v1809_v3, 5  ;;  %v1749_v28 = vrot.slane %v1747_v29, 4  ;;  %v1819_v36 = vshrl.u32 %v6016_v5, 16 }
 0x188   : > { %v3639_v33 = vsel %vm3621_vm13, %v3606_v52, %v3359_v63  ;;  %3362 = vrot.lane.b32.xlu2 %v3336_v27, %s4538_s26  ;;  %v1739_v27 = vrot.slane %v1737_v22, 5  ;;  %v1815_v52 = vshll.u32 %v6016_v5, 16  ;;  %v1972_v10 = vsel %vm4957_vm14, %v1970_v18, %v1971_v26 }
 0x189   : > { %4325 = vmatmul.msk.bf16.vlgmr.msra.gmra.mxu2 %vm3674_vm2, %v3639_v33  ;;  %v2578_v63 = vsel %vm4957_vm14, %v4108_v34, %v2577_v57  ;;  %v3228_v59 = vunpack.c.l.b16 %v2259_v62  ;;  %v3229_v6 = vunpack.c.l.b16 %v2269_v38  ;;  %v1821_v33 = vrot.slane %v1819_v36, 4  ;;  %v2052_v36 = vld [vmem:[#allocation2 + $0x9c] sm:$0xf] }
 0x18a   : > { %v6013_v47 = vpop.permute.xlu2 %2950  ;;  %v1817_v41 = vrot.slane %v1815_v52, 5  ;;  %v2581_v16 = vsel %vm4957_vm14, %v2579_v42, %v2580_v17  ;;  %v1812_v22 = vor.u32 %v1811_v50, %v1808_v9  ;;  %v3339_v18 = vpack.c.b16 %v3321_v23, %v3320_v48  ;;  %v244_v9 = vld [vmem:[#allocation2 + $0xc0] sm:$0x1] }
 0x18b   : > { %v1750_v57 = vor.u32 %v1749_v28, %v6027_v56  ;;  %v3462_v29 = vsel %vm3456_vm4, %v5515_v35, %v6001_v21  ;;  %v3053_v3 = vunpack.c.l.b16 %v1972_v10  ;;  %v3309_v17 = vunpack.c.l.b16 %v2581_v16  ;;  %v337_v16 = vld [vmem:[%s4601_s18 + $0xf8] sm:$0xff] }
 0x18c   : > { %v1822_v26 = vor.u32 %v1821_v33, %v1817_v41  ;;  %v3253_v62 = vpack.c.b16 %v3229_v6, %v3228_v59  ;;  %v1813_v23 = vrot.slane %v1812_v22, 4  ;;  %v3468_v50 = vsel %vm3456_vm4, %v5562_v40, %v5863_v13  ;;  %v6069_v33 = vld [vmem:[#allocation2 + $0xa0] sm:$0xf]  ;;  %v4375_v13 = vld [vmem:[#allocation2 + $0x6c] sm:$0xff] }
 0x18d   : > { %3288 = vrot.lane.b32.xlu1 %v3259_v8, %s4535_s23  ;;  %3282 = vrot.lane.b32.xlu0 %v3256_v25, %s4535_s23  ;;  %v1969_v8 = vsel %vm4957_vm14, %v4092_v15, %v1968_v20  ;;  %v6037_v25 = vld [vmem:[#allocation2 + $0xbc] sm:$0x1]  ;;  %v1740_v20 = vor.u32 %v1739_v27, %v1736_v30  ;;  %v1753_v15 = vshll.u32 %v6025_v55, 16  ;;  %v6055_v30 = vld [vmem:[#allocation2 + $0xb4] sm:$0xe]  ;;  %v6059_v35 = vrot.slane %v1750_v57, 4 }
 0x18e   : > { %v1825_v46 = vshll.u32 %v6037_v25, 16  ;;  %v3052_v49 = vunpack.c.l.b16 %v1969_v8  ;;  %v1823_v21 = vrot.slane %v1822_v26, 4  ;;  %v300_v8 = vld [vmem:[#allocation2 + $0xc8] sm:$0x1]  ;;  %v6440_v6 = vrot.slane %v6016_v5, 5 }
 0x18f   : > { %v3017_v31 = vpop.permute.xlu1 %3016  ;;  %v3011_v12 = vpop.permute.xlu0 %3010  ;;  %v6051_v42 = vrot.slane %v1740_v20, 4  ;;  %v6053_v48 = vrot.slane %v1753_v15, 5  ;;  %v1818_v20 = vsel %vm4649_vm11, %v1813_v23, %v1817_v41  ;;  %v245_v15 = vsel %vm4572_vm3, 0, %v244_v9  ;;  %v4366_v23 = vld [vmem:[#allocation2 + $0xb4] sm:$0xff] }
 0x190   : > { %3020 = vrot.lane.b32.xlu2 %v2997_v45, %s4533_s21  ;;  %v3308_v45 = vunpack.c.l.b16 %v2578_v63  ;;  %v3495_v38 = vsel %vm3489_vm6, %v3462_v29, %v3011_v12  ;;  %v1827_v27 = vrot.slane %v1825_v46, 5  ;;  %v3077_v52 = vpack.c.b16 %v3053_v3, %v3052_v49  ;;  %246 = vst [vmem:[#allocation2 + $0xc0] sm:$0x1] %v245_v15 }
 0x191   : > { %v3501_v10 = vsel %vm3489_vm6, %v3468_v50, %v3017_v31  ;;  %v3528_v40 = vsel %vm3522_vm7, %v3495_v38, %v5902_v54  ;;  %v1746_v31 = vsel %vm4649_vm11, %v6051_v42, %v6027_v56  ;;  %v301_v57 = vsel %vm4579_vm5, 0, %v300_v8 }
 0x192   : > { %v6048_v34 = vpop.permute.xlu2 %3104  ;;  %v6065_v12 = vpack.c.b16 %v3309_v17, %v3308_v45  ;;  %v1828_v54 = vsel %vm4649_vm11, %v1823_v21, %v1827_v27  ;;  %v2346_v46 = vshll.u32 %v2052_v36, 16  ;;  %v2352_v41 = vshll.u32 %v6069_v33, 16  ;;  %302 = vst [vmem:[#allocation2 + $0xc8] sm:$0x1] %v301_v57  ;;  %v1864_v17 = vld [vmem:[#allocation2 + $0x90] sm:$0xe] }
 0x193   : > { %v369_v49 = vpack.c.bf16 %v337_v16, %v337_v16  ;;  %v6095_v3 = vunpack.c.l.b16 %v1818_v20  ;;  %v6099_v45 = vrot.slane %v6440_v6, 4  ;;  %v6104_v38 = vunpack.c.l.b16 %v1828_v54 }
 0x194   : > { %v2348_v20 = vrot.slane %v2346_v46, 5  ;;  %v6109_v15 = vrot.slane %v2352_v41, 5  ;;  %v4096_v6 = vrot.slane %v1864_v17, 9  ;;  %v1999_v22 = vrot.slane %v6025_v55, 5  ;;  %v247_v41 = vld [vmem:[#allocation2 + $0xcc] sm:$0x1] }
 0x195   : > { %2940 = vrot.lane.b32.xlu1 %v4359_v43, %s4534_s22  ;;  %3368 = vrot.lane.b32.xlu0 %v3339_v18, %s4538_s26  ;;  %v336_v43 = vld [vmem:[%s4601_s18 + $0xf0] sm:$0xff]  ;;  %v2343_v18 = vshrl.u32 %v2052_v36, 16  ;;  %v636_v9 = vshrl.u32 %v369_v49, 16  ;;  %v639_v8 = vshll.u32 %v369_v49, 16  ;;  %v2980_v1 = vunpack.c.l.b16 %v1746_v31  ;;  %v4520_v31 = vld [vmem:[#allocation2 + $0xb8] sm:$0xf] }
 0x196   : > { %v368_v29 = vpack.c.bf16 %v336_v43, %v336_v43  ;;  %v1996_v43 = vrot.slane %v6004_v11, 5  ;;  %v6457_v42 = vrot.slane %v6037_v25, 5 }
 0x197   : > { %v3187_v28 = vpop.permute.xlu1 %3186  ;;  %v3097_v63 = vpop.permute.xlu0 %3096  ;;  %v2345_v36 = vrot.slane %v2343_v18, 4  ;;  %v800_v46 = vld [vmem:[#allocation2 + $0xc0] sm:$0xf] }
 0x198   : > { %3276 = vrot.lane.b32.xlu2 %v3253_v62, %s4535_s23  ;;  %v2356_v62 = vshrl.u32 %v6069_v33, 16  ;;  %v628_v21 = vshrl.u32 %v368_v29, 16  ;;  %v631_v27 = vshll.u32 %v368_v29, 16  ;;  %v3561_v50 = vsel %vm3555_vm8, %v3528_v40, %v3187_v28  ;;  %v4363_v40 = vld [vmem:[#allocation2 + $0x90] sm:$0xff] }
 0x199   : > { %v1998_v29 = vrot.slane %v1996_v43, 4  ;;  %v3534_v28 = vsel %vm3522_vm7, %v3501_v10, %v3097_v63  ;;  %v1997_v55 = vsel %vm4957_vm14, %v4096_v6, %v1996_v43  ;;  %v2349_v10 = vor.u32 %v2348_v20, %v2345_v36 }
 0x19a   : > { %v6092_v26 = vpop.permute.xlu2 %3206  ;;  %v630_v57 = vrot.slane %v628_v21, 7  ;;  %v2358_v59 = vrot.slane %v2356_v62, 4  ;;  %v6117_v21 = vld [vmem:[#allocation2 + $0xa4] sm:$0x1]  ;;  %v248_v36 = vsel %vm4572_vm3, 0, %v247_v41  ;;  %v3567_v32 = vsel %vm3555_vm8, %v3534_v28, %v5944_v58 }
 0x19b   : > { %v2362_v20 = vshll.u32 %v6117_v21, 16  ;;  %v6454_v58 = vsel %vm4649_vm11, %v6059_v35, %v6053_v48  ;;  %249 = vst [vmem:[#allocation2 + $0xcc] sm:$0x1] %v248_v36  ;;  %v2021_v48 = vsel %vm4957_vm14, %v6099_v45, %v6457_v42  ;;  %v1257_v35 = vld [vmem:[#allocation2 + $0xb4] sm:$0xe]  ;;  %v1416_v28 = vrot.slane %v4520_v31, 5 }
 0x19c   : > { %v633_v11 = vor.u32 %v631_v27, %v630_v57  ;;  %v634_v18 = vrot.slane %v630_v57, 4  ;;  %v3060_v27 = vunpack.c.l.b16 %v1997_v55  ;;  %v4084_v41 = vrot.slane %v1257_v35, 9 }
 0x19d   : > { %3196 = vrot.lane.b32.xlu1 %v4375_v13, %s4536_s24  ;;  %3100 = vrot.lane.b32.xlu0 %v3077_v52, %s4537_s25  ;;  %v638_v13 = vrot.slane %v636_v9, 7  ;;  %v804_v9 = vld [vmem:[#allocation2 + $0xc8] sm:$0x1] }
 0x19e   : > { %v801_v63 = vsel %vm4617_vm9, %v633_v11, %v800_v46  ;;  %v1417_v42 = vsel %vm4957_vm14, %v4084_v41, %v1416_v28 }
 0x19f   : > { %v3273_v16 = vpop.permute.xlu1 %3272  ;;  %v3267_v54 = vpop.permute.xlu0 %3266  ;;  %v641_v17 = vor.u32 %v639_v8, %v638_v13  ;;  %v643_v62 = vrot.slane %v638_v13, 4  ;;  %802 = vst [vmem:[#allocation2 + $0xc0] sm:$0xf] %v801_v63 }
 0x1a0   : > { %v3594_v52 = vsel %vm3588_vm12, %v3561_v50, %v3267_v54  ;;  %2954 = vrot.lane.b32.xlu2 %v4366_v23, %s4534_s22  ;;  %v2000_v23 = vsel %vm4957_vm14, %v1998_v29, %v1999_v22  ;;  %v303_v50 = vld [vmem:[#allocation2 + $0xd4] sm:$0x1]  ;;  %v2359_v22 = vor.u32 %v2358_v59, %v6109_v15  ;;  %v3600_v57 = vsel %vm3588_vm12, %v3567_v32, %v3273_v16 }
 0x1a1   : > { %v3627_v49 = vsel %vm3621_vm13, %v3594_v52, %v5977_v51  ;;  %v642_v8 = vsel %vm4624_vm10, %v634_v18, %v641_v17  ;;  %v805_v6 = vsel %vm4572_vm3, %v643_v62, %v804_v9  ;;  %v3061_v43 = vunpack.c.l.b16 %v2000_v23 }
 0x1a2   : > { %4319 = vmatmul.msk.bf16.gmra.mxu0 %vm3674_vm2, %v3627_v49  ;;  %v6126_v51 = vpop.permute.xlu2 %3360  ;;  %803 = vst.msk [vmem:[#allocation2 + $0xc4] sm:$0xf] %vm184_vm0, %v642_v8  ;;  %v304_v39 = vsel %vm4579_vm5, 0, %v303_v50  ;;  %v2981_v59 = vunpack.c.l.b16 %v6454_v58  ;;  %v2350_v54 = vrot.slane %v2349_v10, 4  ;;  %v6456_v29 = vrot.slane %v6055_v30, 9 }
 0x1a3   : > { %806 = vst [vmem:[#allocation2 + $0xc8] sm:$0x1] %v805_v6  ;;  %v3081_v2 = vpack.c.b16 %v3061_v43, %v3060_v27  ;;  %v2364_v30 = vrot.slane %v2362_v20, 5  ;;  %v3067_v18 = vunpack.c.l.b16 %v2021_v48 }
 0x1a4   : > { %305 = vst [vmem:[#allocation2 + $0xd4] sm:$0x1] %v304_v39  ;;  %v3001_v25 = vpack.c.b16 %v2981_v59, %v2980_v1  ;;  %v2355_v45 = vsel %vm4649_vm11, %v2350_v54, %v6109_v15 }
 0x1a5   : > { %2948 = vrot.lane.b32.xlu1 %v4363_v40, %s4534_s22  ;;  %3356 = vrot.lane.b32.xlu0 %v6065_v12, %s4538_s26  ;;  %v6455_v12 = vrot.slane %v6016_v5, 5  ;;  %v3004_v5 = vpack.c.b16 %v6104_v38, %v6095_v3  ;;  %v2360_v40 = vrot.slane %v2359_v22, 4  ;;  %v1418_v3 = vrot.slane %v1416_v28, 4  ;;  %v4521_v38 = vld [vmem:[#allocation2 + $0xbc] sm:$0x1] }
 0x1a6   : > { %v2058_v46 = vld [vmem:[#allocation2 + $0xc0] sm:$0xf]  ;;  %v1419_v9 = vrot.slane %v4521_v38, 5  ;;  %v6186_v32 = vunpack.c.l.b16 %v2355_v45 }
 0x1a7   : > { %v2945_v13 = vpop.permute.xlu1 %2944  ;;  %v3353_v16 = vpop.permute.xlu0 %3352  ;;  %v2018_v56 = vsel %vm4957_vm14, %v6456_v29, %v6455_v12  ;;  %v2415_v17 = vshrl.u32 %v2058_v46, 16  ;;  %v2418_v62 = vshll.u32 %v2058_v46, 16  ;;  %v2365_v55 = vsel %vm4649_vm11, %v2360_v40, %v2364_v30  ;;  %v1451_v15 = vld [vmem:[#allocation2 + $0xc0] sm:$0xf] }
 0x1a8   : > { %v3633_v52 = vsel %vm3621_vm13, %v3600_v57, %v3353_v16  ;;  %3108 = vrot.lane.b32.xlu2 %v3081_v2, %s4537_s25  ;;  %v3066_v11 = vunpack.c.l.b16 %v2018_v56  ;;  %v2476_v39 = vld [vmem:[#allocation2 + $0xc0] sm:$0xe]  ;;  %v6188_v58 = vunpack.c.l.b16 %v2365_v55  ;;  %v1830_v16 = vshrl.u32 %v1451_v15, 16 }
 0x1a9   : > { %4322 = vmatmul.msk.bf16.gmra.mxu1 %vm3674_vm2, %v3633_v52  ;;  %v6174_v49 = vld [vmem:[#allocation2 + $0xc4] sm:$0xf]  ;;  %v2417_v50 = vrot.slane %v2415_v17, 4  ;;  %v2420_v8 = vrot.slane %v2418_v62, 5  ;;  %v4379_v12 = vld [vmem:[#allocation2 + $0x9c] sm:$0xff]  ;;  %v1420_v48 = vsel %vm4957_vm14, %v1418_v3, %v1419_v9  ;;  %v3476_v35 = vsel %vm3456_vm4, %v5607_v60, %v2945_v13 }
 0x1aa   : > { %v2076_v10 = vld [vmem:[#allocation2 + $0xc8] sm:$0x1]  ;;  %v2424_v63 = vshll.u32 %v6174_v49, 16  ;;  %v2428_v23 = vshrl.u32 %v6174_v49, 16  ;;  %v6182_v27 = vpop.permute.xlu2 %2938  ;;  %v3084_v36 = vpack.c.b16 %v3067_v18, %v3066_v11  ;;  %v4382_v57 = vld [vmem:[#allocation2 + $0xc0] sm:$0xff]  ;;  %v2626_v2 = vrot.slane %v6174_v49, 5 }
 0x1ab   : > { %v2434_v6 = vshll.u32 %v2076_v10, 16  ;;  %v2421_v59 = vor.u32 %v2420_v8, %v2417_v50  ;;  %v6191_v54 = vld [vmem:[#allocation2 + $0xc4] sm:$0xf]  ;;  %v4115_v52 = vrot.slane %v2476_v39, 9  ;;  %v2629_v30 = vrot.slane %v2076_v10, 5 }
 0x1ac   : > { %v2426_v22 = vrot.slane %v2424_v63, 5  ;;  %v2430_v20 = vrot.slane %v2428_v23, 4  ;;  %v1843_v11 = vshrl.u32 %v6191_v54, 16  ;;  %v2628_v18 = vrot.slane %v2626_v2, 4  ;;  %v6207_v41 = vld [vmem:[#allocation2 + $0xc8] sm:$0x1] }
 0x1ad   : > { %3034 = vrot.lane.b32.xlu1 %v3004_v5, %s4533_s21  ;;  %3028 = vrot.lane.b32.xlu0 %v3001_v25, %s4533_s21  ;;  %v2436_v56 = vrot.slane %v2434_v6, 5  ;;  %v2422_v31 = vrot.slane %v2421_v59, 4  ;;  %v1833_v5 = vshll.u32 %v1451_v15, 16  ;;  %v1839_v25 = vshll.u32 %v6191_v54, 16  ;;  %v6212_v9 = vld [vmem:[#allocation2 + $0xd0] sm:$0xf] }
 0x1ae   : > { %v2431_v29 = vor.u32 %v2430_v20, %v2426_v22  ;;  %v1832_v45 = vrot.slane %v1830_v16, 4  ;;  %v1845_v17 = vrot.slane %v1843_v11, 4  ;;  %v2812_v3 = vunpack.c.l.b16 %v1417_v42  ;;  %v2060_v15 = vld [vmem:[#allocation2 + $0xcc] sm:$0xf]  ;;  %v1868_v39 = vld [vmem:[#allocation2 + $0xc0] sm:$0xe] }
 0x1af   : > { %v6184_v43 = vpop.permute.xlu1 %3030  ;;  %v3025_v1 = vpop.permute.xlu0 %3024  ;;  %v2427_v28 = vsel %vm4649_vm11, %v2422_v31, %v2426_v22  ;;  %v1835_v46 = vrot.slane %v1833_v5, 5  ;;  %v6209_v49 = vrot.slane %v1839_v25, 5  ;;  %v2813_v38 = vunpack.c.l.b16 %v1420_v48  ;;  %v2473_v16 = vld [vmem:[#allocation2 + $0x9c] sm:$0xe] }
 0x1b0   : > { %3210 = vrot.lane.b32.xlu2 %v4382_v57, %s4536_s24  ;;  %v2432_v40 = vrot.slane %v2431_v29, 4  ;;  %v3242_v13 = vunpack.c.l.b16 %v2427_v28  ;;  %v3482_v55 = vsel %vm3456_vm4, %v5658_v4, %v6013_v47  ;;  %v3257_v63 = vpack.c.b16 %v6188_v58, %v6186_v32 }
 0x1b1   : > { %v2627_v23 = vsel %vm4957_vm14, %v4115_v52, %v2626_v2  ;;  %v3509_v50 = vsel %vm3489_vm6, %v3476_v35, %v3025_v1  ;;  %v1836_v22 = vor.u32 %v1835_v46, %v1832_v45  ;;  %v1849_v20 = vshll.u32 %v6207_v41, 16 }
 0x1b2   : > { %v2437_v60 = vsel %vm4649_vm11, %v2432_v40, %v2436_v56  ;;  %v6222_v6 = vpop.permute.xlu2 %3092  ;;  %v1846_v47 = vor.u32 %v1845_v17, %v6209_v49  ;;  %v2448_v32 = vshll.u32 %v6212_v9, 16  ;;  %v2452_v57 = vshrl.u32 %v6212_v9, 16  ;;  %v2077_v17 = vld [vmem:[#allocation2 + $0xd4] sm:$0x1] }
 0x1b3   : > { %v3243_v62 = vunpack.c.l.b16 %v2437_v60  ;;  %v2829_v58 = vpack.c.b16 %v2813_v38, %v2812_v3  ;;  %v2024_v1 = vrot.slane %v6191_v54, 5  ;;  %v2439_v59 = vshrl.u32 %v2060_v15, 16 }
 0x1b4   : > { %v2442_v2 = vshll.u32 %v2060_v15, 16  ;;  %v3542_v29 = vsel %vm3522_vm7, %v3509_v50, %v6048_v34  ;;  %v3322_v56 = vunpack.c.l.b16 %v2627_v23  ;;  %v1837_v48 = vrot.slane %v1836_v22, 4 }
 0x1b5   : > { %3204 = vrot.lane.b32.xlu1 %v4379_v12, %s4536_s24  ;;  %3114 = vrot.lane.b32.xlu0 %v3084_v36, %s4537_s25  ;;  %v2630_v36 = vsel %vm4957_vm14, %v2628_v18, %v2629_v30  ;;  %v3260_v4 = vpack.c.b16 %v3243_v62, %v3242_v13  ;;  %v3515_v12 = vsel %vm3489_vm6, %v3482_v55, %v6184_v43  ;;  %v1851_v35 = vrot.slane %v1849_v20, 5  ;;  %v2477_v20 = vld [vmem:[#allocation2 + $0xcc] sm:$0xe] }
 0x1b6   : > { %v3323_v42 = vunpack.c.l.b16 %v2630_v36  ;;  %v4100_v31 = vrot.slane %v1868_v39, 9  ;;  %v2027_v52 = vrot.slane %v6207_v41, 5  ;;  %v1847_v5 = vrot.slane %v1846_v47, 4 }
 0x1b7   : > { %v3201_v10 = vpop.permute.xlu1 %3200  ;;  %v3111_v8 = vpop.permute.xlu0 %3110  ;;  %v4112_v54 = vrot.slane %v2473_v16, 9  ;;  %v2605_v40 = vrot.slane %v6069_v33, 5  ;;  %v2608_v30 = vrot.slane %v6117_v21, 5  ;;  %v2026_v34 = vrot.slane %v2024_v1, 4 }
 0x1b8   : > { %v3575_v43 = vsel %vm3555_vm8, %v3542_v29, %v3201_v10  ;;  %v2441_v25 = vrot.slane %v2439_v59, 4  ;;  %v2444_v11 = vrot.slane %v2442_v2, 5  ;;  %v2450_v18 = vrot.slane %v2448_v32, 5 }
 0x1b9   : > { %v2454_v45 = vrot.slane %v2452_v57, 4  ;;  %v2606_v46 = vsel %vm4957_vm14, %v4112_v54, %v2605_v40  ;;  %v2607_v60 = vrot.slane %v2605_v40, 4  ;;  %v3548_v13 = vsel %vm3522_vm7, %v3515_v12, %v3111_v8 }
 0x1ba   : > { %v3340_v33 = vpack.c.b16 %v3323_v42, %v3322_v56  ;;  %v2025_v21 = vsel %vm4957_vm14, %v4100_v31, %v2024_v1  ;;  %v3316_v62 = vunpack.c.l.b16 %v2606_v46  ;;  %v1842_v38 = vsel %vm4649_vm11, %v1837_v48, %v6209_v49  ;;  %v6256_v23 = vpop.permute.xlu2 %3194 }
 0x1bb   : > { %v1852_v55 = vsel %vm4649_vm11, %v1847_v5, %v1851_v35  ;;  %v2609_v10 = vsel %vm4957_vm14, %v2607_v60, %v2608_v30  ;;  %v2028_v15 = vsel %vm4957_vm14, %v2026_v34, %v2027_v52  ;;  %v2633_v8 = vrot.slane %v6212_v9, 5  ;;  %v4367_v52 = vld [vmem:[#allocation2 + $0xc0] sm:$0xff] }
 0x1bc   : > { %v3317_v50 = vunpack.c.l.b16 %v2609_v10  ;;  %v2445_v49 = vor.u32 %v2444_v11, %v2441_v25  ;;  %v2455_v36 = vor.u32 %v2454_v45, %v2450_v18  ;;  %v2458_v22 = vshll.u32 %v2077_v17, 16 }
 0x1bd   : > { %3290 = vrot.lane.b32.xlu1 %v3260_v4, %s4535_s23  ;;  %3284 = vrot.lane.b32.xlu0 %v3257_v63, %s4535_s23  ;;  %v3068_v4 = vunpack.c.l.b16 %v2025_v21  ;;  %v3581_v39 = vsel %vm3555_vm8, %v3548_v13, %v6092_v26  ;;  %v2989_v32 = vunpack.c.l.b16 %v1852_v55  ;;  %v3069_v57 = vunpack.c.l.b16 %v2028_v15 }
 0x1be   : > { %v3337_v47 = vpack.c.b16 %v3317_v50, %v3316_v62  ;;  %v4116_v9 = vrot.slane %v2477_v20, 9  ;;  %v2635_v59 = vrot.slane %v2633_v8, 4  ;;  %v2636_v2 = vrot.slane %v2077_v17, 5 }
 0x1bf   : > { %v3287_v28 = vpop.permute.xlu1 %3286  ;;  %v3281_v41 = vpop.permute.xlu0 %3280  ;;  %v2446_v12 = vrot.slane %v2445_v49, 4  ;;  %v2456_v29 = vrot.slane %v2455_v36, 4  ;;  %v2460_v56 = vrot.slane %v2458_v22, 5  ;;  %v3470_v17 = vsel %vm3456_vm4, %v5556_v44, %v6182_v27 }
 0x1c0   : > { %v3608_v3 = vsel %vm3588_vm12, %v3575_v43, %v3281_v41  ;;  %v3614_v1 = vsel %vm3588_vm12, %v3581_v39, %v3287_v28  ;;  %3364 = vrot.lane.b32.xlu2 %v3337_v47, %s4538_s26  ;;  %v2634_v35 = vsel %vm4957_vm14, %v4116_v9, %v2633_v8  ;;  %v2637_v31 = vsel %vm4957_vm14, %v2635_v59, %v2636_v2 }
 0x1c1   : > { %v3641_v63 = vsel %vm3621_vm13, %v3608_v3, %v6126_v51  ;;  %v2988_v51 = vunpack.c.l.b16 %v1842_v38  ;;  %v2451_v5 = vsel %vm4649_vm11, %v2446_v12, %v2450_v18  ;;  %v2461_v54 = vsel %vm4649_vm11, %v2456_v29, %v2460_v56  ;;  %v4383_v18 = vld [vmem:[#allocation2 + $0xcc] sm:$0xff] }
 0x1c2   : > { %4326 = vmatmul.msk.bf16.gmra.mxu2 %vm3674_vm2, %v3641_v63  ;;  %v3349_v40 = vpop.permute.xlu2 %3348  ;;  %v3324_v30 = vunpack.c.l.b16 %v2634_v35  ;;  %v3325_v43 = vunpack.c.l.b16 %v2637_v31  ;;  %v3244_v34 = vunpack.c.l.b16 %v2451_v5  ;;  %v3245_v25 = vunpack.c.l.b16 %v2461_v54 }
 0x1c3   : > { %v3005_v48 = vpack.c.b16 %v2989_v32, %v2988_v51 }
 0x1c4   : > { %v3341_v28 = vpack.c.b16 %v3325_v43, %v3324_v30  ;;  %v3261_v45 = vpack.c.b16 %v3245_v25, %v3244_v34 }
 0x1c5   : > { %2860 = vrot.lane.b32.xlu1 %v2829_v58, %s4532_s20  ;;  %3370 = vrot.lane.b32.xlu0 %v3340_v33, %s4538_s26  ;;  %v3085_v58 = vpack.c.b16 %v3069_v57, %v3068_v4 }
 0x1c7   : > { %v2933_v16 = vpop.permute.xlu1 %2932  ;;  %v3367_v42 = vpop.permute.xlu0 %3366 }
 0x1c8   : > { %v3647_v26 = vsel %vm3621_vm13, %v3614_v1, %v3367_v42  ;;  %2956 = vrot.lane.b32.xlu2 %v4367_v52, %s4534_s22  ;;  %v3464_v46 = vsel %vm3456_vm4, %v5504_v7, %v2933_v16 }
 0x1c9   : > { %4329 = vmatmul.msk.bf16.vlgmr.msra.gmra.mxu3 %vm3674_vm2, %v3647_v26 }
 0x1ca   : > { %v2953_v14 = vpop.permute.xlu2 %2952 }
 0x1cb   : > { %v3484_v52 = vsel %vm3456_vm4, %v5466_v53, %v2953_v14 }
 0x1cd   : > { %3116 = vrot.lane.b32.xlu1 %v3085_v58, %s4537_s25  ;;  %3036 = vrot.lane.b32.xlu0 %v3005_v48, %s4533_s21 }
 0x1cf   : > { %v3019_v61 = vpop.permute.xlu1 %3018  ;;  %v3013_v11 = vpop.permute.xlu0 %3012 }
 0x1d0   : > { %3212 = vrot.lane.b32.xlu2 %v4383_v18, %s4536_s24  ;;  %v3497_v33 = vsel %vm3489_vm6, %v3464_v46, %v3013_v11  ;;  %v3503_v3 = vsel %vm3489_vm6, %v3470_v17, %v3019_v61 }
 0x1d1   : > { %v3530_v21 = vsel %vm3522_vm7, %v3497_v33, %v6222_v6 }
 0x1d2   : > { %v3107_v10 = vpop.permute.xlu2 %3106 }
 0x1d5   : > { %3372 = vrot.lane.b32.xlu1 %v3341_v28, %s4538_s26  ;;  %3292 = vrot.lane.b32.xlu0 %v3261_v45, %s4535_s23 }
 0x1d6   : > { %v3720_v60 = vpop.f32.mrf.mxu0 }
 0x1d7   : > { %v3189_v13 = vpop.permute.xlu1 %3188  ;;  %v3099_v41 = vpop.permute.xlu0 %3098  ;;  %v3902_v55 = vmul.f32 %v3720_v60, %v3720_v60 }
 0x1d8   : > { %v3563_v62 = vsel %vm3555_vm8, %v3530_v21, %v3189_v13  ;;  %v3536_v27 = vsel %vm3522_vm7, %v3503_v3, %v3099_v41 }
 0x1d9   : > { %v3569_v36 = vsel %vm3555_vm8, %v3536_v27, %v6256_v23 }
 0x1da   : > { %v3209_v39 = vpop.permute.xlu2 %3208 }
 0x1de   : > { %v3722_v7 = vpop.f32.mrf.mxu0 }
 0x1df   : > { %v3275_v38 = vpop.permute.xlu1 %3274  ;;  %v4389_v63 = vpack.c.bf16 %v3722_v7, %v3720_v60  ;;  %v3864_v6 = vadd.f32 %v3722_v7, %v3720_v60  ;;  %v3903_v15 = vmul.f32 %v3722_v7, %v3722_v7  ;;  %v3269_v50 = vpop.permute.xlu0 %3268 }
 0x1e0   : > { %v3596_v44 = vsel %vm3588_vm12, %v3563_v62, %v3269_v50  ;;  %v3602_v22 = vsel %vm3588_vm12, %v3569_v36, %v3275_v38 }
 0x1e1   : > { %4390 = vst [vmem:[%s6298_s10] sm:$0xff] %v4389_v63   ;;  %v3934_v8 = vadd.f32 %v3903_v15, %v3902_v55  ;;  %v3629_v49 = vsel %vm3621_vm13, %v3596_v44, %v3349_v40 }
 0x1e2   : > { %4320 = vmatmul.msk.bf16.gmra.mxu0 %vm3674_vm2, %v3629_v49  ;;  %v3363_v2 = vpop.permute.xlu2 %3362 }
 0x1e7   : > { %v2947_v20 = vpop.permute.xlu1 %2946  ;;  %v3355_v4 = vpop.permute.xlu0 %3354 }
 0x1e8   : > { %v3635_v47 = vsel %vm3621_vm13, %v3602_v22, %v3355_v4  ;;  %v3478_v23 = vsel %vm3456_vm4, %v5427_v19, %v2947_v20 }
 0x1e9   : > { %4323 = vmatmul.msk.bf16.gmra.mxu1 %vm3674_vm2, %v3635_v47 }
 0x1ea   : > { %v3021_v5 = vpop.permute.xlu2 %3020 }
 0x1ef   : > { %v3033_v51 = vpop.permute.xlu1 %3032  ;;  %v3725_v32 = vpop.f32.mrf.mxu0 }
 0x1f0   : > { %v3027_v57 = vpop.permute.xlu0 %3026  ;;  %v3865_v1 = vadd.f32 %v3864_v6, %v3725_v32  ;;  %v3904_v9 = vmul.f32 %v3725_v32, %v3725_v32  ;;  %v3517_v54 = vsel %vm3489_vm6, %v3484_v52, %v3033_v51  ;;  %v4351_v52 = vld [vmem:[#allocation2 + $0xb4] sm:$0xff] }
 0x1f1   : > { %v3511_v48 = vsel %vm3489_vm6, %v3478_v23, %v3027_v57 }
 0x1f2   : > { %v3935_v59 = vadd.f32 %v3934_v8, %v3904_v9  ;;  %v3544_v31 = vsel %vm3522_vm7, %v3511_v48, %v3107_v10  ;;  %v3277_v18 = vpop.permute.xlu2 %3276 }
 0x1f6   : > { %v6312_v16 = vpop.f32.mrf.mxu1 }
 0x1f7   : > { %v3203_v12 = vpop.permute.xlu1 %3202  ;;  %v3727_v29 = vpop.f32.mrf.mxu0 }
 0x1f8   : > { %v3113_v56 = vpop.permute.xlu0 %3112  ;;  %v4394_v42 = vpack.c.bf16 %v3727_v29, %v3725_v32  ;;  %v3866_v26 = vadd.f32 %v3865_v1, %v3727_v29  ;;  %v3905_v58 = vmul.f32 %v3727_v29, %v3727_v29  ;;  %v3577_v19 = vsel %vm3555_vm8, %v3544_v31, %v3203_v12 }
 0x1f9   : > { %v3550_v61 = vsel %vm3522_vm7, %v3517_v54, %v3113_v56 }
 0x1fa   : > { %4466 = vst [vmem:[%s6298_s10 + $0x8] sm:$0xff] %v4394_v42   ;;  %v3936_v35 = vadd.f32 %v3935_v59, %v3905_v58  ;;  %v3583_v53 = vsel %vm3555_vm8, %v3550_v61, %v3209_v39  ;;  %v2955_v17 = vpop.permute.xlu2 %2954 }
 0x1fe   : > { %v6321_v40 = vpop.f32.mrf.mxu1 }
 0x1ff   : > { %v3289_v30 = vpop.permute.xlu1 %3288  ;;  %v4409_v43 = vpack.c.bf16 %v6321_v40, %v6312_v16 }
 0x200   : > { %v3283_v34 = vpop.permute.xlu0 %3282  ;;  %v3616_v28 = vsel %vm3588_vm12, %v3583_v53, %v3289_v30 }
 0x201   : > { %v3610_v25 = vsel %vm3588_vm12, %v3577_v19, %v3283_v34  ;;  %4469 = vst [vmem:[%s6298_s10 + $0x20] sm:$0xff] %v4409_v43   ;;  %v6458_v43 = vld [vmem:[#allocation3_spill] sm:$0xff] }
 0x202   : > { %v3643_v11 = vsel %vm3621_vm13, %v3610_v25, %v3363_v2  ;;  %v3109_v6 = vpop.permute.xlu2 %3108  ;;  %v3486_v2 = vsel %vm3456_vm4, %v5706_v0, %v2955_v17  ;;  %v3422_v34 = vsel %vm3374_vm15, %v4351_v52, %v6458_v43 }
 0x203   : > { %4327 = vmatmul.msk.bf16.gmra.mxu2 %vm3674_vm2, %v3643_v11 }
 0x207   : > { %v2941_v45 = vpop.permute.xlu1 %2940 }
 0x208   : > { %v3369_v14 = vpop.permute.xlu0 %3368  ;;  %v3472_v60 = vsel %vm3456_vm4, %v5387_v24, %v2941_v45 }
 0x209   : > { %v3649_v46 = vsel %vm3621_vm13, %v3616_v28, %v3369_v14  ;;  %v3505_v41 = vsel %vm3489_vm6, %v3472_v60, %v3021_v5 }
 0x20a   : > { %4330 = vmatmul.msk.bf16.gmra.mxu3 %vm3674_vm2, %v3649_v46  ;;  %v3211_v36 = vpop.permute.xlu2 %3210 }
 0x20c   : > { %v6336_v13 = vpop.f32.mrf.mxu2 }
 0x20f   : > { %v3197_v33 = vpop.permute.xlu1 %3196 }
 0x210   : > { %v3101_v21 = vpop.permute.xlu0 %3100 }
 0x211   : > { %v3538_v62 = vsel %vm3522_vm7, %v3505_v41, %v3101_v21 }
 0x212   : > { %v3571_v3 = vsel %vm3555_vm8, %v3538_v62, %v3197_v33 }
 0x213   : > { %v3604_v55 = vsel %vm3588_vm12, %v3571_v3, %v3277_v18 }
 0x214   : > { %v6341_v7 = vpop.f32.mrf.mxu2 }
 0x215   : > { %v4429_v38 = vpack.c.bf16 %v6341_v7, %v6336_v13 }
 0x217   : > { %v2949_v10 = vpop.permute.xlu1 %2948  ;;  %4473 = vst [vmem:[%s6298_s10 + $0x40] sm:$0xff] %v4429_v38  }
 0x218   : > { %v3357_v24 = vpop.permute.xlu0 %3356  ;;  %v3480_v22 = vsel %vm3456_vm4, %v5662_v37, %v2949_v10 }
 0x219   : > { %v3637_v63 = vsel %vm3621_vm13, %v3604_v55, %v3357_v24 }
 0x21a   : > { %4324 = vmatmul.msk.bf16.gmra.mxu1 %vm3674_vm2, %v3637_v63  ;;  %v3365_v23 = vpop.permute.xlu2 %3364 }
 0x21f   : > { %v3035_v15 = vpop.permute.xlu1 %3034  ;;  %v3730_v50 = vpop.f32.mrf.mxu0 }
 0x220   : > { %v3029_v44 = vpop.permute.xlu0 %3028  ;;  %v3867_v27 = vadd.f32 %v3866_v26, %v3730_v50  ;;  %v3906_v8 = vmul.f32 %v3730_v50, %v3730_v50  ;;  %v3519_v12 = vsel %vm3489_vm6, %v3486_v2, %v3035_v15 }
 0x221   : > { %v3513_v1 = vsel %vm3489_vm6, %v3480_v22, %v3029_v44 }
 0x222   : > { %v3937_v49 = vadd.f32 %v3936_v35, %v3906_v8  ;;  %v3546_v59 = vsel %vm3522_vm7, %v3513_v1, %v3109_v6  ;;  %v2957_v30 = vpop.permute.xlu2 %2956 }
 0x226   : > { %v6351_v20 = vpop.f32.mrf.mxu1 }
 0x227   : > { %v3205_v4 = vpop.permute.xlu1 %3204  ;;  %v3732_v47 = vpop.f32.mrf.mxu0 }
 0x228   : > { %v3115_v39 = vpop.permute.xlu0 %3114  ;;  %v4399_v51 = vpack.c.bf16 %v3732_v47, %v3730_v50  ;;  %v3868_v32 = vadd.f32 %v3867_v27, %v3732_v47  ;;  %v3907_v57 = vmul.f32 %v3732_v47, %v3732_v47  ;;  %v3579_v37 = vsel %vm3555_vm8, %v3546_v59, %v3205_v4 }
 0x229   : > { %v3552_v48 = vsel %vm3522_vm7, %v3519_v12, %v3115_v39  ;;  %v3911_v4 = vmul.f32 %v6321_v40, %v6321_v40 }
 0x22a   : > { %4467 = vst [vmem:[%s6298_s10 + $0x10] sm:$0xff] %v4399_v51   ;;  %v3938_v9 = vadd.f32 %v3937_v49, %v3907_v57  ;;  %v3585_v0 = vsel %vm3555_vm8, %v3552_v48, %v3211_v36  ;;  %v3213_v18 = vpop.permute.xlu2 %3212  ;;  %v3910_v49 = vmul.f32 %v6312_v16, %v6312_v16  ;;  %v3912_v51 = vmul.f32 %v6351_v20, %v6351_v20 }
 0x22e   : > { %v3747_v29 = vpop.f32.mrf.mxu1 }
 0x22f   : > { %v3291_v56 = vpop.permute.xlu1 %3290  ;;  %v4414_v42 = vpack.c.bf16 %v3747_v29, %v6351_v20  ;;  %v3913_v59 = vmul.f32 %v3747_v29, %v3747_v29 }
 0x230   : > { %v3285_v26 = vpop.permute.xlu0 %3284  ;;  %v3618_v31 = vsel %vm3588_vm12, %v3585_v0, %v3291_v56 }
 0x231   : > { %v3612_v58 = vsel %vm3588_vm12, %v3579_v37, %v3285_v26  ;;  %4470 = vst [vmem:[%s6298_s10 + $0x28] sm:$0xff] %v4414_v42  }
 0x232   : > { %v3645_v35 = vsel %vm3621_vm13, %v3612_v58, %v3365_v23 }
 0x233   : > { %4328 = vmatmul.msk.bf16.gmra.mxu2 %vm3674_vm2, %v3645_v35 }
 0x237   : > { %v2861_v5 = vpop.permute.xlu1 %2860 }
 0x238   : > { %v3371_v19 = vpop.permute.xlu0 %3370  ;;  %v3455_v25 = vsel %vm3423_vm1, %v3422_v34, %v2861_v5 }
 0x239   : > { %v3651_v54 = vsel %vm3621_vm13, %v3618_v31, %v3371_v19  ;;  %v3488_v61 = vsel %vm3456_vm4, %v3455_v25, %v2957_v30 }
 0x23a   : > { %4331 = vmatmul.msk.bf16.gmra.mxu3 %vm3674_vm2, %v3651_v54 }
 0x23f   : > { %v3117_v11 = vpop.permute.xlu1 %3116 }
 0x240   : > { %v3037_v53 = vpop.permute.xlu0 %3036 }
 0x241   : > { %v3521_v28 = vsel %vm3489_vm6, %v3488_v61, %v3037_v53  ;;  %v3918_v61 = vmul.f32 %v6336_v13, %v6336_v13 }
 0x242   : > { %v3554_v45 = vsel %vm3522_vm7, %v3521_v28, %v3117_v11  ;;  %v3919_v28 = vmul.f32 %v6341_v7, %v6341_v7 }
 0x243   : > { %v3587_v46 = vsel %vm3555_vm8, %v3554_v45, %v3213_v18 }
 0x245   : > { %v6376_v14 = vpop.f32.mrf.mxu2 }
 0x247   : > { %v3373_v60 = vpop.permute.xlu1 %3372 }
 0x248   : > { %v3293_v41 = vpop.permute.xlu0 %3292 }
 0x249   : > { %v3620_v33 = vsel %vm3588_vm12, %v3587_v46, %v3293_v41  ;;  %v3920_v46 = vmul.f32 %v6376_v14, %v6376_v14 }
 0x24a   : > { %v3653_v21 = vsel %vm3621_vm13, %v3620_v33, %v3373_v60 }
 0x24b   : > { %4332 = vmatmul.msk.bf16.gmra.mxu3 %vm3674_vm2, %v3653_v21 }
 0x24c   : > { %v6382_v17 = vpop.f32.mrf.mxu3 }
 0x24d   : > { %v6384_v62 = vpop.f32.mrf.mxu2 }
 0x24e   : > { %v4434_v3 = vpack.c.bf16 %v6384_v62, %v6376_v14  ;;  %v3921_v33 = vmul.f32 %v6384_v62, %v6384_v62 }
 0x250   : > { %4474 = vst [vmem:[%s6298_s10 + $0x48] sm:$0xff] %v4434_v3  }
 0x254   : > { %v6389_v38 = vpop.f32.mrf.mxu3 }
 0x255   : > { %v4449_v55 = vpack.c.bf16 %v6389_v38, %v6382_v17 }
 0x257   : > { %4477 = vst [vmem:[%s6298_s10 + $0x60] sm:$0xff] %v4449_v55  }
 0x25f   : > { %v3735_v10 = vpop.f32.mrf.mxu0 }
 0x260   : > { %v3869_v24 = vadd.f32 %v3868_v32, %v3735_v10  ;;  %v3908_v63 = vmul.f32 %v3735_v10, %v3735_v10 }
 0x262   : > { %v3939_v6 = vadd.f32 %v3938_v9, %v3908_v63 }
 0x266   : > { %v3750_v15 = vpop.f32.mrf.mxu1 }
 0x267   : > { %v3737_v50 = vpop.f32.mrf.mxu0 }
 0x268   : > { %v4404_v44 = vpack.c.bf16 %v3737_v50, %v3735_v10  ;;  %v3870_v27 = vadd.f32 %v3869_v24, %v3737_v50  ;;  %v3909_v8 = vmul.f32 %v3737_v50, %v3737_v50 }
 0x26a   : > { %4468 = vst [vmem:[%s6298_s10 + $0x18] sm:$0xff] %v4404_v44   ;;  %v3871_v36 = vadd.f32 %v3870_v27, %v6312_v16  ;;  %v3940_v22 = vadd.f32 %v3939_v6, %v3909_v8  ;;  %v3914_v16 = vmul.f32 %v3750_v15, %v3750_v15 }
 0x26c   : > { %v3872_v47 = vadd.f32 %v3871_v36, %v6321_v40  ;;  %v3941_v39 = vadd.f32 %v3940_v22, %v3910_v49 }
 0x26e   : > { %v3873_v32 = vadd.f32 %v3872_v47, %v6351_v20  ;;  %v3942_v57 = vadd.f32 %v3941_v39, %v3911_v4  ;;  %v3752_v1 = vpop.f32.mrf.mxu1  ;;  %v3927_v47 = vmul.f32 %v6389_v38, %v6389_v38 }
 0x26f   : > { %v4419_v9 = vpack.c.bf16 %v3752_v1, %v3750_v15  ;;  %v3915_v40 = vmul.f32 %v3752_v1, %v3752_v1 }
 0x270   : > { %v3943_v2 = vadd.f32 %v3942_v57, %v3912_v51  ;;  %v3874_v37 = vadd.f32 %v3873_v32, %v3747_v29 }
 0x271   : > { %4471 = vst [vmem:[%s6298_s10 + $0x30] sm:$0xff] %v4419_v9  }
 0x272   : > { %v3875_v23 = vadd.f32 %v3874_v37, %v3750_v15  ;;  %v3944_v12 = vadd.f32 %v3943_v2, %v3913_v59 }
 0x274   : > { %v3876_v56 = vadd.f32 %v3875_v23, %v3752_v1  ;;  %v3945_v42 = vadd.f32 %v3944_v12, %v3914_v16 }
 0x276   : > { %v3946_v26 = vadd.f32 %v3945_v42, %v3915_v40 }
 0x286   : > { %v3770_v58 = vpop.f32.mrf.mxu2 }
 0x287   : > { %v3922_v55 = vmul.f32 %v3770_v58, %v3770_v58 }
 0x28d   : > { %v3785_v48 = vpop.f32.mrf.mxu3 }
 0x28e   : > { %v3772_v20 = vpop.f32.mrf.mxu2  ;;  %v3928_v9 = vmul.f32 %v3785_v48, %v3785_v48 }
 0x28f   : > { %v4439_v35 = vpack.c.bf16 %v3772_v20, %v3770_v58  ;;  %v3923_v63 = vmul.f32 %v3772_v20, %v3772_v20 }
 0x291   : > { %4475 = vst [vmem:[%s6298_s10 + $0x50] sm:$0xff] %v4439_v35  }
 0x295   : > { %v3787_v0 = vpop.f32.mrf.mxu3 }
 0x296   : > { %v4454_v31 = vpack.c.bf16 %v3787_v0, %v3785_v48  ;;  %v3929_v37 = vmul.f32 %v3787_v0, %v3787_v0 }
 0x297   : > { %v3755_v52 = vpop.f32.mrf.mxu1 }
 0x298   : > { %4478 = vst [vmem:[%s6298_s10 + $0x68] sm:$0xff] %v4454_v31   ;;  %v3916_v29 = vmul.f32 %v3755_v52, %v3755_v52  ;;  %v3877_v54 = vadd.f32 %v3876_v56, %v3755_v52 }
 0x29a   : > { %v3947_v43 = vadd.f32 %v3946_v26, %v3916_v29 }
 0x29f   : > { %v3757_v5 = vpop.f32.mrf.mxu1 }
 0x2a0   : > { %v4424_v19 = vpack.c.bf16 %v3757_v5, %v3755_v52  ;;  %v3917_v30 = vmul.f32 %v3757_v5, %v3757_v5  ;;  %v3878_v34 = vadd.f32 %v3877_v54, %v3757_v5 }
 0x2a2   : > { %4472 = vst [vmem:[%s6298_s10 + $0x38] sm:$0xff] %v4424_v19   ;;  %v3948_v25 = vadd.f32 %v3947_v43, %v3917_v30  ;;  %v3879_v11 = vadd.f32 %v3878_v34, %v6336_v13 }
 0x2a4   : > { %v3949_v53 = vadd.f32 %v3948_v25, %v3918_v61  ;;  %v3880_v45 = vadd.f32 %v3879_v11, %v6341_v7 }
 0x2a6   : > { %v3950_v18 = vadd.f32 %v3949_v53, %v3919_v28  ;;  %v3881_v60 = vadd.f32 %v3880_v45, %v6376_v14 }
 0x2a8   : > { %v3951_v41 = vadd.f32 %v3950_v18, %v3920_v46  ;;  %v3882_v21 = vadd.f32 %v3881_v60, %v6384_v62  ;;  %v3926_v62 = vmul.f32 %v6382_v17, %v6382_v17 }
 0x2aa   : > { %v3952_v3 = vadd.f32 %v3951_v41, %v3921_v33  ;;  %v3883_v10 = vadd.f32 %v3882_v21, %v3770_v58 }
 0x2ac   : > { %v3953_v24 = vadd.f32 %v3952_v3, %v3922_v55  ;;  %v3884_v7 = vadd.f32 %v3883_v10, %v3772_v20 }
 0x2ae   : > { %v3954_v50 = vadd.f32 %v3953_v24, %v3923_v63 }
 0x2b6   : > { %v3775_v13 = vpop.f32.mrf.mxu2 }
 0x2b7   : > { %v3924_v6 = vmul.f32 %v3775_v13, %v3775_v13  ;;  %v3885_v15 = vadd.f32 %v3884_v7, %v3775_v13 }
 0x2b9   : > { %v3955_v14 = vadd.f32 %v3954_v50, %v3924_v6 }
 0x2bd   : > { %v3790_v44 = vpop.f32.mrf.mxu3 }
 0x2be   : > { %v3777_v27 = vpop.f32.mrf.mxu2 }
 0x2bf   : > { %v4444_v8 = vpack.c.bf16 %v3777_v27, %v3775_v13  ;;  %v3886_v49 = vadd.f32 %v3885_v15, %v3777_v27  ;;  %v3925_v36 = vmul.f32 %v3777_v27, %v3777_v27 }
 0x2c1   : > { %4476 = vst [vmem:[%s6298_s10 + $0x58] sm:$0xff] %v4444_v8   ;;  %v3887_v22 = vadd.f32 %v3886_v49, %v6382_v17  ;;  %v3956_v4 = vadd.f32 %v3955_v14, %v3925_v36  ;;  %v3930_v17 = vmul.f32 %v3790_v44, %v3790_v44 }
 0x2c3   : > { %v3888_v39 = vadd.f32 %v3887_v22, %v6389_v38  ;;  %v3957_v51 = vadd.f32 %v3956_v4, %v3926_v62 }
 0x2c5   : > { %v3958_v32 = vadd.f32 %v3957_v51, %v3927_v47  ;;  %v3792_v57 = vpop.f32.mrf.mxu3  ;;  %v3889_v59 = vadd.f32 %v3888_v39, %v3785_v48 }
 0x2c6   : > { %v4459_v1 = vpack.c.bf16 %v3792_v57, %v3790_v44  ;;  %v3931_v26 = vmul.f32 %v3792_v57, %v3792_v57 }
 0x2c7   : > { %v3959_v2 = vadd.f32 %v3958_v32, %v3928_v9  ;;  %v3890_v16 = vadd.f32 %v3889_v59, %v3787_v0 }
 0x2c8   : > { %4479 = vst [vmem:[%s6298_s10 + $0x70] sm:$0xff] %v4459_v1  }
 0x2c9   : > { %v3960_v23 = vadd.f32 %v3959_v2, %v3929_v37  ;;  %v3891_v56 = vadd.f32 %v3890_v16, %v3790_v44 }
 0x2cb   : > { %v3961_v40 = vadd.f32 %v3960_v23, %v3930_v17  ;;  %v3892_v42 = vadd.f32 %v3891_v56, %v3792_v57 }
 0x2cd   : > { %v3962_v58 = vadd.f32 %v3961_v40, %v3931_v26 }
 0x2ce   : > { %v3795_v12 = vpop.f32.mrf.mxu3 }
 0x2cf   : > { %v3932_v38 = vmul.f32 %v3795_v12, %v3795_v12  ;;  %v3893_v20 = vadd.f32 %v3892_v42, %v3795_v12 }
 0x2d1   : > { %v3963_v31 = vadd.f32 %v3962_v58, %v3932_v38 }
 0x2d6   : > { %v3797_v35 = vpop.f32.mrf.mxu3 }
 0x2d7   : > { %v4464_v52 = vpack.c.bf16 %v3797_v35, %v3795_v12  ;;  %v3894_v48 = vadd.f32 %v3893_v20, %v3797_v35  ;;  %v3933_v29 = vmul.f32 %v3797_v35, %v3797_v35 }
 0x2d9   : > { %4480 = vst [vmem:[%s6298_s10 + $0x78] sm:$0xff] %v4464_v52   ;;  %v3895_v5 = vrot.slane %v3894_v48, 4  ;;  %v3964_v0 = vadd.f32 %v3963_v31, %v3933_v29 }
 0x2db   : > { %v3896_v19 = vadd.f32 %v3895_v5, %v3894_v48  ;;  %v3965_v54 = vrot.slane %v3964_v0, 4 }
 0x2dd   : > { %v3897_v30 = vrot.slane %v3896_v19, 2  ;;  %v3966_v43 = vadd.f32 %v3965_v54, %v3964_v0 }
 0x2df   : > { %v3898_v34 = vadd.f32 %v3897_v30, %v3896_v19  ;;  %v3967_v25 = vrot.slane %v3966_v43, 2 }
 0x2e1   : > { %v3899_v61 = vrot.slane %v3898_v34, 1  ;;  %v3968_v11 = vadd.f32 %v3967_v25, %v3966_v43 }
 0x2e3   : > { %v3900_v53 = vadd.f32 %v3899_v61, %v3898_v34  ;;  %v3969_v28 = vrot.slane %v3968_v11, 1 }
 0x2e5   : > { %3901 = vst [vmem:[%s182_s16] sm:$0x1] %v3900_v53  ;;  %v3970_v45 = vadd.f32 %v3969_v28, %v3968_v11 }
 0x2e7   : > { %3971 = vst [vmem:[%s182_s16 + $0x1] sm:$0x1] %v3970_v45 }
 0x2e8 PF: > { %s14_s12 = sadd.s32 1, %s4528_s12  }
 0x2e9   : > { %p11_p5 = scmp.ge.s32.totalorder %s14_s12, 4  }
 0x2eb   :  { %13 = sbr.rel (!%p11_p5) target bundleno = 1 (0x1), region = 73 }

// kernel: convblock_forward.4
= control target key start
LH: loop header
LB: loop body
LE: loop exit
PB: predicated region body
PF: predicated region fallthrough
CT: control target
= control target key end

     0   :  { %s7207_s18 = smov 0   ;;  %s8673_s0 = inlined_call_operand.vmem [shape: bf16[2,16,16,128], index: 0, kind: input, shape index: {}]   ;;  %s8674_s1 = inlined_call_operand.vmem [shape: bf16[9,128,128], index: 1, kind: input, shape index: {}]   ;;  %s8675_s2 = inlined_call_operand.vmem [shape: f32[1,128], index: 2, kind: input, shape index: {}]   ;;  %s8676_s3 = inlined_call_operand.vmem [shape: f32[1,128], index: 3, kind: input, shape index: {}]   ;;  %s8677_s4 = inlined_call_operand.vmem [shape: bf16[512,128], index: 4, kind: output, shape index: {0}]   ;;  %s8678_s5 = inlined_call_operand.vmem [shape: f32[2,2,128], index: 5, kind: output, shape index: {1}]  }
   0x1 LB: > { %s7213_s19 = sadd.s32 4294967295, %s7174_s18   ;;  %p6170_p0 = scmp.ge.s32.totalorder %s7174_s18, 1  ;;  %s7174_s18 = sphi %s7207_s18, %s16_s18  }
   0x2   : > { %p190_p1 = scmp.lt.s32.totalorder %s7174_s18, 3 }
   0x4   : > { %p191_p2 = pnand %p6170_p0, %p190_p1 }
   0x6   : > { %194 = sbr.rel (%p191_p2) target bundleno = 785 (0x311), region = 36 }
   0xb   : > { %v6858_v0 = vld [vmem:[%s8674_s1 + $0x38] sm:$0xff]  ;;  %p222_p3 = scmp.lt.s32.totalorder %s7213_s19, 1  ;;  %vm245_vm0 = vcmask 1040384   ;;  %vm246_vm1 = vsmask.f32 256  ;;  %v6857_v1 = vld [vmem:[%s8674_s1 + $0x30] sm:$0xff] }
   0xc   : > { %7129 = vmatpush.bf16.msra.mxu1 %v6858_v0  ;;  %7130 = vmatpush.bf16.msra.mxu2 %v6858_v0  ;;  %vm7228_vm2 = vmand %vm245_vm0, %vm246_vm1  ;;  %vm302_vm3 = vsmask.f32 7938  ;;  %v260_v3 = vld [vmem:[#allocation2 + $0x30] sm:$0x1]  ;;  %v6856_v5 = vld [vmem:[%s8674_s1 + $0x28] sm:$0xff]  ;;  %v7176_v22 = vmov 0  }
   0xd   : > { %s7225_s24 = scalar_select %p222_p3, %s7213_s19, 1  ;;  %7131 = vmatpush.bf16.msra.mxu3 %v6858_v0  ;;  %1187 = vmatpush.bf16.msra.mxu0 %v6858_v0  ;;  %vm7233_vm4 = vmand %vm245_vm0, %vm302_vm3  ;;  %v261_v6 = vsel %vm7228_vm2, 0, %v260_v3  ;;  %v7251_v7 = vld [vmem:[%s8675_s2] ss:$0 sm:$0xff]  ;;  %v284_v12 = vld [vmem:[#allocation2 + $0x90] sm:$0x1] }
   0xe   : > { %262 = vst [vmem:[#allocation2 + $0x30] sm:$0x1] %v261_v6  ;;  %v272_v8 = vld [vmem:[#allocation2 + $0x60] sm:$0x1]  ;;  %v285_v19 = vsel %vm7228_vm2, 0, %v284_v12  ;;  %vm881_vm5 = vcmask 1043456  }
   0xf   : > { %s6834_s27 = sshll.u32 %s7225_s24, 7  ;;  %v273_v10 = vsel %vm7228_vm2, 0, %v272_v8  ;;  %v7260_v15 = vld [vmem:[%s8676_s3] ss:$0 sm:$0xff]  ;;  %238 = vst [vmem:[#allocation2] sm:$0xf] %v7176_v22  ;;  %vm7306_vm8 = vmand %vm881_vm5, %vm302_vm3 }
  0x10   : > { %s7246_s30 = scalar_lea.vmem %s8673_s0, %s6834_s27  ;;  %7132 = vmatpush.bf16.msra.mxu1 %v6857_v1  ;;  %7133 = vmatpush.bf16.msra.mxu2 %v6857_v1  ;;  %274 = vst [vmem:[#allocation2 + $0x60] sm:$0x1] %v273_v10  ;;  %v263_v27 = vld [vmem:[#allocation2 + $0x3c] sm:$0x1]  ;;  %v6855_v28 = vld [vmem:[%s8674_s1 + $0x20] sm:$0xff]  ;;  %v6853_v60 = vld [vmem:[%s8674_s1 + $0x10] sm:$0xff] }
  0x11   : > { %v7101_v9 = vld [vmem:[%s7246_s30 + $0x18] sm:$0xff]   ;;  %7134 = vmatpush.bf16.msra.mxu3 %v6857_v1  ;;  %1188 = vmatpush.bf16.msra.mxu0 %v6857_v1  ;;  %286 = vst [vmem:[#allocation2 + $0x90] sm:$0x1] %v285_v19  ;;  %v7275_v31 = vld [vmem:[%s7246_s30 + $0x20] sm:$0xff]   ;;  %v264_v38 = vsel %vm7228_vm2, 0, %v263_v27  ;;  %vm2153_vm11 = vcmask 1042432  }
  0x12   : > { %v7105_v11 = vld [vmem:[%s7246_s30 + $0x38] sm:$0xff]   ;;  %v6969_v13 = vunpack.c.l.bf16 %v7101_v9  ;;  %v6970_v14 = vunpack.c.h.bf16 %v7101_v9  ;;  %239 = vst [vmem:[#allocation2 + $0x4] sm:$0xf] %v7176_v22  ;;  %v6973_v42 = vunpack.c.l.bf16 %v7275_v31  ;;  %v6974_v47 = vunpack.c.h.bf16 %v7275_v31  ;;  %s6173_s8 = sshll.u32 %s7213_s19, 5  ;;  %s6175_s13 = sshll.u32 %s7225_s24, 1 }
  0x13   : > { %v6985_v16 = vunpack.c.l.bf16 %v7105_v11  ;;  %v6986_v17 = vunpack.c.h.bf16 %v7105_v11  ;;  %v7109_v18 = vld [vmem:[%s7246_s30 + $0x58] sm:$0xff]   ;;  %240 = vst [vmem:[#allocation2 + $0x8] sm:$0x1] %v7176_v22  ;;  %vm558_vm6 = vsmask.f32 4368  ;;  %vm2154_vm13 = vcmask 1046532   ;;  %s236_s16 = scalar_lea.vmem %s8678_s5, %s6175_s13 }
  0x14   : > { %v7001_v20 = vunpack.c.l.bf16 %v7109_v18  ;;  %v7002_v21 = vunpack.c.h.bf16 %v7109_v18  ;;  %v432_v23 = vmul.f32 %v7251_v7, %v6969_v13  ;;  %v433_v24 = vmul.f32 %v7251_v7, %v6970_v14  ;;  %7135 = vmatpush.bf16.msra.mxu1 %v6856_v5  ;;  %7136 = vmatpush.bf16.msra.mxu2 %v6856_v5  ;;  %242 = vst [vmem:[#allocation2 + $0xcc] sm:$0xf] %v7176_v22  ;;  %v6854_v43 = vld [vmem:[%s8674_s1 + $0x18] sm:$0xff]  ;;  %vm7297_vm7 = vmor %vm246_vm1, %vm558_vm6  ;;  %p8497_p4 = scmp.lt.s32.totalorder %s6173_s8, 63 }
  0x15   : > { %v440_v25 = vmul.f32 %v7251_v7, %v6985_v16  ;;  %v441_v26 = vmul.f32 %v7251_v7, %v6986_v17  ;;  %7137 = vmatpush.bf16.msra.mxu3 %v6856_v5  ;;  %1189 = vmatpush.bf16.msra.mxu0 %v6856_v5  ;;  %243 = vst [vmem:[#allocation2 + $0xd0] sm:$0xf] %v7176_v22  ;;  %v904_v10 = vld [vmem:[#allocation2 + $0x30] sm:$0xf]  ;;  %vm1356_vm9 = vsmask.f32 3328  ;;  %vm7616_vm14 = vmor %vm2153_vm11, %vm2154_vm13 }
  0x16   : > { %v448_v29 = vmul.f32 %v7251_v7, %v7001_v20  ;;  %v449_v30 = vmul.f32 %v7251_v7, %v7002_v21  ;;  %v468_v32 = vadd.f32 %v7260_v15, %v432_v23  ;;  %v469_v33 = vadd.f32 %v7260_v15, %v433_v24  ;;  %v248_v51 = vld [vmem:[#allocation2] sm:$0x1]  ;;  %244 = vst [vmem:[#allocation2 + $0xd4] sm:$0x1] %v7176_v22  ;;  %v6852_v21 = vld [vmem:[%s8674_s1 + $0x8] sm:$0xff]  ;;  %s8731_s8 = smov (!%p8497_p4, %s6173_s8), 63 }
  0x17   : > { %v476_v34 = vadd.f32 %v7260_v15, %v440_v25  ;;  %v477_v35 = vadd.f32 %v7260_v15, %v441_v26  ;;  %v249_v55 = vsel %vm7228_vm2, 0, %v248_v51  ;;  %265 = vst [vmem:[#allocation2 + $0x3c] sm:$0x1] %v264_v38  ;;  %v434_v8 = vmul.f32 %v7251_v7, %v6973_v42  ;;  %v932_v19 = vld [vmem:[#allocation2 + $0x60] sm:$0xf]  ;;  %s6174_s19 = sshll.u32 %s8731_s8, 2 }
  0x18   : > { %v484_v36 = vadd.f32 %v7260_v15, %v448_v29  ;;  %v485_v37 = vadd.f32 %v7260_v15, %v449_v30  ;;  %v500_v39 = vmax.f32 %v468_v32, 0.0  ;;  %v501_v40 = vmax.f32 %v469_v33, 0.0  ;;  %7138 = vmatpush.bf16.msra.mxu1 %v6855_v28  ;;  %7139 = vmatpush.bf16.msra.mxu2 %v6855_v28  ;;  %250 = vst [vmem:[#allocation2] sm:$0x1] %v249_v55  ;;  %v275_v29 = vld [vmem:[#allocation2 + $0x6c] sm:$0x1]  ;;  %s8526_s12 = scalar_lea.vmem %s8677_s4, %s6174_s19 }
  0x19   : > { %v508_v41 = vmax.f32 %v476_v34, 0.0  ;;  %v509_v44 = vmax.f32 %v477_v35, 0.0  ;;  %7140 = vmatpush.bf16.msra.mxu3 %v6855_v28  ;;  %1190 = vmatpush.bf16.msra.mxu0 %v6855_v28  ;;  %v7106_v30 = vld [vmem:[%s7246_s30 + $0x40] sm:$0xff]   ;;  %v960_v33 = vld [vmem:[#allocation2 + $0x90] sm:$0xf]  ;;  %v435_v34 = vmul.f32 %v7251_v7, %v6974_v47  ;;  %v470_v35 = vadd.f32 %v7260_v15, %v434_v8 }
  0x1a   : > { %v516_v45 = vmax.f32 %v484_v36, 0.0  ;;  %v517_v46 = vmax.f32 %v485_v37, 0.0  ;;  %v532_v48 = vpack.c.bf16 %v500_v39, %v500_v39  ;;  %v533_v49 = vpack.c.bf16 %v501_v40, %v501_v40  ;;  %v287_v36 = vld [vmem:[#allocation2 + $0x9c] sm:$0x1]  ;;  %v7110_v40 = vld [vmem:[%s7246_s30 + $0x60] sm:$0xff]  }
  0x1b   : > { %v540_v50 = vpack.c.bf16 %v508_v41, %v508_v41  ;;  %v541_v52 = vpack.c.bf16 %v509_v44, %v509_v44  ;;  %v251_v41 = vld [vmem:[#allocation2 + $0xc] sm:$0x1]  ;;  %v6851_v42 = vld [vmem:[%s8674_s1] sm:$0xff]  ;;  %v502_v44 = vmax.f32 %v470_v35, 0.0  ;;  %v288_v51 = vsel %vm7228_vm2, 0, %v287_v36  ;;  %v6905_v35 = vld [vmem:[%s8674_s1 + $0x130] sm:$0xff] }
  0x1c   : > { %v548_v53 = vpack.c.bf16 %v516_v45, %v516_v45  ;;  %v549_v54 = vpack.c.bf16 %v517_v46, %v517_v46  ;;  %v612_v56 = vshrl.u32 %v532_v48, 16  ;;  %v615_v57 = vshll.u32 %v532_v48, 16  ;;  %7141 = vmatpush.bf16.msra.mxu1 %v6854_v43  ;;  %7142 = vmatpush.bf16.msra.mxu2 %v6854_v43  ;;  %v7339_v47 = vld [vmem:[%s7246_s30] sm:$0xff]   ;;  %289 = vst [vmem:[#allocation2 + $0x9c] sm:$0x1] %v288_v51 }
  0x1d   : > { %v620_v58 = vshrl.u32 %v533_v49, 16  ;;  %v623_v59 = vshll.u32 %v533_v49, 16  ;;  %v680_v61 = vshrl.u32 %v540_v50, 16  ;;  %v683_v62 = vshll.u32 %v540_v50, 16  ;;  %7143 = vmatpush.bf16.msra.mxu3 %v6854_v43  ;;  %1191 = vmatpush.bf16.msra.mxu0 %v6854_v43 }
  0x1e   : > { %v688_v63 = vshrl.u32 %v541_v52, 16  ;;  %v691_v0 = vshll.u32 %v541_v52, 16  ;;  %v614_v3 = vrot.slane %v612_v56, 7  ;;  %v748_v6 = vshrl.u32 %v548_v53, 16  ;;  %v6874_v52 = vld [vmem:[%s8674_s1 + $0xb8] sm:$0xff] }
  0x1f   : > { %v7301_v5 = vrot.slane %v620_v58, 7  ;;  %v682_v11 = vrot.slane %v680_v61, 7  ;;  %v751_v13 = vshll.u32 %v548_v53, 16  ;;  %v756_v14 = vshrl.u32 %v549_v54, 16  ;;  %v6898_v53 = vld [vmem:[%s8674_s1 + $0xf8] sm:$0xff] }
  0x20   : > { %v7310_v12 = vrot.slane %v688_v63, 7  ;;  %v617_v16 = vor.u32 %v615_v57, %v614_v3  ;;  %v618_v17 = vrot.slane %v614_v3, 4  ;;  %v759_v20 = vshll.u32 %v549_v54, 16  ;;  %7144 = vmatpush.bf16.msra.mxu1 %v6853_v60  ;;  %7145 = vmatpush.bf16.msra.mxu2 %v6853_v60  ;;  %v6866_v58 = vld [vmem:[%s8674_s1 + $0x78] sm:$0xff] }
  0x21   : > { %v625_v18 = vor.u32 %v623_v59, %v7301_v5  ;;  %v685_v22 = vor.u32 %v683_v62, %v682_v11  ;;  %v686_v23 = vrot.slane %v682_v11, 4  ;;  %7146 = vmatpush.bf16.msra.mxu3 %v6853_v60  ;;  %1192 = vmatpush.bf16.msra.mxu0 %v6853_v60  ;;  %v750_v27 = vrot.slane %v748_v6, 7  ;;  %v6906_v59 = vld [vmem:[%s8674_s1 + $0x138] sm:$0xff]  ;;  %v6873_v11 = vld [vmem:[%s8674_s1 + $0xb0] sm:$0xff] }
  0x22   : > { %v693_v24 = vor.u32 %v691_v0, %v7310_v12  ;;  %v905_v26 = vsel %vm7306_vm8, %v617_v16, %v904_v10  ;;  %v7321_v28 = vrot.slane %v756_v14, 7  ;;  %v471_v43 = vadd.f32 %v7260_v15, %v435_v34  ;;  %v6835_v0 = vld [vmem:[#allocation2] sm:$0xff] }
  0x23   : > { %v626_v25 = vsel %vm7297_vm7, %v618_v17, %v625_v18  ;;  %906 = vst [vmem:[#allocation2 + $0x30] sm:$0xf] %v905_v26  ;;  %v933_v32 = vsel %vm7306_vm8, %v685_v22, %v932_v19  ;;  %v753_v37 = vor.u32 %v751_v13, %v750_v27  ;;  %v754_v38 = vrot.slane %v750_v27, 4  ;;  %v6897_v18 = vld [vmem:[%s8674_s1 + $0xf0] sm:$0xff] }
  0x24   : > { %v694_v31 = vsel %vm7297_vm7, %v686_v23, %v693_v24  ;;  %907 = vst [vmem:[#allocation2 + $0x34] sm:$0xf] %v626_v25  ;;  %v761_v39 = vor.u32 %v759_v20, %v7321_v28  ;;  %7147 = vmatpush.bf16.msra.mxu1 %v6852_v21  ;;  %7148 = vmatpush.bf16.msra.mxu2 %v6852_v21  ;;  %v276_v45 = vsel %vm7228_vm2, 0, %v275_v29  ;;  %v6989_v46 = vunpack.c.l.bf16 %v7106_v30  ;;  %v6865_v23 = vld [vmem:[%s8674_s1 + $0x70] sm:$0xff]  ;;  %v911_v24 = vld [vmem:[#allocation2 + $0x3c] sm:$0xf] }
  0x25   : > { %934 = vst [vmem:[#allocation2 + $0x60] sm:$0xf] %v933_v32  ;;  %7149 = vmatpush.bf16.msra.mxu3 %v6852_v21  ;;  %1193 = vmatpush.bf16.msra.mxu0 %v6852_v21  ;;  %v961_v49 = vsel %vm7306_vm8, %v753_v37, %v960_v33  ;;  %v6990_v50 = vunpack.c.h.bf16 %v7106_v30  ;;  %v503_v54 = vmax.f32 %v471_v43, 0.0  ;;  %v534_v55 = vpack.c.bf16 %v502_v44, %v502_v44  ;;  %v6872_v44 = vld [vmem:[%s8674_s1 + $0xa8] sm:$0xff] }
  0x26   : > { %935 = vst [vmem:[#allocation2 + $0x64] sm:$0xf] %v694_v31  ;;  %v762_v48 = vsel %vm7297_vm7, %v754_v38, %v761_v39  ;;  %v442_v56 = vmul.f32 %v7251_v7, %v6989_v46  ;;  %v7005_v57 = vunpack.c.l.bf16 %v7110_v40  ;;  %v7006_v61 = vunpack.c.h.bf16 %v7110_v40 }
  0x27   : > { %962 = vst [vmem:[#allocation2 + $0x90] sm:$0xf] %v961_v49  ;;  %v443_v60 = vmul.f32 %v7251_v7, %v6990_v50  ;;  %v252_v62 = vsel %vm7228_vm2, 0, %v251_v41  ;;  %v6957_v63 = vunpack.c.l.bf16 %v7339_v47  ;;  %v535_v3 = vpack.c.bf16 %v503_v54, %v503_v54  ;;  %v6864_v50 = vld [vmem:[%s8674_s1 + $0x68] sm:$0xff] }
  0x28   : > { %963 = vst [vmem:[#allocation2 + $0x94] sm:$0xf] %v762_v48  ;;  %7150 = vmatpush.bf16.msra.mxu1 %v6851_v42  ;;  %7151 = vmatpush.bf16.msra.mxu2 %v6851_v42  ;;  %v629_v6 = vshrl.u32 %v534_v55, 16  ;;  %v632_v8 = vshll.u32 %v534_v55, 16  ;;  %v478_v10 = vadd.f32 %v7260_v15, %v442_v56  ;;  %v450_v14 = vmul.f32 %v7251_v7, %v7005_v57  ;;  %v6904_v56 = vld [vmem:[%s8674_s1 + $0x128] sm:$0xff] }
  0x29   : > { %277 = vst [vmem:[#allocation2 + $0x6c] sm:$0x1] %v276_v45  ;;  %7152 = vmatpush.bf16.msra.mxu3 %v6851_v42  ;;  %1194 = vmatpush.bf16.msra.mxu0 %v6851_v42  ;;  %v479_v13 = vadd.f32 %v7260_v15, %v443_v60  ;;  %v451_v16 = vmul.f32 %v7251_v7, %v7006_v61  ;;  %v637_v20 = vshrl.u32 %v535_v3, 16  ;;  %v640_v21 = vshll.u32 %v535_v3, 16  ;;  %v6896_v45 = vld [vmem:[%s8674_s1 + $0xe8] sm:$0xff] }
  0x2a   : > { %v631_v19 = vrot.slane %v629_v6, 7  ;;  %v510_v22 = vmax.f32 %v478_v10, 0.0  ;;  %v486_v26 = vadd.f32 %v7260_v15, %v450_v14  ;;  %253 = vst [vmem:[#allocation2 + $0xc] sm:$0x1] %v252_v62  ;;  %v6958_v29 = vunpack.c.h.bf16 %v7339_v47  ;;  %v266_v57 = vld [vmem:[#allocation2 + $0x48] sm:$0x1] }
  0x2b   : > { %v6839_v17 = vld [vmem:[#allocation2 + $0x30] sm:$0xff]  ;;  %v511_v25 = vmax.f32 %v479_v13, 0.0  ;;  %v487_v27 = vadd.f32 %v7260_v15, %v451_v16  ;;  %v7380_v33 = vrot.slane %v637_v20, 7  ;;  %v426_v39 = vmul.f32 %v7251_v7, %v6957_v63  ;;  %v6895_v6 = vld [vmem:[%s8674_s1 + $0xe0] sm:$0xff]  ;;  %v967_v20 = vld [vmem:[#allocation2 + $0x9c] sm:$0xf] }
  0x2c   : > { %2397 = vmatpush.bf16.msrb.mxu2 %v6874_v52  ;;  %1872 = vmatpush.bf16.msrb.mxu1 %v6866_v58  ;;  %v634_v31 = vor.u32 %v632_v8, %v631_v19  ;;  %v635_v32 = vrot.slane %v631_v19, 4  ;;  %v542_v34 = vpack.c.bf16 %v510_v22, %v510_v22  ;;  %v518_v37 = vmax.f32 %v486_v26, 0.0  ;;  %v7103_v8 = vld [vmem:[%s7246_s30 + $0x28] sm:$0xff]   ;;  %v6871_v14 = vld [vmem:[%s8674_s1 + $0xa0] sm:$0xff] }
  0x2d   : > { %2775 = vmatpush.bf16.msrb.mxu3 %v6898_v53  ;;  %3521 = vmatpush.bf16.msrb.mxu0 %v6906_v59  ;;  %v6843_v30 = vld [vmem:[#allocation2 + $0x60] sm:$0xff]  ;;  %v543_v36 = vpack.c.bf16 %v511_v25, %v511_v25  ;;  %v519_v38 = vmax.f32 %v487_v27, 0.0  ;;  %v642_v41 = vor.u32 %v640_v21, %v7380_v33  ;;  %v427_v55 = vmul.f32 %v7251_v7, %v6958_v29 }
  0x2e   : > { %1215 = vmatmul.bf16.vlgmr.msra.gmra.mxu1 %v6839_v17  ;;  %1195 = vmatmul.bf16.vlgmr.msra.gmra.mxu0 %v6835_v0  ;;  %v912_v42 = vsel %vm7306_vm8, %v634_v31, %v911_v24  ;;  %v697_v43 = vshrl.u32 %v542_v34, 16  ;;  %v700_v46 = vshll.u32 %v542_v34, 16  ;;  %v550_v49 = vpack.c.bf16 %v518_v37, %v518_v37  ;;  %v6863_v16 = vld [vmem:[%s8674_s1 + $0x60] sm:$0xff]  ;;  %v278_v17 = vld [vmem:[#allocation2 + $0x78] sm:$0x1]  ;;  %v7107_v31 = vld [vmem:[%s7246_s30 + $0x48] sm:$0xff]  }
  0x2f   : > { %1235 = vmatmul.bf16.vlgmr.msra.gmra.mxu2 %v6843_v30  ;;  %v6847_v40 = vld [vmem:[#allocation2 + $0x90] sm:$0xff]  ;;  %913 = vst [vmem:[#allocation2 + $0x3c] sm:$0xf] %v912_v42  ;;  %v705_v47 = vshrl.u32 %v543_v36, 16  ;;  %v708_v48 = vshll.u32 %v543_v36, 16  ;;  %v643_v51 = vsel %vm7297_vm7, %v635_v32, %v642_v41  ;;  %v551_v54 = vpack.c.bf16 %v519_v38, %v519_v38 }
  0x30   : > { %2398 = vmatpush.bf16.msrb.mxu2 %v6873_v11  ;;  %1873 = vmatpush.bf16.msrb.mxu1 %v6865_v23  ;;  %v699_v52 = vrot.slane %v697_v43, 7  ;;  %v939_v53 = vld [vmem:[#allocation2 + $0x6c] sm:$0xf]  ;;  %914 = vst [vmem:[#allocation2 + $0x40] sm:$0xf] %v643_v51  ;;  %v765_v59 = vshrl.u32 %v550_v49, 16  ;;  %v462_v61 = vadd.f32 %v7260_v15, %v426_v39  ;;  %v463_v13 = vadd.f32 %v7260_v15, %v427_v55 }
  0x31   : > { %2776 = vmatpush.bf16.msrb.mxu3 %v6897_v18  ;;  %3522 = vmatpush.bf16.msrb.mxu0 %v6905_v35  ;;  %v7404_v58 = vrot.slane %v705_v47, 7  ;;  %v768_v60 = vshll.u32 %v550_v49, 16  ;;  %v773_v0 = vshrl.u32 %v551_v54, 16  ;;  %v776_v3 = vshll.u32 %v551_v54, 16  ;;  %v290_v37 = vld [vmem:[#allocation2 + $0xa8] sm:$0x1] }
  0x32   : > { %1255 = vmatmul.bf16.vlgmr.msra.gmra.mxu3 %v6847_v40  ;;  %v702_v62 = vor.u32 %v700_v46, %v699_v52  ;;  %v703_v63 = vrot.slane %v699_v52, 4  ;;  %v767_v11 = vrot.slane %v765_v59, 7  ;;  %v494_v21 = vmax.f32 %v462_v61, 0.0  ;;  %v7111_v43 = vld [vmem:[%s7246_s30 + $0x68] sm:$0xff]  }
  0x33   : > { %v710_v10 = vor.u32 %v708_v48, %v7404_v58  ;;  %v7421_v19 = vrot.slane %v773_v0, 7  ;;  %v267_v22 = vsel %vm7228_vm2, 0, %v266_v57  ;;  %v495_v26 = vmax.f32 %v463_v13, 0.0  ;;  %v6870_v48 = vld [vmem:[%s8674_s1 + $0x98] sm:$0xff]  ;;  %v883_v54 = vld [vmem:[#allocation2 + $0xc] sm:$0xf] }
  0x34   : > { %2399 = vmatpush.bf16.msrb.mxu2 %v6872_v44  ;;  %1874 = vmatpush.bf16.msrb.mxu1 %v6864_v50  ;;  %v940_v18 = vsel %vm7306_vm8, %v702_v62, %v939_v53  ;;  %v770_v24 = vor.u32 %v768_v60, %v767_v11  ;;  %v771_v25 = vrot.slane %v767_v11, 4  ;;  %v526_v29 = vpack.c.bf16 %v494_v21, %v494_v21 }
  0x35   : > { %2777 = vmatpush.bf16.msrb.mxu3 %v6896_v45  ;;  %3523 = vmatpush.bf16.msrb.mxu0 %v6904_v56  ;;  %v711_v23 = vsel %vm7297_vm7, %v703_v63, %v710_v10  ;;  %941 = vst [vmem:[#allocation2 + $0x6c] sm:$0xf] %v940_v18  ;;  %v778_v27 = vor.u32 %v776_v3, %v7421_v19  ;;  %v6977_v30 = vunpack.c.l.bf16 %v7103_v8  ;;  %v6978_v35 = vunpack.c.h.bf16 %v7103_v8 }
  0x36   : > { %942 = vst [vmem:[#allocation2 + $0x70] sm:$0xf] %v711_v23  ;;  %v968_v32 = vsel %vm7306_vm8, %v770_v24, %v967_v20  ;;  %v527_v34 = vpack.c.bf16 %v495_v26, %v495_v26  ;;  %v279_v36 = vsel %vm7228_vm2, 0, %v278_v17  ;;  %v561_v40 = vshrl.u32 %v526_v29, 16  ;;  %v254_v20 = vld [vmem:[#allocation2 + $0x18] sm:$0x1] }
  0x37   : > { %268 = vst [vmem:[#allocation2 + $0x48] sm:$0x1] %v267_v22  ;;  %v6840_v38 = vld [vmem:[#allocation2 + $0x3c] sm:$0xff]  ;;  %v779_v39 = vsel %vm7297_vm7, %v771_v25, %v778_v27  ;;  %v564_v41 = vshll.u32 %v526_v29, 16  ;;  %v436_v42 = vmul.f32 %v7251_v7, %v6977_v30  ;;  %v437_v46 = vmul.f32 %v7251_v7, %v6978_v35 }
  0x38   : > { %2400 = vmatpush.bf16.msrb.mxu2 %v6871_v14  ;;  %1875 = vmatpush.bf16.msrb.mxu1 %v6863_v16  ;;  %969 = vst [vmem:[#allocation2 + $0x9c] sm:$0xf] %v968_v32  ;;  %v569_v44 = vshrl.u32 %v527_v34, 16  ;;  %v572_v45 = vshll.u32 %v527_v34, 16  ;;  %v6993_v47 = vunpack.c.l.bf16 %v7107_v31  ;;  %v563_v49 = vrot.slane %v561_v40, 7 }
  0x39   : > { %2778 = vmatpush.bf16.msrb.mxu3 %v6895_v6  ;;  %970 = vst [vmem:[#allocation2 + $0xa0] sm:$0xf] %v779_v39  ;;  %v472_v50 = vadd.f32 %v7260_v15, %v436_v42  ;;  %v6994_v51 = vunpack.c.h.bf16 %v7107_v31  ;;  %v291_v52 = vsel %vm7228_vm2, 0, %v290_v37  ;;  %v473_v55 = vadd.f32 %v7260_v15, %v437_v46  ;;  %v7099_v37 = vld [vmem:[%s7246_s30 + $0x8] sm:$0xff]   ;;  %v6894_v46 = vld [vmem:[%s8674_s1 + $0xd8] sm:$0xff] }
  0x3a   : > { %280 = vst [vmem:[#allocation2 + $0x78] sm:$0x1] %v279_v36  ;;  %v7444_v53 = vrot.slane %v569_v44, 7  ;;  %v444_v56 = vmul.f32 %v7251_v7, %v6993_v47  ;;  %v7009_v57 = vunpack.c.l.bf16 %v7111_v43  ;;  %v566_v59 = vor.u32 %v564_v41, %v563_v49  ;;  %v6903_v47 = vld [vmem:[%s8674_s1 + $0x120] sm:$0xff] }
  0x3b   : > { %292 = vst [vmem:[#allocation2 + $0xa8] sm:$0x1] %v291_v52  ;;  %v567_v60 = vrot.slane %v563_v49, 4  ;;  %v504_v61 = vmax.f32 %v472_v50, 0.0  ;;  %v445_v62 = vmul.f32 %v7251_v7, %v6994_v51  ;;  %v505_v3 = vmax.f32 %v473_v55, 0.0  ;;  %v6869_v52 = vld [vmem:[%s8674_s1 + $0x90] sm:$0xff]  ;;  %3524 = vmatpush.bf16.msrb.mxu0 %v6903_v47 }
  0x3c   : > { %2401 = vmatpush.bf16.msrb.mxu2 %v6870_v48  ;;  %v574_v0 = vor.u32 %v572_v45, %v7444_v53  ;;  %v480_v6 = vadd.f32 %v7260_v15, %v444_v56  ;;  %v884_v8 = vsel %vm7306_vm8, %v566_v59, %v883_v54  ;;  %v7010_v13 = vunpack.c.h.bf16 %v7111_v43  ;;  %v6862_v48 = vld [vmem:[%s8674_s1 + $0x58] sm:$0xff]  ;;  %v269_v54 = vld [vmem:[#allocation2 + $0x54] sm:$0x1] }
  0x3d   : > { %v6844_v63 = vld [vmem:[#allocation2 + $0x6c] sm:$0xff]  ;;  %v536_v10 = vpack.c.bf16 %v504_v61, %v504_v61  ;;  %v481_v11 = vadd.f32 %v7260_v15, %v445_v62  ;;  %885 = vst [vmem:[#allocation2 + $0xc] sm:$0xf] %v884_v8  ;;  %v537_v16 = vpack.c.bf16 %v505_v3, %v505_v3  ;;  %v452_v18 = vmul.f32 %v7251_v7, %v7009_v57  ;;  %v6902_v62 = vld [vmem:[%s8674_s1 + $0x118] sm:$0xff] }
  0x3e   : > { %1220 = vmatmul.bf16.gmra.mxu1 %v6840_v38  ;;  %v575_v14 = vsel %vm7297_vm7, %v567_v60, %v574_v0  ;;  %v512_v17 = vmax.f32 %v480_v6, 0.0  ;;  %v453_v25 = vmul.f32 %v7251_v7, %v7010_v13  ;;  %v918_v32 = vld [vmem:[#allocation2 + $0x48] sm:$0xf]  ;;  %v255_v36 = vsel %vm7228_vm2, 0, %v254_v20  ;;  %2779 = vmatpush.bf16.msrb.mxu3 %v6894_v46  ;;  %v6893_v61 = vld [vmem:[%s8674_s1 + $0xd0] sm:$0xff] }
  0x3f   : > { %1240 = vmatmul.bf16.gmra.mxu2 %v6844_v63  ;;  %886 = vst [vmem:[#allocation2 + $0x10] sm:$0xf] %v575_v14  ;;  %v646_v22 = vshrl.u32 %v536_v10, 16  ;;  %v649_v23 = vshll.u32 %v536_v10, 16  ;;  %v513_v24 = vmax.f32 %v481_v11, 0.0  ;;  %v654_v26 = vshrl.u32 %v537_v16, 16  ;;  %1876 = vmatpush.bf16.msrb.mxu1 %v6862_v48 }
  0x40   : > { %v6848_v21 = vld [vmem:[#allocation2 + $0x9c] sm:$0xff]  ;;  %v657_v27 = vshll.u32 %v537_v16, 16  ;;  %v544_v29 = vpack.c.bf16 %v512_v17, %v512_v17  ;;  %v488_v30 = vadd.f32 %v7260_v15, %v452_v18  ;;  %v489_v35 = vadd.f32 %v7260_v15, %v453_v25  ;;  %256 = vst [vmem:[#allocation2 + $0x18] sm:$0x1] %v255_v36  ;;  %v6861_v10 = vld [vmem:[%s8674_s1 + $0x50] sm:$0xff]  ;;  %2402 = vmatpush.bf16.msrb.mxu2 %v6869_v52 }
  0x41   : > { %v648_v31 = vrot.slane %v646_v22, 7  ;;  %v545_v34 = vpack.c.bf16 %v513_v24, %v513_v24  ;;  %v7463_v38 = vrot.slane %v654_v26, 7  ;;  %v946_v57 = vld [vmem:[#allocation2 + $0x78] sm:$0xf]  ;;  %v6961_v60 = vunpack.c.l.bf16 %v7099_v37  ;;  %v7104_v16 = vld [vmem:[%s7246_s30 + $0x30] sm:$0xff]   ;;  %3525 = vmatpush.bf16.msrb.mxu0 %v6902_v62 }
  0x42   : > { %1260 = vmatmul.bf16.gmra.mxu3 %v6848_v21  ;;  %v714_v39 = vshrl.u32 %v544_v29, 16  ;;  %v717_v40 = vshll.u32 %v544_v29, 16  ;;  %v520_v41 = vmax.f32 %v488_v30, 0.0  ;;  %v521_v51 = vmax.f32 %v489_v35, 0.0  ;;  %v281_v22 = vld [vmem:[#allocation2 + $0x84] sm:$0x1] }
  0x43   : > { %v651_v42 = vor.u32 %v649_v23, %v648_v31  ;;  %v652_v43 = vrot.slane %v648_v31, 4  ;;  %v722_v44 = vshrl.u32 %v545_v34, 16  ;;  %v725_v45 = vshll.u32 %v545_v34, 16  ;;  %2780 = vmatpush.bf16.msrb.mxu3 %v6893_v61  ;;  %v974_v29 = vld [vmem:[#allocation2 + $0xa8] sm:$0xf]  ;;  %1877 = vmatpush.bf16.msrb.mxu1 %v6861_v10  ;;  %v7108_v34 = vld [vmem:[%s7246_s30 + $0x50] sm:$0xff]  }
  0x44   : > { %v659_v49 = vor.u32 %v657_v27, %v7463_v38  ;;  %v716_v50 = vrot.slane %v714_v39, 7  ;;  %v552_v59 = vpack.c.bf16 %v520_v41, %v520_v41  ;;  %v553_v8 = vpack.c.bf16 %v521_v51, %v521_v51 }
  0x45   : > { %v919_v55 = vsel %vm7306_vm8, %v651_v42, %v918_v32  ;;  %v7480_v56 = vrot.slane %v722_v44, 7  ;;  %v6962_v21 = vunpack.c.h.bf16 %v7099_v37  ;;  %v428_v25 = vmul.f32 %v7251_v7, %v6961_v60 }
  0x46   : > { %v6836_v63 = vld [vmem:[#allocation2 + $0xc] sm:$0xff]  ;;  %v660_v0 = vsel %vm7297_vm7, %v652_v43, %v659_v49  ;;  %920 = vst [vmem:[#allocation2 + $0x48] sm:$0xf] %v919_v55  ;;  %v719_v3 = vor.u32 %v717_v40, %v716_v50  ;;  %v720_v6 = vrot.slane %v716_v50, 4  ;;  %v782_v13 = vshrl.u32 %v552_v59, 16 }
  0x47   : > { %921 = vst [vmem:[#allocation2 + $0x4c] sm:$0xf] %v660_v0  ;;  %v727_v11 = vor.u32 %v725_v45, %v7480_v56  ;;  %v785_v14 = vshll.u32 %v552_v59, 16  ;;  %1200 = vmatmul.bf16.gmra.mxu0 %v6836_v63  ;;  %v790_v18 = vshrl.u32 %v553_v8, 16  ;;  %v793_v20 = vshll.u32 %v553_v8, 16  ;;  %v7112_v63 = vld [vmem:[%s7246_s30 + $0x70] sm:$0xff]  }
  0x48   : > { %v947_v17 = vsel %vm7306_vm8, %v719_v3, %v946_v57  ;;  %v784_v24 = vrot.slane %v782_v13, 7  ;;  %v270_v26 = vsel %vm7228_vm2, 0, %v269_v54  ;;  %v429_v30 = vmul.f32 %v7251_v7, %v6962_v21  ;;  %v293_v43 = vld [vmem:[#allocation2 + $0xb4] sm:$0x1] }
  0x49   : > { %v728_v23 = vsel %vm7297_vm7, %v720_v6, %v727_v11  ;;  %948 = vst [vmem:[#allocation2 + $0x78] sm:$0xf] %v947_v17  ;;  %v7502_v27 = vrot.slane %v790_v18, 7  ;;  %v6981_v31 = vunpack.c.l.bf16 %v7104_v16  ;;  %v6982_v32 = vunpack.c.h.bf16 %v7104_v16  ;;  %v6868_v17 = vld [vmem:[%s8674_s1 + $0x88] sm:$0xff] }
  0x4a   : > { %949 = vst [vmem:[#allocation2 + $0x7c] sm:$0xf] %v728_v23  ;;  %v787_v35 = vor.u32 %v785_v14, %v784_v24  ;;  %v788_v36 = vrot.slane %v784_v24, 4  ;;  %v464_v37 = vadd.f32 %v7260_v15, %v428_v25  ;;  %v282_v39 = vsel %vm7228_vm2, 0, %v281_v22  ;;  %v890_v24 = vld [vmem:[#allocation2 + $0x18] sm:$0xf]  ;;  %2403 = vmatpush.bf16.msrb.mxu2 %v6868_v17 }
  0x4b   : > { %271 = vst [vmem:[#allocation2 + $0x54] sm:$0x1] %v270_v26  ;;  %v795_v40 = vor.u32 %v793_v20, %v7502_v27  ;;  %v465_v41 = vadd.f32 %v7260_v15, %v429_v30  ;;  %v438_v42 = vmul.f32 %v7251_v7, %v6981_v31  ;;  %v439_v46 = vmul.f32 %v7251_v7, %v6982_v32 }
  0x4c   : > { %283 = vst [vmem:[#allocation2 + $0x84] sm:$0x1] %v282_v39  ;;  %v975_v44 = vsel %vm7306_vm8, %v787_v35, %v974_v29  ;;  %v496_v45 = vmax.f32 %v464_v37, 0.0  ;;  %v6997_v47 = vunpack.c.l.bf16 %v7108_v34  ;;  %v6998_v52 = vunpack.c.h.bf16 %v7108_v34 }
  0x4d   : > { %v796_v49 = vsel %vm7297_vm7, %v788_v36, %v795_v40  ;;  %976 = vst [vmem:[#allocation2 + $0xa8] sm:$0xf] %v975_v44  ;;  %v497_v50 = vmax.f32 %v465_v41, 0.0  ;;  %v474_v51 = vadd.f32 %v7260_v15, %v438_v42  ;;  %v475_v55 = vadd.f32 %v7260_v15, %v439_v46  ;;  %v257_v41 = vld [vmem:[#allocation2 + $0x24] sm:$0x1] }
  0x4e   : > { %v6841_v48 = vld [vmem:[#allocation2 + $0x48] sm:$0xff]  ;;  %977 = vst [vmem:[#allocation2 + $0xac] sm:$0xf] %v796_v49  ;;  %v528_v54 = vpack.c.bf16 %v496_v45, %v496_v45  ;;  %v446_v57 = vmul.f32 %v7251_v7, %v6997_v47  ;;  %v294_v59 = vsel %vm7228_vm2, 0, %v293_v43  ;;  %v447_v62 = vmul.f32 %v7251_v7, %v6998_v52 }
  0x4f   : > { %1225 = vmatmul.bf16.gmra.mxu1 %v6841_v48  ;;  %v529_v60 = vpack.c.bf16 %v497_v50, %v497_v50  ;;  %v506_v61 = vmax.f32 %v474_v51, 0.0  ;;  %295 = vst [vmem:[#allocation2 + $0xb4] sm:$0x1] %v294_v59  ;;  %v507_v8 = vmax.f32 %v475_v55, 0.0  ;;  %v7013_v22 = vunpack.c.l.bf16 %v7112_v63  ;;  %v6892_v47 = vld [vmem:[%s8674_s1 + $0xc8] sm:$0xff]  ;;  %v6901_v48 = vld [vmem:[%s8674_s1 + $0x110] sm:$0xff] }
  0x50   : > { %v578_v3 = vshrl.u32 %v528_v54, 16  ;;  %v581_v6 = vshll.u32 %v528_v54, 16  ;;  %v482_v10 = vadd.f32 %v7260_v15, %v446_v57  ;;  %v483_v16 = vadd.f32 %v7260_v15, %v447_v62  ;;  %v6860_v54 = vld [vmem:[%s8674_s1 + $0x48] sm:$0xff]  ;;  %v6867_v55 = vld [vmem:[%s8674_s1 + $0x80] sm:$0xff]  ;;  %2781 = vmatpush.bf16.msrb.mxu3 %v6892_v47  ;;  %3526 = vmatpush.bf16.msrb.mxu0 %v6901_v48 }
  0x51   : > { %v6845_v0 = vld [vmem:[#allocation2 + $0x78] sm:$0xff]  ;;  %v586_v11 = vshrl.u32 %v529_v60, 16  ;;  %v589_v13 = vshll.u32 %v529_v60, 16  ;;  %v538_v14 = vpack.c.bf16 %v506_v61, %v506_v61  ;;  %v539_v20 = vpack.c.bf16 %v507_v8, %v507_v8  ;;  %v7100_v61 = vld [vmem:[%s7246_s30 + $0x10] sm:$0xff]   ;;  %v6891_v62 = vld [vmem:[%s8674_s1 + $0xc0] sm:$0xff]  ;;  %1878 = vmatpush.bf16.msrb.mxu1 %v6860_v54  ;;  %2404 = vmatpush.bf16.msrb.mxu2 %v6867_v55 }
  0x52   : > { %1245 = vmatmul.bf16.gmra.mxu2 %v6845_v0  ;;  %v580_v18 = vrot.slane %v578_v3, 7  ;;  %v514_v21 = vmax.f32 %v482_v10, 0.0  ;;  %v515_v29 = vmax.f32 %v483_v16, 0.0  ;;  %v7014_v40 = vunpack.c.h.bf16 %v7112_v63  ;;  %v925_v44 = vld [vmem:[#allocation2 + $0x54] sm:$0xf]  ;;  %v6900_v10 = vld [vmem:[%s8674_s1 + $0x108] sm:$0xff] }
  0x53   : > { %v7529_v23 = vrot.slane %v586_v11, 7  ;;  %v663_v25 = vshrl.u32 %v538_v14, 16  ;;  %v666_v26 = vshll.u32 %v538_v14, 16  ;;  %v671_v32 = vshrl.u32 %v539_v20, 16  ;;  %v6859_v11 = vld [vmem:[%s8674_s1 + $0x40] sm:$0xff] }
  0x54   : > { %v583_v30 = vor.u32 %v581_v6, %v580_v18  ;;  %v584_v31 = vrot.slane %v580_v18, 4  ;;  %v674_v34 = vshll.u32 %v539_v20, 16  ;;  %v546_v39 = vpack.c.bf16 %v514_v21, %v514_v21  ;;  %v953_v6 = vld [vmem:[#allocation2 + $0x84] sm:$0xf]  ;;  %v304_v18 = vld [vmem:[#allocation2 + $0x8] sm:$0x1]  ;;  %2782 = vmatpush.bf16.msrb.mxu3 %v6891_v62  ;;  %3527 = vmatpush.bf16.msrb.mxu0 %v6900_v10 }
  0x55   : > { %v6849_v35 = vld [vmem:[#allocation2 + $0xa8] sm:$0xff]  ;;  %v591_v36 = vor.u32 %v589_v13, %v7529_v23  ;;  %v665_v37 = vrot.slane %v663_v25, 7  ;;  %v7534_v43 = vrot.slane %v671_v32, 7  ;;  %v547_v45 = vpack.c.bf16 %v515_v29, %v515_v29  ;;  %1879 = vmatpush.bf16.msrb.mxu1 %v6859_v11 }
  0x56   : > { %v891_v42 = vsel %vm7306_vm8, %v583_v30, %v890_v24  ;;  %v454_v46 = vmul.f32 %v7251_v7, %v7013_v22  ;;  %1265 = vmatmul.bf16.gmra.mxu3 %v6849_v35  ;;  %v731_v52 = vshrl.u32 %v546_v39, 16  ;;  %v734_v59 = vshll.u32 %v546_v39, 16  ;;  %v6899_v30 = vld [vmem:[%s8674_s1 + $0x100] sm:$0xff] }
  0x57   : > { %v592_v49 = vsel %vm7297_vm7, %v584_v31, %v591_v36  ;;  %892 = vst [vmem:[#allocation2 + $0x18] sm:$0xf] %v891_v42  ;;  %v668_v50 = vor.u32 %v666_v26, %v665_v37  ;;  %v669_v51 = vrot.slane %v665_v37, 4  ;;  %v676_v57 = vor.u32 %v674_v34, %v7534_v43  ;;  %v1308_v31 = vld [vmem:[#allocation2] sm:$0xf] }
  0x58   : > { %893 = vst [vmem:[#allocation2 + $0x1c] sm:$0xf] %v592_v49  ;;  %v739_v60 = vshrl.u32 %v547_v45, 16  ;;  %v733_v0 = vrot.slane %v731_v52, 7  ;;  %v742_v3 = vshll.u32 %v547_v45, 16  ;;  %v455_v8 = vmul.f32 %v7251_v7, %v7014_v40  ;;  %3528 = vmatpush.bf16.msrb.mxu0 %v6899_v30 }
  0x59   : > { %v926_v63 = vsel %vm7306_vm8, %v668_v50, %v925_v44  ;;  %v677_v13 = vsel %vm7297_vm7, %v669_v51, %v676_v57  ;;  %v490_v16 = vadd.f32 %v7260_v15, %v454_v46  ;;  %v258_v17 = vsel %vm7228_vm2, 0, %v257_v41  ;;  %v7164_v40 = vld [vmem:[%s8675_s2] ss:$0 sm:$0xff]  ;;  %v1309_v42 = vld [vmem:[#allocation2 + $0x4] sm:$0xf] }
  0x5a   : > { %927 = vst [vmem:[#allocation2 + $0x54] sm:$0xf] %v926_v63  ;;  %v7567_v14 = vrot.slane %v739_v60, 7  ;;  %v736_v20 = vor.u32 %v734_v59, %v733_v0  ;;  %v737_v21 = vrot.slane %v733_v0, 4  ;;  %v491_v22 = vadd.f32 %v7260_v15, %v455_v8  ;;  %v7165_v49 = vld [vmem:[%s8676_s3] ss:$0 sm:$0xff] }
  0x5b   : > { %928 = vst [vmem:[#allocation2 + $0x58] sm:$0xf] %v677_v13  ;;  %v6965_v24 = vunpack.c.l.bf16 %v7100_v61  ;;  %v522_v26 = vmax.f32 %v490_v16, 0.0  ;;  %v6966_v29 = vunpack.c.h.bf16 %v7100_v61  ;;  %v305_v36 = vsel %vm7233_vm4, 0, %v304_v18  ;;  %v981_v0 = vld [vmem:[#allocation2 + $0xb4] sm:$0xf] }
  0x5c   : > { %v744_v25 = vor.u32 %v742_v3, %v7567_v14  ;;  %259 = vst [vmem:[#allocation2 + $0x24] sm:$0x1] %v258_v17  ;;  %v954_v32 = vsel %vm7306_vm8, %v736_v20, %v953_v6  ;;  %v523_v34 = vmax.f32 %v491_v22, 0.0  ;;  %v1360_v46 = vshrl.u32 %v1308_v31, 16 }
  0x5d   : > { %v430_v35 = vmul.f32 %v7251_v7, %v6965_v24  ;;  %955 = vst [vmem:[#allocation2 + $0x84] sm:$0xf] %v954_v32  ;;  %v554_v39 = vpack.c.bf16 %v522_v26, %v522_v26  ;;  %v431_v41 = vmul.f32 %v7164_v40, %v6966_v29  ;;  %v1363_v51 = vshll.u32 %v1308_v31, 16  ;;  %v2058_v31 = vld [vmem:[#allocation2 + $0x4] sm:$0xf] }
  0x5e   : > { %v745_v37 = vsel %vm7297_vm7, %v737_v21, %v744_v25  ;;  %v555_v45 = vpack.c.bf16 %v523_v34, %v523_v34  ;;  %306 = vst [vmem:[#allocation2 + $0x8] sm:$0x1] %v305_v36  ;;  %v1362_v57 = vrot.slane %v1360_v46, 4  ;;  %vm1357_vm10 = vsmask.f32 7440 }
  0x5f   : > { %v6837_v44 = vld [vmem:[#allocation2 + $0x18] sm:$0xff]  ;;  %956 = vst [vmem:[#allocation2 + $0x88] sm:$0xf] %v745_v37  ;;  %v466_v7 = vadd.f32 %v7260_v15, %v430_v35  ;;  %v799_v47 = vshrl.u32 %v554_v39, 16  ;;  %v802_v48 = vshll.u32 %v554_v39, 16  ;;  %v467_v50 = vadd.f32 %v7165_v49, %v431_v41  ;;  %vm7603_vm12 = vmor %vm1356_vm9, %vm1357_vm10 }
  0x60   : > { %1205 = vmatmul.bf16.gmra.mxu0 %v6837_v44  ;;  %v807_v52 = vshrl.u32 %v555_v45, 16  ;;  %v810_v54 = vshll.u32 %v555_v45, 16  ;;  %v6938_v15 = vld [vmem:[%s8674_s1 + $0x1b8] sm:$0xff]  ;;  %v1365_v62 = vrot.slane %v1363_v51, 5  ;;  %v1369_v6 = vshll.u32 %v1309_v42, 16 }
  0x61   : > { %v498_v55 = vmax.f32 %v466_v7, 0.0  ;;  %v801_v60 = vrot.slane %v799_v47, 7  ;;  %v499_v61 = vmax.f32 %v467_v50, 0.0  ;;  %v1373_v8 = vshrl.u32 %v1309_v42, 16  ;;  %4422 = vmatpush.bf16.msra.mxu2 %v6938_v15  ;;  %v2057_v21 = vld [vmem:[#allocation2] sm:$0xe] }
  0x62   : > { %v6842_v59 = vld [vmem:[#allocation2 + $0x54] sm:$0xff]  ;;  %v7594_v63 = vrot.slane %v807_v52, 7  ;;  %v1366_v16 = vor.u32 %v1365_v62, %v1362_v57  ;;  %v1371_v37 = vrot.slane %v1369_v6, 5  ;;  %v2960_v40 = vld [vmem:[#allocation2 + $0xc] sm:$0xf]  ;;  %v6320_v47 = vrot.slane %v2057_v21, 9 }
  0x63   : > { %v530_v3 = vpack.c.bf16 %v498_v55, %v498_v55  ;;  %1230 = vmatmul.bf16.gmra.mxu1 %v6842_v59  ;;  %v804_v10 = vor.u32 %v802_v48, %v801_v60  ;;  %v805_v11 = vrot.slane %v801_v60, 4  ;;  %v531_v13 = vpack.c.bf16 %v499_v61, %v499_v61  ;;  %v897_v29 = vld [vmem:[#allocation2 + $0x24] sm:$0xf]  ;;  %v307_v39 = vld [vmem:[#allocation2 + $0x14] sm:$0x1]  ;;  %v6946_v48 = vld [vmem:[%s8674_s1 + $0x1f8] sm:$0xff] }
  0x64   : > { %v812_v17 = vor.u32 %v810_v54, %v7594_v63  ;;  %v1367_v30 = vrot.slane %v1366_v16, 4  ;;  %v1375_v42 = vrot.slane %v1373_v8, 4  ;;  %v6914_v55 = vld [vmem:[%s8674_s1 + $0x178] sm:$0xff]  ;;  %v2158_v59 = vrot.slane %v2058_v31, 5  ;;  %v2961_v61 = vld [vmem:[#allocation2 + $0x10] sm:$0xf]  ;;  %5168 = vmatpush.bf16.msra.mxu3 %v6946_v48 }
  0x65   : > { %v595_v18 = vshrl.u32 %v530_v3, 16  ;;  %v598_v20 = vshll.u32 %v530_v3, 16  ;;  %v982_v24 = vsel %vm7306_vm8, %v804_v10, %v981_v0  ;;  %v603_v25 = vshrl.u32 %v531_v13, 16  ;;  %v1310_v35 = vld [vmem:[#allocation2 + $0x8] sm:$0x1]  ;;  %v6954_v57 = vld [vmem:[%s8674_s1 + $0x238] sm:$0xff]  ;;  %4043 = vmatpush.bf16.msra.mxu1 %v6914_v55 }
  0x66   : > { %v6846_v22 = vld [vmem:[#allocation2 + $0x84] sm:$0xff]  ;;  %v606_v26 = vshll.u32 %v531_v13, 16  ;;  %v813_v32 = vsel %vm7297_vm7, %v805_v11, %v812_v17  ;;  %983 = vst [vmem:[#allocation2 + $0xb4] sm:$0xf] %v982_v24  ;;  %v1379_v44 = vshll.u32 %v1310_v35, 16  ;;  %v1372_v50 = vsel %vm7603_vm12, %v1367_v30, %v1371_v37  ;;  %5690 = vmatpush.bf16.msra.mxu0 %v6954_v57 }
  0x67   : > { %v597_v34 = vrot.slane %v595_v18, 7  ;;  %1250 = vmatmul.bf16.gmra.mxu2 %v6846_v22  ;;  %984 = vst [vmem:[#allocation2 + $0xb8] sm:$0xf] %v813_v32  ;;  %v7607_v41 = vrot.slane %v603_v25, 7  ;;  %v2059_v46 = vld [vmem:[#allocation2 + $0x8] sm:$0x1]  ;;  %v1376_v51 = vor.u32 %v1375_v42, %v1371_v37  ;;  %v1760_v8 = vunpack.c.l.b16 %v1372_v50 }
  0x68   : > { %v1381_v52 = vrot.slane %v1379_v44, 5  ;;  %v2161_v60 = vrot.slane %v2059_v46, 5  ;;  %v308_v3 = vsel %vm7233_vm4, 0, %v307_v39  ;;  %v3009_v6 = vshrl.u32 %v2960_v40, 16  ;;  %v1311_v16 = vld [vmem:[#allocation2 + $0xc] sm:$0xf] }
  0x69   : > { %v600_v45 = vor.u32 %v598_v20, %v597_v34  ;;  %v601_v7 = vrot.slane %v597_v34, 4  ;;  %v608_v49 = vor.u32 %v606_v26, %v7607_v41  ;;  %v1377_v0 = vrot.slane %v1376_v51, 4  ;;  %309 = vst [vmem:[#allocation2 + $0x14] sm:$0x1] %v308_v3  ;;  %v1312_v21 = vld [vmem:[#allocation2 + $0x10] sm:$0xf] }
  0x6a   : > { %v2159_v10 = vsel %vm7616_vm14, %v6320_v47, %v2158_v59  ;;  %v2160_v11 = vrot.slane %v2158_v59, 4  ;;  %v3012_v13 = vshll.u32 %v2960_v40, 16  ;;  %v3018_v18 = vshll.u32 %v2961_v61, 16  ;;  %v310_v42 = vld [vmem:[#allocation2 + $0x20] sm:$0x1] }
  0x6b   : > { %v898_v15 = vsel %vm7306_vm8, %v600_v45, %v897_v29  ;;  %v609_v62 = vsel %vm7297_vm7, %v601_v7, %v608_v49  ;;  %v1382_v17 = vsel %vm7603_vm12, %v1377_v0, %v1381_v52  ;;  %v3022_v20 = vshrl.u32 %v2961_v61, 16  ;;  %v2060_v48 = vld [vmem:[#allocation2 + $0xc] sm:$0xe]  ;;  %v2061_v51 = vld [vmem:[#allocation2 + $0x10] sm:$0xf] }
  0x6c   : > { %899 = vst [vmem:[#allocation2 + $0x24] sm:$0xf] %v898_v15  ;;  %v576_v22 = vrot.slane %v7444_v53, 4  ;;  %v1761_v25 = vunpack.c.l.b16 %v1382_v17  ;;  %v2162_v26 = vsel %vm7616_vm14, %v2160_v11, %v2161_v60  ;;  %v2285_v29 = vunpack.c.l.b16 %v2159_v10  ;;  %v2963_v55 = vld [vmem:[#allocation2 + $0x18] sm:$0xf] }
  0x6d   : > { %900 = vst [vmem:[#allocation2 + $0x28] sm:$0xf] %v609_v62  ;;  %v2286_v30 = vunpack.c.l.b16 %v2162_v26  ;;  %v3011_v31 = vrot.slane %v3009_v6, 4  ;;  %v1384_v32 = vshrl.u32 %v1311_v16, 16  ;;  %v1387_v34 = vshll.u32 %v1311_v16, 16 }
  0x6e   : > { %v6850_v24 = vld [vmem:[#allocation2 + $0xb4] sm:$0xff]  ;;  %v1792_v35 = vpack.c.b16 %v1761_v25, %v1760_v8  ;;  %v3014_v37 = vrot.slane %v3012_v13, 5  ;;  %v1393_v39 = vshll.u32 %v1312_v21, 16  ;;  %v1397_v40 = vshrl.u32 %v1312_v21, 16  ;;  %v2964_v59 = vld [vmem:[#allocation2 + $0x1c] sm:$0xf] }
  0x6f   : > { %1270 = vmatmul.bf16.gmra.mxu3 %v6850_v24  ;;  %v7639_v44 = vrot.slane %v3018_v18, 5  ;;  %v3024_v45 = vrot.slane %v3022_v20, 4  ;;  %v1386_v53 = vrot.slane %v1384_v32, 4  ;;  %v1389_v7 = vrot.slane %v1387_v34, 5  ;;  %v1314_v16 = vld [vmem:[#allocation2 + $0x18] sm:$0xf] }
  0x70   : > { %v7641_v46 = vrot.slane %v1393_v39, 5  ;;  %v1399_v47 = vrot.slane %v1397_v40, 4  ;;  %v2317_v50 = vpack.c.b16 %v2286_v30, %v2285_v29  ;;  %v311_v52 = vsel %vm7233_vm4, 0, %v310_v42  ;;  %v887_v57 = vld [vmem:[#allocation2 + $0x14] sm:$0x1] }
  0x71   : > { %v3015_v15 = vor.u32 %v3014_v37, %v3011_v31  ;;  %312 = vst [vmem:[#allocation2 + $0x20] sm:$0x1] %v311_v52  ;;  %v888_v60 = vsel %vm7228_vm2, %v576_v22, %v887_v57  ;;  %v3025_v61 = vor.u32 %v3024_v45, %v7639_v44  ;;  %v1390_v62 = vor.u32 %v1389_v7, %v1386_v53  ;;  %v1315_v18 = vld [vmem:[#allocation2 + $0x1c] sm:$0xf]  ;;  %v313_v26 = vld [vmem:[#allocation2 + $0x2c] sm:$0x1] }
  0x72   : > { %v6321_v0 = vrot.slane %v2060_v48, 9  ;;  %889 = vst [vmem:[#allocation2 + $0x14] sm:$0x1] %v888_v60  ;;  %v1400_v3 = vor.u32 %v1399_v47, %v7641_v46  ;;  %v2165_v6 = vrot.slane %v2061_v51, 5  ;;  %v3033_v8 = vshrl.u32 %v2963_v55, 16 }
  0x73   : > { %1880 = vmatmul.bf16.vlgmr.msrb.gmra.mxu1 %v1792_v35  ;;  %v3036_v10 = vshll.u32 %v2963_v55, 16  ;;  %v3042_v11 = vshll.u32 %v2964_v59, 16  ;;  %v3046_v13 = vshrl.u32 %v2964_v59, 16  ;;  %v593_v17 = vrot.slane %v7529_v23, 4  ;;  %v6875_v23 = vld [vmem:[#allocation2 + $0xc] sm:$0xff] }
  0x74   : > { %v6838_v49 = vld [vmem:[#allocation2 + $0x24] sm:$0xff]  ;;  %v1408_v20 = vshrl.u32 %v1314_v16, 16  ;;  %v3016_v21 = vrot.slane %v3015_v15, 4  ;;  %v3026_v22 = vrot.slane %v3025_v61, 4  ;;  %v1391_v24 = vrot.slane %v1390_v62, 4 }
  0x75   : > { %1210 = vmatmul.bf16.gmra.mxu0 %v6838_v49  ;;  %v2166_v25 = vsel %vm7616_vm14, %v6321_v0, %v2165_v6  ;;  %v1401_v29 = vrot.slane %v1400_v3, 4  ;;  %v2167_v30 = vrot.slane %v2165_v6, 4  ;;  %v3035_v31 = vrot.slane %v3033_v8, 4  ;;  %v2064_v6 = vld [vmem:[#allocation2 + $0x1c] sm:$0xf] }
  0x76   : > { %v1411_v32 = vshll.u32 %v1314_v16, 16  ;;  %v3038_v35 = vrot.slane %v3036_v10, 5  ;;  %v7652_v37 = vrot.slane %v3042_v11, 5  ;;  %v3048_v39 = vrot.slane %v3046_v13, 4  ;;  %v2063_v13 = vld [vmem:[#allocation2 + $0x18] sm:$0xe] }
  0x77   : > { %2405 = vmatmul.bf16.vlgmr.msrb.gmra.mxu2 %v2317_v50  ;;  %v1417_v40 = vshll.u32 %v1315_v18, 16  ;;  %v1410_v45 = vrot.slane %v1408_v20, 4  ;;  %v1421_v53 = vshrl.u32 %v1315_v18, 16  ;;  %v314_v7 = vsel %vm7233_vm4, 0, %v313_v26 }
  0x78   : > { %v894_v34 = vld [vmem:[#allocation2 + $0x20] sm:$0x1]  ;;  %v3021_v48 = vsel %vm7603_vm12, %v3016_v21, %v7639_v44  ;;  %v1396_v50 = vsel %vm7603_vm12, %v1391_v24, %v7641_v46  ;;  %v1413_v15 = vrot.slane %v1411_v32, 5  ;;  %v2287_v59 = vunpack.c.l.b16 %v2166_v25  ;;  %315 = vst [vmem:[#allocation2 + $0x2c] sm:$0x1] %v314_v7  ;;  %v6937_v46 = vld [vmem:[%s8674_s1 + $0x1b0] sm:$0xff] }
  0x79   : > { %v895_v42 = vsel %vm7228_vm2, %v593_v17, %v894_v34  ;;  %v2962_v47 = vld [vmem:[#allocation2 + $0x14] sm:$0x1]  ;;  %v3039_v60 = vor.u32 %v3038_v35, %v3035_v31  ;;  %v7664_v61 = vrot.slane %v1417_v40, 5  ;;  %v1423_v3 = vrot.slane %v1421_v53, 4  ;;  %4423 = vmatpush.bf16.msra.mxu2 %v6937_v46  ;;  %v316_v35 = vld [vmem:[#allocation2 + $0x38] sm:$0x1] }
  0x7a   : > { %v1313_v49 = vld [vmem:[#allocation2 + $0x14] sm:$0x1]  ;;  %v3028_v52 = vshll.u32 %v2962_v47, 16  ;;  %896 = vst [vmem:[#allocation2 + $0x20] sm:$0x1] %v895_v42  ;;  %v3409_v8 = vunpack.c.l.b16 %v3021_v48  ;;  %v1762_v10 = vunpack.c.l.b16 %v1396_v50  ;;  %v3049_v18 = vor.u32 %v3048_v39, %v7652_v37 }
  0x7b   : > { %v2062_v51 = vld [vmem:[#allocation2 + $0x14] sm:$0x1]  ;;  %v1403_v55 = vshll.u32 %v1313_v49, 16  ;;  %v1414_v20 = vor.u32 %v1413_v15, %v1410_v45  ;;  %v610_v21 = vrot.slane %v7607_v41, 4  ;;  %v2172_v26 = vrot.slane %v2064_v6, 5 }
  0x7c   : > { %v2168_v57 = vrot.slane %v2062_v51, 5  ;;  %v3030_v62 = vrot.slane %v3028_v52, 5  ;;  %v3040_v31 = vrot.slane %v3039_v60, 4  ;;  %v1424_v32 = vor.u32 %v1423_v3, %v7664_v61  ;;  %v2966_v53 = vld [vmem:[#allocation2 + $0x24] sm:$0xf]  ;;  %v6945_v52 = vld [vmem:[%s8674_s1 + $0x1f0] sm:$0xff] }
  0x7d   : > { %v1405_v0 = vrot.slane %v1403_v55, 5  ;;  %v6322_v34 = vrot.slane %v2063_v13, 9  ;;  %v2967_v39 = vld [vmem:[#allocation2 + $0x28] sm:$0xf]  ;;  %v3050_v45 = vrot.slane %v3049_v18, 4  ;;  %v1415_v47 = vrot.slane %v1414_v20, 4  ;;  %5169 = vmatpush.bf16.msra.mxu3 %v6945_v52 }
  0x7e   : > { %v2169_v44 = vsel %vm7616_vm14, %v2167_v30, %v2168_v57  ;;  %v3031_v16 = vsel %vm7603_vm12, %v3026_v22, %v3030_v62  ;;  %v2174_v49 = vrot.slane %v2172_v26, 4  ;;  %v6913_v55 = vld [vmem:[%s8674_s1 + $0x170] sm:$0xff]  ;;  %v317_v15 = vsel %vm7233_vm4, 0, %v316_v35  ;;  %v1317_v3 = vld [vmem:[#allocation2 + $0x24] sm:$0xf] }
  0x7f   : > { %2783 = vmatmul.bf16.vlgmr.msrb.gmra.mxu3 %v6875_v23  ;;  %v2288_v11 = vunpack.c.l.b16 %v2169_v44  ;;  %v1406_v17 = vsel %vm7603_vm12, %v1401_v29, %v1405_v0  ;;  %v3410_v24 = vunpack.c.l.b16 %v3031_v16  ;;  %v901_v48 = vld [vmem:[#allocation2 + $0x2c] sm:$0x1]  ;;  %v6953_v57 = vld [vmem:[%s8674_s1 + $0x230] sm:$0xff]  ;;  %v1425_v60 = vrot.slane %v1424_v32, 4  ;;  %4044 = vmatpush.bf16.msra.mxu1 %v6913_v55  ;;  %v1318_v6 = vld [vmem:[#allocation2 + $0x28] sm:$0xf] }
  0x80   : > { %v1763_v25 = vunpack.c.l.b16 %v1406_v17  ;;  %v902_v51 = vsel %vm7228_vm2, %v610_v21, %v901_v48  ;;  %v3045_v0 = vsel %vm7603_vm12, %v3040_v31, %v7652_v37  ;;  %v2173_v44 = vsel %vm7616_vm14, %v6322_v34, %v2172_v26  ;;  %5691 = vmatpush.bf16.msra.mxu0 %v6953_v57  ;;  %318 = vst [vmem:[#allocation2 + $0x38] sm:$0x1] %v317_v15  ;;  %v6876_v17 = vld [vmem:[#allocation2 + $0x18] sm:$0xff] }
  0x81   : > { %v2318_v30 = vpack.c.b16 %v2288_v11, %v2287_v59  ;;  %v3441_v40 = vpack.c.b16 %v3410_v24, %v3409_v8  ;;  %v2965_v23 = vld [vmem:[#allocation2 + $0x20] sm:$0x1]  ;;  %903 = vst [vmem:[#allocation2 + $0x2c] sm:$0x1] %v902_v51  ;;  %v3057_v46 = vshrl.u32 %v2966_v53, 16  ;;  %v3060_v8 = vshll.u32 %v2966_v53, 16 }
  0x82   : > { %v1793_v22 = vpack.c.b16 %v1763_v25, %v1762_v10  ;;  %v1316_v42 = vld [vmem:[#allocation2 + $0x20] sm:$0x1]  ;;  %v3052_v7 = vshll.u32 %v2965_v23, 16  ;;  %v3066_v10 = vshll.u32 %v2967_v39, 16  ;;  %v3070_v11 = vshrl.u32 %v2967_v39, 16 }
  0x83   : > { %v2065_v29 = vld [vmem:[#allocation2 + $0x20] sm:$0x1]  ;;  %v1427_v41 = vshll.u32 %v1316_v42, 16  ;;  %v1420_v37 = vsel %vm7603_vm12, %v1415_v47, %v7664_v61  ;;  %v1432_v20 = vshrl.u32 %v1317_v3, 16  ;;  %v1435_v21 = vshll.u32 %v1317_v3, 16 }
  0x84   : > { %1885 = vmatmul.bf16.gmra.mxu1 %v1793_v22  ;;  %v2175_v50 = vrot.slane %v2065_v29, 5  ;;  %v3054_v59 = vrot.slane %v3052_v7, 5  ;;  %v1441_v24 = vshll.u32 %v1318_v6, 16  ;;  %v627_v25 = vrot.slane %v7301_v5, 4  ;;  %v2067_v29 = vld [vmem:[#allocation2 + $0x28] sm:$0xf] }
  0x85   : > { %3529 = vmatmul.bf16.vlgmr.msrb.gmra.mxu0 %v3441_v40  ;;  %v1429_v62 = vrot.slane %v1427_v41, 5  ;;  %v3411_v26 = vunpack.c.l.b16 %v3045_v0  ;;  %v1445_v31 = vshrl.u32 %v1318_v6, 16  ;;  %v3059_v32 = vrot.slane %v3057_v46, 4  ;;  %v2066_v0 = vld [vmem:[#allocation2 + $0x24] sm:$0xe] }
  0x86   : > { %v3055_v13 = vsel %vm7603_vm12, %v3050_v45, %v3054_v59  ;;  %v2176_v16 = vsel %vm7616_vm14, %v2174_v49, %v2175_v50  ;;  %v3062_v34 = vrot.slane %v3060_v8, 5  ;;  %v7706_v35 = vrot.slane %v3066_v10, 5  ;;  %v2970_v8 = vld [vmem:[#allocation2 + $0x34] sm:$0xf]  ;;  %v319_v10 = vld [vmem:[#allocation2 + $0x44] sm:$0x1] }
  0x87   : > { %2410 = vmatmul.bf16.gmra.mxu2 %v2318_v30  ;;  %v1430_v18 = vsel %vm7603_vm12, %v1425_v60, %v1429_v62  ;;  %v2289_v30 = vunpack.c.l.b16 %v2173_v44  ;;  %v3072_v61 = vrot.slane %v3070_v11, 4  ;;  %v3412_v40 = vunpack.c.l.b16 %v3055_v13  ;;  %v908_v41 = vld [vmem:[#allocation2 + $0x38] sm:$0x1]  ;;  %v2969_v44 = vld [vmem:[#allocation2 + $0x30] sm:$0xf] }
  0x88   : > { %v1764_v22 = vunpack.c.l.b16 %v1420_v37  ;;  %v1765_v23 = vunpack.c.l.b16 %v1430_v18  ;;  %v2290_v42 = vunpack.c.l.b16 %v2176_v16  ;;  %v2968_v53 = vld [vmem:[#allocation2 + $0x2c] sm:$0x1]  ;;  %v1434_v39 = vrot.slane %v1432_v20, 4 }
  0x89   : > { %v1437_v45 = vrot.slane %v1435_v21, 5  ;;  %v1443_v7 = vrot.slane %v1441_v24, 5  ;;  %v1447_v47 = vrot.slane %v1445_v31, 4  ;;  %v1319_v5 = vld [vmem:[#allocation2 + $0x2c] sm:$0x1]  ;;  %v3063_v48 = vor.u32 %v3062_v34, %v3059_v32 }
  0x8a   : > { %v3073_v49 = vor.u32 %v3072_v61, %v7706_v35  ;;  %v909_v50 = vsel %vm7228_vm2, %v627_v25, %v908_v41  ;;  %v3442_v51 = vpack.c.b16 %v3412_v40, %v3411_v26  ;;  %v1794_v52 = vpack.c.b16 %v1765_v23, %v1764_v22  ;;  %v2068_v3 = vld [vmem:[#allocation2 + $0x2c] sm:$0x1]  ;;  %v1321_v25 = vld [vmem:[#allocation2 + $0x34] sm:$0xf] }
  0x8b   : > { %v3076_v55 = vshll.u32 %v2968_v53, 16  ;;  %v2179_v57 = vrot.slane %v2067_v29, 5  ;;  %910 = vst [vmem:[#allocation2 + $0x38] sm:$0x1] %v909_v50  ;;  %v2319_v15 = vpack.c.b16 %v2290_v42, %v2289_v30  ;;  %v1438_v59 = vor.u32 %v1437_v45, %v1434_v39  ;;  %v6877_v29 = vld [vmem:[#allocation2 + $0x24] sm:$0xff] }
  0x8c   : > { %v1448_v60 = vor.u32 %v1447_v47, %v1443_v7  ;;  %v1451_v62 = vshll.u32 %v1319_v5, 16  ;;  %v3064_v6 = vrot.slane %v3063_v48, 4  ;;  %v3074_v46 = vrot.slane %v3073_v49, 4 }
  0x8d   : > { %v3078_v11 = vrot.slane %v3076_v55, 5  ;;  %v6323_v13 = vrot.slane %v2066_v0, 9  ;;  %v2181_v37 = vrot.slane %v2179_v57, 4  ;;  %v3081_v16 = vshrl.u32 %v2969_v44, 16 }
  0x8e   : > { %v1439_v18 = vrot.slane %v1438_v59, 4  ;;  %v1449_v20 = vrot.slane %v1448_v60, 4  ;;  %v1453_v21 = vrot.slane %v1451_v62, 5  ;;  %v2182_v24 = vrot.slane %v2068_v3, 5 }
  0x8f   : > { %2788 = vmatmul.bf16.gmra.mxu3 %v6876_v17  ;;  %v1320_v17 = vld [vmem:[#allocation2 + $0x30] sm:$0xf]  ;;  %v3084_v26 = vshll.u32 %v2969_v44, 16  ;;  %v3090_v30 = vshll.u32 %v2970_v8, 16  ;;  %v3094_v31 = vshrl.u32 %v2970_v8, 16  ;;  %v320_v32 = vsel %vm7233_vm4, 0, %v319_v10 }
  0x90   : > { %v1456_v34 = vshrl.u32 %v1320_v17, 16  ;;  %v1459_v61 = vshll.u32 %v1320_v17, 16  ;;  %v3069_v40 = vsel %vm7603_vm12, %v3064_v6, %v7706_v35  ;;  %v3079_v22 = vsel %vm7603_vm12, %v3074_v46, %v3078_v11  ;;  %321 = vst [vmem:[#allocation2 + $0x44] sm:$0x1] %v320_v32  ;;  %v6936_v6 = vld [vmem:[%s8674_s1 + $0x1a8] sm:$0xff] }
  0x91   : > { %v1465_v23 = vshll.u32 %v1321_v25, 16  ;;  %v1469_v42 = vshrl.u32 %v1321_v25, 16  ;;  %v1444_v53 = vsel %vm7603_vm12, %v1439_v18, %v1443_v7  ;;  %v1454_v39 = vsel %vm7603_vm12, %v1449_v20, %v1453_v21  ;;  %v322_v46 = vld [vmem:[#allocation2 + $0x50] sm:$0x1]  ;;  %4424 = vmatpush.bf16.msra.mxu2 %v6936_v6 }
  0x92   : > { %v2180_v45 = vsel %vm7616_vm14, %v6323_v13, %v2179_v57  ;;  %v2183_v47 = vsel %vm7616_vm14, %v2181_v37, %v2182_v24  ;;  %v3083_v35 = vrot.slane %v3081_v16, 4  ;;  %v3086_v5 = vrot.slane %v3084_v26, 5  ;;  %v2070_v57 = vld [vmem:[#allocation2 + $0x34] sm:$0xf]  ;;  %v1322_v3 = vld [vmem:[#allocation2 + $0x38] sm:$0x1] }
  0x93   : > { %v7726_v41 = vrot.slane %v3090_v30, 5  ;;  %v3096_v48 = vrot.slane %v3094_v31, 4  ;;  %v3413_v49 = vunpack.c.l.b16 %v3069_v40  ;;  %v3414_v50 = vunpack.c.l.b16 %v3079_v22  ;;  %v2069_v16 = vld [vmem:[#allocation2 + $0x30] sm:$0xe]  ;;  %v2071_v21 = vld [vmem:[#allocation2 + $0x38] sm:$0x1] }
  0x94   : > { %1890 = vmatmul.bf16.gmra.mxu1 %v1794_v52  ;;  %v1461_v52 = vrot.slane %v1459_v61, 5  ;;  %v1766_v7 = vunpack.c.l.b16 %v1444_v53  ;;  %v1767_v55 = vunpack.c.l.b16 %v1454_v39  ;;  %v7728_v59 = vrot.slane %v1465_v23, 5 }
  0x95   : > { %3534 = vmatmul.bf16.gmra.mxu0 %v3442_v51  ;;  %v1458_v51 = vrot.slane %v1456_v34, 4  ;;  %v1471_v60 = vrot.slane %v1469_v42, 4  ;;  %v644_v62 = vrot.slane %v7380_v33, 4  ;;  %v2291_v0 = vunpack.c.l.b16 %v2180_v45  ;;  %v6944_v45 = vld [vmem:[%s8674_s1 + $0x1e8] sm:$0xff] }
  0x96   : > { %v2292_v44 = vunpack.c.l.b16 %v2183_v47  ;;  %v3087_v8 = vor.u32 %v3086_v5, %v3083_v35  ;;  %v3097_v10 = vor.u32 %v3096_v48, %v7726_v41  ;;  %v3443_v11 = vpack.c.b16 %v3414_v50, %v3413_v49  ;;  %v6912_v47 = vld [vmem:[%s8674_s1 + $0x168] sm:$0xff]  ;;  %v2973_v48 = vld [vmem:[#allocation2 + $0x40] sm:$0xf]  ;;  %v1323_v49 = vld [vmem:[#allocation2 + $0x3c] sm:$0xf]  ;;  %5170 = vmatpush.bf16.msra.mxu3 %v6944_v45 }
  0x97   : > { %2415 = vmatmul.bf16.gmra.mxu2 %v2319_v15  ;;  %v2971_v15 = vld [vmem:[#allocation2 + $0x38] sm:$0x1]  ;;  %v1462_v37 = vor.u32 %v1461_v52, %v1458_v51  ;;  %v2186_v17 = vrot.slane %v2070_v57, 5  ;;  %v1795_v18 = vpack.c.b16 %v1767_v55, %v1766_v7  ;;  %v1472_v33 = vor.u32 %v1471_v60, %v7728_v59  ;;  %v915_v24 = vld [vmem:[#allocation2 + $0x44] sm:$0x1]  ;;  %v6952_v35 = vld [vmem:[%s8674_s1 + $0x228] sm:$0xff]  ;;  %4045 = vmatpush.bf16.msra.mxu1 %v6912_v47 }
  0x98   : > { %v3100_v13 = vshll.u32 %v2971_v15, 16  ;;  %v1475_v20 = vshll.u32 %v1322_v3, 16  ;;  %v323_v25 = vsel %vm7233_vm4, 0, %v322_v46  ;;  %v2320_v26 = vpack.c.b16 %v2292_v44, %v2291_v0  ;;  %v1324_v7 = vld [vmem:[#allocation2 + $0x40] sm:$0xf]  ;;  %5692 = vmatpush.bf16.msra.mxu0 %v6952_v35  ;;  %v6878_v3 = vld [vmem:[#allocation2 + $0x30] sm:$0xff] }
  0x99   : > { %v916_v30 = vsel %vm7228_vm2, %v644_v62, %v915_v24  ;;  %324 = vst [vmem:[#allocation2 + $0x50] sm:$0x1] %v323_v25  ;;  %v3088_v31 = vrot.slane %v3087_v8, 4  ;;  %v3098_v32 = vrot.slane %v3097_v10, 4  ;;  %v6324_v34 = vrot.slane %v2069_v16, 9 }
  0x9a   : > { %917 = vst [vmem:[#allocation2 + $0x44] sm:$0x1] %v916_v30  ;;  %v3102_v61 = vrot.slane %v3100_v13, 5  ;;  %v1463_v22 = vrot.slane %v1462_v37, 4  ;;  %v2188_v23 = vrot.slane %v2186_v17, 4  ;;  %v2189_v42 = vrot.slane %v2071_v21, 5 }
  0x9b   : > { %v1473_v53 = vrot.slane %v1472_v33, 4  ;;  %v1477_v39 = vrot.slane %v1475_v20, 5  ;;  %v661_v5 = vrot.slane %v7463_v38, 4  ;;  %v3093_v50 = vsel %vm7603_vm12, %v3088_v31, %v7726_v41 }
  0x9c   : > { %v2187_v51 = vsel %vm7616_vm14, %v6324_v34, %v2186_v17  ;;  %v3103_v55 = vsel %vm7603_vm12, %v3098_v32, %v3102_v61  ;;  %v1468_v38 = vsel %vm7603_vm12, %v1463_v22, %v7728_v59  ;;  %v2190_v15 = vsel %vm7616_vm14, %v2188_v23, %v2189_v42  ;;  %v325_v22 = vld [vmem:[#allocation2 + $0x5c] sm:$0x1] }
  0x9d   : > { %v1478_v41 = vsel %vm7603_vm12, %v1473_v53, %v1477_v39  ;;  %v3114_v57 = vshll.u32 %v2973_v48, 16  ;;  %v3118_v62 = vshrl.u32 %v2973_v48, 16  ;;  %v1480_v0 = vshrl.u32 %v1323_v49, 16 }
  0x9e   : > { %v1483_v6 = vshll.u32 %v1323_v49, 16  ;;  %v1489_v46 = vshll.u32 %v1324_v7, 16  ;;  %v1493_v8 = vshrl.u32 %v1324_v7, 16  ;;  %v3415_v59 = vunpack.c.l.b16 %v3093_v50  ;;  %v2072_v49 = vld [vmem:[#allocation2 + $0x3c] sm:$0xe] }
  0x9f   : > { %2793 = vmatmul.bf16.gmra.mxu3 %v6877_v29  ;;  %v2972_v29 = vld [vmem:[#allocation2 + $0x3c] sm:$0xf]  ;;  %v3416_v13 = vunpack.c.l.b16 %v3103_v55  ;;  %v1768_v37 = vunpack.c.l.b16 %v1468_v38  ;;  %v1769_v20 = vunpack.c.l.b16 %v1478_v41  ;;  %v2294_v21 = vunpack.c.l.b16 %v2190_v15  ;;  %v2975_v50 = vld [vmem:[#allocation2 + $0x48] sm:$0xf] }
  0xa0   : > { %v3105_v52 = vshrl.u32 %v2972_v29, 16  ;;  %v3108_v60 = vshll.u32 %v2972_v29, 16  ;;  %v922_v44 = vld [vmem:[#allocation2 + $0x50] sm:$0x1]  ;;  %v7772_v24 = vrot.slane %v3114_v57, 5  ;;  %v3120_v25 = vrot.slane %v3118_v62, 4 }
  0xa1   : > { %v923_v10 = vsel %vm7228_vm2, %v661_v5, %v922_v44  ;;  %v1482_v30 = vrot.slane %v1480_v0, 4  ;;  %v1485_v31 = vrot.slane %v1483_v6, 5  ;;  %v7774_v32 = vrot.slane %v1489_v46, 5  ;;  %v1325_v61 = vld [vmem:[#allocation2 + $0x44] sm:$0x1] }
  0xa2   : > { %924 = vst [vmem:[#allocation2 + $0x50] sm:$0x1] %v923_v10  ;;  %v3107_v16 = vrot.slane %v3105_v52, 4  ;;  %v3110_v17 = vrot.slane %v3108_v60, 5  ;;  %v1495_v34 = vrot.slane %v1493_v8, 4  ;;  %v3444_v23 = vpack.c.b16 %v3416_v13, %v3415_v59 }
  0xa3   : > { %v2073_v29 = vld [vmem:[#allocation2 + $0x40] sm:$0xf]  ;;  %v1796_v53 = vpack.c.b16 %v1769_v20, %v1768_v37  ;;  %v3121_v45 = vor.u32 %v3120_v25, %v7772_v24  ;;  %v1486_v35 = vor.u32 %v1485_v31, %v1482_v30  ;;  %v1499_v48 = vshll.u32 %v1325_v61, 16  ;;  %v2074_v15 = vld [vmem:[#allocation2 + $0x44] sm:$0x1] }
  0xa4   : > { %1895 = vmatmul.bf16.gmra.mxu1 %v1795_v18  ;;  %v3111_v42 = vor.u32 %v3110_v17, %v3107_v16  ;;  %v1496_v5 = vor.u32 %v1495_v34, %v7774_v32  ;;  %v2193_v52 = vrot.slane %v2073_v29, 5  ;;  %v678_v7 = vrot.slane %v7534_v43, 4  ;;  %v2976_v60 = vld [vmem:[#allocation2 + $0x4c] sm:$0xf]  ;;  %v6879_v61 = vld [vmem:[#allocation2 + $0x3c] sm:$0xff] }
  0xa5   : > { %3539 = vmatmul.bf16.gmra.mxu0 %v3443_v11  ;;  %v2293_v11 = vunpack.c.l.b16 %v2187_v51  ;;  %v326_v51 = vsel %vm7233_vm4, 0, %v325_v22  ;;  %v3122_v41 = vrot.slane %v3121_v45, 4  ;;  %v6325_v0 = vrot.slane %v2072_v49, 9 }
  0xa6   : > { %327 = vst [vmem:[#allocation2 + $0x5c] sm:$0x1] %v326_v51  ;;  %v3112_v38 = vrot.slane %v3111_v42, 4  ;;  %v3129_v44 = vshrl.u32 %v2975_v50, 16  ;;  %v1487_v43 = vrot.slane %v1486_v35, 4  ;;  %v1497_v8 = vrot.slane %v1496_v5, 4 }
  0xa7   : > { %2420 = vmatmul.bf16.gmra.mxu2 %v2320_v26  ;;  %v2974_v26 = vld [vmem:[#allocation2 + $0x44] sm:$0x1]  ;;  %v2321_v39 = vpack.c.b16 %v2294_v21, %v2293_v11  ;;  %v1501_v10 = vrot.slane %v1499_v48, 5  ;;  %v3132_v59 = vshll.u32 %v2975_v50, 16  ;;  %v1327_v11 = vld [vmem:[#allocation2 + $0x4c] sm:$0xf]  ;;  %v2194_v30 = vsel %vm7616_vm14, %v6325_v0, %v2193_v52 }
  0xa8   : > { %v3124_v47 = vshll.u32 %v2974_v26, 16  ;;  %v2195_v13 = vrot.slane %v2193_v52, 4  ;;  %v2196_v37 = vrot.slane %v2074_v15, 5  ;;  %v3138_v16 = vshll.u32 %v2976_v60, 16  ;;  %v2076_v0 = vld [vmem:[#allocation2 + $0x4c] sm:$0xf] }
  0xa9   : > { %v3142_v17 = vshrl.u32 %v2976_v60, 16  ;;  %v3117_v20 = vsel %vm7603_vm12, %v3112_v38, %v7772_v24  ;;  %v1513_v31 = vshll.u32 %v1327_v11, 16  ;;  %v1517_v34 = vshrl.u32 %v1327_v11, 16  ;;  %v2977_v48 = vld [vmem:[#allocation2 + $0x50] sm:$0x1] }
  0xaa   : > { %v3126_v57 = vrot.slane %v3124_v47, 5  ;;  %v1492_v22 = vsel %vm7603_vm12, %v1487_v43, %v7774_v32  ;;  %v3131_v42 = vrot.slane %v3129_v44, 4  ;;  %v3134_v24 = vrot.slane %v3132_v59, 5  ;;  %v1328_v52 = vld [vmem:[#allocation2 + $0x50] sm:$0x1] }
  0xab   : > { %v7740_v40 = vpop.f32.mrf.mxu1  ;;  %v7781_v55 = vpop.f32.mrf.mxu0  ;;  %v3144_v45 = vrot.slane %v3142_v17, 4  ;;  %v3417_v35 = vunpack.c.l.b16 %v3117_v20  ;;  %v1770_v50 = vunpack.c.l.b16 %v1492_v22  ;;  %v7807_v38 = vrot.slane %v1513_v31, 5  ;;  %v328_v44 = vld [vmem:[#allocation2 + $0x68] sm:$0x1] }
  0xac   : > { %v3127_v26 = vsel %vm7603_vm12, %v3122_v41, %v3126_v57  ;;  %v1519_v15 = vrot.slane %v1517_v34, 4  ;;  %v2295_v41 = vunpack.c.l.b16 %v2194_v30  ;;  %v3135_v43 = vor.u32 %v3134_v24, %v3131_v42  ;;  %v2077_v34 = vld [vmem:[#allocation2 + $0x50] sm:$0x1] }
  0xad   : > { %v929_v29 = vld [vmem:[#allocation2 + $0x5c] sm:$0x1]  ;;  %v3418_v5 = vunpack.c.l.b16 %v3127_v26  ;;  %v2978_v26 = vld [vmem:[#allocation2 + $0x54] sm:$0xf]  ;;  %v329_v30 = vsel %vm7233_vm4, 0, %v328_v44 }
  0xae   : > { %v930_v47 = vsel %vm7228_vm2, %v678_v7, %v929_v29  ;;  %v6935_v7 = vld [vmem:[%s8674_s1 + $0x1a0] sm:$0xff]  ;;  %v1520_v20 = vor.u32 %v1519_v15, %v7807_v38  ;;  %330 = vst [vmem:[#allocation2 + $0x68] sm:$0x1] %v329_v30 }
  0xaf   : > { %2798 = vmatmul.bf16.gmra.mxu3 %v6878_v3  ;;  %v1326_v3 = vld [vmem:[#allocation2 + $0x48] sm:$0xf]  ;;  %931 = vst [vmem:[#allocation2 + $0x5c] sm:$0x1] %v930_v47  ;;  %v3445_v59 = vpack.c.b16 %v3418_v5, %v3417_v35  ;;  %4425 = vmatpush.bf16.msra.mxu2 %v6935_v7  ;;  %v2203_v5 = vrot.slane %v2077_v34, 5 }
  0xb0   : > { %v1504_v21 = vshrl.u32 %v1326_v3, 16  ;;  %v1507_v25 = vshll.u32 %v1326_v3, 16  ;;  %v1521_v47 = vrot.slane %v1520_v20, 4 }
  0xb2   : > { %v7768_v18 = vpop.f32.mrf.mxu2  ;;  %v1506_v49 = vrot.slane %v1504_v21, 4  ;;  %v1509_v32 = vrot.slane %v1507_v25, 5  ;;  %v2075_v21 = vld [vmem:[#allocation2 + $0x48] sm:$0xe]  ;;  %v2200_v25 = vrot.slane %v2076_v0, 5 }
  0xb3   : > { %v7770_v33 = vpop.f32.mrf.mxu1  ;;  %v7809_v60 = vpop.f32.mrf.mxu0  ;;  %v6326_v29 = vrot.slane %v2075_v21, 9 }
  0xb4   : > { %1900 = vmatmul.bf16.gmra.mxu1 %v1796_v53  ;;  %v2197_v53 = vsel %vm7616_vm14, %v2195_v13, %v2196_v37  ;;  %v1510_v37 = vor.u32 %v1509_v32, %v1506_v49  ;;  %v2202_v35 = vrot.slane %v2200_v25, 4  ;;  %v6911_v49 = vld [vmem:[%s8674_s1 + $0x160] sm:$0xff] }
  0xb5   : > { %3544 = vmatmul.bf16.gmra.mxu0 %v3444_v23  ;;  %v7783_v62 = vpop.f32.mrf.mxu3  ;;  %v1502_v23 = vsel %vm7603_vm12, %v1497_v8, %v1501_v10  ;;  %v2296_v57 = vunpack.c.l.b16 %v2197_v53  ;;  %v3148_v10 = vshll.u32 %v2977_v48, 16  ;;  %v2979_v53 = vld [vmem:[#allocation2 + $0x58] sm:$0xf]  ;;  %v6943_v48 = vld [vmem:[%s8674_s1 + $0x1e0] sm:$0xff]  ;;  %4046 = vmatpush.bf16.msra.mxu1 %v6911_v49 }
  0xb6   : > { %8691 = vst [vmem:[#allocation4_spill] sm:$0xff] %v7783_v62  ;;  %v1771_v51 = vunpack.c.l.b16 %v1502_v23  ;;  %v1511_v42 = vrot.slane %v1510_v37, 4  ;;  %v6951_v32 = vld [vmem:[%s8674_s1 + $0x220] sm:$0xff]  ;;  %v3166_v15 = vshrl.u32 %v2979_v53, 16  ;;  %5171 = vmatpush.bf16.msra.mxu3 %v6943_v48  ;;  %v2201_v37 = vsel %vm7616_vm14, %v6326_v29, %v2200_v25  ;;  %v2988_v62 = vld [vmem:[#allocation2 + $0x7c] sm:$0xf] }
  0xb7   : > { %2425 = vmatmul.bf16.gmra.mxu2 %v2321_v39  ;;  %v7803_v39 = vrot.slane %v3138_v16, 5  ;;  %v1523_v16 = vshll.u32 %v1328_v52, 16  ;;  %v2322_v31 = vpack.c.b16 %v2296_v57, %v2295_v41  ;;  %v3150_v23 = vrot.slane %v3148_v10, 5  ;;  %v1329_v41 = vld [vmem:[#allocation2 + $0x54] sm:$0xf]  ;;  %5693 = vmatpush.bf16.msra.mxu0 %v6951_v32 }
  0xb8   : > { %v1797_v17 = vpack.c.b16 %v1771_v51, %v1770_v50  ;;  %v695_v50 = vrot.slane %v7310_v12, 4  ;;  %v3156_v51 = vshll.u32 %v2978_v26, 16  ;;  %v3162_v52 = vshll.u32 %v2979_v53, 16  ;;  %v1330_v57 = vld [vmem:[#allocation2 + $0x58] sm:$0xf]  ;;  %v6880_v12 = vld [vmem:[#allocation2 + $0x48] sm:$0xff] }
  0xb9   : > { %v3145_v8 = vor.u32 %v3144_v45, %v7803_v39  ;;  %v1525_v24 = vrot.slane %v1523_v16, 5  ;;  %v3153_v45 = vshrl.u32 %v2978_v26, 16  ;;  %v1516_v10 = vsel %vm7603_vm12, %v1511_v42, %v7807_v38  ;;  %v2980_v42 = vld [vmem:[#allocation2 + $0x5c] sm:$0x1]  ;;  %v331_v32 = vld [vmem:[#allocation2 + $0x74] sm:$0x1] }
  0xba   : > { %v7785_v6 = vpop.f32.mrf.mxu2  ;;  %v1528_v20 = vshrl.u32 %v1329_v41, 16  ;;  %v1531_v21 = vshll.u32 %v1329_v41, 16  ;;  %v1537_v26 = vshll.u32 %v1330_v57, 16  ;;  %v1541_v30 = vshrl.u32 %v1330_v57, 16  ;;  %v2079_v41 = vld [vmem:[#allocation2 + $0x58] sm:$0xf] }
  0xbb   : > { %v7787_v46 = vpop.f32.mrf.mxu1  ;;  %v3146_v22 = vrot.slane %v3145_v8, 4  ;;  %v3158_v34 = vrot.slane %v3156_v51, 5  ;;  %v7856_v38 = vrot.slane %v3162_v52, 5  ;;  %v2297_v53 = vunpack.c.l.b16 %v2201_v37 }
  0xbc   : > { %v7860_v48 = vrot.slane %v1537_v26, 5  ;;  %v1543_v49 = vrot.slane %v1541_v30, 4 }
  0xbd   : > { %v7814_v3 = vpop.f32.mrf.mxu3  ;;  %v3151_v44 = vsel %vm7603_vm12, %v3146_v22, %v3150_v23 }
  0xbe   : > { %8692 = vst [vmem:[#allocation5_spill] sm:$0xff] %v7814_v3  ;;  %v3420_v23 = vunpack.c.l.b16 %v3151_v44  ;;  %v2078_v44 = vld [vmem:[#allocation2 + $0x54] sm:$0xe] }
  0xbf   : > { %2803 = vmatmul.bf16.gmra.mxu3 %v6879_v61  ;;  %v3136_v61 = vrot.slane %v3135_v43, 4  ;;  %v3155_v43 = vrot.slane %v3153_v45, 4 }
  0xc1   : > { %v3141_v7 = vsel %vm7603_vm12, %v3136_v61, %v7803_v39  ;;  %v2204_v39 = vsel %vm7616_vm14, %v2202_v35, %v2203_v5  ;;  %v3168_v61 = vrot.slane %v3166_v15, 4  ;;  %v1530_v35 = vrot.slane %v1528_v20, 4 }
  0xc2   : > { %v7817_v11 = vpop.f32.mrf.mxu2  ;;  %v3419_v25 = vunpack.c.l.b16 %v3141_v7  ;;  %v2298_v45 = vunpack.c.l.b16 %v2204_v39  ;;  %v1533_v5 = vrot.slane %v1531_v21, 5  ;;  %v3159_v51 = vor.u32 %v3158_v34, %v3155_v43  ;;  %v2982_v21 = vld [vmem:[#allocation2 + $0x64] sm:$0xf] }
  0xc3   : > { %v7819_v13 = vpop.f32.mrf.mxu1  ;;  %v3169_v52 = vor.u32 %v3168_v61, %v7856_v38  ;;  %v1544_v43 = vor.u32 %v1543_v49, %v7860_v48  ;;  %v2207_v61 = vrot.slane %v2079_v41, 5 }
  0xc4   : > { %1905 = vmatmul.bf16.gmra.mxu1 %v1797_v17  ;;  %v7834_v0 = vpop.f32.mrf.mxu0  ;;  %v3446_v57 = vpack.c.b16 %v3420_v23, %v3419_v25  ;;  %v2323_v39 = vpack.c.b16 %v2298_v45, %v2297_v53  ;;  %v1534_v20 = vor.u32 %v1533_v5, %v1530_v35  ;;  %v3160_v30 = vrot.slane %v3159_v51, 4  ;;  %v1333_v35 = vld [vmem:[#allocation2 + $0x64] sm:$0xf] }
  0xc5   : > { %3549 = vmatmul.bf16.gmra.mxu0 %v3445_v59  ;;  %v7841_v8 = vpop.f32.mrf.mxu3  ;;  %v1526_v59 = vsel %vm7603_vm12, %v1521_v47, %v1525_v24  ;;  %v1772_v24 = vunpack.c.l.b16 %v1516_v10  ;;  %v1331_v47 = vld [vmem:[#allocation2 + $0x5c] sm:$0x1]  ;;  %v2981_v10 = vld [vmem:[#allocation2 + $0x60] sm:$0xf]  ;;  %v3186_v53 = vshll.u32 %v2982_v21, 16  ;;  %v3190_v45 = vshrl.u32 %v2982_v21, 16 }
  0xc6   : > { %8693 = vst [vmem:[#allocation6_spill] sm:$0xff] %v7841_v8  ;;  %v1773_v29 = vunpack.c.l.b16 %v1526_v59  ;;  %v1547_v15 = vshll.u32 %v1331_v47, 16  ;;  %v332_v59 = vsel %vm7233_vm4, 0, %v331_v32  ;;  %v1332_v47 = vld [vmem:[#allocation2 + $0x60] sm:$0xf]  ;;  %v1535_v5 = vrot.slane %v1534_v20, 4 }
  0xc7   : > { %2430 = vmatmul.bf16.gmra.mxu2 %v2322_v31  ;;  %v936_v31 = vld [vmem:[#allocation2 + $0x68] sm:$0x1]  ;;  %333 = vst [vmem:[#allocation2 + $0x74] sm:$0x1] %v332_v59  ;;  %v1545_v49 = vrot.slane %v1544_v43, 4  ;;  %v1552_v32 = vshrl.u32 %v1332_v47, 16 }
  0xc8   : > { %v937_v22 = vsel %vm7228_vm2, %v695_v50, %v936_v31  ;;  %v3172_v50 = vshll.u32 %v2980_v42, 16  ;;  %v1798_v7 = vpack.c.b16 %v1773_v29, %v1772_v24  ;;  %v3170_v31 = vrot.slane %v3169_v52, 4  ;;  %v2081_v8 = vld [vmem:[#allocation2 + $0x60] sm:$0xe] }
  0xc9   : > { %938 = vst [vmem:[#allocation2 + $0x68] sm:$0x1] %v937_v22  ;;  %v1549_v23 = vrot.slane %v1547_v15, 5  ;;  %v6327_v42 = vrot.slane %v2078_v44, 9  ;;  %v3177_v24 = vshrl.u32 %v2981_v10, 16  ;;  %v3180_v29 = vshll.u32 %v2981_v10, 16 }
  0xca   : > { %v7852_v16 = vpop.f32.mrf.mxu2  ;;  %v3174_v34 = vrot.slane %v3172_v50, 5  ;;  %v1555_v51 = vshll.u32 %v1332_v47, 16  ;;  %v2209_v52 = vrot.slane %v2207_v61, 4  ;;  %v1561_v41 = vshll.u32 %v1333_v35, 16 }
  0xcb   : > { %8694 = vst [vmem:[#allocation7_spill] sm:$0xff] %v7852_v16  ;;  %v1565_v59 = vshrl.u32 %v1333_v35, 16  ;;  %v3165_v15 = vsel %vm7603_vm12, %v3160_v30, %v7856_v38  ;;  %v3179_v44 = vrot.slane %v3177_v24, 4  ;;  %v7882_v20 = vrot.slane %v3186_v53, 5 }
  0xcc   : > { %v7854_v17 = vpop.f32.mrf.mxu1  ;;  %v7866_v37 = vpop.f32.mrf.mxu0  ;;  %v3175_v10 = vsel %vm7603_vm12, %v3170_v31, %v3174_v34  ;;  %v3192_v43 = vrot.slane %v3190_v45, 4  ;;  %v1540_v21 = vsel %vm7603_vm12, %v1535_v5, %v7860_v48  ;;  %v1554_v30 = vrot.slane %v1552_v32, 4 }
  0xcd   : > { %v7869_v26 = vpop.f32.mrf.mxu3  ;;  %v1557_v24 = vrot.slane %v1555_v51, 5  ;;  %v7891_v34 = vrot.slane %v1561_v41, 5  ;;  %v3421_v45 = vunpack.c.l.b16 %v3165_v15  ;;  %v3422_v48 = vunpack.c.l.b16 %v3175_v10 }
  0xce   : > { %8695 = vst [vmem:[#allocation8_spill] sm:$0xff] %v7869_v26  ;;  %v1774_v5 = vunpack.c.l.b16 %v1540_v21  ;;  %v3193_v32 = vor.u32 %v3192_v43, %v7882_v20 }
  0xcf   : > { %2808 = vmatmul.bf16.gmra.mxu3 %v6880_v12  ;;  %v712_v12 = vrot.slane %v7404_v58, 4  ;;  %v2080_v58 = vld [vmem:[#allocation2 + $0x5c] sm:$0x1]  ;;  %v1558_v10 = vor.u32 %v1557_v24, %v1554_v30  ;;  %v3447_v43 = vpack.c.b16 %v3422_v48, %v3421_v45  ;;  %v729_v48 = vrot.slane %v7480_v56, 4 }
  0xd0   : > { %v2210_v50 = vrot.slane %v2080_v58, 5  ;;  %v1550_v58 = vsel %vm7603_vm12, %v1545_v49, %v1549_v23  ;;  %v2983_v38 = vld [vmem:[#allocation2 + $0x68] sm:$0x1]  ;;  %v6942_v56 = vld [vmem:[%s8674_s1 + $0x1d8] sm:$0xff] }
  0xd1   : > { %v1334_v35 = vld [vmem:[#allocation2 + $0x68] sm:$0x1]  ;;  %v1775_v49 = vunpack.c.l.b16 %v1550_v58  ;;  %v3196_v51 = vshll.u32 %v2983_v38, 16  ;;  %v1559_v24 = vrot.slane %v1558_v10, 4  ;;  %5172 = vmatpush.bf16.msra.mxu3 %v6942_v56 }
  0xd2   : > { %v2211_v31 = vsel %vm7616_vm14, %v2209_v52, %v2210_v50  ;;  %v2984_v52 = vld [vmem:[#allocation2 + $0x6c] sm:$0xf]  ;;  %v334_v50 = vld [vmem:[#allocation2 + $0x80] sm:$0x1]  ;;  %v1571_v58 = vshll.u32 %v1334_v35, 16 }
  0xd3   : > { %v2300_v15 = vunpack.c.l.b16 %v2211_v31  ;;  %v3198_v26 = vrot.slane %v3196_v51, 5  ;;  %v2083_v31 = vld [vmem:[#allocation2 + $0x68] sm:$0x1] }
  0xd4   : > { %v7873_v25 = vpop.f32.mrf.mxu1  ;;  %1910 = vmatmul.bf16.gmra.mxu1 %v1798_v7  ;;  %v6881_v7 = vld [vmem:[#allocation2 + $0x54] sm:$0xff] }
  0xd5   : > { %v7871_v22 = vpop.f32.mrf.mxu2  ;;  %3554 = vmatmul.bf16.gmra.mxu0 %v3446_v57  ;;  %v3182_v57 = vrot.slane %v3180_v29, 5  ;;  %v943_v29 = vld [vmem:[#allocation2 + $0x74] sm:$0x1] }
  0xd6   : > { %8696 = vst [vmem:[#allocation9_spill] sm:$0xff] %v7871_v22 }
  0xd7   : > { %2435 = vmatmul.bf16.gmra.mxu2 %v2323_v39  ;;  %v2208_v39 = vsel %vm7616_vm14, %v6327_v42, %v2207_v61  ;;  %v1567_v61 = vrot.slane %v1565_v59, 4  ;;  %v944_v42 = vsel %vm7228_vm2, %v712_v12, %v943_v29  ;;  %v3183_v47 = vor.u32 %v3182_v57, %v3179_v44  ;;  %v7904_v44 = vld [vmem:[#allocation2 + $0x64] sm:$0xf]  ;;  %v2985_v29 = vld [vmem:[#allocation2 + $0x70] sm:$0xf] }
  0xd8   : > { %945 = vst [vmem:[#allocation2 + $0x74] sm:$0x1] %v944_v42  ;;  %v2299_v59 = vunpack.c.l.b16 %v2208_v39  ;;  %v335_v57 = vsel %vm7233_vm4, 0, %v334_v50  ;;  %v1799_v42 = vpack.c.b16 %v1775_v49, %v1774_v5  ;;  %v2214_v39 = vrot.slane %v7904_v44, 5  ;;  %v6934_v50 = vld [vmem:[%s8674_s1 + $0x198] sm:$0xff] }
  0xd9   : > { %v7897_v23 = vpop.f32.mrf.mxu3  ;;  %v1568_v21 = vor.u32 %v1567_v61, %v7891_v34  ;;  %336 = vst [vmem:[#allocation2 + $0x80] sm:$0x1] %v335_v57  ;;  %v3184_v38 = vrot.slane %v3183_v47, 4  ;;  %v3204_v61 = vshll.u32 %v2984_v52, 16  ;;  %v1573_v57 = vrot.slane %v1571_v58, 5  ;;  %4426 = vmatpush.bf16.msra.mxu2 %v6934_v50 }
  0xda   : > { %8697 = vst [vmem:[#allocation10_spill] sm:$0xff] %v7897_v23  ;;  %v3194_v23 = vrot.slane %v3193_v32, 4  ;;  %v2324_v30 = vpack.c.b16 %v2300_v15, %v2299_v59  ;;  %v3210_v45 = vshll.u32 %v2985_v29, 16  ;;  %v6328_v47 = vrot.slane %v2081_v8, 9  ;;  %v6910_v8 = vld [vmem:[%s8674_s1 + $0x158] sm:$0xff] }
  0xdb   : > { %v1569_v35 = vrot.slane %v1568_v21, 4  ;;  %v3214_v49 = vshrl.u32 %v2985_v29, 16  ;;  %v3189_v32 = vsel %vm7603_vm12, %v3184_v38, %v7882_v20  ;;  %v2217_v59 = vrot.slane %v2083_v31, 5  ;;  %v1335_v15 = vld [vmem:[#allocation2 + $0x6c] sm:$0xf]  ;;  %4047 = vmatpush.bf16.msra.mxu1 %v6910_v8  ;;  %v6950_v8 = vld [vmem:[%s8674_s1 + $0x218] sm:$0xff] }
  0xdc   : > { %v3199_v51 = vsel %vm7603_vm12, %v3194_v23, %v3198_v26  ;;  %v1564_v26 = vsel %vm7603_vm12, %v1559_v24, %v7891_v34  ;;  %v3206_v20 = vrot.slane %v3204_v61, 5  ;;  %v1336_v23 = vld [vmem:[#allocation2 + $0x70] sm:$0xf]  ;;  %v1576_v21 = vshrl.u32 %v1335_v15, 16  ;;  %5694 = vmatpush.bf16.msra.mxu0 %v6950_v8 }
  0xdd   : > { %v7895_v53 = vpop.f32.mrf.mxu0  ;;  %v7900_v41 = vpop.f32.mrf.mxu2  ;;  %v1579_v58 = vshll.u32 %v1335_v15, 16  ;;  %v1574_v38 = vsel %vm7603_vm12, %v1569_v35, %v1573_v57  ;;  %v7938_v29 = vrot.slane %v3210_v45, 5  ;;  %v3216_v50 = vrot.slane %v3214_v49, 4  ;;  %v6882_v35 = vld [vmem:[#allocation2 + $0x60] sm:$0xff] }
  0xde   : > { %8698 = vst [vmem:[#allocation11_spill] sm:$0xff] %v7900_v41  ;;  %v1578_v34 = vrot.slane %v1576_v21, 4  ;;  %v3423_v57 = vunpack.c.l.b16 %v3189_v32  ;;  %v3424_v45 = vunpack.c.l.b16 %v3199_v51  ;;  %v2215_v56 = vsel %vm7616_vm14, %v6328_v47, %v2214_v39  ;;  %v2084_v41 = vld [vmem:[#allocation2 + $0x6c] sm:$0xe] }
  0xdf   : > { %2813 = vmatmul.bf16.gmra.mxu3 %v6881_v7  ;;  %v3201_v7 = vshrl.u32 %v2984_v52, 16  ;;  %v2216_v52 = vrot.slane %v2214_v39, 4  ;;  %v1581_v24 = vrot.slane %v1579_v58, 5  ;;  %v2986_v15 = vld [vmem:[#allocation2 + $0x74] sm:$0x1]  ;;  %v1777_v21 = vunpack.c.l.b16 %v1574_v38 }
  0xe0   : > { %v7902_v12 = vpop.f32.mrf.mxu1  ;;  %v1337_v49 = vld [vmem:[#allocation2 + $0x74] sm:$0x1]  ;;  %v3217_v32 = vor.u32 %v3216_v50, %v7938_v29  ;;  %v3220_v51 = vshll.u32 %v2986_v15, 16  ;;  %v2987_v39 = vld [vmem:[#allocation2 + $0x78] sm:$0xf]  ;;  %v2301_v38 = vunpack.c.l.b16 %v2215_v56 }
  0xe1   : > { %v7914_v5 = vrot.slane %v3201_v7, 4  ;;  %v1585_v7 = vshll.u32 %v1336_v23, 16  ;;  %v3225_v22 = vshrl.u32 %v2987_v39, 16  ;;  %v3228_v50 = vshll.u32 %v2987_v39, 16 }
  0xe3   : > { %v3207_v58 = vor.u32 %v3206_v20, %v7914_v5  ;;  %v3227_v39 = vrot.slane %v3225_v22, 4  ;;  %v3230_v16 = vrot.slane %v3228_v50, 5 }
  0xe4   : > { %1915 = vmatmul.bf16.gmra.mxu1 %v1799_v42  ;;  %v1589_v42 = vshrl.u32 %v1336_v23, 16  ;;  %v1776_v23 = vunpack.c.l.b16 %v1564_v26 }
  0xe5   : > { %3559 = vmatmul.bf16.gmra.mxu0 %v3447_v43  ;;  %v7927_v10 = vpop.f32.mrf.mxu0  ;;  %v7934_v43 = vpop.f32.mrf.mxu3  ;;  %v3208_v20 = vrot.slane %v3207_v58, 4 }
  0xe6   : > { %8699 = vst [vmem:[#allocation12_spill] sm:$0xff] %v7934_v43  ;;  %v7944_v43 = vrot.slane %v1585_v7, 5  ;;  %v1591_v3 = vrot.slane %v1589_v42, 4  ;;  %v2085_v7 = vld [vmem:[#allocation2 + $0x70] sm:$0xf]  ;;  %v1582_v42 = vor.u32 %v1581_v24, %v1578_v34  ;;  %v1800_v5 = vpack.c.b16 %v1777_v21, %v1776_v23 }
  0xe7   : > { %2440 = vmatmul.bf16.gmra.mxu2 %v2324_v30  ;;  %v950_v30 = vld [vmem:[#allocation2 + $0x80] sm:$0x1]  ;;  %v3218_v24 = vrot.slane %v3217_v32, 4  ;;  %v746_v32 = vrot.slane %v7567_v14, 4 }
  0xe8   : > { %v7929_v44 = vpop.f32.mrf.mxu1  ;;  %v951_v61 = vsel %vm7228_vm2, %v729_v48, %v950_v30  ;;  %v2218_v48 = vsel %vm7616_vm14, %v2216_v52, %v2217_v59  ;;  %v1592_v47 = vor.u32 %v1591_v3, %v7944_v43  ;;  %v1595_v30 = vshll.u32 %v1337_v49, 16  ;;  %v337_v59 = vld [vmem:[#allocation2 + $0x8c] sm:$0x1]  ;;  %v2086_v49 = vld [vmem:[#allocation2 + $0x74] sm:$0x1] }
  0xe9   : > { %952 = vst [vmem:[#allocation2 + $0x80] sm:$0x1] %v951_v61  ;;  %v3448_v61 = vpack.c.b16 %v3424_v45, %v3423_v57  ;;  %v2221_v52 = vrot.slane %v2085_v7, 5  ;;  %v3222_v3 = vrot.slane %v3220_v51, 5  ;;  %v1583_v8 = vrot.slane %v1582_v42, 4 }
  0xea   : > { %v7940_v31 = vpop.f32.mrf.mxu2  ;;  %v1593_v45 = vrot.slane %v1592_v47, 4  ;;  %v1597_v56 = vrot.slane %v1595_v30, 5  ;;  %v338_v23 = vsel %vm7233_vm4, 0, %v337_v59  ;;  %v2224_v7 = vrot.slane %v2086_v49, 5  ;;  %v1339_v47 = vld [vmem:[#allocation2 + $0x7c] sm:$0xf] }
  0xeb   : > { %8700 = vst [vmem:[#allocation13_spill] sm:$0xff] %v7940_v31  ;;  %v2302_v31 = vunpack.c.l.b16 %v2218_v48  ;;  %v6329_v48 = vrot.slane %v2084_v41, 9  ;;  %v2223_v58 = vrot.slane %v2221_v52, 4  ;;  %v3213_v51 = vsel %vm7603_vm12, %v3208_v20, %v7938_v29 }
  0xec   : > { %339 = vst [vmem:[#allocation2 + $0x8c] sm:$0x1] %v338_v23  ;;  %v3223_v42 = vsel %vm7603_vm12, %v3218_v24, %v3222_v3  ;;  %v1588_v41 = vsel %vm7603_vm12, %v1583_v8, %v7944_v43  ;;  %v1598_v22 = vsel %vm7603_vm12, %v1593_v45, %v1597_v56  ;;  %v3231_v20 = vor.u32 %v3230_v16, %v3227_v39 }
  0xed   : > { %v2325_v21 = vpack.c.b16 %v2302_v31, %v2301_v38  ;;  %v1338_v31 = vld [vmem:[#allocation2 + $0x78] sm:$0xf]  ;;  %v1609_v38 = vshll.u32 %v1339_v47, 16  ;;  %v2225_v43 = vsel %vm7616_vm14, %v2223_v58, %v2224_v7  ;;  %v3426_v56 = vunpack.c.l.b16 %v3223_v42 }
  0xee   : > { %v1600_v29 = vshrl.u32 %v1338_v31, 16  ;;  %v1603_v30 = vshll.u32 %v1338_v31, 16  ;;  %v1778_v23 = vunpack.c.l.b16 %v1588_v41  ;;  %v2304_v58 = vunpack.c.l.b16 %v2225_v43  ;;  %v340_v42 = vld [vmem:[#allocation2 + $0x98] sm:$0x1]  ;;  %v2990_v43 = vld [vmem:[#allocation2 + $0x84] sm:$0xf] }
  0xef   : > { %2818 = vmatmul.bf16.gmra.mxu3 %v6882_v35  ;;  %v3234_v35 = vshll.u32 %v2988_v62, 16  ;;  %v7988_v16 = vrot.slane %v1609_v38, 5  ;;  %v3232_v39 = vrot.slane %v3231_v20, 4  ;;  %v2087_v20 = vld [vmem:[#allocation2 + $0x78] sm:$0xe] }
  0xf0   : > { %v1881_v26 = vpop.f32.mrf.mxu1  ;;  %v2989_v8 = vld [vmem:[#allocation2 + $0x80] sm:$0x1]  ;;  %v1602_v49 = vrot.slane %v1600_v29, 4  ;;  %v2088_v29 = vld [vmem:[#allocation2 + $0x7c] sm:$0xf] }
  0xf1   : > { %v7977_v14 = vrot.slane %v3234_v35, 5  ;;  %v1993_v59 = vadd.f32 %v1881_v26, %v7781_v55  ;;  %v1605_v35 = vrot.slane %v1603_v30, 5  ;;  %v1779_v55 = vunpack.c.l.b16 %v1598_v22  ;;  %v1340_v26 = vld [vmem:[#allocation2 + $0x80] sm:$0x1] }
  0xf2   : > { %v7956_v15 = vpop.f32.mrf.mxu0  ;;  %v7958_v34 = vpop.f32.mrf.mxu2  ;;  %v1619_v41 = vshll.u32 %v1340_v26, 16 }
  0xf3   : > { %8701 = vst [vmem:[#allocation14_spill] sm:$0xff] %v7958_v34  ;;  %v7960_v57 = vpop.f32.mrf.mxu3  ;;  %v3238_v34 = vshrl.u32 %v2988_v62, 16  ;;  %v2222_v62 = vsel %vm7616_vm14, %v6329_v48, %v2221_v52  ;;  %v7984_v52 = vunpack.c.l.b16 %v3213_v51  ;;  %v957_v7 = vld [vmem:[#allocation2 + $0x8c] sm:$0x1] }
  0xf4   : > { %8702 = vst [vmem:[#allocation15_spill] sm:$0xff] %v7960_v57  ;;  %1920 = vmatmul.bf16.gmra.mxu1 %v1800_v5  ;;  %v2303_v31 = vunpack.c.l.b16 %v2222_v62  ;;  %v958_v30 = vsel %vm7228_vm2, %v746_v32, %v957_v7  ;;  %v1801_v62 = vpack.c.b16 %v1779_v55, %v1778_v23  ;;  %v1621_v26 = vrot.slane %v1619_v41, 5 }
  0xf5   : > { %3564 = vmatmul.bf16.gmra.mxu0 %v3448_v61  ;;  %v1613_v61 = vshrl.u32 %v1339_v47, 16  ;;  %v3240_v50 = vrot.slane %v3238_v34, 4  ;;  %v3244_v47 = vshll.u32 %v2989_v8, 16  ;;  %959 = vst [vmem:[#allocation2 + $0x8c] sm:$0x1] %v958_v30  ;;  %v3449_v22 = vpack.c.b16 %v3426_v56, %v7984_v52 }
  0xf6   : > { %v2326_v38 = vpack.c.b16 %v2304_v58, %v2303_v31  ;;  %v341_v8 = vsel %vm7233_vm4, 0, %v340_v42  ;;  %v2089_v56 = vld [vmem:[#allocation2 + $0x80] sm:$0x1]  ;;  %v3252_v31 = vshll.u32 %v2990_v43, 16  ;;  %v6330_v7 = vrot.slane %v2087_v20, 9 }
  0xf7   : > { %2445 = vmatmul.bf16.gmra.mxu2 %v2325_v21  ;;  %v6883_v21 = vld [vmem:[#allocation2 + $0x6c] sm:$0xff]  ;;  %v1615_v34 = vrot.slane %v1613_v61, 4  ;;  %v3241_v51 = vor.u32 %v3240_v50, %v7977_v14  ;;  %v2991_v50 = vld [vmem:[#allocation2 + $0x88] sm:$0xf]  ;;  %v3246_v52 = vrot.slane %v3244_v47, 5 }
  0xf8   : > { %v1883_v5 = vpop.f32.mrf.mxu1  ;;  %342 = vst [vmem:[#allocation2 + $0x98] sm:$0x1] %v341_v8  ;;  %v3262_v30 = vshrl.u32 %v2991_v50, 16  ;;  %v6941_v8 = vld [vmem:[%s8674_s1 + $0x1d0] sm:$0xff] }
  0xf9   : > { %v1616_v61 = vor.u32 %v1615_v34, %v7988_v16  ;;  %v1994_v32 = vadd.f32 %v1883_v5, %v7809_v60  ;;  %5173 = vmatpush.bf16.msra.mxu3 %v6941_v8 }
  0xfa   : > { %v7982_v24 = vpop.f32.mrf.mxu0  ;;  %v2406_v3 = vpop.f32.mrf.mxu2 }
  0xfb   : > { %v7986_v45 = vpop.f32.mrf.mxu3  ;;  %v2518_v48 = vadd.f32 %v2406_v3, %v1993_v59  ;;  %v1606_v59 = vor.u32 %v1605_v35, %v1602_v49  ;;  %v2228_v3 = vrot.slane %v2088_v29, 5  ;;  %v3237_v49 = vsel %vm7603_vm12, %v3232_v39, %v7977_v14  ;;  %v6933_v39 = vld [vmem:[%s8674_s1 + $0x190] sm:$0xff] }
  0xfc   : > { %8703 = vst [vmem:[#allocation16_spill] sm:$0xff] %v7986_v45  ;;  %v3242_v35 = vrot.slane %v3241_v51, 4  ;;  %v3258_v29 = vshll.u32 %v2991_v50, 16  ;;  %v1617_v45 = vrot.slane %v1616_v61, 4  ;;  %v2231_v14 = vrot.slane %v2089_v56, 5  ;;  %4427 = vmatpush.bf16.msra.mxu2 %v6933_v39 }
  0xfd   : > { %v1607_v55 = vrot.slane %v1606_v59, 4  ;;  %v2230_v57 = vrot.slane %v2228_v3, 4  ;;  %v763_v51 = vrot.slane %v7321_v28, 4  ;;  %v8013_v20 = vunpack.c.l.b16 %v3237_v49 }
  0xfe   : > { %v3247_v59 = vsel %vm7603_vm12, %v3242_v35, %v3246_v52  ;;  %v2229_v28 = vsel %vm7616_vm14, %v6330_v7, %v2228_v3  ;;  %v3264_v50 = vrot.slane %v3262_v30, 4  ;;  %v1342_v3 = vld [vmem:[#allocation2 + $0x88] sm:$0xf] }
  0xff   : > { %2823 = vmatmul.bf16.gmra.mxu3 %v6883_v21  ;;  %v3249_v21 = vshrl.u32 %v2990_v43, 16  ;;  %v1612_v41 = vsel %vm7603_vm12, %v1607_v55, %v7988_v16  ;;  %v3254_v43 = vrot.slane %v3252_v31, 5  ;;  %v6909_v16 = vld [vmem:[%s8674_s1 + $0x150] sm:$0xff]  ;;  %v8029_v52 = vunpack.c.l.b16 %v3247_v59  ;;  %v6884_v59 = vld [vmem:[#allocation2 + $0x78] sm:$0xff] }
 0x100   : > { %v8031_v56 = vunpack.c.l.b16 %v1612_v41  ;;  %4048 = vmatpush.bf16.msra.mxu1 %v6909_v16  ;;  %v1637_v55 = vshrl.u32 %v1342_v3, 16  ;;  %v2305_v31 = vunpack.c.l.b16 %v2229_v28  ;;  %v6949_v28 = vld [vmem:[%s8674_s1 + $0x210] sm:$0xff] }
 0x101   : > { %v1886_v5 = vpop.f32.mrf.mxu1  ;;  %5695 = vmatpush.bf16.msra.mxu0 %v6949_v28 }
 0x102   : > { %v2408_v23 = vpop.f32.mrf.mxu2  ;;  %v3530_v42 = vpop.f32.mrf.mxu0  ;;  %v1995_v47 = vadd.f32 %v1886_v5, %v7834_v0  ;;  %v8017_v0 = vrot.slane %v3258_v29, 5  ;;  %v1343_v5 = vld [vmem:[#allocation2 + $0x8c] sm:$0x1] }
 0x103   : > { %v2784_v58 = vpop.f32.mrf.mxu3  ;;  %v2519_v34 = vadd.f32 %v2408_v23, %v1994_v32  ;;  %v1341_v32 = vld [vmem:[#allocation2 + $0x84] sm:$0xf]  ;;  %v1633_v23 = vshll.u32 %v1342_v3, 16  ;;  %v2092_v3 = vld [vmem:[#allocation2 + $0x8c] sm:$0x1] }
 0x104   : > { %v2896_v60 = vadd.f32 %v2784_v58, %v2518_v48  ;;  %v3251_v48 = vrot.slane %v3249_v21, 4  ;;  %1925 = vmatmul.bf16.gmra.mxu1 %v1801_v62  ;;  %v2232_v62 = vsel %vm7616_vm14, %v2230_v57, %v2231_v14  ;;  %v1624_v49 = vshrl.u32 %v1341_v32, 16  ;;  %v964_v21 = vld [vmem:[#allocation2 + $0x98] sm:$0x1] }
 0x105   : > { %3569 = vmatmul.bf16.gmra.mxu0 %v3449_v22  ;;  %v1622_v22 = vsel %vm7603_vm12, %v1617_v45, %v1621_v26  ;;  %v1627_v35 = vshll.u32 %v1341_v32, 16  ;;  %v965_v45 = vsel %vm7228_vm2, %v763_v51, %v964_v21  ;;  %v2306_v30 = vunpack.c.l.b16 %v2232_v62  ;;  %v2090_v62 = vld [vmem:[#allocation2 + $0x84] sm:$0xe] }
 0x106   : > { %v8011_v61 = vadd.f32 %v3530_v42, %v2896_v60  ;;  %v1626_v58 = vrot.slane %v1624_v49, 4  ;;  %v1781_v29 = vunpack.c.l.b16 %v1622_v22  ;;  %v3255_v42 = vor.u32 %v3254_v43, %v3251_v48  ;;  %966 = vst [vmem:[#allocation2 + $0x98] sm:$0x1] %v965_v45  ;;  %v2993_v49 = vld [vmem:[#allocation2 + $0x90] sm:$0xf] }
 0x107   : > { %2450 = vmatmul.bf16.gmra.mxu2 %v2326_v38  ;;  %v2992_v38 = vld [vmem:[#allocation2 + $0x8c] sm:$0x1]  ;;  %v1629_v7 = vrot.slane %v1627_v35, 5  ;;  %v3265_v60 = vor.u32 %v3264_v50, %v8017_v0  ;;  %v8039_v16 = vrot.slane %v1633_v23, 5  ;;  %v1639_v51 = vrot.slane %v1637_v55, 4 }
 0x108   : > { %v3268_v22 = vshll.u32 %v2992_v38, 16  ;;  %v1643_v43 = vshll.u32 %v1343_v5, 16  ;;  %v2091_v50 = vld [vmem:[#allocation2 + $0x88] sm:$0xf]  ;;  %v2327_v35 = vpack.c.b16 %v2306_v30, %v2305_v31  ;;  %v3256_v23 = vrot.slane %v3255_v42, 4 }
 0x109   : > { %v1888_v8 = vpop.f32.mrf.mxu1  ;;  %v1630_v48 = vor.u32 %v1629_v7, %v1626_v58  ;;  %v1640_v55 = vor.u32 %v1639_v51, %v8039_v16  ;;  %v2235_v21 = vrot.slane %v2091_v50, 5  ;;  %v343_v38 = vld [vmem:[#allocation2 + $0xa4] sm:$0x1]  ;;  %v3266_v58 = vrot.slane %v3265_v60, 4 }
 0x10a   : > { %v2411_v26 = vpop.f32.mrf.mxu2  ;;  %v3532_v14 = vpop.f32.mrf.mxu0  ;;  %v1996_v32 = vadd.f32 %v1888_v8, %v7866_v37  ;;  %v2994_v37 = vld [vmem:[#allocation2 + $0x94] sm:$0xf]  ;;  %v3270_v7 = vrot.slane %v3268_v22, 5  ;;  %v2238_v5 = vrot.slane %v2092_v3, 5  ;;  %v344_v31 = vsel %vm7233_vm4, 0, %v343_v38 }
 0x10b   : > { %v2786_v57 = vpop.f32.mrf.mxu3  ;;  %v2520_v41 = vadd.f32 %v2411_v26, %v1995_v47  ;;  %v1802_v47 = vpack.c.b16 %v1781_v29, %v8031_v56  ;;  %v1631_v45 = vrot.slane %v1630_v48, 4  ;;  %v6331_v26 = vrot.slane %v2090_v62, 9  ;;  %345 = vst [vmem:[#allocation2 + $0xa4] sm:$0x1] %v344_v31 }
 0x10c   : > { %v2897_v39 = vadd.f32 %v2786_v57, %v2519_v34  ;;  %v3450_v34 = vpack.c.b16 %v8029_v52, %v8013_v20  ;;  %v1645_v57 = vrot.slane %v1643_v43, 5  ;;  %v3273_v20 = vshrl.u32 %v2993_v49, 16 }
 0x10d   : > { %v3276_v52 = vshll.u32 %v2993_v49, 16  ;;  %v3282_v8 = vshll.u32 %v2994_v37, 16  ;;  %v3286_v28 = vshrl.u32 %v2994_v37, 16  ;;  %v1641_v22 = vrot.slane %v1640_v55, 4 }
 0x10e   : > { %v8048_v30 = vadd.f32 %v3532_v14, %v2897_v39  ;;  %v2237_v48 = vrot.slane %v2235_v21, 4  ;;  %v780_v43 = vrot.slane %v7421_v19, 4  ;;  %v3261_v62 = vsel %vm7603_vm12, %v3256_v23, %v8017_v0  ;;  %v1344_v0 = vld [vmem:[#allocation2 + $0x90] sm:$0xf] }
 0x10f   : > { %2828 = vmatmul.bf16.gmra.mxu3 %v6884_v59  ;;  %v3271_v3 = vsel %vm7603_vm12, %v3266_v58, %v3270_v7  ;;  %v3275_v14 = vrot.slane %v3273_v20, 4  ;;  %v3278_v39 = vrot.slane %v3276_v52, 5  ;;  %v2236_v19 = vsel %vm7616_vm14, %v6331_v26, %v2235_v21 }
 0x110   : > { %v1646_v23 = vsel %vm7603_vm12, %v1641_v22, %v1645_v57  ;;  %v2239_v55 = vsel %vm7616_vm14, %v2237_v48, %v2238_v5  ;;  %v1651_v37 = vshll.u32 %v1344_v0, 16  ;;  %v8070_v38 = vunpack.c.l.b16 %v3261_v62 }
 0x111   : > { %v1891_v60 = vpop.f32.mrf.mxu1  ;;  %v3279_v26 = vor.u32 %v3278_v39, %v3275_v14  ;;  %v2307_v5 = vunpack.c.l.b16 %v2236_v19  ;;  %v1346_v39 = vld [vmem:[#allocation2 + $0x98] sm:$0x1] }
 0x112   : > { %v2413_v29 = vpop.f32.mrf.mxu2  ;;  %v3535_v42 = vpop.f32.mrf.mxu0  ;;  %v1997_v50 = vadd.f32 %v1891_v60, %v7895_v53  ;;  %v8064_v53 = vrot.slane %v3282_v8, 5  ;;  %v1653_v20 = vrot.slane %v1651_v37, 5  ;;  %v971_v62 = vld [vmem:[#allocation2 + $0xa4] sm:$0x1] }
 0x113   : > { %v2789_v56 = vpop.f32.mrf.mxu3  ;;  %v2521_v51 = vadd.f32 %v2413_v29, %v1996_v32  ;;  %v3288_v32 = vrot.slane %v3286_v28, 4  ;;  %v2308_v29 = vunpack.c.l.b16 %v2239_v55  ;;  %v972_v19 = vsel %vm7228_vm2, %v780_v43, %v971_v62  ;;  %v2093_v55 = vld [vmem:[#allocation2 + $0x90] sm:$0xe] }
 0x114   : > { %v2898_v59 = vadd.f32 %v2789_v56, %v2520_v41  ;;  %1930 = vmatmul.bf16.gmra.mxu1 %v1802_v47  ;;  %v1636_v41 = vsel %vm7603_vm12, %v1631_v45, %v8039_v16  ;;  %v1648_v47 = vshrl.u32 %v1344_v0, 16  ;;  %v8072_v16 = vunpack.c.l.b16 %v3271_v3  ;;  %v2995_v45 = vld [vmem:[#allocation2 + $0x98] sm:$0x1]  ;;  %973 = vst [vmem:[#allocation2 + $0xa4] sm:$0x1] %v972_v19 }
 0x115   : > { %3574 = vmatmul.bf16.gmra.mxu0 %v3450_v34  ;;  %v1345_v34 = vld [vmem:[#allocation2 + $0x94] sm:$0xf]  ;;  %v8074_v7 = vunpack.c.l.b16 %v1636_v41  ;;  %v8076_v56 = vunpack.c.l.b16 %v1646_v23  ;;  %v3289_v8 = vor.u32 %v3288_v32, %v8064_v53  ;;  %v3292_v14 = vshll.u32 %v2995_v45, 16  ;;  %v2996_v32 = vld [vmem:[#allocation2 + $0x9c] sm:$0xf] }
 0x116   : > { %v8057_v49 = vadd.f32 %v3535_v42, %v2898_v59  ;;  %v1657_v58 = vshll.u32 %v1345_v34, 16  ;;  %v1661_v21 = vshrl.u32 %v1345_v34, 16  ;;  %v6885_v42 = vld [vmem:[#allocation2 + $0x84] sm:$0xff]  ;;  %v3280_v41 = vrot.slane %v3279_v26, 4  ;;  %v2094_v23 = vld [vmem:[#allocation2 + $0x94] sm:$0xf] }
 0x117   : > { %2455 = vmatmul.bf16.gmra.mxu2 %v2327_v35  ;;  %v1650_v35 = vrot.slane %v1648_v47, 4  ;;  %v2997_v34 = vld [vmem:[#allocation2 + $0xa0] sm:$0xf]  ;;  %v3290_v47 = vrot.slane %v3289_v8, 4  ;;  %v346_v45 = vld [vmem:[#allocation2 + $0xb0] sm:$0x1] }
 0x118   : > { %v8079_v22 = vrot.slane %v1657_v58, 5  ;;  %v1663_v48 = vrot.slane %v1661_v21, 4  ;;  %v1667_v58 = vshll.u32 %v1346_v39, 16  ;;  %v2095_v21 = vld [vmem:[#allocation2 + $0x98] sm:$0x1]  ;;  %v3294_v26 = vrot.slane %v3292_v14, 5 }
 0x119   : > { %v1893_v60 = vpop.f32.mrf.mxu1  ;;  %v1654_v0 = vor.u32 %v1653_v20, %v1650_v35  ;;  %v2242_v43 = vrot.slane %v2094_v23, 5  ;;  %v3297_v35 = vshrl.u32 %v2996_v32, 16  ;;  %v3300_v20 = vshll.u32 %v2996_v32, 16 }
 0x11a   : > { %v2416_v57 = vpop.f32.mrf.mxu2  ;;  %v3537_v28 = vpop.f32.mrf.mxu0  ;;  %v1998_v3 = vadd.f32 %v1893_v60, %v7927_v10  ;;  %v2328_v10 = vpack.c.b16 %v2308_v29, %v2307_v5  ;;  %v1664_v37 = vor.u32 %v1663_v48, %v8079_v22  ;;  %v2245_v5 = vrot.slane %v2095_v21, 5  ;;  %v1347_v21 = vld [vmem:[#allocation2 + $0x9c] sm:$0xf] }
 0x11b   : > { %v2791_v52 = vpop.f32.mrf.mxu3  ;;  %v2522_v59 = vadd.f32 %v2416_v57, %v1997_v50  ;;  %v1803_v50 = vpack.c.b16 %v8076_v56, %v8074_v7  ;;  %v6332_v7 = vrot.slane %v2093_v55, 9  ;;  %v3310_v29 = vshrl.u32 %v2997_v34, 16 }
 0x11c   : > { %v2899_v31 = vadd.f32 %v2791_v52, %v2521_v51  ;;  %v3451_v51 = vpack.c.b16 %v8072_v16, %v8070_v38  ;;  %v3285_v38 = vsel %vm7603_vm12, %v3280_v41, %v8064_v53  ;;  %v1655_v16 = vrot.slane %v1654_v0, 4  ;;  %v6932_v53 = vld [vmem:[%s8674_s1 + $0x188] sm:$0xff] }
 0x11d   : > { %v3306_v52 = vshll.u32 %v2997_v34, 16  ;;  %v347_v8 = vsel %vm7233_vm4, 0, %v346_v45  ;;  %v1665_v39 = vrot.slane %v1664_v37, 4  ;;  %v1669_v23 = vrot.slane %v1667_v58, 5  ;;  %4428 = vmatpush.bf16.msra.mxu2 %v6932_v53  ;;  %v6908_v58 = vld [vmem:[%s8674_s1 + $0x148] sm:$0xff] }
 0x11e   : > { %348 = vst [vmem:[#allocation2 + $0xb0] sm:$0x1] %v347_v8  ;;  %v2244_v0 = vrot.slane %v2242_v43, 4  ;;  %v3299_v19 = vrot.slane %v3297_v35, 4  ;;  %v3302_v32 = vrot.slane %v3300_v20, 5  ;;  %v797_v34 = vrot.slane %v7502_v27, 4  ;;  %4049 = vmatpush.bf16.msra.mxu1 %v6908_v58 }
 0x11f   : > { %2833 = vmatmul.bf16.gmra.mxu3 %v6885_v42  ;;  %v8094_v42 = vadd.f32 %v3537_v28, %v2899_v31  ;;  %v3295_v28 = vsel %vm7603_vm12, %v3290_v47, %v3294_v26  ;;  %v2998_v31 = vld [vmem:[#allocation2 + $0xa4] sm:$0x1]  ;;  %v8107_v37 = vunpack.c.l.b16 %v3285_v38  ;;  %v6940_v47 = vld [vmem:[%s8674_s1 + $0x1c8] sm:$0xff]  ;;  %v1670_v27 = vsel %vm7603_vm12, %v1665_v39, %v1669_v23 }
 0x120   : > { %v1672_v45 = vshrl.u32 %v1347_v21, 16  ;;  %v1675_v26 = vshll.u32 %v1347_v21, 16  ;;  %v2246_v35 = vsel %vm7616_vm14, %v2244_v0, %v2245_v5  ;;  %v3303_v20 = vor.u32 %v3302_v32, %v3299_v19  ;;  %5174 = vmatpush.bf16.msra.mxu3 %v6940_v47  ;;  %v6948_v0 = vld [vmem:[%s8674_s1 + $0x208] sm:$0xff]  ;;  %v1349_v19 = vld [vmem:[#allocation2 + $0xa4] sm:$0x1] }
 0x121   : > { %v1896_v14 = vpop.f32.mrf.mxu1  ;;  %v2310_v53 = vunpack.c.l.b16 %v2246_v35  ;;  %v2097_v47 = vld [vmem:[#allocation2 + $0xa0] sm:$0xf]  ;;  %5696 = vmatpush.bf16.msra.mxu0 %v6948_v0  ;;  %v2999_v21 = vld [vmem:[#allocation2 + $0xa8] sm:$0xf] }
 0x122   : > { %v2418_v56 = vpop.f32.mrf.mxu2  ;;  %v3540_v60 = vpop.f32.mrf.mxu0  ;;  %v1999_v41 = vadd.f32 %v1896_v14, %v7956_v15  ;;  %v1660_v15 = vsel %vm7603_vm12, %v1655_v16, %v8079_v22  ;;  %v8122_v22 = vunpack.c.l.b16 %v3295_v28 }
 0x123   : > { %v2794_v57 = vpop.f32.mrf.mxu3  ;;  %v2523_v62 = vadd.f32 %v2418_v56, %v1998_v3  ;;  %v3312_v3 = vrot.slane %v3310_v29, 4  ;;  %v8126_v16 = vunpack.c.l.b16 %v1660_v15  ;;  %v8129_v29 = vunpack.c.l.b16 %v1670_v27 }
 0x124   : > { %v2900_v48 = vadd.f32 %v2794_v57, %v2522_v59  ;;  %v8102_v59 = vrot.slane %v3306_v52, 5  ;;  %1935 = vmatmul.bf16.gmra.mxu1 %v1803_v50  ;;  %v1348_v50 = vld [vmem:[#allocation2 + $0xa0] sm:$0xf]  ;;  %v3316_v52 = vshll.u32 %v2998_v31, 16 }
 0x125   : > { %3579 = vmatmul.bf16.gmra.mxu0 %v3451_v51  ;;  %v2243_v51 = vsel %vm7616_vm14, %v6332_v7, %v2242_v43  ;;  %v1681_v38 = vshll.u32 %v1348_v50, 16  ;;  %v1685_v57 = vshrl.u32 %v1348_v50, 16  ;;  %v6886_v43 = vld [vmem:[#allocation2 + $0x90] sm:$0xff]  ;;  %v3000_v50 = vld [vmem:[#allocation2 + $0xac] sm:$0xf] }
 0x126   : > { %v8104_v55 = vadd.f32 %v3540_v60, %v2900_v48  ;;  %v2309_v8 = vunpack.c.l.b16 %v2243_v51  ;;  %v1674_v60 = vrot.slane %v1672_v45, 4  ;;  %v1677_v48 = vrot.slane %v1675_v26, 5  ;;  %v978_v28 = vld [vmem:[#allocation2 + $0xb0] sm:$0x1]  ;;  %v349_v45 = vld [vmem:[#allocation2 + $0xbc] sm:$0x1] }
 0x127   : > { %2460 = vmatmul.bf16.gmra.mxu2 %v2328_v10  ;;  %v3313_v10 = vor.u32 %v3312_v3, %v8102_v59  ;;  %v8138_v32 = vrot.slane %v1681_v38, 5  ;;  %v3304_v3 = vrot.slane %v3303_v20, 4  ;;  %v1687_v15 = vrot.slane %v1685_v57, 4  ;;  %v2096_v20 = vld [vmem:[#allocation2 + $0x9c] sm:$0xe] }
 0x128   : > { %v1678_v27 = vor.u32 %v1677_v48, %v1674_v60  ;;  %v1691_v51 = vshll.u32 %v1349_v19, 16  ;;  %v3452_v26 = vpack.c.b16 %v8122_v22, %v8107_v37  ;;  %v2249_v38 = vrot.slane %v2097_v47, 5 }
 0x129   : > { %v1898_v23 = vpop.f32.mrf.mxu1  ;;  %v3314_v58 = vrot.slane %v3313_v10, 4  ;;  %v1688_v35 = vor.u32 %v1687_v15, %v8138_v32  ;;  %v2329_v10 = vpack.c.b16 %v2310_v53, %v2309_v8  ;;  %v3321_v57 = vshrl.u32 %v2999_v21, 16 }
 0x12a   : > { %v2421_v7 = vpop.f32.mrf.mxu2  ;;  %v8131_v14 = vpop.f32.mrf.mxu0  ;;  %v2000_v31 = vadd.f32 %v1898_v23, %v7982_v24  ;;  %v1804_v24 = vpack.c.b16 %v8129_v29, %v8126_v16  ;;  %v3334_v37 = vshrl.u32 %v3000_v50, 16  ;;  %v350_v22 = vsel %vm7233_vm4, 0, %v349_v45  ;;  %v1350_v45 = vld [vmem:[#allocation2 + $0xa8] sm:$0xf] }
 0x12b   : > { %v2796_v56 = vpop.f32.mrf.mxu3  ;;  %v2524_v39 = vadd.f32 %v2421_v7, %v1999_v41  ;;  %v3318_v41 = vrot.slane %v3316_v52, 5  ;;  %v3309_v52 = vsel %vm7603_vm12, %v3304_v3, %v8102_v59  ;;  %v3330_v7 = vshll.u32 %v3000_v50, 16  ;;  %351 = vst [vmem:[#allocation2 + $0xbc] sm:$0x1] %v350_v22 }
 0x12c   : > { %v8133_v5 = vadd.f32 %v2796_v56, %v2523_v62  ;;  %v979_v62 = vsel %vm7228_vm2, %v797_v34, %v978_v28  ;;  %v2098_v34 = vld [vmem:[#allocation2 + $0xa4] sm:$0x1]  ;;  %v3324_v56 = vshll.u32 %v2999_v21, 16  ;;  %v1679_v60 = vrot.slane %v1678_v27, 4  ;;  %v7113_v27 = vld [vmem:[%s7246_s30 + $0x78] sm:$0xff]  }
 0x12d   : > { %980 = vst [vmem:[#allocation2 + $0xb0] sm:$0x1] %v979_v62  ;;  %v1693_v48 = vrot.slane %v1691_v51, 5  ;;  %v6333_v8 = vrot.slane %v2096_v20, 9  ;;  %v2252_v23 = vrot.slane %v2098_v34, 5  ;;  %v1689_v28 = vrot.slane %v1688_v35, 4 }
 0x12e   : > { %v2251_v3 = vrot.slane %v2249_v38, 4  ;;  %v3323_v15 = vrot.slane %v3321_v57, 4  ;;  %v3326_v47 = vrot.slane %v3324_v56, 5  ;;  %v814_v62 = vrot.slane %v7594_v63, 4  ;;  %v1351_v63 = vld [vmem:[#allocation2 + $0xac] sm:$0xf] }
 0x12f   : > { %2838 = vmatmul.bf16.gmra.mxu3 %v6886_v43  ;;  %v3319_v43 = vsel %vm7603_vm12, %v3314_v58, %v3318_v41  ;;  %v8160_v58 = vunpack.c.l.b16 %v3309_v52  ;;  %v8162_v41 = vrot.slane %v3330_v7, 5  ;;  %v3336_v21 = vrot.slane %v3334_v37, 4 }
 0x130   : > { %v8165_v51 = vunpack.c.l.b16 %v3319_v43  ;;  %v8174_v35 = vadd.f32 %v8131_v14, %v8133_v5  ;;  %v1696_v20 = vshrl.u32 %v1350_v45, 16  ;;  %v1699_v34 = vshll.u32 %v1350_v45, 16 }
 0x131   : > { %v1901_v19 = vpop.f32.mrf.mxu1  ;;  %v1705_v52 = vshll.u32 %v1351_v63, 16  ;;  %v1709_v57 = vshrl.u32 %v1351_v63, 16  ;;  %v3337_v43 = vor.u32 %v3336_v21, %v8162_v41  ;;  %v7018_v5 = vunpack.c.h.bf16 %v7113_v27  ;;  %v2100_v63 = vld [vmem:[#allocation2 + $0xac] sm:$0xf] }
 0x132   : > { %v2423_v29 = vpop.f32.mrf.mxu2  ;;  %v8155_v53 = vpop.f32.mrf.mxu0  ;;  %v2001_v56 = vadd.f32 %v1901_v19, %v7740_v40  ;;  %v985_v14 = vld [vmem:[#allocation2 + $0xbc] sm:$0x1] }
 0x133   : > { %v2799_v16 = vpop.f32.mrf.mxu3  ;;  %v2525_v0 = vadd.f32 %v2423_v29, %v2000_v31  ;;  %v2250_v31 = vsel %vm7616_vm14, %v6333_v8, %v2249_v38  ;;  %v7017_v38 = vunpack.c.l.bf16 %v7113_v27  ;;  %v1701_v29 = vrot.slane %v1699_v34, 5 }
 0x134   : > { %v8157_v59 = vadd.f32 %v2799_v16, %v2524_v39  ;;  %1940 = vmatmul.bf16.gmra.mxu1 %v1804_v24  ;;  %v1684_v39 = vsel %vm7603_vm12, %v1679_v60, %v8138_v32  ;;  %v3001_v50 = vld [vmem:[#allocation2 + $0xb0] sm:$0x1]  ;;  %v2253_v24 = vsel %vm7616_vm14, %v2251_v3, %v2252_v23  ;;  %v3327_v32 = vor.u32 %v3326_v47, %v3323_v15  ;;  %v6887_v23 = vld [vmem:[#allocation2 + $0x9c] sm:$0xff] }
 0x135   : > { %3584 = vmatmul.bf16.gmra.mxu0 %v3452_v26  ;;  %v1694_v26 = vsel %vm7603_vm12, %v1689_v28, %v1693_v48  ;;  %v3340_v7 = vshll.u32 %v3001_v50, 16  ;;  %v8182_v22 = vunpack.c.l.b16 %v1684_v39  ;;  %v1698_v16 = vrot.slane %v1696_v20, 4  ;;  %v1352_v39 = vld [vmem:[#allocation2 + $0xb0] sm:$0x1] }
 0x136   : > { %v986_v60 = vsel %vm7228_vm2, %v814_v62, %v985_v14  ;;  %v8186_v40 = vrot.slane %v1705_v52, 5  ;;  %v1711_v19 = vrot.slane %v1709_v57, 4  ;;  %v1787_v15 = vunpack.c.l.b16 %v1694_v26  ;;  %v7166_v62 = vld [vmem:[%s8675_s2] ss:$0 sm:$0xff] }
 0x137   : > { %2465 = vmatmul.bf16.gmra.mxu2 %v2329_v10  ;;  %987 = vst [vmem:[#allocation2 + $0xbc] sm:$0x1] %v986_v60  ;;  %v2311_v47 = vunpack.c.l.b16 %v2250_v31  ;;  %v2312_v21 = vunpack.c.l.b16 %v2253_v24  ;;  %v3328_v27 = vrot.slane %v3327_v32, 4  ;;  %v3338_v50 = vrot.slane %v3337_v43, 4  ;;  %v2099_v24 = vld [vmem:[#allocation2 + $0xa8] sm:$0xe] }
 0x138   : > { %v3342_v45 = vrot.slane %v3340_v7, 5  ;;  %v457_v20 = vmul.f32 %v7166_v62, %v7018_v5  ;;  %v1702_v34 = vor.u32 %v1701_v29, %v1698_v16  ;;  %v3453_v52 = vpack.c.b16 %v8165_v51, %v8160_v58  ;;  %v296_v32 = vld [vmem:[#allocation2 + $0xc0] sm:$0x1]  ;;  %v2101_v5 = vld [vmem:[#allocation2 + $0xb0] sm:$0x1] }
 0x139   : > { %v1903_v3 = vpop.f32.mrf.mxu1  ;;  %v1712_v26 = vor.u32 %v1711_v19, %v8186_v40  ;;  %v1715_v31 = vshll.u32 %v1352_v39, 16  ;;  %v1805_v57 = vpack.c.b16 %v1787_v15, %v8182_v22  ;;  %v3333_v43 = vsel %vm7603_vm12, %v3328_v27, %v8162_v41  ;;  %v8201_v58 = vld [vmem:[#allocation2 + $0xb4] sm:$0xf]  ;;  %v7167_v51 = vld [vmem:[%s8676_s3] ss:$0 sm:$0xff] }
 0x13a   : > { %v2426_v37 = vpop.f32.mrf.mxu2  ;;  %v3547_v48 = vpop.f32.mrf.mxu0  ;;  %v2256_v7 = vrot.slane %v2100_v63, 5  ;;  %v3343_v14 = vsel %vm7603_vm12, %v3338_v50, %v3342_v45  ;;  %v1703_v29 = vrot.slane %v1702_v34, 4  ;;  %v6334_v41 = vrot.slane %v2099_v24, 9  ;;  %v352_v60 = vld [vmem:[#allocation2 + $0xc8] sm:$0x1]  ;;  %v6931_v39 = vld [vmem:[%s8674_s1 + $0x180] sm:$0xff] }
 0x13b   : > { %v2801_v10 = vpop.f32.mrf.mxu3  ;;  %v2526_v28 = vadd.f32 %v2426_v37, %v2001_v56  ;;  %v2330_v56 = vpack.c.b16 %v2312_v21, %v2311_v47  ;;  %v8206_v37 = vadd.f32 %v7167_v51, %v457_v20  ;;  %v1713_v21 = vrot.slane %v1712_v26, 4  ;;  %4429 = vmatpush.bf16.msra.mxu2 %v6931_v39 }
 0x13c   : > { %v2903_v8 = vadd.f32 %v2801_v10, %v2525_v0  ;;  %v456_v0 = vmul.f32 %v7166_v62, %v7017_v38  ;;  %v2002_v38 = vadd.f32 %v1903_v3, %v7770_v33  ;;  %v297_v33 = vsel %vm7228_vm2, 0, %v296_v32  ;;  %v1354_v32 = vld [vmem:[#allocation2 + $0xb8] sm:$0xf] }
 0x13d   : > { %v1717_v27 = vrot.slane %v1715_v31, 5  ;;  %298 = vst [vmem:[#allocation2 + $0xc0] sm:$0x1] %v297_v33  ;;  %v8217_v50 = vunpack.c.l.b16 %v3333_v43  ;;  %v2258_v45 = vrot.slane %v2256_v7, 4  ;;  %v2259_v63 = vrot.slane %v2101_v5, 5  ;;  %v6939_v31 = vld [vmem:[%s8674_s1 + $0x1c0] sm:$0xff] }
 0x13e   : > { %v492_v10 = vadd.f32 %v7167_v51, %v456_v0  ;;  %v8219_v62 = vunpack.c.l.b16 %v3343_v14  ;;  %v8223_v0 = vadd.f32 %v3547_v48, %v2903_v8  ;;  %v1708_v20 = vsel %vm7603_vm12, %v1703_v29, %v8186_v40  ;;  %v6907_v48 = vld [vmem:[%s8674_s1 + $0x140] sm:$0xff]  ;;  %v1353_v8 = vld [vmem:[#allocation2 + $0xb4] sm:$0xf]  ;;  %5175 = vmatpush.bf16.msra.mxu3 %v6939_v31 }
 0x13f   : > { %2843 = vmatmul.bf16.gmra.mxu3 %v6887_v23  ;;  %v8212_v23 = vadd.f32 %v8155_v53, %v8157_v59  ;;  %v3003_v53 = vld [vmem:[#allocation2 + $0xb8] sm:$0xf]  ;;  %v2257_v34 = vsel %vm7616_vm14, %v6334_v41, %v2256_v7  ;;  %v3345_v26 = vshrl.u32 %v8201_v58, 16  ;;  %v1718_v40 = vsel %vm7603_vm12, %v1713_v21, %v1717_v27  ;;  %4050 = vmatpush.bf16.msra.mxu1 %v6907_v48  ;;  %v6947_v27 = vld [vmem:[%s8674_s1 + $0x200] sm:$0xff] }
 0x140   : > { %v524_v59 = vmax.f32 %v492_v10, 0.0  ;;  %v3348_v24 = vshll.u32 %v8201_v58, 16  ;;  %v3354_v14 = vshll.u32 %v3003_v53, 16  ;;  %v3358_v5 = vshrl.u32 %v3003_v53, 16  ;;  %5697 = vmatpush.bf16.msra.mxu0 %v6947_v27 }
 0x141   : > { %v1906_v47 = vpop.f32.mrf.mxu1  ;;  %v1723_v51 = vshll.u32 %v1353_v8, 16  ;;  %v1729_v10 = vshll.u32 %v1354_v32, 16  ;;  %v8246_v29 = vunpack.c.l.b16 %v1708_v20  ;;  %v2313_v41 = vunpack.c.l.b16 %v2257_v34 }
 0x142   : > { %v2428_v16 = vpop.f32.mrf.mxu2  ;;  %v3550_v3 = vpop.f32.mrf.mxu0  ;;  %v556_v43 = vpack.c.bf16 %v524_v59, %v524_v59  ;;  %v2003_v7 = vadd.f32 %v1906_v47, %v7787_v46  ;;  %v8251_v53 = vrot.slane %v3354_v14, 5  ;;  %v3360_v59 = vrot.slane %v3358_v5, 4  ;;  %v1355_v14 = vld [vmem:[#allocation2 + $0xbc] sm:$0x1]  ;;  %v2103_v5 = vld [vmem:[#allocation2 + $0xb8] sm:$0xf] }
 0x143   : > { %v2804_v22 = vpop.f32.mrf.mxu3  ;;  %v2527_v15 = vadd.f32 %v2428_v16, %v2002_v38  ;;  %v2260_v38 = vsel %vm7616_vm14, %v2258_v45, %v2259_v63  ;;  %v3347_v45 = vrot.slane %v3345_v26, 4  ;;  %v3350_v63 = vrot.slane %v3348_v24, 5 }
 0x144   : > { %v2904_v19 = vadd.f32 %v2804_v22, %v2526_v28  ;;  %v353_v28 = vsel %vm7233_vm4, 0, %v352_v60  ;;  %1945 = vmatmul.bf16.gmra.mxu1 %v1805_v57  ;;  %v525_v57 = vmax.f32 %v8206_v37, 0.0  ;;  %v1733_v22 = vshrl.u32 %v1354_v32, 16 }
 0x145   : > { %3589 = vmatmul.bf16.gmra.mxu0 %v3453_v52  ;;  %354 = vst [vmem:[#allocation2 + $0xc8] sm:$0x1] %v353_v28  ;;  %v1789_v37 = vunpack.c.l.b16 %v1718_v40  ;;  %v816_v33 = vshrl.u32 %v556_v43, 16  ;;  %v2314_v21 = vunpack.c.l.b16 %v2260_v38  ;;  %v3004_v28 = vld [vmem:[#allocation2 + $0xbc] sm:$0x1]  ;;  %v1725_v34 = vrot.slane %v1723_v51, 5 }
 0x146   : > { %v8237_v52 = vadd.f32 %v3550_v3, %v2904_v19  ;;  %v6888_v3 = vld [vmem:[#allocation2 + $0xa8] sm:$0xff]  ;;  %v557_v39 = vpack.c.bf16 %v525_v57, %v525_v57  ;;  %v8253_v31 = vrot.slane %v1729_v10, 5  ;;  %v819_v32 = vshll.u32 %v556_v43, 16 }
 0x147   : > { %2470 = vmatmul.bf16.gmra.mxu2 %v2330_v56  ;;  %v1720_v56 = vshrl.u32 %v1353_v8, 16  ;;  %v818_v48 = vrot.slane %v816_v33, 7  ;;  %v3454_v8 = vpack.c.b16 %v8219_v62, %v8217_v50  ;;  %v1806_v40 = vpack.c.b16 %v1789_v37, %v8246_v29 }
 0x148   : > { %v824_v26 = vshrl.u32 %v557_v39, 16  ;;  %v2331_v24 = vpack.c.b16 %v2314_v21, %v2313_v41  ;;  %v3351_v57 = vor.u32 %v3350_v63, %v3347_v45  ;;  %v3364_v38 = vshll.u32 %v3004_v28, 16  ;;  %v2102_v45 = vld [vmem:[#allocation2 + $0xb4] sm:$0xe] }
 0x149   : > { %v1908_v47 = vpop.f32.mrf.mxu1  ;;  %v1722_v20 = vrot.slane %v1720_v56, 4  ;;  %v822_v62 = vrot.slane %v818_v48, 4  ;;  %v827_v43 = vshll.u32 %v557_v39, 16  ;;  %v1739_v27 = vshll.u32 %v1355_v14, 16 }
 0x14a   : > { %v2431_v58 = vpop.f32.mrf.mxu2  ;;  %v3552_v60 = vpop.f32.mrf.mxu0  ;;  %v2004_v56 = vadd.f32 %v1908_v47, %v7819_v13  ;;  %v826_v29 = vrot.slane %v824_v26, 7  ;;  %v2263_v63 = vrot.slane %v2103_v5, 5  ;;  %v2104_v47 = vld [vmem:[#allocation2 + $0xbc] sm:$0x1] }
 0x14b   : > { %v2806_v16 = vpop.f32.mrf.mxu3  ;;  %v2528_v19 = vadd.f32 %v2431_v58, %v2003_v7  ;;  %v3361_v7 = vor.u32 %v3360_v59, %v8251_v53  ;;  %v1726_v51 = vor.u32 %v1725_v34, %v1722_v20  ;;  %v3352_v34 = vrot.slane %v3351_v57, 4 }
 0x14c   : > { %v2905_v46 = vadd.f32 %v2806_v16, %v2527_v15  ;;  %v1735_v15 = vrot.slane %v1733_v22, 4  ;;  %v821_v22 = vor.u32 %v819_v32, %v818_v48  ;;  %v988_v16 = vld [vmem:[#allocation2 + $0xc0] sm:$0xf]  ;;  %v992_v13 = vld [vmem:[#allocation2 + $0xc8] sm:$0x1]  ;;  %v829_v59 = vor.u32 %v827_v43, %v826_v29 }
 0x14d   : > { %v831_v28 = vrot.slane %v826_v29, 4  ;;  %v3366_v48 = vrot.slane %v3364_v38, 5  ;;  %v1741_v9 = vrot.slane %v1739_v27, 5  ;;  %v2265_v14 = vrot.slane %v2263_v63, 4 }
 0x14e   : > { %v1736_v10 = vor.u32 %v1735_v15, %v8253_v31  ;;  %v8261_v37 = vadd.f32 %v3552_v60, %v2905_v46  ;;  %v989_v20 = vsel %vm7306_vm8, %v821_v22, %v988_v16  ;;  %v3362_v15 = vrot.slane %v3361_v7, 4 }
 0x14f   : > { %2848 = vmatmul.bf16.gmra.mxu3 %v6888_v3  ;;  %990 = vst [vmem:[#allocation2 + $0xc0] sm:$0xf] %v989_v20  ;;  %v1727_v46 = vrot.slane %v1726_v51, 4  ;;  %v830_v39 = vsel %vm7297_vm7, %v822_v62, %v829_v59  ;;  %v993_v32 = vsel %vm7228_vm2, %v831_v28, %v992_v13  ;;  %v2266_v57 = vrot.slane %v2104_v47, 5 }
 0x150   : > { %v1737_v26 = vrot.slane %v1736_v10, 4  ;;  %991 = vst [vmem:[#allocation2 + $0xc4] sm:$0xf] %v830_v39  ;;  %v3367_v1 = vsel %vm7603_vm12, %v3362_v15, %v3366_v48  ;;  %v6889_v10 = vld [vmem:[#allocation2 + $0xb4] sm:$0xff] }
 0x151   : > { %v1911_v21 = vpop.f32.mrf.mxu1  ;;  %994 = vst [vmem:[#allocation2 + $0xc8] sm:$0x1] %v993_v32  ;;  %v2267_v16 = vsel %vm7616_vm14, %v2265_v14, %v2266_v57  ;;  %v3438_v62 = vunpack.c.l.b16 %v3367_v1 }
 0x152   : > { %v2433_v50 = vpop.f32.mrf.mxu2  ;;  %v3555_v41 = vpop.f32.mrf.mxu0  ;;  %v2005_v7 = vadd.f32 %v1911_v21, %v7854_v17 }
 0x153   : > { %v2809_v58 = vpop.f32.mrf.mxu3  ;;  %v2529_v3 = vadd.f32 %v2433_v50, %v2004_v56 }
 0x154   : > { %v2906_v33 = vadd.f32 %v2809_v58, %v2528_v19  ;;  %1950 = vmatmul.bf16.gmra.mxu1 %v1806_v40  ;;  %v6335_v19 = vrot.slane %v2102_v45, 9 }
 0x155   : > { %3594 = vmatmul.bf16.gmra.mxu0 %v3454_v8  ;;  %v3357_v8 = vsel %vm7603_vm12, %v3352_v34, %v8251_v53  ;;  %v1742_v53 = vsel %vm7603_vm12, %v1737_v26, %v1741_v9 }
 0x156   : > { %v8265_v60 = vadd.f32 %v3555_v41, %v2906_v33  ;;  %v2264_v5 = vsel %vm7616_vm14, %v6335_v19, %v2263_v63  ;;  %v3437_v58 = vunpack.c.l.b16 %v3357_v8  ;;  %v3005_v50 = vld [vmem:[#allocation2 + $0xc0] sm:$0xf]  ;;  %v4607_v41 = vld [vmem:[#allocation2 + $0x18] sm:$0xf]  ;;  %v4608_v33 = vld [vmem:[#allocation2 + $0x1c] sm:$0xf]  ;;  %v1791_v21 = vunpack.c.l.b16 %v1742_v53 }
 0x157   : > { %2475 = vmatmul.bf16.gmra.mxu2 %v2331_v24  ;;  %v1732_v24 = vsel %vm7603_vm12, %v1727_v46, %v8253_v31  ;;  %v3369_v43 = vshrl.u32 %v3005_v50, 16  ;;  %v3372_v31 = vshll.u32 %v3005_v50, 16  ;;  %v2315_v27 = vunpack.c.l.b16 %v2264_v5  ;;  %v3006_v45 = vld [vmem:[#allocation2 + $0xc4] sm:$0xf]  ;;  %v3707_v63 = vld [vmem:[#allocation2 + $0x10] sm:$0xf] }
 0x158   : > { %v1790_v29 = vunpack.c.l.b16 %v1732_v24  ;;  %v3007_v47 = vld [vmem:[#allocation2 + $0xc8] sm:$0x1]  ;;  %v3378_v20 = vshll.u32 %v3006_v45, 16  ;;  %v3382_v34 = vshrl.u32 %v3006_v45, 16  ;;  %v4656_v15 = vshrl.u32 %v4607_v41, 16 }
 0x159   : > { %v1913_v22 = vpop.f32.mrf.mxu1  ;;  %v3371_v59 = vrot.slane %v3369_v43, 4  ;;  %v3374_v28 = vrot.slane %v3372_v31, 5  ;;  %v4659_v48 = vshll.u32 %v4607_v41, 16  ;;  %v4665_v46 = vshll.u32 %v4608_v33, 16  ;;  %v3708_v24 = vld [vmem:[#allocation2 + $0x14] sm:$0x1] }
 0x15a   : > { %v2436_v38 = vpop.f32.mrf.mxu2  ;;  %v3557_v56 = vpop.f32.mrf.mxu0  ;;  %v4669_v19 = vshrl.u32 %v4608_v33, 16  ;;  %v2006_v39 = vadd.f32 %v1913_v22, %v7873_v25  ;;  %v3380_v32 = vrot.slane %v3378_v20, 5  ;;  %v3384_v26 = vrot.slane %v3382_v34, 4 }
 0x15b   : > { %v2811_v40 = vpop.f32.mrf.mxu3  ;;  %v2530_v17 = vadd.f32 %v2436_v38, %v2005_v7  ;;  %v3804_v9 = vrot.slane %v3707_v63, 5  ;;  %v3455_v14 = vpack.c.b16 %v3438_v62, %v3437_v58  ;;  %v1807_v8 = vpack.c.b16 %v1791_v21, %v1790_v29  ;;  %v3706_v38 = vld [vmem:[#allocation2 + $0xc] sm:$0xe]  ;;  %v4609_v62 = vld [vmem:[#allocation2 + $0x20] sm:$0x1] }
 0x15c   : > { %v2907_v51 = vadd.f32 %v2811_v40, %v2529_v3  ;;  %v2316_v3 = vunpack.c.l.b16 %v2267_v16  ;;  %v3388_v1 = vshll.u32 %v3007_v47, 16  ;;  %v3375_v53 = vor.u32 %v3374_v28, %v3371_v59 }
 0x15d   : > { %v3385_v16 = vor.u32 %v3384_v26, %v3380_v32  ;;  %v4658_v50 = vrot.slane %v4656_v15, 4  ;;  %v4661_v43 = vrot.slane %v4659_v48, 5  ;;  %v4667_v25 = vrot.slane %v4665_v46, 5  ;;  %v6890_v48 = vld [vmem:[#allocation2 + $0xc0] sm:$0xff] }
 0x15e   : > { %v8286_v13 = vadd.f32 %v3557_v56, %v2907_v51  ;;  %v2332_v40 = vpack.c.b16 %v2316_v3, %v2315_v27  ;;  %v4671_v22 = vrot.slane %v4669_v19, 4  ;;  %v6544_v31 = vrot.slane %v3706_v38, 9  ;;  %v4610_v38 = vld [vmem:[#allocation2 + $0x24] sm:$0xf] }
 0x15f   : > { %2853 = vmatmul.bf16.gmra.mxu3 %v6889_v10  ;;  %v3806_v41 = vrot.slane %v3804_v9, 4  ;;  %v3807_v58 = vrot.slane %v3708_v24, 5  ;;  %v3376_v33 = vrot.slane %v3375_v53, 4  ;;  %v3386_v21 = vrot.slane %v3385_v16, 4  ;;  %v5353_v16 = vld [vmem:[#allocation2 + $0x18] sm:$0xe] }
 0x160   : > { %v4662_v27 = vor.u32 %v4661_v43, %v4658_v50  ;;  %v4672_v3 = vor.u32 %v4671_v22, %v4667_v25  ;;  %v3805_v63 = vsel %vm7616_vm14, %v6544_v31, %v3804_v9  ;;  %v4675_v59 = vshll.u32 %v4609_v62, 16 }
 0x161   : > { %v1916_v10 = vpop.f32.mrf.mxu1  ;;  %v3808_v47 = vsel %vm7616_vm14, %v3806_v41, %v3807_v58  ;;  %v3381_v46 = vsel %vm7603_vm12, %v3376_v33, %v3380_v32  ;;  %v3931_v26 = vunpack.c.l.b16 %v3805_v63  ;;  %v4680_v43 = vshrl.u32 %v4610_v38, 16  ;;  %v5355_v58 = vld [vmem:[#allocation2 + $0x20] sm:$0x1] }
 0x162   : > { %v2438_v7 = vpop.f32.mrf.mxu2  ;;  %v3560_v5 = vpop.f32.mrf.mxu0  ;;  %v2007_v45 = vadd.f32 %v1916_v10, %v7902_v12  ;;  %v4663_v9 = vrot.slane %v4662_v27, 4  ;;  %v4683_v62 = vshll.u32 %v4610_v38, 16 }
 0x163   : > { %v2814_v57 = vpop.f32.mrf.mxu3  ;;  %v2531_v51 = vadd.f32 %v2438_v7, %v2006_v39  ;;  %v4677_v7 = vrot.slane %v4675_v59, 5  ;;  %v3709_v59 = vld [vmem:[#allocation2 + $0x18] sm:$0xe] }
 0x164   : > { %v2908_v56 = vadd.f32 %v2814_v57, %v2530_v17  ;;  %1955 = vmatmul.bf16.gmra.mxu1 %v1807_v8  ;;  %v3390_v17 = vrot.slane %v3388_v1, 5  ;;  %v4673_v57 = vrot.slane %v4672_v3, 4  ;;  %v3439_v8 = vunpack.c.l.b16 %v3381_v46  ;;  %v5354_v1 = vld [vmem:[#allocation2 + $0x1c] sm:$0xf] }
 0x165   : > { %3599 = vmatmul.bf16.gmra.mxu0 %v3455_v14  ;;  %v3932_v14 = vunpack.c.l.b16 %v3808_v47  ;;  %v4668_v32 = vsel %vm7603_vm12, %v4663_v9, %v4667_v25  ;;  %v5451_v50 = vrot.slane %v5354_v1, 5  ;;  %v6768_v47 = vrot.slane %v5353_v16, 9 }
 0x166   : > { %v8289_v29 = vadd.f32 %v3560_v5, %v2908_v56  ;;  %v3391_v19 = vsel %vm7603_vm12, %v3386_v21, %v3390_v17  ;;  %v4611_v5 = vld [vmem:[#allocation2 + $0x28] sm:$0xf]  ;;  %v4678_v53 = vsel %vm7603_vm12, %v4673_v57, %v4677_v7  ;;  %v4682_v46 = vrot.slane %v4680_v43, 4  ;;  %v4612_v57 = vld [vmem:[#allocation2 + $0x2c] sm:$0x1] }
 0x167   : > { %2480 = vmatmul.bf16.gmra.mxu2 %v2332_v40  ;;  %v3440_v40 = vunpack.c.l.b16 %v3391_v19  ;;  %v3963_v56 = vpack.c.b16 %v3932_v14, %v3931_v26  ;;  %v4689_v33 = vshll.u32 %v4611_v5, 16  ;;  %v4693_v21 = vshrl.u32 %v4611_v5, 16 }
 0x168   : > { %v4685_v19 = vrot.slane %v4683_v62, 5  ;;  %v6545_v26 = vrot.slane %v3709_v59, 9 }
 0x169   : > { %v1918_v12 = vpop.f32.mrf.mxu1  ;;  %v3456_v22 = vpack.c.b16 %v3440_v40, %v3439_v8  ;;  %v5452_v40 = vsel %vm7616_vm14, %v6768_v47, %v5451_v50  ;;  %v5356_v47 = vld [vmem:[#allocation2 + $0x24] sm:$0xe] }
 0x16a   : > { %v2441_v20 = vpop.f32.mrf.mxu2  ;;  %v3562_v34 = vpop.f32.mrf.mxu0  ;;  %v2008_v10 = vadd.f32 %v1918_v12, %v7929_v44  ;;  %v5056_v44 = vunpack.c.l.b16 %v4668_v32  ;;  %v8309_v12 = vrot.slane %v4689_v33, 5 }
 0x16b   : > { %v2816_v28 = vpop.f32.mrf.mxu3  ;;  %v2532_v39 = vadd.f32 %v2441_v20, %v2007_v45  ;;  %v6915_v45 = vld [vmem:[#allocation2 + $0x18] sm:$0xff]  ;;  %v5057_v20 = vunpack.c.l.b16 %v4678_v53 }
 0x16c   : > { %v2909_v15 = vadd.f32 %v2816_v28, %v2531_v51  ;;  %v3710_v51 = vld [vmem:[#allocation2 + $0x1c] sm:$0xf]  ;;  %v3711_v28 = vld [vmem:[#allocation2 + $0x20] sm:$0x1] }
 0x16d   : > { %v3811_v63 = vrot.slane %v3710_v51, 5  ;;  %v3814_v9 = vrot.slane %v3711_v28, 5  ;;  %v5088_v8 = vpack.c.b16 %v5057_v20, %v5056_v44  ;;  %v4699_v51 = vshll.u32 %v4612_v57, 16 }
 0x16e   : > { %v8300_v24 = vadd.f32 %v3562_v34, %v2909_v15  ;;  %v5453_v34 = vrot.slane %v5451_v50, 4  ;;  %v5454_v15 = vrot.slane %v5355_v58, 5  ;;  %v5578_v50 = vunpack.c.l.b16 %v5452_v40  ;;  %v5358_v40 = vld [vmem:[#allocation2 + $0x2c] sm:$0x1] }
 0x16f   : > { %2858 = vmatmul.bf16.gmra.mxu3 %v6890_v48  ;;  %v3813_v14 = vrot.slane %v3811_v63, 4 }
 0x170   : > { %v5455_v38 = vsel %vm7616_vm14, %v5453_v34, %v5454_v15 }
 0x171   : > { %v1921_v25 = vpop.f32.mrf.mxu1 }
 0x172   : > { %v2443_v41 = vpop.f32.mrf.mxu2  ;;  %v3565_v17 = vpop.f32.mrf.mxu0  ;;  %v2009_v7 = vadd.f32 %v1921_v25, %v7768_v18  ;;  %v3812_v18 = vsel %vm7616_vm14, %v6545_v26, %v3811_v63  ;;  %v5357_v25 = vld [vmem:[#allocation2 + $0x28] sm:$0xf] }
 0x173   : > { %v2819_v31 = vpop.f32.mrf.mxu3  ;;  %v2533_v3 = vadd.f32 %v2443_v41, %v2008_v10  ;;  %v4613_v41 = vld [vmem:[#allocation2 + $0x30] sm:$0xf]  ;;  %v3933_v58 = vunpack.c.l.b16 %v3812_v18  ;;  %v5458_v26 = vrot.slane %v5357_v25, 5 }
 0x174   : > { %v2910_v27 = vadd.f32 %v2819_v31, %v2532_v39  ;;  %4051 = vmatmul.bf16.vlgmr.msra.gmra.mxu1 %v3963_v56  ;;  %v4695_v39 = vrot.slane %v4693_v21, 4  ;;  %v4686_v56 = vor.u32 %v4685_v19, %v4682_v46  ;;  %v5579_v31 = vunpack.c.l.b16 %v5455_v38  ;;  %v4614_v21 = vld [vmem:[#allocation2 + $0x34] sm:$0xf] }
 0x175   : > { %3604 = vmatmul.bf16.gmra.mxu0 %v3456_v22  ;;  %v3815_v22 = vsel %vm7616_vm14, %v3813_v14, %v3814_v9  ;;  %v4704_v44 = vshrl.u32 %v4613_v41, 16  ;;  %v4707_v59 = vshll.u32 %v4613_v41, 16  ;;  %v4713_v28 = vshll.u32 %v4614_v21, 16 }
 0x176   : > { %v8307_v48 = vadd.f32 %v3565_v17, %v2910_v27  ;;  %v4696_v32 = vor.u32 %v4695_v39, %v8309_v12  ;;  %v3934_v62 = vunpack.c.l.b16 %v3815_v22  ;;  %v4687_v33 = vrot.slane %v4686_v56, 4  ;;  %v3714_v56 = vld [vmem:[#allocation2 + $0x2c] sm:$0x1] }
 0x177   : > { %4430 = vmatmul.bf16.vlgmr.msra.gmra.mxu2 %v6915_v45  ;;  %v3713_v45 = vld [vmem:[#allocation2 + $0x28] sm:$0xf]  ;;  %v4717_v20 = vshrl.u32 %v4614_v21, 16  ;;  %v5610_v34 = vpack.c.b16 %v5579_v31, %v5578_v50  ;;  %v6769_v38 = vrot.slane %v5356_v47, 9  ;;  %v5460_v18 = vrot.slane %v5458_v26, 4 }
 0x178   : > { %v4697_v27 = vrot.slane %v4696_v32, 4  ;;  %v3964_v19 = vpack.c.b16 %v3934_v62, %v3933_v58  ;;  %v4692_v39 = vsel %vm7603_vm12, %v4687_v33, %v8309_v12  ;;  %v4706_v32 = vrot.slane %v4704_v44, 4  ;;  %v4615_v50 = vld [vmem:[#allocation2 + $0x38] sm:$0x1] }
 0x179   : > { %v1923_v43 = vpop.f32.mrf.mxu1  ;;  %v5461_v22 = vrot.slane %v5358_v40, 5  ;;  %v3821_v58 = vrot.slane %v3714_v56, 5  ;;  %v5459_v62 = vsel %vm7616_vm14, %v6769_v38, %v5458_v26  ;;  %v8704_v38 = vld [vmem:[#allocation7_spill] sm:$0xff] }
 0x17a   : > { %v2446_v5 = vpop.f32.mrf.mxu2  ;;  %v3567_v10 = vpop.f32.mrf.mxu0  ;;  %v2010_v63 = vadd.f32 %v1923_v43, %v7785_v6 }
 0x17b   : > { %v2821_v1 = vpop.f32.mrf.mxu3  ;;  %v2534_v16 = vadd.f32 %v2446_v5, %v2009_v7  ;;  %v3712_v5 = vld [vmem:[#allocation2 + $0x24] sm:$0xe]  ;;  %v5462_v44 = vsel %vm7616_vm14, %v5460_v18, %v5461_v22 }
 0x17c   : > { %v2911_v53 = vadd.f32 %v2821_v1, %v2533_v3  ;;  %v4701_v3 = vrot.slane %v4699_v51, 5  ;;  %v3818_v1 = vrot.slane %v3713_v45, 5  ;;  %v4709_v51 = vrot.slane %v4707_v59, 5 }
 0x17d   : > { %v6546_v31 = vrot.slane %v3712_v5, 9 }
 0x17e   : > { %v8321_v17 = vadd.f32 %v3567_v10, %v2911_v53  ;;  %v4702_v6 = vsel %vm7603_vm12, %v4697_v27, %v4701_v3  ;;  %v8329_v10 = vrot.slane %v4713_v28, 5  ;;  %v4719_v53 = vrot.slane %v4717_v20, 4 }
 0x17f   : > { %5176 = vmatmul.bf16.vlgmr.msra.gmra.mxu3 %v5088_v8  ;;  %v6916_v8 = vld [vmem:[#allocation2 + $0x24] sm:$0xff]  ;;  %v5059_v43 = vunpack.c.l.b16 %v4702_v6  ;;  %v3820_v41 = vrot.slane %v3818_v1, 4  ;;  %v4710_v21 = vor.u32 %v4709_v51, %v4706_v32  ;;  %v4723_v3 = vshll.u32 %v4615_v50, 16  ;;  %v3716_v6 = vld [vmem:[#allocation2 + $0x34] sm:$0xf] }
 0x180   : > { %v4720_v27 = vor.u32 %v4719_v53, %v8329_v10  ;;  %v4617_v32 = vld [vmem:[#allocation2 + $0x40] sm:$0xf] }
 0x181   : > { %v1926_v7 = vpop.f32.mrf.mxu1  ;;  %v4725_v26 = vrot.slane %v4723_v3, 5  ;;  %v3715_v3 = vld [vmem:[#allocation2 + $0x30] sm:$0xe] }
 0x182   : > { %v2448_v46 = vpop.f32.mrf.mxu2  ;;  %v3570_v14 = vpop.f32.mrf.mxu0  ;;  %v2011_v33 = vadd.f32 %v1926_v7, %v7817_v11  ;;  %v3822_v11 = vsel %vm7616_vm14, %v3820_v41, %v3821_v58 }
 0x183   : > { %v2824_v15 = vpop.f32.mrf.mxu3  ;;  %v2535_v57 = vadd.f32 %v2448_v46, %v2010_v63  ;;  %v5581_v46 = vunpack.c.l.b16 %v5462_v44 }
 0x184   : > { %v2912_v9 = vadd.f32 %v2824_v15, %v2534_v16  ;;  %4056 = vmatmul.bf16.gmra.mxu1 %v3964_v19  ;;  %v5058_v16 = vunpack.c.l.b16 %v4692_v39  ;;  %v5580_v15 = vunpack.c.l.b16 %v5459_v62  ;;  %v4711_v19 = vrot.slane %v4710_v21, 4  ;;  %v5361_v21 = vld [vmem:[#allocation2 + $0x38] sm:$0x1] }
 0x185   : > { %5698 = vmatmul.bf16.vlgmr.msra.gmra.mxu0 %v5610_v34  ;;  %v3819_v34 = vsel %vm7616_vm14, %v6546_v31, %v3818_v1  ;;  %v4721_v39 = vrot.slane %v4720_v27, 4  ;;  %v3825_v27 = vrot.slane %v3716_v6, 5 }
 0x186   : > { %v8331_v12 = vadd.f32 %v3570_v14, %v2912_v9  ;;  %v5089_v45 = vpack.c.b16 %v5059_v43, %v5058_v16  ;;  %v3935_v14 = vunpack.c.l.b16 %v3819_v34  ;;  %v3936_v9 = vunpack.c.l.b16 %v3822_v11  ;;  %v5359_v43 = vld [vmem:[#allocation2 + $0x30] sm:$0xe] }
 0x187   : > { %4435 = vmatmul.bf16.gmra.mxu2 %v6916_v8  ;;  %v5360_v8 = vld [vmem:[#allocation2 + $0x34] sm:$0xf]  ;;  %v5611_v40 = vpack.c.b16 %v5581_v46, %v5580_v15  ;;  %v4716_v1 = vsel %vm7603_vm12, %v4711_v19, %v8329_v10  ;;  %v4726_v56 = vsel %vm7603_vm12, %v4721_v39, %v4725_v26  ;;  %v3717_v10 = vld [vmem:[#allocation2 + $0x38] sm:$0x1]  ;;  %v5468_v34 = vrot.slane %v5361_v21, 5 }
 0x188   : > { %v3965_v16 = vpack.c.b16 %v3936_v9, %v3935_v14  ;;  %v5465_v18 = vrot.slane %v5360_v8, 5  ;;  %v5060_v44 = vunpack.c.l.b16 %v4716_v1  ;;  %v6547_v15 = vrot.slane %v3715_v3, 9  ;;  %v8705_v14 = vld [vmem:[#allocation9_spill] sm:$0xff]  ;;  %v4620_v3 = vld [vmem:[#allocation2 + $0x4c] sm:$0xf] }
 0x189   : > { %v1928_v20 = vpop.f32.mrf.mxu1  ;;  %v3827_v46 = vrot.slane %v3825_v27, 4  ;;  %v3828_v19 = vrot.slane %v3717_v10, 5  ;;  %v4618_v8 = vld [vmem:[#allocation2 + $0x44] sm:$0x1]  ;;  %v5363_v21 = vld [vmem:[#allocation2 + $0x40] sm:$0xf] }
 0x18a   : > { %v2451_v63 = vpop.f32.mrf.mxu2  ;;  %v3572_v47 = vpop.f32.mrf.mxu0  ;;  %v2012_v5 = vadd.f32 %v1928_v20, %v8704_v38  ;;  %v5467_v20 = vrot.slane %v5465_v18, 4 }
 0x18b   : > { %v2826_v25 = vpop.f32.mrf.mxu3  ;;  %v2536_v28 = vadd.f32 %v2451_v63, %v2011_v33  ;;  %v6917_v33 = vld [vmem:[#allocation2 + $0x30] sm:$0xff]  ;;  %v5061_v63 = vunpack.c.l.b16 %v4726_v56 }
 0x18c   : > { %v2913_v59 = vadd.f32 %v2826_v25, %v2535_v57  ;;  %v4616_v57 = vld [vmem:[#allocation2 + $0x3c] sm:$0xf]  ;;  %v4737_v25 = vshll.u32 %v4617_v32, 16  ;;  %v5469_v38 = vsel %vm7616_vm14, %v5467_v20, %v5468_v34  ;;  %v8706_v20 = vld [vmem:[#allocation11_spill] sm:$0xff] }
 0x18d   : > { %v4728_v22 = vshrl.u32 %v4616_v57, 16  ;;  %v4731_v50 = vshll.u32 %v4616_v57, 16  ;;  %v5090_v6 = vpack.c.b16 %v5061_v63, %v5060_v44  ;;  %v5362_v44 = vld [vmem:[#allocation2 + $0x3c] sm:$0xe] }
 0x18e   : > { %v8343_v7 = vadd.f32 %v3572_v47, %v2913_v59  ;;  %v6770_v47 = vrot.slane %v5359_v43, 9  ;;  %v8353_v39 = vrot.slane %v4737_v25, 5  ;;  %v3829_v43 = vsel %vm7616_vm14, %v3827_v46, %v3828_v19  ;;  %v3719_v25 = vld [vmem:[#allocation2 + $0x40] sm:$0xf] }
 0x18f   : > { %5181 = vmatmul.bf16.gmra.mxu3 %v5089_v45  ;;  %v4741_v45 = vshrl.u32 %v4617_v32, 16  ;;  %v4730_v11 = vrot.slane %v4728_v22, 4  ;;  %v4765_v46 = vshrl.u32 %v4620_v3, 16 }
 0x191   : > { %v1931_v62 = vpop.f32.mrf.mxu1  ;;  %v4743_v26 = vrot.slane %v4741_v45, 4 }
 0x192   : > { %v2453_v53 = vpop.f32.mrf.mxu2  ;;  %v3575_v31 = vpop.f32.mrf.mxu0  ;;  %v2013_v9 = vadd.f32 %v1931_v62, %v8705_v14 }
 0x193   : > { %v2829_v51 = vpop.f32.mrf.mxu3  ;;  %v2537_v58 = vadd.f32 %v2453_v53, %v2012_v5  ;;  %v4744_v22 = vor.u32 %v4743_v26, %v8353_v39 }
 0x194   : > { %v2914_v41 = vadd.f32 %v2829_v51, %v2536_v28  ;;  %4061 = vmatmul.bf16.gmra.mxu1 %v3965_v16  ;;  %v4733_v28 = vrot.slane %v4731_v50, 5  ;;  %v3826_v16 = vsel %vm7616_vm14, %v6547_v15, %v3825_v27  ;;  %v4747_v50 = vshll.u32 %v4618_v8, 16 }
 0x195   : > { %5703 = vmatmul.bf16.gmra.mxu0 %v5611_v40  ;;  %v5466_v40 = vsel %vm7616_vm14, %v6770_v47, %v5465_v18  ;;  %v4619_v18 = vld [vmem:[#allocation2 + $0x48] sm:$0xf]  ;;  %v3937_v62 = vunpack.c.l.b16 %v3826_v16  ;;  %v4745_v45 = vrot.slane %v4744_v22, 4  ;;  %v4761_v15 = vshll.u32 %v4620_v3, 16 }
 0x196   : > { %v8351_v59 = vadd.f32 %v3575_v31, %v2914_v41  ;;  %v4734_v1 = vor.u32 %v4733_v28, %v4730_v11  ;;  %v5582_v31 = vunpack.c.l.b16 %v5466_v40  ;;  %v5583_v41 = vunpack.c.l.b16 %v5469_v38  ;;  %v5364_v11 = vld [vmem:[#allocation2 + $0x44] sm:$0x1] }
 0x197   : > { %4440 = vmatmul.bf16.gmra.mxu2 %v6917_v33  ;;  %v3938_v33 = vunpack.c.l.b16 %v3829_v43  ;;  %v4749_v27 = vrot.slane %v4747_v50, 5  ;;  %v4752_v63 = vshrl.u32 %v4619_v18, 16  ;;  %v4755_v47 = vshll.u32 %v4619_v18, 16 }
 0x198   : > { %v5472_v28 = vrot.slane %v5363_v21, 5  ;;  %v5612_v19 = vpack.c.b16 %v5583_v41, %v5582_v31  ;;  %v3832_v8 = vrot.slane %v3719_v25, 5  ;;  %v5475_v43 = vrot.slane %v5364_v11, 5 }
 0x199   : > { %v1933_v53 = vpop.f32.mrf.mxu1  ;;  %v4750_v16 = vsel %vm7603_vm12, %v4745_v45, %v4749_v27  ;;  %v4754_v22 = vrot.slane %v4752_v63, 4  ;;  %v4757_v50 = vrot.slane %v4755_v47, 5  ;;  %v4763_v18 = vrot.slane %v4761_v15, 5  ;;  %v8707_v27 = vld [vmem:[#allocation13_spill] sm:$0xff] }
 0x19a   : > { %v2456_v5 = vpop.f32.mrf.mxu2  ;;  %v3577_v56 = vpop.f32.mrf.mxu0  ;;  %v2014_v34 = vadd.f32 %v1933_v53, %v8706_v20  ;;  %v3720_v53 = vld [vmem:[#allocation2 + $0x44] sm:$0x1]  ;;  %v5474_v31 = vrot.slane %v5472_v28, 4  ;;  %v4767_v41 = vrot.slane %v4765_v46, 4 }
 0x19b   : > { %v2831_v57 = vpop.f32.mrf.mxu3  ;;  %v2538_v51 = vadd.f32 %v2456_v5, %v2013_v9  ;;  %v3966_v9 = vpack.c.b16 %v3938_v33, %v3937_v62  ;;  %v6918_v5 = vld [vmem:[#allocation2 + $0x3c] sm:$0xff]  ;;  %v3834_v33 = vrot.slane %v3832_v8, 4  ;;  %v3835_v21 = vrot.slane %v3720_v53, 5  ;;  %v5366_v53 = vld [vmem:[#allocation2 + $0x4c] sm:$0xf] }
 0x19c   : > { %v2915_v32 = vadd.f32 %v2831_v57, %v2537_v58  ;;  %v4735_v58 = vrot.slane %v4734_v1, 4  ;;  %v4758_v45 = vor.u32 %v4757_v50, %v4754_v22  ;;  %v5476_v63 = vsel %vm7616_vm14, %v5474_v31, %v5475_v43  ;;  %v4623_v43 = vld [vmem:[#allocation2 + $0x58] sm:$0xf]  ;;  %v3722_v50 = vld [vmem:[#allocation2 + $0x4c] sm:$0xf] }
 0x19d   : > { %v4768_v47 = vor.u32 %v4767_v41, %v4763_v18  ;;  %v3836_v46 = vsel %vm7616_vm14, %v3834_v33, %v3835_v21  ;;  %v8708_v31 = vld [vmem:[#allocation14_spill] sm:$0xff] }
 0x19e   : > { %v8365_v10 = vadd.f32 %v3577_v56, %v2915_v32  ;;  %v4740_v1 = vsel %vm7603_vm12, %v4735_v58, %v8353_v39  ;;  %v6771_v56 = vrot.slane %v5362_v44, 9  ;;  %v3718_v32 = vld [vmem:[#allocation2 + $0x3c] sm:$0xe]  ;;  %v4621_v39 = vld [vmem:[#allocation2 + $0x50] sm:$0x1]  ;;  %v5063_v58 = vunpack.c.l.b16 %v4750_v16 }
 0x19f   : > { %5186 = vmatmul.bf16.gmra.mxu3 %v5090_v6  ;;  %v6548_v62 = vrot.slane %v3718_v32, 9  ;;  %v5062_v3 = vunpack.c.l.b16 %v4740_v1  ;;  %v4771_v20 = vshll.u32 %v4621_v39, 16  ;;  %v3940_v1 = vunpack.c.l.b16 %v3836_v46  ;;  %v5365_v21 = vld [vmem:[#allocation2 + $0x48] sm:$0xe] }
 0x1a0   : > { %v5473_v25 = vsel %vm7616_vm14, %v6771_v56, %v5472_v28  ;;  %v4769_v56 = vrot.slane %v4768_v47, 4  ;;  %v5479_v39 = vrot.slane %v5366_v53, 5 }
 0x1a1   : > { %v1936_v38 = vpop.f32.mrf.mxu1  ;;  %v3833_v15 = vsel %vm7616_vm14, %v6548_v62, %v3832_v8  ;;  %v4773_v32 = vrot.slane %v4771_v20, 5  ;;  %v4622_v8 = vld [vmem:[#allocation2 + $0x54] sm:$0xf] }
 0x1a2   : > { %v2458_v14 = vpop.f32.mrf.mxu2  ;;  %v3580_v57 = vpop.f32.mrf.mxu0  ;;  %v2015_v44 = vadd.f32 %v1936_v38, %v8707_v27  ;;  %v4759_v38 = vrot.slane %v4758_v45, 4  ;;  %v4776_v45 = vshrl.u32 %v4622_v8, 16  ;;  %v4779_v27 = vshll.u32 %v4622_v8, 16 }
 0x1a3   : > { %v2834_v26 = vpop.f32.mrf.mxu3  ;;  %v2539_v40 = vadd.f32 %v2458_v14, %v2014_v34  ;;  %v5091_v14 = vpack.c.b16 %v5063_v58, %v5062_v3  ;;  %v4774_v33 = vsel %vm7603_vm12, %v4769_v56, %v4773_v32 }
 0x1a4   : > { %v2916_v6 = vadd.f32 %v2834_v26, %v2538_v51  ;;  %4066 = vmatmul.bf16.gmra.mxu1 %v3966_v9 }
 0x1a5   : > { %5708 = vmatmul.bf16.gmra.mxu0 %v5612_v19 }
 0x1a6   : > { %v8373_v51 = vadd.f32 %v3580_v57, %v2916_v6  ;;  %v5584_v57 = vunpack.c.l.b16 %v5473_v25  ;;  %v5585_v6 = vunpack.c.l.b16 %v5476_v63  ;;  %v5367_v25 = vld [vmem:[#allocation2 + $0x50] sm:$0x1]  ;;  %v4789_v63 = vshrl.u32 %v4623_v43, 16 }
 0x1a7   : > { %4445 = vmatmul.bf16.gmra.mxu2 %v6918_v5  ;;  %v3939_v5 = vunpack.c.l.b16 %v3833_v15  ;;  %v3839_v15 = vrot.slane %v3722_v50, 5 }
 0x1a8   : > { %v5613_v22 = vpack.c.b16 %v5585_v6, %v5584_v57  ;;  %v5481_v57 = vrot.slane %v5479_v39, 4  ;;  %v5482_v6 = vrot.slane %v5367_v25, 5 }
 0x1a9   : > { %v1938_v9 = vpop.f32.mrf.mxu1  ;;  %v3967_v62 = vpack.c.b16 %v3940_v1, %v3939_v5  ;;  %v4778_v5 = vrot.slane %v4776_v45, 4  ;;  %v4781_v1 = vrot.slane %v4779_v27, 5  ;;  %v3841_v53 = vrot.slane %v3839_v15, 4 }
 0x1aa   : > { %v2461_v11 = vpop.f32.mrf.mxu2  ;;  %v3582_v19 = vpop.f32.mrf.mxu0  ;;  %v2016_v41 = vadd.f32 %v1938_v9, %v8708_v31  ;;  %v5065_v9 = vunpack.c.l.b16 %v4774_v33 }
 0x1ab   : > { %v2836_v34 = vpop.f32.mrf.mxu3  ;;  %v2540_v28 = vadd.f32 %v2461_v11, %v2015_v44  ;;  %v4785_v44 = vshll.u32 %v4623_v43, 16  ;;  %v6919_v11 = vld [vmem:[#allocation2 + $0x48] sm:$0xff]  ;;  %v4624_v43 = vld [vmem:[#allocation2 + $0x5c] sm:$0x1] }
 0x1ac   : > { %v2917_v26 = vadd.f32 %v2836_v34, %v2539_v40  ;;  %v4764_v40 = vsel %vm7603_vm12, %v4759_v38, %v4763_v18 }
 0x1ad   : > { %v5064_v46 = vunpack.c.l.b16 %v4764_v40  ;;  %v8393_v56 = vrot.slane %v4785_v44, 5  ;;  %v8709_v40 = vld [vmem:[#allocation4_spill] sm:$0xff] }
 0x1ae   : > { %v8384_v16 = vadd.f32 %v3582_v19, %v2917_v26  ;;  %v6772_v19 = vrot.slane %v5365_v21, 9  ;;  %v3721_v26 = vld [vmem:[#allocation2 + $0x48] sm:$0xe]  ;;  %v4782_v21 = vor.u32 %v4781_v1, %v4778_v5  ;;  %v8710_v1 = vld [vmem:[#allocation5_spill] sm:$0xff] }
 0x1af   : > { %5191 = vmatmul.bf16.gmra.mxu3 %v5091_v14  ;;  %v3723_v14 = vld [vmem:[#allocation2 + $0x50] sm:$0x1]  ;;  %v6549_v32 = vrot.slane %v3721_v26, 9  ;;  %v5092_v31 = vpack.c.b16 %v5065_v9, %v5064_v46  ;;  %v4626_v26 = vld [vmem:[#allocation2 + $0x64] sm:$0xf] }
 0x1b0   : > { %v3842_v8 = vrot.slane %v3723_v14, 5 }
 0x1b1   : > { %v1941_v18 = vpop.f32.mrf.mxu1 }
 0x1b2   : > { %v2463_v58 = vpop.f32.mrf.mxu2  ;;  %v3585_v47 = vpop.f32.mrf.mxu0  ;;  %v2017_v50 = vadd.f32 %v1941_v18, %v8709_v40  ;;  %v4625_v18 = vld [vmem:[#allocation2 + $0x60] sm:$0xf] }
 0x1b3   : > { %v2839_v3 = vpop.f32.mrf.mxu3  ;;  %v2541_v34 = vadd.f32 %v2463_v58, %v2016_v41  ;;  %v5480_v41 = vsel %vm7616_vm14, %v6772_v19, %v5479_v39  ;;  %v4795_v58 = vshll.u32 %v4624_v43, 16  ;;  %v4783_v19 = vrot.slane %v4782_v21, 4 }
 0x1b4   : > { %v2918_v20 = vadd.f32 %v2839_v3, %v2540_v28  ;;  %4071 = vmatmul.bf16.gmra.mxu1 %v3967_v62  ;;  %v4791_v28 = vrot.slane %v4789_v63, 4  ;;  %v3840_v63 = vsel %vm7616_vm14, %v6549_v32, %v3839_v15  ;;  %v5586_v39 = vunpack.c.l.b16 %v5480_v41 }
 0x1b5   : > { %5713 = vmatmul.bf16.gmra.mxu0 %v5613_v22  ;;  %v5483_v22 = vsel %vm7616_vm14, %v5481_v57, %v5482_v6  ;;  %v5369_v57 = vld [vmem:[#allocation2 + $0x58] sm:$0xf]  ;;  %v4800_v5 = vshrl.u32 %v4625_v18, 16  ;;  %v4803_v32 = vshll.u32 %v4625_v18, 16 }
 0x1b6   : > { %v8391_v38 = vadd.f32 %v3585_v47, %v2918_v20  ;;  %v4792_v3 = vor.u32 %v4791_v28, %v8393_v56  ;;  %v3843_v47 = vsel %vm7616_vm14, %v3841_v53, %v3842_v8  ;;  %v5587_v20 = vunpack.c.l.b16 %v5483_v22  ;;  %v3725_v6 = vld [vmem:[#allocation2 + $0x58] sm:$0xf]  ;;  %v5368_v28 = vld [vmem:[#allocation2 + $0x54] sm:$0xe] }
 0x1b7   : > { %4450 = vmatmul.bf16.gmra.mxu2 %v6919_v11  ;;  %v3941_v11 = vunpack.c.l.b16 %v3840_v63  ;;  %v3942_v46 = vunpack.c.l.b16 %v3843_v47  ;;  %v4809_v53 = vshll.u32 %v4626_v26, 16  ;;  %v4813_v8 = vshrl.u32 %v4626_v26, 16  ;;  %v3724_v47 = vld [vmem:[#allocation2 + $0x54] sm:$0xe] }
 0x1b8   : > { %v4793_v9 = vrot.slane %v4792_v3, 4  ;;  %v5614_v43 = vpack.c.b16 %v5587_v20, %v5586_v39  ;;  %v6773_v63 = vrot.slane %v5368_v28, 9  ;;  %v3726_v39 = vld [vmem:[#allocation2 + $0x5c] sm:$0x1]  ;;  %v4802_v20 = vrot.slane %v4800_v5, 4 }
 0x1b9   : > { %v1943_v44 = vpop.f32.mrf.mxu1  ;;  %v3968_v41 = vpack.c.b16 %v3942_v46, %v3941_v11  ;;  %v4805_v18 = vrot.slane %v4803_v32, 5  ;;  %v8413_v11 = vrot.slane %v4809_v53, 5  ;;  %v4815_v46 = vrot.slane %v4813_v8, 4 }
 0x1ba   : > { %v2466_v62 = vpop.f32.mrf.mxu2  ;;  %v3587_v25 = vpop.f32.mrf.mxu0  ;;  %v2018_v15 = vadd.f32 %v1943_v44, %v8710_v1  ;;  %v3846_v44 = vrot.slane %v3725_v6, 5  ;;  %v4627_v1 = vld [vmem:[#allocation2 + $0x68] sm:$0x1]  ;;  %v3849_v6 = vrot.slane %v3726_v39, 5 }
 0x1bb   : > { %v2841_v33 = vpop.f32.mrf.mxu3  ;;  %v2542_v27 = vadd.f32 %v2466_v62, %v2017_v50  ;;  %v4806_v32 = vor.u32 %v4805_v18, %v4802_v20  ;;  %v4816_v53 = vor.u32 %v4815_v46, %v8413_v11  ;;  %v4819_v8 = vshll.u32 %v4627_v1, 16 }
 0x1bc   : > { %v2919_v45 = vadd.f32 %v2841_v33, %v2541_v34  ;;  %v4797_v34 = vrot.slane %v4795_v58, 5  ;;  %v4788_v33 = vsel %vm7603_vm12, %v4783_v19, %v8393_v56  ;;  %v6920_v58 = vld [vmem:[#allocation2 + $0x54] sm:$0xff] }
 0x1bd   : > { %v4821_v39 = vrot.slane %v4819_v8, 5 }
 0x1be   : > { %v8405_v14 = vadd.f32 %v3587_v25, %v2919_v45  ;;  %v4798_v25 = vsel %vm7603_vm12, %v4793_v9, %v4797_v34  ;;  %v5370_v45 = vld [vmem:[#allocation2 + $0x5c] sm:$0x1]  ;;  %v6550_v9 = vrot.slane %v3724_v47, 9  ;;  %v3848_v34 = vrot.slane %v3846_v44, 4 }
 0x1bf   : > { %5196 = vmatmul.bf16.gmra.mxu3 %v5092_v31  ;;  %v5486_v31 = vrot.slane %v5369_v57, 5  ;;  %v5067_v19 = vunpack.c.l.b16 %v4798_v25  ;;  %v5489_v57 = vrot.slane %v5370_v45, 5  ;;  %v4817_v47 = vrot.slane %v4816_v53, 4 }
 0x1c0   : > { %v3847_v25 = vsel %vm7616_vm14, %v6550_v9, %v3846_v44 }
 0x1c1   : > { %v1946_v3 = vpop.f32.mrf.mxu1  ;;  %v5488_v26 = vrot.slane %v5486_v31, 4  ;;  %v5487_v5 = vsel %vm7616_vm14, %v6773_v63, %v5486_v31  ;;  %v3850_v31 = vsel %vm7616_vm14, %v3848_v34, %v3849_v6  ;;  %v4807_v63 = vrot.slane %v4806_v32, 4  ;;  %v4629_v34 = vld [vmem:[#allocation2 + $0x70] sm:$0xf] }
 0x1c2   : > { %v2468_v50 = vpop.f32.mrf.mxu2  ;;  %v3590_v22 = vpop.f32.mrf.mxu0  ;;  %v3943_v20 = vunpack.c.l.b16 %v3847_v25  ;;  %v3944_v18 = vunpack.c.l.b16 %v3850_v31  ;;  %v4822_v9 = vsel %vm7603_vm12, %v4817_v47, %v4821_v39  ;;  %v3727_v25 = vld [vmem:[#allocation2 + $0x60] sm:$0xe]  ;;  %v4833_v31 = vshll.u32 %v4629_v34, 16 }
 0x1c3   : > { %v2844_v40 = vpop.f32.mrf.mxu3  ;;  %v2543_v21 = vadd.f32 %v2468_v50, %v2018_v15  ;;  %v8711_v15 = vld [vmem:[#allocation6_spill] sm:$0xff]  ;;  %v5490_v50 = vsel %vm7616_vm14, %v5488_v26, %v5489_v57  ;;  %v8712_v57 = vld [vmem:[#allocation8_spill] sm:$0xff]  ;;  %v4812_v44 = vsel %vm7603_vm12, %v4807_v63, %v8413_v11  ;;  %v5069_v63 = vunpack.c.l.b16 %v4822_v9 }
 0x1c4   : > { %v2920_v62 = vadd.f32 %v2844_v40, %v2542_v27  ;;  %4076 = vmatmul.bf16.gmra.mxu1 %v3968_v41  ;;  %v5066_v27 = vunpack.c.l.b16 %v4788_v33  ;;  %v2019_v28 = vadd.f32 %v1946_v3, %v8711_v15  ;;  %v5588_v3 = vunpack.c.l.b16 %v5487_v5  ;;  %v3729_v11 = vld [vmem:[#allocation2 + $0x68] sm:$0x1] }
 0x1c5   : > { %5718 = vmatmul.bf16.gmra.mxu0 %v5614_v43  ;;  %v5589_v45 = vunpack.c.l.b16 %v5490_v50  ;;  %v3969_v15 = vpack.c.b16 %v3944_v18, %v3943_v20 }
 0x1c6   : > { %v8415_v56 = vadd.f32 %v3590_v22, %v2920_v62  ;;  %v5093_v40 = vpack.c.b16 %v5067_v19, %v5066_v27  ;;  %v5372_v27 = vld [vmem:[#allocation2 + $0x64] sm:$0xf] }
 0x1c7   : > { %4455 = vmatmul.bf16.gmra.mxu2 %v6920_v58  ;;  %v3728_v19 = vld [vmem:[#allocation2 + $0x64] sm:$0xf]  ;;  %v5615_v26 = vpack.c.b16 %v5589_v45, %v5588_v3  ;;  %v5493_v32 = vrot.slane %v5372_v27, 5  ;;  %v4837_v3 = vshrl.u32 %v4629_v34, 16  ;;  %v5068_v45 = vunpack.c.l.b16 %v4812_v44  ;;  %v4630_v44 = vld [vmem:[#allocation2 + $0x74] sm:$0x1] }
 0x1c9   : > { %v1948_v58 = vpop.f32.mrf.mxu1  ;;  %v5495_v20 = vrot.slane %v5493_v32, 4 }
 0x1ca   : > { %v2471_v41 = vpop.f32.mrf.mxu2  ;;  %v3592_v33 = vpop.f32.mrf.mxu0  ;;  %v2020_v1 = vadd.f32 %v1948_v58, %v8712_v57  ;;  %v3853_v58 = vrot.slane %v3728_v19, 5  ;;  %v8437_v19 = vrot.slane %v4833_v31, 5  ;;  %v4843_v31 = vshll.u32 %v4630_v44, 16  ;;  %v5376_v44 = vld [vmem:[#allocation2 + $0x74] sm:$0x1] }
 0x1cb   : > { %v2846_v43 = vpop.f32.mrf.mxu3  ;;  %v2544_v62 = vadd.f32 %v2471_v41, %v2019_v28  ;;  %v5371_v28 = vld [vmem:[#allocation2 + $0x60] sm:$0xe] }
 0x1cc   : > { %v2921_v22 = vadd.f32 %v2846_v43, %v2543_v21  ;;  %v4628_v21 = vld [vmem:[#allocation2 + $0x6c] sm:$0xf]  ;;  %v6774_v47 = vrot.slane %v5371_v28, 9  ;;  %v3855_v57 = vrot.slane %v3853_v58, 4  ;;  %v5094_v28 = vpack.c.b16 %v5069_v63, %v5068_v45 }
 0x1cd   : > { %v4824_v53 = vshrl.u32 %v4628_v21, 16  ;;  %v4827_v8 = vshll.u32 %v4628_v21, 16  ;;  %v6551_v21 = vrot.slane %v3727_v25, 9 }
 0x1ce   : > { %v8427_v46 = vadd.f32 %v3592_v33, %v2921_v22  ;;  %v6921_v33 = vld [vmem:[#allocation2 + $0x60] sm:$0xff]  ;;  %v5373_v22 = vld [vmem:[#allocation2 + $0x68] sm:$0x1] }
 0x1cf   : > { %5201 = vmatmul.bf16.gmra.mxu3 %v5093_v40  ;;  %v5496_v18 = vrot.slane %v5373_v22, 5  ;;  %v4826_v27 = vrot.slane %v4824_v53, 4  ;;  %v3854_v25 = vsel %vm7616_vm14, %v6551_v21, %v3853_v58  ;;  %v4845_v58 = vrot.slane %v4843_v31, 5  ;;  %v5374_v21 = vld [vmem:[#allocation2 + $0x6c] sm:$0xe] }
 0x1d0   : > { %v3945_v63 = vunpack.c.l.b16 %v3854_v25 }
 0x1d1   : > { %v1951_v41 = vpop.f32.mrf.mxu1 }
 0x1d2   : > { %v2473_v5 = vpop.f32.mrf.mxu2  ;;  %v3595_v43 = vpop.f32.mrf.mxu0 }
 0x1d3   : > { %v2849_v6 = vpop.f32.mrf.mxu3  ;;  %v2545_v50 = vadd.f32 %v2473_v5, %v2020_v1  ;;  %v3856_v1 = vrot.slane %v3729_v11, 5  ;;  %v8714_v5 = vld [vmem:[#allocation10_spill] sm:$0xff] }
 0x1d4   : > { %v2922_v40 = vadd.f32 %v2849_v6, %v2544_v62  ;;  %4081 = vmatmul.bf16.gmra.mxu1 %v3969_v15  ;;  %v4829_v62 = vrot.slane %v4827_v8, 5  ;;  %v4839_v6 = vrot.slane %v4837_v3, 4  ;;  %v2021_v34 = vadd.f32 %v1951_v41, %v8714_v5 }
 0x1d5   : > { %5723 = vmatmul.bf16.gmra.mxu0 %v5615_v26  ;;  %v5494_v26 = vsel %vm7616_vm14, %v6774_v47, %v5493_v32  ;;  %v5497_v15 = vsel %vm7616_vm14, %v5495_v20, %v5496_v18  ;;  %v3857_v41 = vsel %vm7616_vm14, %v3855_v57, %v3856_v1  ;;  %v4631_v32 = vld [vmem:[#allocation2 + $0x78] sm:$0xf]  ;;  %v5375_v20 = vld [vmem:[#allocation2 + $0x70] sm:$0xf]  ;;  %v4632_v18 = vld [vmem:[#allocation2 + $0x7c] sm:$0xf] }
 0x1d6   : > { %v8435_v39 = vadd.f32 %v3595_v43, %v2922_v40  ;;  %v4830_v8 = vor.u32 %v4829_v62, %v4826_v27  ;;  %v4840_v11 = vor.u32 %v4839_v6, %v8437_v19  ;;  %v5590_v3 = vunpack.c.l.b16 %v5494_v26  ;;  %v3731_v62 = vld [vmem:[#allocation2 + $0x70] sm:$0xf]  ;;  %v8716_v1 = vld [vmem:[#allocation12_spill] sm:$0xff] }
 0x1d7   : > { %4460 = vmatmul.bf16.gmra.mxu2 %v6921_v33  ;;  %v5591_v45 = vunpack.c.l.b16 %v5497_v15  ;;  %v3946_v47 = vunpack.c.l.b16 %v3857_v41  ;;  %v4851_v57 = vshll.u32 %v4631_v32, 16  ;;  %v4857_v26 = vshll.u32 %v4632_v18, 16 }
 0x1d8   : > { %8713 = vst [vmem:[#allocation7_spill] sm:$0xff] %v8435_v39  ;;  %v4841_v5 = vrot.slane %v4840_v11, 4  ;;  %v4861_v15 = vshrl.u32 %v4632_v18, 16  ;;  %v6922_v11 = vld [vmem:[#allocation2 + $0x6c] sm:$0xff] }
 0x1d9   : > { %v1953_v22 = vpop.f32.mrf.mxu1  ;;  %v3970_v39 = vpack.c.b16 %v3946_v47, %v3945_v63  ;;  %v4853_v18 = vrot.slane %v4851_v57, 5  ;;  %v4859_v47 = vrot.slane %v4857_v26, 5 }
 0x1da   : > { %v2476_v53 = vpop.f32.mrf.mxu2  ;;  %v3597_v43 = vpop.f32.mrf.mxu0  ;;  %v2022_v6 = vadd.f32 %v1953_v22, %v8716_v1  ;;  %v3730_v22 = vld [vmem:[#allocation2 + $0x6c] sm:$0xe]  ;;  %v3732_v1 = vld [vmem:[#allocation2 + $0x74] sm:$0x1] }
 0x1db   : > { %v2851_v9 = vpop.f32.mrf.mxu3  ;;  %v2546_v33 = vadd.f32 %v2476_v53, %v2021_v34  ;;  %v4848_v34 = vshrl.u32 %v4631_v32, 16  ;;  %v5616_v53 = vpack.c.b16 %v5591_v45, %v5590_v3  ;;  %v6775_v32 = vrot.slane %v5374_v21, 9 }
 0x1dc   : > { %v2923_v40 = vadd.f32 %v2851_v9, %v2545_v50  ;;  %v4831_v50 = vrot.slane %v4830_v8, 4  ;;  %v5500_v9 = vrot.slane %v5375_v20, 5  ;;  %v4846_v20 = vsel %vm7603_vm12, %v4841_v5, %v4845_v58 }
 0x1dd   : > { %v5503_v3 = vrot.slane %v5376_v44, 5  ;;  %v4850_v45 = vrot.slane %v4848_v34, 4  ;;  %v5071_v21 = vunpack.c.l.b16 %v4846_v20  ;;  %v8718_v34 = vld [vmem:[#allocation15_spill] sm:$0xff] }
 0x1de   : > { %v8449_v27 = vadd.f32 %v3597_v43, %v2923_v40  ;;  %v3860_v43 = vrot.slane %v3731_v62, 5  ;;  %v4836_v31 = vsel %vm7603_vm12, %v4831_v50, %v8437_v19  ;;  %v5502_v63 = vrot.slane %v5500_v9, 4  ;;  %v4633_v19 = vld [vmem:[#allocation2 + $0x80] sm:$0x1] }
 0x1df   : > { %5206 = vmatmul.bf16.gmra.mxu3 %v5094_v28  ;;  %v4863_v62 = vrot.slane %v4861_v15, 4  ;;  %v5070_v50 = vunpack.c.l.b16 %v4836_v31  ;;  %v5501_v5 = vsel %vm7616_vm14, %v6775_v32, %v5500_v9  ;;  %v4854_v58 = vor.u32 %v4853_v18, %v4850_v45 }
 0x1e0   : > { %8715 = vst [vmem:[#allocation9_spill] sm:$0xff] %v8449_v27  ;;  %v5504_v44 = vsel %vm7616_vm14, %v5502_v63, %v5503_v3  ;;  %v4867_v15 = vshll.u32 %v4633_v19, 16 }
 0x1e1   : > { %v1956_v27 = vpop.f32.mrf.mxu1  ;;  %v4864_v26 = vor.u32 %v4863_v62, %v4859_v47  ;;  %v4855_v20 = vrot.slane %v4854_v58, 4  ;;  %v5378_v62 = vld [vmem:[#allocation2 + $0x7c] sm:$0xf]  ;;  %v5377_v58 = vld [vmem:[#allocation2 + $0x78] sm:$0xe] }
 0x1e2   : > { %v2478_v41 = vpop.f32.mrf.mxu2  ;;  %v3600_v40 = vpop.f32.mrf.mxu0  ;;  %v2023_v57 = vadd.f32 %v1956_v27, %v8718_v34  ;;  %v5593_v27 = vunpack.c.l.b16 %v5504_v44  ;;  %v4869_v63 = vrot.slane %v4867_v15, 5  ;;  %v5379_v15 = vld [vmem:[#allocation2 + $0x80] sm:$0x1] }
 0x1e3   : > { %v2854_v25 = vpop.f32.mrf.mxu3  ;;  %v2547_v8 = vadd.f32 %v2478_v41, %v2022_v6  ;;  %v6552_v6 = vrot.slane %v3730_v22, 9  ;;  %v3863_v41 = vrot.slane %v3732_v1, 5  ;;  %v5095_v22 = vpack.c.b16 %v5071_v21, %v5070_v50 }
 0x1e4   : > { %v2924_v28 = vadd.f32 %v2854_v25, %v2546_v33  ;;  %4086 = vmatmul.bf16.gmra.mxu1 %v3970_v39  ;;  %v3862_v25 = vrot.slane %v3860_v43, 4  ;;  %v5592_v1 = vunpack.c.l.b16 %v5501_v5  ;;  %v4865_v18 = vrot.slane %v4864_v26, 4 }
 0x1e5   : > { %5728 = vmatmul.bf16.gmra.mxu0 %v5616_v53 }
 0x1e6   : > { %v8457_v33 = vadd.f32 %v3600_v40, %v2924_v28  ;;  %v3861_v40 = vsel %vm7616_vm14, %v6552_v6, %v3860_v43  ;;  %v3864_v28 = vsel %vm7616_vm14, %v3862_v25, %v3863_v41  ;;  %v4634_v43 = vld [vmem:[#allocation2 + $0x84] sm:$0xf]  ;;  %v4635_v6 = vld [vmem:[#allocation2 + $0x88] sm:$0xf]  ;;  %v5617_v34 = vpack.c.b16 %v5593_v27, %v5592_v1  ;;  %v3734_v25 = vld [vmem:[#allocation2 + $0x7c] sm:$0xf] }
 0x1e7   : > { %4465 = vmatmul.bf16.gmra.mxu2 %v6922_v11  ;;  %v3947_v45 = vunpack.c.l.b16 %v3861_v40  ;;  %v3948_v3 = vunpack.c.l.b16 %v3864_v28  ;;  %v8720_v41 = vld [vmem:[#allocation16_spill] sm:$0xff]  ;;  %v4870_v5 = vsel %vm7603_vm12, %v4865_v18, %v4869_v63  ;;  %v4881_v40 = vshll.u32 %v4635_v6, 16 }
 0x1e8   : > { %8717 = vst [vmem:[#allocation11_spill] sm:$0xff] %v8457_v33  ;;  %v4885_v28 = vshrl.u32 %v4635_v6, 16  ;;  %v6923_v1 = vld [vmem:[#allocation2 + $0x78] sm:$0xff]  ;;  %v3867_v27 = vrot.slane %v3734_v25, 5  ;;  %v5073_v18 = vunpack.c.l.b16 %v4870_v5 }
 0x1e9   : > { %v1958_v32 = vpop.f32.mrf.mxu1  ;;  %v3971_v21 = vpack.c.b16 %v3948_v3, %v3947_v45  ;;  %v3733_v45 = vld [vmem:[#allocation2 + $0x78] sm:$0xe]  ;;  %v3735_v3 = vld [vmem:[#allocation2 + $0x80] sm:$0x1]  ;;  %v8477_v6 = vrot.slane %v4881_v40, 5 }
 0x1ea   : > { %v2481_v39 = vpop.f32.mrf.mxu2  ;;  %v3602_v11 = vpop.f32.mrf.mxu0  ;;  %v2024_v50 = vadd.f32 %v1958_v32, %v8720_v41  ;;  %v3870_v25 = vrot.slane %v3735_v3, 5 }
 0x1eb   : > { %v2856_v53 = vpop.f32.mrf.mxu3  ;;  %v2548_v9 = vadd.f32 %v2481_v39, %v2023_v57  ;;  %v5507_v57 = vrot.slane %v5378_v62, 5  ;;  %v4875_v39 = vshll.u32 %v4634_v43, 16  ;;  %v5510_v62 = vrot.slane %v5379_v15, 5 }
 0x1ec   : > { %v2925_v31 = vadd.f32 %v2856_v53, %v2547_v8  ;;  %v4860_v8 = vsel %vm7603_vm12, %v4855_v20, %v4859_v47  ;;  %v4872_v53 = vshrl.u32 %v4634_v43, 16  ;;  %v6776_v20 = vrot.slane %v5377_v58, 9 }
 0x1ed   : > { %v5072_v32 = vunpack.c.l.b16 %v4860_v8  ;;  %v5509_v63 = vrot.slane %v5507_v57, 4  ;;  %v4636_v8 = vld [vmem:[#allocation2 + $0x8c] sm:$0x1] }
 0x1ee   : > { %v8468_v19 = vadd.f32 %v3602_v11, %v2925_v31  ;;  %v4874_v43 = vrot.slane %v4872_v53, 4  ;;  %v5508_v5 = vsel %vm7616_vm14, %v6776_v20, %v5507_v57  ;;  %v5381_v20 = vld [vmem:[#allocation2 + $0x88] sm:$0xf] }
 0x1ef   : > { %5211 = vmatmul.bf16.gmra.mxu3 %v5095_v22  ;;  %v5096_v58 = vpack.c.b16 %v5073_v18, %v5072_v32  ;;  %v5511_v15 = vsel %vm7616_vm14, %v5509_v63, %v5510_v62  ;;  %v5594_v32 = vunpack.c.l.b16 %v5508_v5  ;;  %v4638_v63 = vld [vmem:[#allocation2 + $0x94] sm:$0xf] }
 0x1f0   : > { %8719 = vst [vmem:[#allocation13_spill] sm:$0xff] %v8468_v19  ;;  %v4877_v19 = vrot.slane %v4875_v39, 5  ;;  %v5595_v57 = vunpack.c.l.b16 %v5511_v15  ;;  %v4905_v5 = vshll.u32 %v4638_v63, 16  ;;  %v4909_v15 = vshrl.u32 %v4638_v63, 16 }
 0x1f1   : > { %v4052_v47 = vpop.f32.mrf.mxu1 }
 0x1f2   : > { %v2483_v26 = vpop.f32.mrf.mxu2  ;;  %v3605_v11 = vpop.f32.mrf.mxu0  ;;  %v8504_v63 = vrot.slane %v4905_v5, 5 }
 0x1f3   : > { %v2859_v44 = vpop.f32.mrf.mxu3  ;;  %v2549_v22 = vadd.f32 %v2483_v26, %v2024_v50  ;;  %v6553_v50 = vrot.slane %v3733_v45, 9  ;;  %v4637_v45 = vld [vmem:[#allocation2 + $0x90] sm:$0xf] }
 0x1f4   : > { %v2926_v31 = vadd.f32 %v2859_v44, %v2548_v9  ;;  %4091 = vmatmul.bf16.gmra.mxu1 %v3971_v21  ;;  %v4887_v9 = vrot.slane %v4885_v28, 4  ;;  %v3869_v44 = vrot.slane %v3867_v27, 4  ;;  %v4878_v21 = vor.u32 %v4877_v19, %v4874_v43 }
 0x1f5   : > { %5733 = vmatmul.bf16.gmra.mxu0 %v5617_v34 }
 0x1f6   : > { %v8475_v41 = vadd.f32 %v3605_v11, %v2926_v31  ;;  %v4888_v53 = vor.u32 %v4887_v9, %v8477_v6  ;;  %v3868_v11 = vsel %vm7616_vm14, %v6553_v50, %v3867_v27  ;;  %v3871_v31 = vsel %vm7616_vm14, %v3869_v44, %v3870_v25  ;;  %v5380_v9 = vld [vmem:[#allocation2 + $0x84] sm:$0xe]  ;;  %v5382_v50 = vld [vmem:[#allocation2 + $0x8c] sm:$0x1]  ;;  %v3737_v25 = vld [vmem:[#allocation2 + $0x88] sm:$0xf] }
 0x1f7   : > { %4470 = vmatmul.bf16.gmra.mxu2 %v6923_v1  ;;  %v4891_v1 = vshll.u32 %v4636_v8, 16  ;;  %v3949_v3 = vunpack.c.l.b16 %v3868_v11  ;;  %v3950_v18 = vunpack.c.l.b16 %v3871_v31  ;;  %v4879_v19 = vrot.slane %v4878_v21, 4 }
 0x1f8   : > { %8721 = vst [vmem:[#allocation14_spill] sm:$0xff] %v8475_v41  ;;  %v4164_v27 = vadd.f32 %v4052_v47, %v8011_v61  ;;  %v5514_v44 = vrot.slane %v5381_v20, 5  ;;  %v4896_v8 = vshrl.u32 %v4637_v45, 16  ;;  %v5618_v11 = vpack.c.b16 %v5595_v57, %v5594_v32  ;;  %v6924_v47 = vld [vmem:[#allocation2 + $0x84] sm:$0xff] }
 0x1f9   : > { %v4054_v28 = vpop.f32.mrf.mxu1  ;;  %v4893_v43 = vrot.slane %v4891_v1, 5  ;;  %v6777_v32 = vrot.slane %v5380_v9, 9  ;;  %v3874_v57 = vrot.slane %v3737_v25, 5 }
 0x1fa   : > { %v4431_v34 = vpop.f32.mrf.mxu2  ;;  %v3607_v39 = vpop.f32.mrf.mxu0  ;;  %v5516_v20 = vrot.slane %v5514_v44, 4 }
 0x1fb   : > { %v2861_v26 = vpop.f32.mrf.mxu3  ;;  %v4543_v21 = vadd.f32 %v4431_v34, %v4164_v27  ;;  %v5517_v34 = vrot.slane %v5382_v50, 5  ;;  %v4911_v27 = vrot.slane %v4909_v15, 4  ;;  %v3876_v50 = vrot.slane %v3874_v57, 4 }
 0x1fc   : > { %v2927_v40 = vadd.f32 %v2861_v26, %v2549_v22  ;;  %v4889_v22 = vrot.slane %v4888_v53, 4  ;;  %v4899_v26 = vshll.u32 %v4637_v45, 16  ;;  %v3736_v45 = vld [vmem:[#allocation2 + $0x84] sm:$0xe] }
 0x1fd   : > { %v6554_v9 = vrot.slane %v3736_v45, 9  ;;  %v4912_v5 = vor.u32 %v4911_v27, %v8504_v63 }
 0x1fe   : > { %v8488_v62 = vadd.f32 %v3607_v39, %v2927_v40  ;;  %v3972_v40 = vpack.c.b16 %v3950_v18, %v3949_v3  ;;  %v4894_v1 = vsel %vm7603_vm12, %v4889_v22, %v4893_v43  ;;  %v3738_v3 = vld [vmem:[#allocation2 + $0x8c] sm:$0x1]  ;;  %v4165_v18 = vadd.f32 %v4054_v28, %v8048_v30  ;;  %v4639_v30 = vld [vmem:[#allocation2 + $0x98] sm:$0x1] }
 0x1ff   : > { %5216 = vmatmul.bf16.gmra.mxu3 %v5096_v58  ;;  %v4884_v58 = vsel %vm7603_vm12, %v4879_v19, %v8477_v6  ;;  %v4898_v6 = vrot.slane %v4896_v8, 4  ;;  %v4901_v19 = vrot.slane %v4899_v26, 5  ;;  %v5075_v22 = vunpack.c.l.b16 %v4894_v1 }
 0x200   : > { %8722 = vst [vmem:[#allocation4_spill] sm:$0xff] %v8488_v62  ;;  %v5074_v41 = vunpack.c.l.b16 %v4884_v58  ;;  %v3877_v25 = vrot.slane %v3738_v3, 5  ;;  %v5515_v28 = vsel %vm7616_vm14, %v6777_v32, %v5514_v44  ;;  %v5518_v8 = vsel %vm7616_vm14, %v5516_v20, %v5517_v34  ;;  %v4640_v3 = vld [vmem:[#allocation2 + $0x9c] sm:$0xf] }
 0x201   : > { %v4057_v61 = vpop.f32.mrf.mxu1  ;;  %v4902_v26 = vor.u32 %v4901_v19, %v4898_v6  ;;  %v3875_v1 = vsel %vm7616_vm14, %v6554_v9, %v3874_v57  ;;  %v5596_v32 = vunpack.c.l.b16 %v5515_v28  ;;  %v5597_v34 = vunpack.c.l.b16 %v5518_v8  ;;  %v4641_v6 = vld [vmem:[#allocation2 + $0xa0] sm:$0xf] }
 0x202   : > { %v4433_v39 = vpop.f32.mrf.mxu2  ;;  %v5699_v53 = vpop.f32.mrf.mxu0  ;;  %v5097_v58 = vpack.c.b16 %v5075_v22, %v5074_v41  ;;  %v3878_v44 = vsel %vm7616_vm14, %v3876_v50, %v3877_v25  ;;  %v4166_v45 = vadd.f32 %v4057_v61, %v8057_v49  ;;  %v3951_v41 = vunpack.c.l.b16 %v3875_v1  ;;  %v5384_v49 = vld [vmem:[#allocation2 + $0x94] sm:$0xf] }
 0x203   : > { %v5177_v31 = vpop.f32.mrf.mxu3  ;;  %v4544_v43 = vadd.f32 %v4433_v39, %v4165_v18  ;;  %v3952_v57 = vunpack.c.l.b16 %v3878_v44  ;;  %v3740_v61 = vld [vmem:[#allocation2 + $0x94] sm:$0xf]  ;;  %v4920_v50 = vshrl.u32 %v4640_v3, 16  ;;  %v4923_v25 = vshll.u32 %v4640_v3, 16  ;;  %v5385_v3 = vld [vmem:[#allocation2 + $0x98] sm:$0x1] }
 0x204   : > { %v5289_v62 = vadd.f32 %v5177_v31, %v4543_v21  ;;  %4096 = vmatmul.bf16.gmra.mxu1 %v3972_v40  ;;  %v4915_v31 = vshll.u32 %v4639_v30, 16  ;;  %v4929_v30 = vshll.u32 %v4641_v6, 16  ;;  %v4933_v28 = vshrl.u32 %v4641_v6, 16  ;;  %v3741_v6 = vld [vmem:[#allocation2 + $0x98] sm:$0x1] }
 0x205   : > { %5738 = vmatmul.bf16.gmra.mxu0 %v5618_v11 }
 0x206   : > { %v5811_v15 = vadd.f32 %v5699_v53, %v5289_v62  ;;  %v4903_v62 = vrot.slane %v4902_v26, 4  ;;  %v4913_v53 = vrot.slane %v4912_v5, 4  ;;  %v4917_v19 = vrot.slane %v4915_v31, 5 }
 0x207   : > { %4475 = vmatmul.bf16.gmra.mxu2 %v6924_v47  ;;  %v5619_v26 = vpack.c.b16 %v5597_v34, %v5596_v32  ;;  %v3739_v32 = vld [vmem:[#allocation2 + $0x90] sm:$0xe]  ;;  %v3881_v34 = vrot.slane %v3740_v61, 5 }
 0x208   : > { %v6009_v18 = vmul.f32 %v5811_v15, %v5811_v15  ;;  %v4908_v31 = vsel %vm7603_vm12, %v4903_v62, %v8504_v63  ;;  %v4935_v63 = vrot.slane %v4933_v28, 4 }
 0x209   : > { %v4059_v47 = vpop.f32.mrf.mxu1  ;;  %v3883_v61 = vrot.slane %v3881_v34, 4 }
 0x20a   : > { %v4436_v21 = vpop.f32.mrf.mxu2  ;;  %v5701_v39 = vpop.f32.mrf.mxu0  ;;  %v4167_v44 = vadd.f32 %v4059_v47, %v8094_v42  ;;  %v5524_v47 = vrot.slane %v5385_v3, 5 }
 0x20b   : > { %v5179_v11 = vpop.f32.mrf.mxu3  ;;  %v4545_v9 = vadd.f32 %v4436_v21, %v4166_v45  ;;  %v5383_v21 = vld [vmem:[#allocation2 + $0x90] sm:$0xe] }
 0x20c   : > { %v5290_v40 = vadd.f32 %v5179_v11, %v4544_v43  ;;  %v6925_v45 = vld [vmem:[#allocation2 + $0x90] sm:$0xff] }
 0x20e   : > { %v5812_v20 = vadd.f32 %v5701_v39, %v5290_v40  ;;  %v3973_v39 = vpack.c.b16 %v3952_v57, %v3951_v41  ;;  %v5521_v40 = vrot.slane %v5384_v49, 5  ;;  %v4925_v41 = vrot.slane %v4923_v25, 5 }
 0x20f   : > { %5221 = vmatmul.bf16.gmra.mxu3 %v5097_v58  ;;  %v8535_v57 = vrot.slane %v4929_v30, 5  ;;  %v6555_v49 = vrot.slane %v3739_v32, 9 }
 0x210   : > { %v7022_v27 = vpack.c.bf16 %v5812_v20, %v5811_v15  ;;  %v5971_v22 = vadd.f32 %v5812_v20, %v5811_v15  ;;  %v6010_v43 = vmul.f32 %v5812_v20, %v5812_v20  ;;  %v4918_v15 = vsel %vm7603_vm12, %v4913_v53, %v4917_v19 }
 0x211   : > { %v4062_v20 = vpop.f32.mrf.mxu1  ;;  %v5077_v53 = vunpack.c.l.b16 %v4918_v15  ;;  %v6778_v19 = vrot.slane %v5383_v21, 9  ;;  %v5523_v42 = vrot.slane %v5521_v40, 4  ;;  %v4936_v30 = vor.u32 %v4935_v63, %v8535_v57 }
 0x212   : > { %7023 = vst [vmem:[%s8526_s12] sm:$0xff] %v7022_v27   ;;  %v6041_v8 = vadd.f32 %v6010_v43, %v6009_v18  ;;  %v4438_v11 = vpop.f32.mrf.mxu2  ;;  %v5704_v58 = vpop.f32.mrf.mxu0  ;;  %v4922_v18 = vrot.slane %v4920_v50, 4  ;;  %v5076_v27 = vunpack.c.l.b16 %v4908_v31  ;;  %v4642_v43 = vld [vmem:[#allocation2 + $0xa4] sm:$0x1]  ;;  %v3884_v50 = vrot.slane %v3741_v6, 5 }
 0x213   : > { %v5182_v5 = vpop.f32.mrf.mxu3  ;;  %v4939_v28 = vshll.u32 %v4642_v43, 16  ;;  %v4168_v6 = vadd.f32 %v4062_v20, %v8104_v55  ;;  %v5386_v20 = vld [vmem:[#allocation2 + $0x9c] sm:$0xe] }
 0x214   : > { %v5291_v1 = vadd.f32 %v5182_v5, %v4545_v9  ;;  %v4546_v9 = vadd.f32 %v4438_v11, %v4167_v44  ;;  %4101 = vmatmul.bf16.gmra.mxu1 %v3973_v39  ;;  %v4926_v25 = vor.u32 %v4925_v41, %v4922_v18  ;;  %v5098_v15 = vpack.c.b16 %v5077_v53, %v5076_v27  ;;  %v5387_v27 = vld [vmem:[#allocation2 + $0xa0] sm:$0xf]  ;;  %v4643_v53 = vld [vmem:[#allocation2 + $0xa8] sm:$0xf] }
 0x215   : > { %5743 = vmatmul.bf16.gmra.mxu0 %v5619_v26  ;;  %v5522_v26 = vsel %vm7616_vm14, %v6778_v19, %v5521_v40  ;;  %v3882_v44 = vsel %vm7616_vm14, %v6555_v49, %v3881_v34  ;;  %v3743_v49 = vld [vmem:[#allocation2 + $0xa0] sm:$0xf] }
 0x216   : > { %v5813_v62 = vadd.f32 %v5704_v58, %v5291_v1  ;;  %v4927_v3 = vrot.slane %v4926_v25, 4  ;;  %v5598_v40 = vunpack.c.l.b16 %v5522_v26  ;;  %v3953_v41 = vunpack.c.l.b16 %v3882_v44 }
 0x217   : > { %4480 = vmatmul.bf16.gmra.mxu2 %v6925_v45  ;;  %v3885_v45 = vsel %vm7616_vm14, %v3883_v61, %v3884_v50  ;;  %v5388_v50 = vld [vmem:[#allocation2 + $0xa4] sm:$0x1]  ;;  %v5528_v25 = vrot.slane %v5387_v27, 5  ;;  %v6779_v44 = vrot.slane %v5386_v20, 9 }
 0x218   : > { %v5972_v5 = vadd.f32 %v5971_v22, %v5813_v62  ;;  %v6011_v33 = vmul.f32 %v5813_v62, %v5813_v62  ;;  %v5525_v22 = vsel %vm7616_vm14, %v5523_v42, %v5524_v47  ;;  %v3954_v63 = vunpack.c.l.b16 %v3885_v45  ;;  %v4644_v42 = vld [vmem:[#allocation2 + $0xac] sm:$0xf]  ;;  %v3742_v45 = vld [vmem:[#allocation2 + $0x9c] sm:$0xe] }
 0x219   : > { %v4064_v1 = vpop.f32.mrf.mxu1  ;;  %v5599_v18 = vunpack.c.l.b16 %v5525_v22  ;;  %v4932_v47 = vsel %vm7603_vm12, %v4927_v3, %v8535_v57  ;;  %v4953_v26 = vshll.u32 %v4644_v42, 16  ;;  %v6926_v22 = vld [vmem:[#allocation2 + $0x9c] sm:$0xff]  ;;  %v3888_v3 = vrot.slane %v3743_v49, 5 }
 0x21a   : > { %v6042_v58 = vadd.f32 %v6041_v8, %v6011_v33  ;;  %v4441_v11 = vpop.f32.mrf.mxu2  ;;  %v5706_v39 = vpop.f32.mrf.mxu0  ;;  %v4937_v33 = vrot.slane %v4936_v30, 4  ;;  %v4941_v8 = vrot.slane %v4939_v28, 5  ;;  %v4944_v30 = vshrl.u32 %v4643_v53, 16 }
 0x21b   : > { %v5184_v31 = vpop.f32.mrf.mxu3  ;;  %v4547_v34 = vadd.f32 %v4441_v11, %v4168_v6  ;;  %v4957_v11 = vshrl.u32 %v4644_v42, 16  ;;  %v3744_v6 = vld [vmem:[#allocation2 + $0xa4] sm:$0x1]  ;;  %v3890_v20 = vrot.slane %v3888_v3, 4 }
 0x21c   : > { %v5292_v21 = vadd.f32 %v5184_v31, %v4546_v9  ;;  %v4942_v55 = vsel %vm7603_vm12, %v4937_v33, %v4941_v8  ;;  %v4169_v33 = vadd.f32 %v4064_v1, %v8174_v35  ;;  %v3891_v35 = vrot.slane %v3744_v6, 5  ;;  %v4645_v1 = vld [vmem:[#allocation2 + $0xb0] sm:$0x1] }
 0x21d   : > { %v5079_v8 = vunpack.c.l.b16 %v4942_v55  ;;  %v5529_v55 = vsel %vm7616_vm14, %v6779_v44, %v5528_v25 }
 0x21e   : > { %v5814_v32 = vadd.f32 %v5706_v39, %v5292_v21 }
 0x21f   : > { %5226 = vmatmul.bf16.gmra.mxu3 %v5098_v15  ;;  %v3974_v15 = vpack.c.b16 %v3954_v63, %v3953_v41  ;;  %v6556_v63 = vrot.slane %v3742_v45, 9  ;;  %v4646_v45 = vld [vmem:[#allocation2 + $0xb4] sm:$0xf] }
 0x220   : > { %v7027_v19 = vpack.c.bf16 %v5814_v32, %v5813_v62  ;;  %v5973_v43 = vadd.f32 %v5972_v5, %v5814_v32  ;;  %v6012_v9 = vmul.f32 %v5814_v32, %v5814_v32  ;;  %v4947_v62 = vshll.u32 %v4643_v53, 16 }
 0x221   : > { %v5620_v5 = vpack.c.b16 %v5599_v18, %v5598_v40  ;;  %v4067_v57 = vpop.f32.mrf.mxu1  ;;  %v5531_v32 = vrot.slane %v5388_v50, 5  ;;  %v5530_v40 = vrot.slane %v5528_v25, 4  ;;  %v4946_v18 = vrot.slane %v4944_v30, 4 }
 0x222   : > { %7114 = vst [vmem:[%s8526_s12 + $0x8] sm:$0xff] %v7027_v19   ;;  %v6043_v61 = vadd.f32 %v6042_v58, %v6012_v9  ;;  %v4443_v31 = vpop.f32.mrf.mxu2  ;;  %v5709_v39 = vpop.f32.mrf.mxu0  ;;  %v5078_v58 = vunpack.c.l.b16 %v4932_v47  ;;  %v4949_v53 = vrot.slane %v4947_v62, 5  ;;  %v8554_v19 = vrot.slane %v4953_v26, 5 }
 0x223   : > { %v5187_v28 = vpop.f32.mrf.mxu3  ;;  %v4548_v41 = vadd.f32 %v4443_v31, %v4169_v33  ;;  %v4959_v9 = vrot.slane %v4957_v11, 4  ;;  %v5532_v30 = vsel %vm7616_vm14, %v5530_v40, %v5531_v32  ;;  %v3889_v11 = vsel %vm7616_vm14, %v6556_v63, %v3888_v3  ;;  %v4647_v33 = vld [vmem:[#allocation2 + $0xb8] sm:$0xf]  ;;  %v3746_v63 = vld [vmem:[#allocation2 + $0xac] sm:$0xf] }
 0x224   : > { %v5293_v21 = vadd.f32 %v5187_v28, %v4547_v34  ;;  %4106 = vmatmul.bf16.gmra.mxu1 %v3974_v15  ;;  %v4950_v49 = vor.u32 %v4949_v53, %v4946_v18  ;;  %v4963_v28 = vshll.u32 %v4645_v1, 16  ;;  %v5099_v15 = vpack.c.b16 %v5079_v8, %v5078_v58 }
 0x225   : > { %5748 = vmatmul.bf16.gmra.mxu0 %v5620_v5  ;;  %v4960_v5 = vor.u32 %v4959_v9, %v8554_v19  ;;  %v5600_v25 = vunpack.c.l.b16 %v5529_v55  ;;  %v3955_v32 = vunpack.c.l.b16 %v3889_v11  ;;  %v4968_v9 = vshrl.u32 %v4646_v45, 16 }
 0x226   : > { %v5815_v27 = vadd.f32 %v5709_v39, %v5293_v21  ;;  %v4170_v21 = vadd.f32 %v4067_v57, %v8212_v23  ;;  %v4951_v44 = vrot.slane %v4950_v49, 4  ;;  %v4965_v58 = vrot.slane %v4963_v28, 5 }
 0x227   : > { %4485 = vmatmul.bf16.gmra.mxu2 %v6926_v22  ;;  %v5601_v22 = vunpack.c.l.b16 %v5532_v30  ;;  %v4961_v40 = vrot.slane %v4960_v5, 4  ;;  %v4981_v23 = vshrl.u32 %v4647_v33, 16  ;;  %v3895_v11 = vrot.slane %v3746_v63, 5 }
 0x228   : > { %v5974_v34 = vadd.f32 %v5973_v43, %v5815_v27  ;;  %v6013_v42 = vmul.f32 %v5815_v27, %v5815_v27 }
 0x229   : > { %v4069_v26 = vpop.f32.mrf.mxu1 }
 0x22a   : > { %v6044_v47 = vadd.f32 %v6043_v61, %v6013_v42  ;;  %v4446_v62 = vpop.f32.mrf.mxu2  ;;  %v5711_v31 = vpop.f32.mrf.mxu0  ;;  %v3892_v61 = vsel %vm7616_vm14, %v3890_v20, %v3891_v35  ;;  %v4971_v42 = vshll.u32 %v4646_v45, 16  ;;  %v4977_v20 = vshll.u32 %v4647_v33, 16 }
 0x22b   : > { %v5189_v50 = vpop.f32.mrf.mxu3  ;;  %v3956_v6 = vunpack.c.l.b16 %v3892_v61  ;;  %v4549_v3 = vadd.f32 %v4446_v62, %v4170_v21  ;;  %v5621_v35 = vpack.c.b16 %v5601_v22, %v5600_v25  ;;  %v4171_v28 = vadd.f32 %v4069_v26, %v8223_v0  ;;  %v3747_v61 = vld [vmem:[#allocation2 + $0xb0] sm:$0x1] }
 0x22c   : > { %v5294_v43 = vadd.f32 %v5189_v50, %v4548_v41  ;;  %v5390_v41 = vld [vmem:[#allocation2 + $0xac] sm:$0xf]  ;;  %v5391_v50 = vld [vmem:[#allocation2 + $0xb0] sm:$0x1]  ;;  %v4970_v25 = vrot.slane %v4968_v9, 4  ;;  %v8573_v21 = vrot.slane %v4977_v20, 5 }
 0x22d   : > { %v3975_v49 = vpack.c.b16 %v3956_v6, %v3955_v32  ;;  %v5535_v30 = vrot.slane %v5390_v41, 5  ;;  %v5538_v33 = vrot.slane %v5391_v50, 5  ;;  %v4648_v32 = vld [vmem:[#allocation2 + $0xbc] sm:$0x1] }
 0x22e   : > { %v5816_v39 = vadd.f32 %v5711_v31, %v5294_v43  ;;  %v6927_v43 = vld [vmem:[#allocation2 + $0xa8] sm:$0xff]  ;;  %v4987_v9 = vshll.u32 %v4648_v32, 16 }
 0x22f   : > { %5231 = vmatmul.bf16.gmra.mxu3 %v5099_v15  ;;  %v3745_v15 = vld [vmem:[#allocation2 + $0xa8] sm:$0xe]  ;;  %v5537_v6 = vrot.slane %v5535_v30, 4 }
 0x230   : > { %v7032_v8 = vpack.c.bf16 %v5816_v39, %v5815_v27  ;;  %v5975_v18 = vadd.f32 %v5974_v34, %v5816_v39  ;;  %v6014_v53 = vmul.f32 %v5816_v39, %v5816_v39  ;;  %v4956_v27 = vsel %vm7603_vm12, %v4951_v44, %v8554_v19  ;;  %v5389_v34 = vld [vmem:[#allocation2 + $0xa8] sm:$0xe] }
 0x231   : > { %v4072_v31 = vpop.f32.mrf.mxu1  ;;  %v4973_v39 = vrot.slane %v4971_v42, 5  ;;  %v4983_v19 = vrot.slane %v4981_v23, 4  ;;  %v5080_v44 = vunpack.c.l.b16 %v4956_v27  ;;  %v6780_v45 = vrot.slane %v5389_v34, 9 }
 0x232   : > { %7115 = vst [vmem:[%s8526_s12 + $0x10] sm:$0xff] %v7032_v8   ;;  %v6045_v57 = vadd.f32 %v6044_v47, %v6014_v53  ;;  %v4448_v55 = vpop.f32.mrf.mxu2  ;;  %v5714_v62 = vpop.f32.mrf.mxu0  ;;  %v4966_v47 = vsel %vm7603_vm12, %v4961_v40, %v4965_v58  ;;  %v6557_v8 = vrot.slane %v3745_v15, 9  ;;  %v3897_v53 = vrot.slane %v3895_v11, 4 }
 0x233   : > { %v5192_v1 = vpop.f32.mrf.mxu3  ;;  %v4550_v0 = vadd.f32 %v4448_v55, %v4171_v28  ;;  %v5081_v26 = vunpack.c.l.b16 %v4966_v47  ;;  %v4974_v41 = vor.u32 %v4973_v39, %v4970_v25  ;;  %v4984_v63 = vor.u32 %v4983_v19, %v8573_v21  ;;  %v5393_v25 = vld [vmem:[#allocation2 + $0xb8] sm:$0xf]  ;;  %v4649_v39 = vld [vmem:[#allocation2 + $0xc0] sm:$0xf] }
 0x234   : > { %v5295_v5 = vadd.f32 %v5192_v1, %v4549_v3  ;;  %4111 = vmatmul.bf16.gmra.mxu1 %v3975_v49  ;;  %v3898_v3 = vrot.slane %v3747_v61, 5  ;;  %v3896_v34 = vsel %vm7616_vm14, %v6557_v8, %v3895_v11  ;;  %v5542_v8 = vrot.slane %v5393_v25, 5 }
 0x235   : > { %5753 = vmatmul.bf16.gmra.mxu0 %v5621_v35  ;;  %v5100_v23 = vpack.c.b16 %v5081_v26, %v5080_v44  ;;  %v5536_v35 = vsel %vm7616_vm14, %v6780_v45, %v5535_v30  ;;  %v3957_v15 = vunpack.c.l.b16 %v3896_v34 }
 0x236   : > { %v5817_v22 = vadd.f32 %v5714_v62, %v5295_v5  ;;  %v3899_v50 = vsel %vm7616_vm14, %v3897_v53, %v3898_v3  ;;  %v4975_v62 = vrot.slane %v4974_v41, 4  ;;  %v4989_v5 = vrot.slane %v4987_v9, 5 }
 0x237   : > { %4490 = vmatmul.bf16.gmra.mxu2 %v6927_v43  ;;  %v4172_v43 = vadd.f32 %v4072_v31, %v8237_v52  ;;  %v5602_v30 = vunpack.c.l.b16 %v5536_v35  ;;  %v3958_v61 = vunpack.c.l.b16 %v3899_v50  ;;  %v5392_v31 = vld [vmem:[#allocation2 + $0xb4] sm:$0xe] }
 0x238   : > { %v5976_v40 = vadd.f32 %v5975_v18, %v5817_v22  ;;  %v6015_v58 = vmul.f32 %v5817_v22, %v5817_v22  ;;  %v5539_v18 = vsel %vm7616_vm14, %v5537_v6, %v5538_v33  ;;  %v4650_v33 = vld [vmem:[#allocation2 + $0xc4] sm:$0xf]  ;;  %v4980_v32 = vsel %vm7603_vm12, %v4975_v62, %v8573_v21  ;;  %v5394_v6 = vld [vmem:[#allocation2 + $0xbc] sm:$0x1]  ;;  %v6928_v35 = vld [vmem:[#allocation2 + $0xb4] sm:$0xff] }
 0x239   : > { %v4074_v27 = vpop.f32.mrf.mxu1  ;;  %v5603_v47 = vunpack.c.l.b16 %v5539_v18  ;;  %v3976_v41 = vpack.c.b16 %v3958_v61, %v3957_v15  ;;  %v5005_v9 = vshrl.u32 %v4650_v33, 16  ;;  %v5545_v50 = vrot.slane %v5394_v6, 5  ;;  %v3750_v62 = vld [vmem:[#allocation2 + $0xbc] sm:$0x1] }
 0x23a   : > { %v6046_v42 = vadd.f32 %v6045_v57, %v6015_v58  ;;  %v4451_v1 = vpop.f32.mrf.mxu2  ;;  %v5716_v55 = vpop.f32.mrf.mxu0  ;;  %v4985_v57 = vrot.slane %v4984_v63, 4  ;;  %v4992_v58 = vshrl.u32 %v4649_v39, 16  ;;  %v5001_v63 = vshll.u32 %v4650_v33, 16 }
 0x23b   : > { %v5194_v20 = vpop.f32.mrf.mxu3  ;;  %v4551_v11 = vadd.f32 %v4451_v1, %v4172_v43  ;;  %v6781_v1 = vrot.slane %v5392_v31, 9  ;;  %v4173_v18 = vadd.f32 %v4074_v27, %v8261_v37  ;;  %v5007_v25 = vrot.slane %v5005_v9, 4 }
 0x23c   : > { %v5296_v49 = vadd.f32 %v5194_v20, %v4550_v0  ;;  %v4990_v52 = vsel %vm7603_vm12, %v4985_v57, %v4989_v5  ;;  %v3749_v0 = vld [vmem:[#allocation2 + $0xb8] sm:$0xf]  ;;  %v5544_v5 = vrot.slane %v5542_v8, 4  ;;  %v8592_v61 = vrot.slane %v5001_v63, 5 }
 0x23d   : > { %v5083_v34 = vunpack.c.l.b16 %v4990_v52  ;;  %v3905_v27 = vrot.slane %v3750_v62, 5  ;;  %v5543_v52 = vsel %vm7616_vm14, %v6781_v1, %v5542_v8 }
 0x23e   : > { %v5818_v28 = vadd.f32 %v5716_v55, %v5296_v49  ;;  %v3748_v55 = vld [vmem:[#allocation2 + $0xb4] sm:$0xe]  ;;  %v3902_v49 = vrot.slane %v3749_v0, 5 }
 0x23f   : > { %5236 = vmatmul.bf16.gmra.mxu3 %v5100_v23  ;;  %v6558_v15 = vrot.slane %v3748_v55, 9 }
 0x240   : > { %v7037_v19 = vpack.c.bf16 %v5818_v28, %v5817_v22  ;;  %v5977_v44 = vadd.f32 %v5976_v40, %v5818_v28  ;;  %v6016_v45 = vmul.f32 %v5818_v28, %v5818_v28  ;;  %v4995_v22 = vshll.u32 %v4649_v39, 16 }
 0x241   : > { %v5622_v40 = vpack.c.b16 %v5603_v47, %v5602_v30  ;;  %v4077_v21 = vpop.f32.mrf.mxu1  ;;  %v4994_v28 = vrot.slane %v4992_v58, 4  ;;  %v299_v30 = vld [vmem:[#allocation2 + $0xcc] sm:$0x1]  ;;  %v3904_v37 = vrot.slane %v3902_v49, 4  ;;  %v3903_v8 = vsel %vm7616_vm14, %v6558_v15, %v3902_v49 }
 0x242   : > { %7116 = vst [vmem:[%s8526_s12 + $0x18] sm:$0xff] %v7037_v19   ;;  %v6047_v26 = vadd.f32 %v6046_v42, %v6016_v45  ;;  %v4453_v3 = vpop.f32.mrf.mxu2  ;;  %v5719_v20 = vpop.f32.mrf.mxu0  ;;  %v5082_v42 = vunpack.c.l.b16 %v4980_v32  ;;  %v4997_v43 = vrot.slane %v4995_v22, 5  ;;  %v4651_v45 = vld [vmem:[#allocation2 + $0xc8] sm:$0x1]  ;;  %v300_v33 = vsel %vm7228_vm2, 0, %v299_v30 }
 0x243   : > { %v5197_v53 = vpop.f32.mrf.mxu3  ;;  %v4552_v47 = vadd.f32 %v4453_v3, %v4173_v18  ;;  %301 = vst [vmem:[#allocation2 + $0xcc] sm:$0x1] %v300_v33  ;;  %v5008_v22 = vor.u32 %v5007_v25, %v8592_v61  ;;  %v3906_v4 = vsel %vm7616_vm14, %v3904_v37, %v3905_v27  ;;  %v4174_v9 = vadd.f32 %v4077_v21, %v8265_v60 }
 0x244   : > { %v5297_v23 = vadd.f32 %v5197_v53, %v4551_v11  ;;  %4116 = vmatmul.bf16.gmra.mxu1 %v3976_v41  ;;  %v355_v11 = vld [vmem:[#allocation2 + $0xd4] sm:$0x1]  ;;  %v4998_v31 = vor.u32 %v4997_v43, %v4994_v28  ;;  %v5604_v41 = vunpack.c.l.b16 %v5543_v52  ;;  %v3960_v1 = vunpack.c.l.b16 %v3906_v4  ;;  %v5395_v28 = vld [vmem:[#allocation2 + $0xc0] sm:$0xe]  ;;  %v3752_v43 = vld [vmem:[#allocation2 + $0xc4] sm:$0xf] }
 0x245   : > { %5758 = vmatmul.bf16.gmra.mxu0 %v5622_v40  ;;  %v356_v0 = vsel %vm7233_vm4, 0, %v355_v11  ;;  %v5011_v40 = vshll.u32 %v4651_v45, 16  ;;  %v5009_v55 = vrot.slane %v5008_v22, 4 }
 0x246   : > { %v5819_v57 = vadd.f32 %v5719_v20, %v5297_v23  ;;  %357 = vst [vmem:[#allocation2 + $0xd4] sm:$0x1] %v356_v0  ;;  %v4999_v23 = vrot.slane %v4998_v31, 4  ;;  %v6782_v31 = vrot.slane %v5395_v28, 9  ;;  %v3751_v0 = vld [vmem:[#allocation2 + $0xc0] sm:$0xe] }
 0x247   : > { %4495 = vmatmul.bf16.gmra.mxu2 %v6928_v35  ;;  %v3959_v35 = vunpack.c.l.b16 %v3903_v8  ;;  %v5013_v18 = vrot.slane %v5011_v40, 5 }
 0x248   : > { %v5978_v39 = vadd.f32 %v5977_v44, %v5819_v57  ;;  %v6017_v19 = vmul.f32 %v5819_v57, %v5819_v57  ;;  %v5546_v44 = vsel %vm7616_vm14, %v5544_v5, %v5545_v50  ;;  %v5396_v50 = vld [vmem:[#allocation2 + $0xc4] sm:$0xf]  ;;  %v4653_v5 = vld [vmem:[#allocation2 + $0xd0] sm:$0xf]  ;;  %v5004_v60 = vsel %vm7603_vm12, %v4999_v23, %v8592_v61 }
 0x249   : > { %v4079_v3 = vpop.f32.mrf.mxu1  ;;  %v5605_v20 = vunpack.c.l.b16 %v5546_v44  ;;  %v5549_v21 = vrot.slane %v5396_v50, 5  ;;  %v3977_v37 = vpack.c.b16 %v3960_v1, %v3959_v35  ;;  %v5025_v27 = vshll.u32 %v4653_v5, 16 }
 0x24a   : > { %v6048_v32 = vadd.f32 %v6047_v26, %v6017_v19  ;;  %v4456_v58 = vpop.f32.mrf.mxu2  ;;  %v5721_v2 = vpop.f32.mrf.mxu0  ;;  %v5101_v26 = vpack.c.b16 %v5083_v34, %v5082_v42  ;;  %v4652_v15 = vld [vmem:[#allocation2 + $0xcc] sm:$0xf]  ;;  %v5029_v45 = vshrl.u32 %v4653_v5, 16  ;;  %v4175_v61 = vadd.f32 %v4079_v3, %v8286_v13 }
 0x24b   : > { %v5199_v6 = vpop.f32.mrf.mxu3  ;;  %v4553_v49 = vadd.f32 %v4456_v58, %v4174_v9  ;;  %v5084_v44 = vunpack.c.l.b16 %v5004_v60  ;;  %v3753_v58 = vld [vmem:[#allocation2 + $0xc8] sm:$0x1]  ;;  %v5016_v22 = vshrl.u32 %v4652_v15, 16  ;;  %v5019_v40 = vshll.u32 %v4652_v15, 16 }
 0x24c   : > { %v5298_v53 = vadd.f32 %v5199_v6, %v4552_v47  ;;  %v5623_v47 = vpack.c.b16 %v5605_v20, %v5604_v41  ;;  %v3909_v6 = vrot.slane %v3752_v43, 5  ;;  %v6559_v41 = vrot.slane %v3751_v0, 9 }
 0x24d   : > { %v5031_v9 = vrot.slane %v5029_v45, 4  ;;  %v3912_v13 = vrot.slane %v3753_v58, 5  ;;  %v4654_v3 = vld [vmem:[#allocation2 + $0xd4] sm:$0x1]  ;;  %v5018_v1 = vrot.slane %v5016_v22, 4 }
 0x24e   : > { %v5820_v63 = vadd.f32 %v5721_v2, %v5298_v53  ;;  %v3911_v35 = vrot.slane %v3909_v6, 4  ;;  %v5035_v28 = vshll.u32 %v4654_v3, 16  ;;  %v3910_v15 = vsel %vm7616_vm14, %v6559_v41, %v3909_v6  ;;  %v5399_v6 = vld [vmem:[#allocation2 + $0xd0] sm:$0xf]  ;;  %v5398_v41 = vld [vmem:[#allocation2 + $0xcc] sm:$0xe] }
 0x24f   : > { %5241 = vmatmul.bf16.gmra.mxu3 %v5101_v26  ;;  %v5551_v26 = vrot.slane %v5549_v21, 4  ;;  %v6783_v3 = vrot.slane %v5398_v41, 9 }
 0x250   : > { %v7042_v42 = vpack.c.bf16 %v5820_v63, %v5819_v57  ;;  %v5979_v34 = vadd.f32 %v5978_v39, %v5820_v63  ;;  %v6018_v62 = vmul.f32 %v5820_v63, %v5820_v63  ;;  %v5014_v57 = vsel %vm7603_vm12, %v5009_v55, %v5013_v18  ;;  %v5397_v39 = vld [vmem:[#allocation2 + $0xc8] sm:$0x1] }
 0x251   : > { %v4082_v52 = vpop.f32.mrf.mxu1  ;;  %v5085_v53 = vunpack.c.l.b16 %v5014_v57  ;;  %v5552_v8 = vrot.slane %v5397_v39, 5  ;;  %v8615_v63 = vrot.slane %v5025_v27, 5  ;;  %v5021_v55 = vrot.slane %v5019_v40, 5 }
 0x252   : > { %7117 = vst [vmem:[%s8526_s12 + $0x20] sm:$0xff] %v7042_v42   ;;  %v6049_v30 = vadd.f32 %v6048_v32, %v6018_v62  ;;  %v4458_v19 = vpop.f32.mrf.mxu2  ;;  %v5724_v11 = vpop.f32.mrf.mxu0  ;;  %v6929_v32 = vld [vmem:[#allocation2 + $0xc0] sm:$0xff]  ;;  %v5550_v42 = vsel %vm7616_vm14, %v6782_v31, %v5549_v21  ;;  %v3961_v39 = vunpack.c.l.b16 %v3910_v15 }
 0x253   : > { %v5202_v25 = vpop.f32.mrf.mxu3  ;;  %v4554_v4 = vadd.f32 %v4458_v19, %v4175_v61  ;;  %v5553_v62 = vsel %vm7616_vm14, %v5551_v26, %v5552_v8  ;;  %v5032_v5 = vor.u32 %v5031_v9, %v8615_v63  ;;  %v4176_v19 = vadd.f32 %v4082_v52, %v8289_v29  ;;  %v5400_v9 = vld [vmem:[#allocation2 + $0xd4] sm:$0x1] }
 0x254   : > { %v5299_v33 = vadd.f32 %v5202_v25, %v4553_v49  ;;  %4121 = vmatmul.bf16.gmra.mxu1 %v3977_v37  ;;  %v5022_v25 = vor.u32 %v5021_v55, %v5018_v1  ;;  %v5606_v37 = vunpack.c.l.b16 %v5550_v42  ;;  %v5607_v57 = vunpack.c.l.b16 %v5553_v62 }
 0x255   : > { %5763 = vmatmul.bf16.gmra.mxu0 %v5623_v47  ;;  %v5102_v47 = vpack.c.b16 %v5085_v53, %v5084_v44  ;;  %v5033_v45 = vrot.slane %v5032_v5, 4  ;;  %v5556_v29 = vrot.slane %v5399_v6, 5  ;;  %v5559_v55 = vrot.slane %v5400_v9, 5 }
 0x256   : > { %v5821_v2 = vadd.f32 %v5724_v11, %v5299_v33  ;;  %v5037_v11 = vrot.slane %v5035_v28, 5  ;;  %v5023_v61 = vrot.slane %v5022_v25, 4  ;;  %v5624_v58 = vpack.c.b16 %v5607_v57, %v5606_v37 }
 0x257   : > { %4500 = vmatmul.bf16.gmra.mxu2 %v6929_v32  ;;  %v5558_v1 = vrot.slane %v5556_v29, 4 }
 0x258   : > { %v5980_v20 = vadd.f32 %v5979_v34, %v5821_v2  ;;  %v6019_v23 = vmul.f32 %v5821_v2, %v5821_v2 }
 0x259   : > { %v4084_v60 = vpop.f32.mrf.mxu1 }
 0x25a   : > { %v6050_v18 = vadd.f32 %v6049_v30, %v6019_v23  ;;  %v4461_v49 = vpop.f32.mrf.mxu2  ;;  %v5726_v34 = vpop.f32.mrf.mxu0  ;;  %v3913_v30 = vsel %vm7616_vm14, %v3911_v35, %v3912_v13  ;;  %v4177_v35 = vadd.f32 %v4084_v60, %v8300_v24  ;;  %v5557_v24 = vsel %vm7616_vm14, %v6783_v3, %v5556_v29 }
 0x25b   : > { %v5204_v50 = vpop.f32.mrf.mxu3  ;;  %v3962_v27 = vunpack.c.l.b16 %v3913_v30  ;;  %v4555_v0 = vadd.f32 %v4461_v49, %v4176_v19  ;;  %v5608_v30 = vunpack.c.l.b16 %v5557_v24 }
 0x25c   : > { %v5300_v43 = vadd.f32 %v5204_v50, %v4554_v4  ;;  %v6930_v4 = vld [vmem:[#allocation2 + $0xcc] sm:$0xff] }
 0x25d   : > { %v3978_v53 = vpack.c.b16 %v3962_v27, %v3961_v39 }
 0x25e   : > { %v5822_v21 = vadd.f32 %v5726_v34, %v5300_v43  ;;  %v5560_v43 = vsel %vm7616_vm14, %v5558_v1, %v5559_v55 }
 0x25f   : > { %5246 = vmatmul.bf16.gmra.mxu3 %v5102_v47  ;;  %v5609_v25 = vunpack.c.l.b16 %v5560_v43 }
 0x260   : > { %v7047_v33 = vpack.c.bf16 %v5822_v21, %v5821_v2  ;;  %v5981_v32 = vadd.f32 %v5980_v20, %v5822_v21  ;;  %v6020_v31 = vmul.f32 %v5822_v21, %v5822_v21  ;;  %v5038_v2 = vsel %vm7603_vm12, %v5033_v45, %v5037_v11 }
 0x261   : > { %v4087_v8 = vpop.f32.mrf.mxu1  ;;  %v5028_v20 = vsel %vm7603_vm12, %v5023_v61, %v8615_v63  ;;  %v5087_v13 = vunpack.c.l.b16 %v5038_v2  ;;  %v5625_v27 = vpack.c.b16 %v5609_v25, %v5608_v30 }
 0x262   : > { %7118 = vst [vmem:[%s8526_s12 + $0x28] sm:$0xff] %v7047_v33   ;;  %v6051_v44 = vadd.f32 %v6050_v18, %v6020_v31  ;;  %v4463_v40 = vpop.f32.mrf.mxu2  ;;  %v5729_v52 = vpop.f32.mrf.mxu0  ;;  %v5086_v62 = vunpack.c.l.b16 %v5028_v20  ;;  %v4178_v15 = vadd.f32 %v4087_v8, %v8307_v48 }
 0x263   : > { %v5207_v22 = vpop.f32.mrf.mxu3  ;;  %v4556_v42 = vadd.f32 %v4463_v40, %v4177_v35 }
 0x264   : > { %v5301_v26 = vadd.f32 %v5207_v22, %v4555_v0  ;;  %4126 = vmatmul.bf16.gmra.mxu1 %v3978_v53  ;;  %v5103_v34 = vpack.c.b16 %v5087_v13, %v5086_v62 }
 0x265   : > { %5768 = vmatmul.bf16.gmra.mxu0 %v5624_v58 }
 0x266   : > { %v5823_v23 = vadd.f32 %v5729_v52, %v5301_v26 }
 0x267   : > { %4505 = vmatmul.bf16.gmra.mxu2 %v6930_v4 }
 0x268   : > { %v5982_v18 = vadd.f32 %v5981_v32, %v5823_v23  ;;  %v6021_v50 = vmul.f32 %v5823_v23, %v5823_v23 }
 0x269   : > { %v4089_v47 = vpop.f32.mrf.mxu1 }
 0x26a   : > { %v6052_v49 = vadd.f32 %v6051_v44, %v6021_v50  ;;  %v4466_v28 = vpop.f32.mrf.mxu2  ;;  %v5731_v36 = vpop.f32.mrf.mxu0  ;;  %v4179_v0 = vadd.f32 %v4089_v47, %v8321_v17 }
 0x26b   : > { %v5209_v5 = vpop.f32.mrf.mxu3  ;;  %v4557_v57 = vadd.f32 %v4466_v28, %v4178_v15 }
 0x26c   : > { %v5302_v63 = vadd.f32 %v5209_v5, %v4556_v42 }
 0x26e   : > { %v5824_v60 = vadd.f32 %v5731_v36, %v5302_v63 }
 0x26f   : > { %5251 = vmatmul.bf16.gmra.mxu3 %v5103_v34 }
 0x270   : > { %v7052_v21 = vpack.c.bf16 %v5824_v60, %v5823_v23  ;;  %v5983_v19 = vadd.f32 %v5982_v18, %v5824_v60  ;;  %v6022_v37 = vmul.f32 %v5824_v60, %v5824_v60 }
 0x271   : > { %v4092_v54 = vpop.f32.mrf.mxu1 }
 0x272   : > { %7119 = vst [vmem:[%s8526_s12 + $0x30] sm:$0xff] %v7052_v21   ;;  %v6053_v39 = vadd.f32 %v6052_v49, %v6022_v37  ;;  %v4468_v11 = vpop.f32.mrf.mxu2  ;;  %v5734_v33 = vpop.f32.mrf.mxu0  ;;  %v4180_v26 = vadd.f32 %v4092_v54, %v8331_v12 }
 0x273   : > { %v5212_v45 = vpop.f32.mrf.mxu3  ;;  %v4558_v61 = vadd.f32 %v4468_v11, %v4179_v0 }
 0x274   : > { %v5303_v32 = vadd.f32 %v5212_v45, %v4557_v57 }
 0x275   : > { %5773 = vmatmul.bf16.gmra.mxu0 %v5625_v27 }
 0x276   : > { %v5825_v31 = vadd.f32 %v5734_v33, %v5303_v32 }
 0x278   : > { %v5984_v48 = vadd.f32 %v5983_v19, %v5825_v31  ;;  %v6023_v6 = vmul.f32 %v5825_v31, %v5825_v31 }
 0x279   : > { %v4094_v29 = vpop.f32.mrf.mxu1 }
 0x27a   : > { %v6054_v44 = vadd.f32 %v6053_v39, %v6023_v6  ;;  %v4471_v22 = vpop.f32.mrf.mxu2  ;;  %v5736_v40 = vpop.f32.mrf.mxu0  ;;  %v4181_v1 = vadd.f32 %v4094_v29, %v8343_v7 }
 0x27b   : > { %v5214_v58 = vpop.f32.mrf.mxu3  ;;  %v4559_v41 = vadd.f32 %v4471_v22, %v4180_v26 }
 0x27c   : > { %v5304_v53 = vadd.f32 %v5214_v58, %v4558_v61 }
 0x27e   : > { %v5826_v52 = vadd.f32 %v5736_v40, %v5304_v53 }
 0x280   : > { %v7057_v8 = vpack.c.bf16 %v5826_v52, %v5825_v31  ;;  %v5985_v4 = vadd.f32 %v5984_v48, %v5826_v52  ;;  %v6024_v2 = vmul.f32 %v5826_v52, %v5826_v52 }
 0x281   : > { %v4097_v13 = vpop.f32.mrf.mxu1 }
 0x282   : > { %7120 = vst [vmem:[%s8526_s12 + $0x38] sm:$0xff] %v7057_v8   ;;  %v6055_v17 = vadd.f32 %v6054_v44, %v6024_v2  ;;  %v4473_v20 = vpop.f32.mrf.mxu2  ;;  %v5739_v23 = vpop.f32.mrf.mxu0  ;;  %v4182_v63 = vadd.f32 %v4097_v13, %v8351_v59 }
 0x283   : > { %v5217_v9 = vpop.f32.mrf.mxu3  ;;  %v4560_v50 = vadd.f32 %v4473_v20, %v4181_v1 }
 0x284   : > { %v5305_v35 = vadd.f32 %v5217_v9, %v4559_v41 }
 0x286   : > { %v5827_v3 = vadd.f32 %v5739_v23, %v5305_v35 }
 0x288   : > { %v5986_v55 = vadd.f32 %v5985_v4, %v5827_v3  ;;  %v6025_v18 = vmul.f32 %v5827_v3, %v5827_v3 }
 0x289   : > { %v4099_v28 = vpop.f32.mrf.mxu1 }
 0x28a   : > { %v6056_v42 = vadd.f32 %v6055_v17, %v6025_v18  ;;  %v4476_v62 = vpop.f32.mrf.mxu2  ;;  %v5741_v49 = vpop.f32.mrf.mxu0  ;;  %v4183_v37 = vadd.f32 %v4099_v28, %v8365_v10 }
 0x28b   : > { %v5219_v12 = vpop.f32.mrf.mxu3  ;;  %v4561_v47 = vadd.f32 %v4476_v62, %v4182_v63 }
 0x28c   : > { %v5306_v5 = vadd.f32 %v5219_v12, %v4560_v50 }
 0x28e   : > { %v5828_v36 = vadd.f32 %v5741_v49, %v5306_v5 }
 0x290   : > { %v7062_v34 = vpack.c.bf16 %v5828_v36, %v5827_v3  ;;  %v5987_v24 = vadd.f32 %v5986_v55, %v5828_v36  ;;  %v6026_v43 = vmul.f32 %v5828_v36, %v5828_v36 }
 0x291   : > { %v4102_v21 = vpop.f32.mrf.mxu1 }
 0x292   : > { %7121 = vst [vmem:[%s8526_s12 + $0x40] sm:$0xff] %v7062_v34   ;;  %v6057_v60 = vadd.f32 %v6056_v42, %v6026_v43  ;;  %v4478_v15 = vpop.f32.mrf.mxu2  ;;  %v5744_v30 = vpop.f32.mrf.mxu0  ;;  %v4184_v0 = vadd.f32 %v4102_v21, %v8373_v51 }
 0x293   : > { %v5222_v7 = vpop.f32.mrf.mxu3  ;;  %v4562_v27 = vadd.f32 %v4478_v15, %v4183_v37 }
 0x294   : > { %v5307_v25 = vadd.f32 %v5222_v7, %v4561_v47 }
 0x296   : > { %v5829_v19 = vadd.f32 %v5744_v30, %v5307_v25 }
 0x298   : > { %v5988_v57 = vadd.f32 %v5987_v24, %v5829_v19  ;;  %v6027_v39 = vmul.f32 %v5829_v19, %v5829_v19 }
 0x299   : > { %v4104_v54 = vpop.f32.mrf.mxu1 }
 0x29a   : > { %v6058_v45 = vadd.f32 %v6057_v60, %v6027_v39  ;;  %v4481_v11 = vpop.f32.mrf.mxu2  ;;  %v5746_v33 = vpop.f32.mrf.mxu0  ;;  %v4185_v26 = vadd.f32 %v4104_v54, %v8384_v16 }
 0x29b   : > { %v5224_v59 = vpop.f32.mrf.mxu3  ;;  %v4563_v44 = vadd.f32 %v4481_v11, %v4184_v0 }
 0x29c   : > { %v5308_v32 = vadd.f32 %v5224_v59, %v4562_v27 }
 0x29e   : > { %v5830_v31 = vadd.f32 %v5746_v33, %v5308_v32 }
 0x2a0   : > { %v7067_v48 = vpack.c.bf16 %v5830_v31, %v5829_v19  ;;  %v5989_v6 = vadd.f32 %v5988_v57, %v5830_v31  ;;  %v6028_v61 = vmul.f32 %v5830_v31, %v5830_v31 }
 0x2a1   : > { %v4107_v29 = vpop.f32.mrf.mxu1 }
 0x2a2   : > { %7122 = vst [vmem:[%s8526_s12 + $0x48] sm:$0xff] %v7067_v48   ;;  %v6059_v58 = vadd.f32 %v6058_v45, %v6028_v61  ;;  %v4483_v22 = vpop.f32.mrf.mxu2  ;;  %v5749_v40 = vpop.f32.mrf.mxu0  ;;  %v4186_v13 = vadd.f32 %v4107_v29, %v8391_v38 }
 0x2a3   : > { %v5227_v10 = vpop.f32.mrf.mxu3  ;;  %v4564_v2 = vadd.f32 %v4483_v22, %v4185_v26 }
 0x2a4   : > { %v5309_v53 = vadd.f32 %v5227_v10, %v4563_v44  ;;  %v8724_v10 = vld [vmem:[#allocation7_spill] sm:$0xff] }
 0x2a6   : > { %v5831_v52 = vadd.f32 %v5749_v40, %v5309_v53 }
 0x2a8   : > { %v5990_v8 = vadd.f32 %v5989_v6, %v5831_v52  ;;  %v6029_v4 = vmul.f32 %v5831_v52, %v5831_v52 }
 0x2a9   : > { %v4109_v23 = vpop.f32.mrf.mxu1 }
 0x2aa   : > { %v6060_v41 = vadd.f32 %v6059_v58, %v6029_v4  ;;  %v4486_v17 = vpop.f32.mrf.mxu2  ;;  %v5751_v9 = vpop.f32.mrf.mxu0  ;;  %v4187_v28 = vadd.f32 %v4109_v23, %v8405_v14 }
 0x2ab   : > { %v5229_v51 = vpop.f32.mrf.mxu3  ;;  %v4565_v18 = vadd.f32 %v4486_v17, %v4186_v13  ;;  %v8725_v17 = vld [vmem:[#allocation9_spill] sm:$0xff] }
 0x2ac   : > { %v5310_v20 = vadd.f32 %v5229_v51, %v4564_v2 }
 0x2ae   : > { %v5832_v35 = vadd.f32 %v5751_v9, %v5310_v20 }
 0x2b0   : > { %v7072_v3 = vpack.c.bf16 %v5832_v35, %v5831_v52  ;;  %v5991_v1 = vadd.f32 %v5990_v8, %v5832_v35  ;;  %v6030_v55 = vmul.f32 %v5832_v35, %v5832_v35 }
 0x2b1   : > { %v4112_v49 = vpop.f32.mrf.mxu1 }
 0x2b2   : > { %7123 = vst [vmem:[%s8526_s12 + $0x50] sm:$0xff] %v7072_v3   ;;  %v6061_v50 = vadd.f32 %v6060_v41, %v6030_v55  ;;  %v4488_v42 = vpop.f32.mrf.mxu2  ;;  %v5754_v12 = vpop.f32.mrf.mxu0  ;;  %v4188_v30 = vadd.f32 %v4112_v49, %v8415_v56 }
 0x2b3   : > { %v5232_v16 = vpop.f32.mrf.mxu3  ;;  %v4566_v34 = vadd.f32 %v4488_v42, %v4187_v28 }
 0x2b4   : > { %v5311_v62 = vadd.f32 %v5232_v16, %v4565_v18  ;;  %v8726_v16 = vld [vmem:[#allocation11_spill] sm:$0xff] }
 0x2b6   : > { %v5833_v5 = vadd.f32 %v5754_v12, %v5311_v62 }
 0x2b8   : > { %v5992_v36 = vadd.f32 %v5991_v1, %v5833_v5  ;;  %v6031_v63 = vmul.f32 %v5833_v5, %v5833_v5 }
 0x2b9   : > { %v4114_v7 = vpop.f32.mrf.mxu1 }
 0x2ba   : > { %v6062_v24 = vadd.f32 %v6061_v50, %v6031_v63  ;;  %v4491_v43 = vpop.f32.mrf.mxu2  ;;  %v5756_v47 = vpop.f32.mrf.mxu0  ;;  %v4189_v33 = vadd.f32 %v4114_v7, %v8427_v46 }
 0x2bb   : > { %v5234_v38 = vpop.f32.mrf.mxu3  ;;  %v4567_v37 = vadd.f32 %v4491_v43, %v4188_v30 }
 0x2bc   : > { %v5312_v60 = vadd.f32 %v5234_v38, %v4566_v34 }
 0x2be   : > { %v5834_v15 = vadd.f32 %v5756_v47, %v5312_v60  ;;  %v8727_v47 = vld [vmem:[#allocation13_spill] sm:$0xff] }
 0x2c0   : > { %v7077_v25 = vpack.c.bf16 %v5834_v15, %v5833_v5  ;;  %v5993_v21 = vadd.f32 %v5992_v36, %v5834_v15  ;;  %v6032_v19 = vmul.f32 %v5834_v15, %v5834_v15 }
 0x2c1   : > { %v4117_v59 = vpop.f32.mrf.mxu1 }
 0x2c2   : > { %7124 = vst [vmem:[%s8526_s12 + $0x58] sm:$0xff] %v7077_v25   ;;  %v6063_v57 = vadd.f32 %v6062_v24, %v6032_v19  ;;  %v4493_v39 = vpop.f32.mrf.mxu2  ;;  %v5759_v27 = vpop.f32.mrf.mxu0  ;;  %v4190_v22 = vadd.f32 %v4117_v59, %v8724_v10 }
 0x2c3   : > { %v5237_v14 = vpop.f32.mrf.mxu3  ;;  %v4568_v31 = vadd.f32 %v4493_v39, %v4189_v33 }
 0x2c4   : > { %v5313_v45 = vadd.f32 %v5237_v14, %v4567_v37 }
 0x2c6   : > { %v5835_v11 = vadd.f32 %v5759_v27, %v5313_v45  ;;  %v8728_v27 = vld [vmem:[#allocation14_spill] sm:$0xff] }
 0x2c8   : > { %v5994_v32 = vadd.f32 %v5993_v21, %v5835_v11  ;;  %v6033_v54 = vmul.f32 %v5835_v11, %v5835_v11 }
 0x2c9   : > { %v4119_v44 = vpop.f32.mrf.mxu1 }
 0x2ca   : > { %v6064_v0 = vadd.f32 %v6063_v57, %v6033_v54  ;;  %v4496_v48 = vpop.f32.mrf.mxu2  ;;  %v5761_v6 = vpop.f32.mrf.mxu0  ;;  %v4191_v9 = vadd.f32 %v4119_v44, %v8725_v17  ;;  %v8729_v44 = vld [vmem:[#allocation4_spill] sm:$0xff] }
 0x2cb   : > { %v5239_v56 = vpop.f32.mrf.mxu3  ;;  %v4569_v52 = vadd.f32 %v4496_v48, %v4190_v22 }
 0x2cc   : > { %v5314_v61 = vadd.f32 %v5239_v56, %v4568_v31 }
 0x2ce   : > { %v5836_v58 = vadd.f32 %v5761_v6, %v5314_v61 }
 0x2d0   : > { %v7082_v40 = vpack.c.bf16 %v5836_v58, %v5835_v11  ;;  %v5995_v53 = vadd.f32 %v5994_v32, %v5836_v58  ;;  %v6034_v29 = vmul.f32 %v5836_v58, %v5836_v58 }
 0x2d1   : > { %v4122_v41 = vpop.f32.mrf.mxu1 }
 0x2d2   : > { %7125 = vst [vmem:[%s8526_s12 + $0x60] sm:$0xff] %v7082_v40   ;;  %v6065_v26 = vadd.f32 %v6064_v0, %v6034_v29  ;;  %v4498_v8 = vpop.f32.mrf.mxu2  ;;  %v5764_v4 = vpop.f32.mrf.mxu0  ;;  %v4192_v42 = vadd.f32 %v4122_v41, %v8726_v16 }
 0x2d3   : > { %v5242_v46 = vpop.f32.mrf.mxu3  ;;  %v4570_v35 = vadd.f32 %v4498_v8, %v4191_v9 }
 0x2d4   : > { %v5315_v2 = vadd.f32 %v5242_v46, %v4569_v52 }
 0x2d6   : > { %v5837_v51 = vadd.f32 %v5764_v4, %v5315_v2 }
 0x2d8   : > { %v5996_v20 = vadd.f32 %v5995_v53, %v5837_v51  ;;  %v6035_v23 = vmul.f32 %v5837_v51, %v5837_v51 }
 0x2d9   : > { %v4124_v12 = vpop.f32.mrf.mxu1 }
 0x2da   : > { %v6066_v13 = vadd.f32 %v6065_v26, %v6035_v23  ;;  %v4501_v1 = vpop.f32.mrf.mxu2  ;;  %v5766_v55 = vpop.f32.mrf.mxu0  ;;  %v4193_v60 = vadd.f32 %v4124_v12, %v8727_v47 }
 0x2db   : > { %v5244_v3 = vpop.f32.mrf.mxu3  ;;  %v4571_v28 = vadd.f32 %v4501_v1, %v4192_v42 }
 0x2dc   : > { %v5316_v18 = vadd.f32 %v5244_v3, %v4570_v35 }
 0x2de   : > { %v5838_v50 = vadd.f32 %v5766_v55, %v5316_v18 }
 0x2e0   : > { %v7087_v62 = vpack.c.bf16 %v5838_v50, %v5837_v51  ;;  %v5997_v49 = vadd.f32 %v5996_v20, %v5838_v50  ;;  %v6036_v5 = vmul.f32 %v5838_v50, %v5838_v50 }
 0x2e1   : > { %v4127_v25 = vpop.f32.mrf.mxu1 }
 0x2e2   : > { %7126 = vst [vmem:[%s8526_s12 + $0x68] sm:$0xff] %v7087_v62   ;;  %v6067_v36 = vadd.f32 %v6066_v13, %v6036_v5  ;;  %v4503_v34 = vpop.f32.mrf.mxu2  ;;  %v5769_v24 = vpop.f32.mrf.mxu0  ;;  %v4194_v45 = vadd.f32 %v4127_v25, %v8728_v27 }
 0x2e3   : > { %v5247_v63 = vpop.f32.mrf.mxu3  ;;  %v4572_v30 = vadd.f32 %v4503_v34, %v4193_v60 }
 0x2e4   : > { %v5317_v38 = vadd.f32 %v5247_v63, %v4571_v28 }
 0x2e6   : > { %v5839_v43 = vadd.f32 %v5769_v24, %v5317_v38 }
 0x2e8   : > { %v5998_v7 = vadd.f32 %v5997_v49, %v5839_v43  ;;  %v6037_v15 = vmul.f32 %v5839_v43, %v5839_v43 }
 0x2e9   : > { %v4129_v0 = vpop.f32.mrf.mxu1 }
 0x2ea   : > { %v6068_v21 = vadd.f32 %v6067_v36, %v6037_v15  ;;  %v4506_v37 = vpop.f32.mrf.mxu2  ;;  %v5771_v57 = vpop.f32.mrf.mxu0  ;;  %v4195_v58 = vadd.f32 %v4129_v0, %v8729_v44 }
 0x2eb   : > { %v5249_v19 = vpop.f32.mrf.mxu3  ;;  %v4573_v32 = vadd.f32 %v4506_v37, %v4194_v45 }
 0x2ec   : > { %v5318_v14 = vadd.f32 %v5249_v19, %v4572_v30 }
 0x2ee   : > { %v5840_v39 = vadd.f32 %v5771_v57, %v5318_v14 }
 0x2f0   : > { %v7092_v59 = vpack.c.bf16 %v5840_v39, %v5839_v43  ;;  %v5999_v11 = vadd.f32 %v5998_v7, %v5840_v39  ;;  %v6038_v33 = vmul.f32 %v5840_v39, %v5840_v39 }
 0x2f2   : > { %7127 = vst [vmem:[%s8526_s12 + $0x70] sm:$0xff] %v7092_v59   ;;  %v6069_v54 = vadd.f32 %v6068_v21, %v6038_v33  ;;  %v5774_v56 = vpop.f32.mrf.mxu0  ;;  %v4508_v6 = vpop.f32.mrf.mxu2 }
 0x2f3   : > { %v5252_v31 = vpop.f32.mrf.mxu3  ;;  %v4574_v40 = vadd.f32 %v4508_v6, %v4195_v58 }
 0x2f4   : > { %v5319_v48 = vadd.f32 %v5252_v31, %v4573_v32 }
 0x2f6   : > { %v5841_v61 = vadd.f32 %v5774_v56, %v5319_v48 }
 0x2f8   : > { %v6000_v10 = vadd.f32 %v5999_v11, %v5841_v61  ;;  %v6039_v22 = vmul.f32 %v5841_v61, %v5841_v61 }
 0x2fa   : > { %v6070_v53 = vadd.f32 %v6069_v54, %v6039_v22  ;;  %v5776_v26 = vpop.f32.mrf.mxu0 }
 0x2fb   : > { %v5254_v29 = vpop.f32.mrf.mxu3 }
 0x2fc   : > { %v5320_v52 = vadd.f32 %v5254_v29, %v4574_v40 }
 0x2fe   : > { %v5842_v46 = vadd.f32 %v5776_v26, %v5320_v52 }
 0x300   : > { %v7097_v8 = vpack.c.bf16 %v5842_v46, %v5841_v61  ;;  %v6001_v4 = vadd.f32 %v6000_v10, %v5842_v46  ;;  %v6040_v2 = vmul.f32 %v5842_v46, %v5842_v46 }
 0x302   : > { %7128 = vst [vmem:[%s8526_s12 + $0x78] sm:$0xff] %v7097_v8   ;;  %v6002_v41 = vrot.slane %v6001_v4, 4  ;;  %v6071_v51 = vadd.f32 %v6070_v53, %v6040_v2 }
 0x304   : > { %v6003_v17 = vadd.f32 %v6002_v41, %v6001_v4  ;;  %v6072_v9 = vrot.slane %v6071_v51, 4 }
 0x306   : > { %v6004_v20 = vrot.slane %v6003_v17, 2  ;;  %v6073_v23 = vadd.f32 %v6072_v9, %v6071_v51 }
 0x308   : > { %v6005_v35 = vadd.f32 %v6004_v20, %v6003_v17  ;;  %v6074_v13 = vrot.slane %v6073_v23, 2 }
 0x30a   : > { %v6006_v3 = vrot.slane %v6005_v35, 1  ;;  %v6075_v1 = vadd.f32 %v6074_v13, %v6073_v23 }
 0x30c   : > { %v6007_v55 = vadd.f32 %v6006_v3, %v6005_v35  ;;  %v6076_v18 = vrot.slane %v6075_v1, 1 }
 0x30e   : > { %6008 = vst [vmem:[%s236_s16] sm:$0x1] %v6007_v55  ;;  %v6077_v50 = vadd.f32 %v6076_v18, %v6075_v1 }
 0x310   : > { %6078 = vst [vmem:[%s236_s16 + $0x1] sm:$0x1] %v6077_v50 }
 0x311 PF: > { %s16_s18 = sadd.s32 1, %s7174_s18  }
 0x312   : > { %p13_p5 = scmp.ge.s32.totalorder %s16_s18, 4  }
 0x314   :  { %15 = sbr.rel (!%p13_p5) target bundleno = 1 (0x1), region = 89 }

</bundles_post_ra>
